<compile_context>
chip_gen: v6e
topology: v6e:2x2x1
jax: 0.10.0
libtpu: 0.0.40
codegen_flags: <defaults>
</compile_context>

<pallas_src>
from functools import partial

import numpy as np
import jax
import jax.numpy as jnp
from jax.experimental import pallas as pl
from jax.experimental.pallas import tpu as pltpu


def _round_up(x, m):
    return ((x + m - 1) // m) * m


# Scaled AlexNet channel counts / classifier sizes.
C1, C2, C3, C4, C5 = 16, 32, 48, 32, 32
HIDDEN = 128          # hidden_layer_neurons
LATENT = 64           # output_latent_dim
FEAT = C5 * 6 * 6     # flattened features after adaptive avgpool (CHW order)


# --------------------------------------------------------------------------
# Pallas kernel 1: single-shot fused  out = relu(A @ W + b)
#   bf16 operands -> MXU, f32 accumulation, bf16 writeback; full K per block.
# --------------------------------------------------------------------------
def _gemm_bias_relu_kernel(a_ref, w_ref, b_ref, o_ref):
    acc = jnp.dot(a_ref[...], w_ref[...], preferred_element_type=jnp.float32)
    acc = jnp.maximum(acc + b_ref[...], 0.0)
    o_ref[...] = acc.astype(o_ref.dtype)


def pallas_gemm_bias_relu(a, w_p, b_p, out_dtype=jnp.bfloat16):
    """relu(a @ w_p + b_p).  Output keeps the full 128-lane padded channels.

    a:(M,K) activations.  w_p:(Kp,Np) bf16 and b_p:(1,Np) f32 are pre-padded at
    init time; only the activation matrix is padded per call (one jnp.pad).
    """
    M, K = a.shape
    Kp, Np = w_p.shape
    assert Kp >= K and Np % 128 == 0
    # 2-way M split only when M is large enough to matter (feeds both v7x
    # TensorCores); otherwise one block -- on v5e/v6e the grid is a sequential
    # loop and splitting is pure per-step overhead.
    if M >= 256:
        tm = _round_up((M + 1) // 2, 16)
    else:
        tm = _round_up(max(M, 16), 16)
    tn = 128
    Mp = _round_up(M, tm)

    a_p = a.astype(jnp.bfloat16)
    if (Mp, Kp) != (M, K):
        a_p = jnp.pad(a_p, ((0, Mp - M), (0, Kp - K)))

    flops = 2 * Mp * Kp * Np
    bytes_accessed = int(a_p.size * 2 + w_p.size * 2 + b_p.size * 4 + Mp * Np * 2)

    out = pl.pallas_call(
        _gemm_bias_relu_kernel,
        out_shape=jax.ShapeDtypeStruct((Mp, Np), out_dtype),
        grid_spec=pltpu.PrefetchScalarGridSpec(
            num_scalar_prefetch=0,
            grid=(Mp // tm, Np // tn),
            in_specs=[
                pl.BlockSpec((tm, Kp), lambda i, j: (i, 0)),
                pl.BlockSpec((Kp, tn), lambda i, j: (0, j)),
                pl.BlockSpec((1, tn), lambda i, j: (0, j)),
            ],
            out_specs=pl.BlockSpec((tm, tn), lambda i, j: (i, j)),
        ),
        compiler_params=pltpu.CompilerParams(
            dimension_semantics=("parallel", "parallel")),
        cost_estimate=pl.CostEstimate(flops=flops, transcendentals=0,
                                      bytes_accessed=bytes_accessed),
    )(a_p, w_p, b_p)
    return out[:M] if Mp != M else out


# --------------------------------------------------------------------------
# Pallas kernel 2: fused tail
#   conv3 -> conv4 -> conv5 -> MaxPool(3,2) -> [avgpool+flatten folded] ->
#   fc6 -> fc7 -> fc8 (classifier[6]) -> fc1.  Everything stays in VMEM.
# --------------------------------------------------------------------------
def _tail_kernel(x_ref, w3, b3, w4, b4, w5, b5,
                 w6, b6, w7, b7, w8, b8, w1, b1, o_ref):
    def mm(h, w_ref, b_ref, relu):
        y = jnp.dot(h.astype(jnp.bfloat16), w_ref[...],
                    preferred_element_type=jnp.float32) + b_ref[...]
        return jnp.maximum(y, 0.0) if relu else y

    h = mm(x_ref[...], w3, b3, True)            # conv3 + ReLU  (Mp, 512)
    h = mm(h, w4, b4, True)                     # conv4 + ReLU  (Mp, 384)
    h = mm(h, w5, b5, True)                     # conv5 + ReLU  (Mp, 1152)

    # MaxPool2d(3,2) on the 3x3 map -> 1x1: max over the 9 spatial positions,
    # each occupying an aligned 128-lane slot (padded lanes are exactly zero).
    pooled = h[:, 0:128]
    for p in range(1, 9):
        pooled = jnp.maximum(pooled, h[:, p * 128:(p + 1) * 128])

    # AdaptiveAvgPool2d((6,6)) of the 1x1 map + CHW flatten are folded into w6.
    h = mm(pooled, w6, b6, True)                # classifier[1] + ReLU
    h = mm(h, w7, b7, True)                     # classifier[4] + ReLU
    h = mm(h, w8, b8, False)                    # classifier[6] (replaced Linear)
    o_ref[...] = mm(h, w1, b1, False)           # self.fc1, f32 out


def pallas_tail(x2p, pp):
    """x2p: (N, 3, 3, 128) bf16 -- conv2 output after maxpool, 128-padded channels."""
    n = x2p.shape[0]
    assert x2p.shape[1:] == (3, 3, 128), x2p.shape   # fold below assumes 3x3 map
    x = x2p.reshape(n, 9 * 128)
    Mp = _round_up(max(n, 16), 16)
    if Mp != n:
        x = jnp.pad(x, ((0, Mp - n), (0, 0)))

    args = (x,
            pp["conv3_w"], pp["conv3_b"], pp["conv4_w"], pp["conv4_b"],
            pp["conv5_w"], pp["conv5_b"],
            pp["fc6_w"], pp["fc6_b"], pp["fc7_w"], pp["fc7_b"],
            pp["fc8_w"], pp["fc8_b"], pp["fc1_w"], pp["fc1_b"])

    ws = [pp[k] for k in ("conv3_w", "conv4_w", "conv5_w",
                          "fc6_w", "fc7_w", "fc8_w", "fc1_w")]
    flops = int(2 * Mp * sum(w.shape[0] * w.shape[1] for w in ws))
    bytes_accessed = int(sum(a.size * a.dtype.itemsize for a in args) + Mp * 128 * 4)

    def full(arr):
        return pl.BlockSpec(arr.shape, lambda i: (0,) * arr.ndim)

    out = pl.pallas_call(
        _tail_kernel,
        out_shape=jax.ShapeDtypeStruct((Mp, 128), jnp.float32),
        grid_spec=pltpu.PrefetchScalarGridSpec(
            num_scalar_prefetch=0,
            grid=(1,),
            in_specs=[full(a) for a in args],
            out_specs=pl.BlockSpec((Mp, 128), lambda i: (0, 0)),
        ),
        compiler_params=pltpu.CompilerParams(
            dimension_semantics=("arbitrary",)),
        cost_estimate=pl.CostEstimate(flops=flops, transcendentals=0,
                                      bytes_accessed=bytes_accessed),
    )(*args)
    return out[:n, :LATENT]


# --------------------------------------------------------------------------
# Plain-JAX glue: patch extraction (one XLA op) and 3x3/2 max-pool (one XLA op)
# --------------------------------------------------------------------------
def _conv2d(x_nhwc, wmat_p, b_p, *, k, stride, pad):
    n = x_nhwc.shape[0]
    # Feature ordering of the patches is (Cin, kh, kw), matched by prepare_params.
    patches = jax.lax.conv_general_dilated_patches(
        x_nhwc, filter_shape=(k, k), window_strides=(stride, stride),
        padding=((pad, pad), (pad, pad)),
        dimension_numbers=("NHWC", "HWIO", "NHWC"))
    _, oh, ow, kk = patches.shape
    out = pallas_gemm_bias_relu(patches.reshape(n * oh * ow, kk), wmat_p, b_p)
    return out.reshape(n, oh, ow, wmat_p.shape[1])   # channels stay 128-padded


def _maxpool3s2(x_nhwc):
    return jax.lax.reduce_window(
        x_nhwc, jnp.array(-jnp.inf, x_nhwc.dtype), jax.lax.max,
        (1, 3, 3, 1), (1, 2, 2, 1), "VALID")


# --------------------------------------------------------------------------
# Parameters (deterministic synthetic init, AlexNet structure, scaled channels)
# --------------------------------------------------------------------------
def init_params(key):
    keys = jax.random.split(key, 18)
    s = 0.02

    def w(k, shape):
        return jax.random.normal(k, shape, jnp.float32) * s

    return {
        # features (PyTorch conv layout: (O, I, kh, kw))
        "conv1_w": w(keys[0], (C1, 3, 11, 11)), "conv1_b": w(keys[1], (C1,)),
        "conv2_w": w(keys[2], (C2, C1, 5, 5)),  "conv2_b": w(keys[3], (C2,)),
        "conv3_w": w(keys[4], (C3, C2, 3, 3)),  "conv3_b": w(keys[5], (C3,)),
        "conv4_w": w(keys[6], (C4, C3, 3, 3)),  "conv4_b": w(keys[7], (C4,)),
        "conv5_w": w(keys[8], (C5, C4, 3, 3)),  "conv5_b": w(keys[9], (C5,)),
        # classifier (PyTorch Linear layout: (out, in))
        "fc6_w": w(keys[10], (HIDDEN, FEAT)),   "fc6_b": w(keys[11], (HIDDEN,)),
        "fc7_w": w(keys[12], (HIDDEN, HIDDEN)), "fc7_b": w(keys[13], (HIDDEN,)),
        # classifier[6] replaced: Linear(hidden, hidden)
        "fc8_w": w(keys[14], (HIDDEN, HIDDEN)), "fc8_b": w(keys[15], (HIDDEN,)),
        # self.fc1 : Linear(hidden, latent)
        "fc1_w": w(keys[16], (LATENT, HIDDEN)), "fc1_b": w(keys[17], (LATENT,)),
    }


def prepare_params(p):
    """One-time weight layout (numpy, outside jit): reshape / block-assemble /
    pad to 128 multiples / cast to bf16; biases to f32 (1, Np)."""
    pp = {}

    def im2col_weight(wk, bk, cin_pad=None):
        w = np.asarray(p[wk], np.float32)
        b = np.asarray(p[bk], np.float32)
        o, i, kh, kw = w.shape
        if cin_pad is not None and cin_pad > i:      # bake padded input channels
            w = np.pad(w, ((0, 0), (0, cin_pad - i), (0, 0), (0, 0)))
            i = cin_pad
        k = i * kh * kw
        kp, npad = _round_up(k, 128), _round_up(o, 128)
        wm = np.pad(w.reshape(o, k).T, ((0, kp - k), (0, npad - o)))
        bp = np.pad(b.reshape(1, -1), ((0, 0), (0, npad - o)))
        return jnp.asarray(wm, jnp.bfloat16), jnp.asarray(bp, jnp.float32)

    pp["conv1_w"], pp["conv1_b"] = im2col_weight("conv1_w", "conv1_b")
    # conv2 consumes conv1's 128-lane padded output: zero K-rows for ci >= C1.
    pp["conv2_w"], pp["conv2_b"] = im2col_weight("conv2_w", "conv2_b", cin_pad=128)

    def conv3x3_block(wk, bk, cin_stride, cout_stride, kpad, npad):
        """Lower a 3x3/s1/p1 conv on a 3x3 map to one (kpad, npad) matmul.
        Row index = q*cin_stride + ci (input position q, channel ci);
        col index = p*cout_stride + co (output position p, channel co)."""
        w = np.asarray(p[wk], np.float32)
        b = np.asarray(p[bk], np.float32)
        o, i, _, _ = w.shape
        Wb = np.zeros((kpad, npad), np.float32)
        Bb = np.zeros((1, npad), np.float32)
        for pi in range(3):
            for pj in range(3):
                pidx = pi * 3 + pj
                Bb[0, pidx * cout_stride:pidx * cout_stride + o] = b
                for qi in range(3):
                    for qj in range(3):
                        ky, kx = qi - pi + 1, qj - pj + 1
                        if 0 <= ky < 3 and 0 <= kx < 3:
                            qidx = qi * 3 + qj
                            Wb[qidx * cin_stride:qidx * cin_stride + i,
                               pidx * cout_stride:pidx * cout_stride + o] = w[:, :, ky, kx].T
        return jnp.asarray(Wb, jnp.bfloat16), jnp.asarray(Bb, jnp.float32)

    n3 = _round_up(9 * C3, 128)   # 512
    n4 = _round_up(9 * C4, 128)   # 384
    pp["conv3_w"], pp["conv3_b"] = conv3x3_block(
        "conv3_w", "conv3_b", cin_stride=128, cout_stride=C3, kpad=9 * 128, npad=n3)
    pp["conv4_w"], pp["conv4_b"] = conv3x3_block(
        "conv4_w", "conv4_b", cin_stride=C3, cout_stride=C4, kpad=n3, npad=n4)
    # conv5 output: each spatial position gets a 128-lane slot (maxpool alignment).
    pp["conv5_w"], pp["conv5_b"] = conv3x3_block(
        "conv5_w", "conv5_b", cin_stride=C4, cout_stride=128, kpad=n4, npad=9 * 128)

    # classifier[1]: fold AdaptiveAvgPool((6,6))-of-1x1 + CHW flatten into the
    # weight: out[o] = sum_c pooled[c] * sum_s W6[o, c*36 + s].
    w6 = np.asarray(p["fc6_w"], np.float32)              # (HIDDEN, C5*36)
    w6f = np.zeros((128, HIDDEN), np.float32)            # rows = pooled channel slot
    for c in range(C5):
        w6f[c] = w6[:, c * 36:(c + 1) * 36].sum(axis=1)
    pp["fc6_w"] = jnp.asarray(w6f, jnp.bfloat16)
    pp["fc6_b"] = jnp.asarray(np.asarray(p["fc6_b"], np.float32).reshape(1, -1),
                              jnp.float32)

    def fc(wk, bk):
        w = np.asarray(p[wk], np.float32)
        b = np.asarray(p[bk], np.float32)
        o, i = w.shape
        ip, op = _round_up(i, 128), _round_up(o, 128)
        wm = np.pad(w.T, ((0, ip - i), (0, op - o)))
        bp = np.pad(b.reshape(1, -1), ((0, 0), (0, op - o)))
        return jnp.asarray(wm, jnp.bfloat16), jnp.asarray(bp, jnp.float32)

    pp["fc7_w"], pp["fc7_b"] = fc("fc7_w", "fc7_b")
    pp["fc8_w"], pp["fc8_b"] = fc("fc8_w", "fc8_b")
    pp["fc1_w"], pp["fc1_b"] = fc("fc1_w", "fc1_b")
    return pp


# --------------------------------------------------------------------------
# Forward pass (AlexNet features -> avgpool -> classifier -> fc1)
# --------------------------------------------------------------------------
def fnet_vlcs_forward(pp, x_nchw):
    x = jnp.transpose(x_nchw, (0, 2, 3, 1)).astype(jnp.bfloat16)   # NCHW -> NHWC

    x = _conv2d(x, pp["conv1_w"], pp["conv1_b"], k=11, stride=4, pad=2)  # (N,15,15,128)
    x = _maxpool3s2(x)                                                   # (N, 7, 7,128)
    x = _conv2d(x, pp["conv2_w"], pp["conv2_b"], k=5, stride=1, pad=2)   # (N, 7, 7,128)
    x = _maxpool3s2(x)                                                   # (N, 3, 3,128)

    # conv3..conv5 + MaxPool(3,2) + AdaptiveAvgPool((6,6)) + flatten +
    # classifier (Dropout = identity in eval) + self.fc1, all in ONE Pallas call.
    return pallas_tail(x, pp)


if __name__ == "__main__":
    key = jax.random.PRNGKey(0)
    k_param, k_x = jax.random.split(key)

    params = init_params(k_param)
    prepped = prepare_params(params)     # one-time weight layout / pad / bf16

    x = jax.random.normal(k_x, (2, 3, 64, 64), jnp.float32)        # NCHW input

    fwd = jax.jit(fnet_vlcs_forward)
    out = jax.block_until_ready(fwd(prepped, x))

    assert out.shape == (2, LATENT), out.shape
    assert jnp.all(jnp.isfinite(out))
    print("KERNEL_OK")
</pallas_src>

<mosaic_0001>
module attributes {stable_mosaic.version = 11 : i64} {
  func.func @_gemm_bias_relu_kernel(%arg0: i32, %arg1: i32, %arg2: memref<240x384xbf16, #tpu.memory_space<vmem>>, %arg3: memref<384x128xbf16, #tpu.memory_space<vmem>>, %arg4: memref<1x128xf32, #tpu.memory_space<vmem>>, %arg5: memref<240x128xbf16, #tpu.memory_space<vmem>>) attributes {dimension_semantics = [#tpu.dimension_semantics<parallel>, #tpu.dimension_semantics<parallel>], iteration_bounds = array<i64: 2, 1>, scalar_prefetch = 0 : i64, scratch_operands = 0 : i64, tpu.core_type = #tpu.core_type<tc>, window_params = [{transform_indices = @transform_0, window_bounds = array<i64: 240, 384>}, {transform_indices = @transform_1, window_bounds = array<i64: 384, 128>}, {transform_indices = @transform_2, window_bounds = array<i64: 1, 128>}, {transform_indices = @transform_3, window_bounds = array<i64: 240, 128>}]} {
    %c0 = arith.constant 0 : index
    %c0_0 = arith.constant 0 : index
    %0 = vector.load %arg2[%c0, %c0_0] : memref<240x384xbf16, #tpu.memory_space<vmem>>, vector<240x384xbf16>
    %c0_1 = arith.constant 0 : index
    %c0_2 = arith.constant 0 : index
    %1 = vector.load %arg3[%c0_1, %c0_2] : memref<384x128xbf16, #tpu.memory_space<vmem>>, vector<384x128xbf16>
    %cst = arith.constant dense<0.000000e+00> : vector<240x128xf32>
    %2 = tpu.matmul %0, %1, %cst {dimension_numbers = #tpu.dot_dimension_numbers<[1], [0], [0], [1], [0, 0, 1, 1], [], []>} : vector<240x384xbf16>, vector<384x128xbf16>, vector<240x128xf32> -> vector<240x128xf32>
    %c0_3 = arith.constant 0 : index
    %c0_4 = arith.constant 0 : index
    %3 = vector.load %arg4[%c0_3, %c0_4] : memref<1x128xf32, #tpu.memory_space<vmem>>, vector<1x128xf32>
    %4 = vector.broadcast %3 : vector<1x128xf32> to vector<240x128xf32>
    %5 = arith.addf %2, %4 : vector<240x128xf32>
    %cst_5 = arith.constant 0.000000e+00 : f32
    %6 = vector.broadcast %cst_5 : f32 to vector<240x128xf32>
    %7 = arith.maximumf %5, %6 : vector<240x128xf32>
    %8 = arith.truncf %7 : vector<240x128xf32> to vector<240x128xbf16>
    %c0_6 = arith.constant 0 : index
    %c0_7 = arith.constant 0 : index
    %9 = vector.load %arg5[%c0_6, %c0_7] : memref<240x128xbf16, #tpu.memory_space<vmem>>, vector<240x128xbf16>
    tpu.vector_store %arg5[%c0_6, %c0_7], %8 {strides = array<i32>} : memref<240x128xbf16, #tpu.memory_space<vmem>>, vector<240x128xbf16>,
    return
  }
  func.func @transform_0(%arg0: i32, %arg1: i32) -> (i32, i32) {
    %c0_i32 = arith.constant 0 : i32
    %c0_i32_0 = arith.constant 0 : i32
    return %arg0, %c0_i32 : i32, i32
  }
  func.func @transform_1(%arg0: i32, %arg1: i32) -> (i32, i32) {
    %c0_i32 = arith.constant 0 : i32
    %c0_i32_0 = arith.constant 0 : i32
    return %c0_i32, %arg1 : i32, i32
  }
  func.func @transform_2(%arg0: i32, %arg1: i32) -> (i32, i32) {
    %c0_i32 = arith.constant 0 : i32
    %c0_i32_0 = arith.constant 0 : i32
    return %c0_i32, %arg1 : i32, i32
  }
  func.func @transform_3(%arg0: i32, %arg1: i32) -> (i32, i32) {
    %c0_i32 = arith.constant 0 : i32
    return %arg0, %arg1 : i32, i32
  }
}

module attributes {stable_mosaic.version = 11 : i64} {
  func.func @_gemm_bias_relu_kernel(%arg0: i32, %arg1: i32, %arg2: memref<112x3200xbf16, #tpu.memory_space<vmem>>, %arg3: memref<3200x128xbf16, #tpu.memory_space<vmem>>, %arg4: memref<1x128xf32, #tpu.memory_space<vmem>>, %arg5: memref<112x128xbf16, #tpu.memory_space<vmem>>) attributes {dimension_semantics = [#tpu.dimension_semantics<parallel>, #tpu.dimension_semantics<parallel>], iteration_bounds = array<i64: 1, 1>, scalar_prefetch = 0 : i64, scratch_operands = 0 : i64, tpu.core_type = #tpu.core_type<tc>, window_params = [{transform_indices = @transform_0, window_bounds = array<i64: 112, 3200>}, {transform_indices = @transform_1, window_bounds = array<i64: 3200, 128>}, {transform_indices = @transform_2, window_bounds = array<i64: 1, 128>}, {transform_indices = @transform_3, window_bounds = array<i64: 112, 128>}]} {
    %c0 = arith.constant 0 : index
    %c0_0 = arith.constant 0 : index
    %0 = vector.load %arg2[%c0, %c0_0] : memref<112x3200xbf16, #tpu.memory_space<vmem>>, vector<112x3200xbf16>
    %c0_1 = arith.constant 0 : index
    %c0_2 = arith.constant 0 : index
    %1 = vector.load %arg3[%c0_1, %c0_2] : memref<3200x128xbf16, #tpu.memory_space<vmem>>, vector<3200x128xbf16>
    %cst = arith.constant dense<0.000000e+00> : vector<112x128xf32>
    %2 = tpu.matmul %0, %1, %cst {dimension_numbers = #tpu.dot_dimension_numbers<[1], [0], [0], [1], [0, 0, 1, 1], [], []>} : vector<112x3200xbf16>, vector<3200x128xbf16>, vector<112x128xf32> -> vector<112x128xf32>
    %c0_3 = arith.constant 0 : index
    %c0_4 = arith.constant 0 : index
    %3 = vector.load %arg4[%c0_3, %c0_4] : memref<1x128xf32, #tpu.memory_space<vmem>>, vector<1x128xf32>
    %4 = vector.broadcast %3 : vector<1x128xf32> to vector<112x128xf32>
    %5 = arith.addf %2, %4 : vector<112x128xf32>
    %cst_5 = arith.constant 0.000000e+00 : f32
    %6 = vector.broadcast %cst_5 : f32 to vector<112x128xf32>
    %7 = arith.maximumf %5, %6 : vector<112x128xf32>
    %8 = arith.truncf %7 : vector<112x128xf32> to vector<112x128xbf16>
    %c0_6 = arith.constant 0 : index
    %c0_7 = arith.constant 0 : index
    %9 = vector.load %arg5[%c0_6, %c0_7] : memref<112x128xbf16, #tpu.memory_space<vmem>>, vector<112x128xbf16>
    tpu.vector_store %arg5[%c0_6, %c0_7], %8 {strides = array<i32>} : memref<112x128xbf16, #tpu.memory_space<vmem>>, vector<112x128xbf16>,
    return
  }
  func.func @transform_0(%arg0: i32, %arg1: i32) -> (i32, i32) {
    %c0_i32 = arith.constant 0 : i32
    %c0_i32_0 = arith.constant 0 : i32
    return %arg0, %c0_i32 : i32, i32
  }
  func.func @transform_1(%arg0: i32, %arg1: i32) -> (i32, i32) {
    %c0_i32 = arith.constant 0 : i32
    %c0_i32_0 = arith.constant 0 : i32
    return %c0_i32, %arg1 : i32, i32
  }
  func.func @transform_2(%arg0: i32, %arg1: i32) -> (i32, i32) {
    %c0_i32 = arith.constant 0 : i32
    %c0_i32_0 = arith.constant 0 : i32
    return %c0_i32, %arg1 : i32, i32
  }
  func.func @transform_3(%arg0: i32, %arg1: i32) -> (i32, i32) {
    %c0_i32 = arith.constant 0 : i32
    return %arg0, %arg1 : i32, i32
  }
}

module attributes {stable_mosaic.version = 11 : i64} {
  func.func @_tail_kernel(%arg0: i32, %arg1: memref<16x1152xbf16, #tpu.memory_space<vmem>>, %arg2: memref<1152x512xbf16, #tpu.memory_space<vmem>>, %arg3: memref<1x512xf32, #tpu.memory_space<vmem>>, %arg4: memref<512x384xbf16, #tpu.memory_space<vmem>>, %arg5: memref<1x384xf32, #tpu.memory_space<vmem>>, %arg6: memref<384x1152xbf16, #tpu.memory_space<vmem>>, %arg7: memref<1x1152xf32, #tpu.memory_space<vmem>>, %arg8: memref<128x128xbf16, #tpu.memory_space<vmem>>, %arg9: memref<1x128xf32, #tpu.memory_space<vmem>>, %arg10: memref<128x128xbf16, #tpu.memory_space<vmem>>, %arg11: memref<1x128xf32, #tpu.memory_space<vmem>>, %arg12: memref<128x128xbf16, #tpu.memory_space<vmem>>, %arg13: memref<1x128xf32, #tpu.memory_space<vmem>>, %arg14: memref<128x128xbf16, #tpu.memory_space<vmem>>, %arg15: memref<1x128xf32, #tpu.memory_space<vmem>>, %arg16: memref<16x128xf32, #tpu.memory_space<vmem>>) attributes {dimension_semantics = [#tpu.dimension_semantics<arbitrary>], iteration_bounds = array<i64: 1>, scalar_prefetch = 0 : i64, scratch_operands = 0 : i64, tpu.core_type = #tpu.core_type<tc>, window_params = [{pipeline_mode = #tpu.pipeline_mode<synchronous>, transform_indices = @transform_0, window_bounds = array<i64: 16, 1152>}, {pipeline_mode = #tpu.pipeline_mode<synchronous>, transform_indices = @transform_1, window_bounds = array<i64: 1152, 512>}, {pipeline_mode = #tpu.pipeline_mode<synchronous>, transform_indices = @transform_2, window_bounds = array<i64: 1, 512>}, {pipeline_mode = #tpu.pipeline_mode<synchronous>, transform_indices = @transform_3, window_bounds = array<i64: 512, 384>}, {pipeline_mode = #tpu.pipeline_mode<synchronous>, transform_indices = @transform_4, window_bounds = array<i64: 1, 384>}, {pipeline_mode = #tpu.pipeline_mode<synchronous>, transform_indices = @transform_5, window_bounds = array<i64: 384, 1152>}, {pipeline_mode = #tpu.pipeline_mode<synchronous>, transform_indices = @transform_6, window_bounds = array<i64: 1, 1152>}, {pipeline_mode = #tpu.pipeline_mode<synchronous>, transform_indices = @transform_7, window_bounds = array<i64: 128, 128>}, {pipeline_mode = #tpu.pipeline_mode<synchronous>, transform_indices = @transform_8, window_bounds = array<i64: 1, 128>}, {pipeline_mode = #tpu.pipeline_mode<synchronous>, transform_indices = @transform_9, window_bounds = array<i64: 128, 128>}, {pipeline_mode = #tpu.pipeline_mode<synchronous>, transform_indices = @transform_10, window_bounds = array<i64: 1, 128>}, {pipeline_mode = #tpu.pipeline_mode<synchronous>, transform_indices = @transform_11, window_bounds = array<i64: 128, 128>}, {pipeline_mode = #tpu.pipeline_mode<synchronous>, transform_indices = @transform_12, window_bounds = array<i64: 1, 128>}, {pipeline_mode = #tpu.pipeline_mode<synchronous>, transform_indices = @transform_13, window_bounds = array<i64: 128, 128>}, {pipeline_mode = #tpu.pipeline_mode<synchronous>, transform_indices = @transform_14, window_bounds = array<i64: 1, 128>}, {pipeline_mode = #tpu.pipeline_mode<synchronous>, transform_indices = @transform_15, window_bounds = array<i64: 16, 128>}]} {
    %c0 = arith.constant 0 : index
    %c0_0 = arith.constant 0 : index
    %0 = vector.load %arg1[%c0, %c0_0] : memref<16x1152xbf16, #tpu.memory_space<vmem>>, vector<16x1152xbf16>
    %c0_1 = arith.constant 0 : index
    %c0_2 = arith.constant 0 : index
    %1 = vector.load %arg2[%c0_1, %c0_2] : memref<1152x512xbf16, #tpu.memory_space<vmem>>, vector<1152x512xbf16>
    %cst = arith.constant dense<0.000000e+00> : vector<16x512xf32>
    %2 = tpu.matmul %0, %1, %cst {dimension_numbers = #tpu.dot_dimension_numbers<[1], [0], [0], [1], [0, 0, 1, 1], [], []>} : vector<16x1152xbf16>, vector<1152x512xbf16>, vector<16x512xf32> -> vector<16x512xf32>
    %c0_3 = arith.constant 0 : index
    %c0_4 = arith.constant 0 : index
    %3 = vector.load %arg3[%c0_3, %c0_4] : memref<1x512xf32, #tpu.memory_space<vmem>>, vector<1x512xf32>
    %4 = vector.broadcast %3 : vector<1x512xf32> to vector<16x512xf32>
    %5 = arith.addf %2, %4 : vector<16x512xf32>
    %cst_5 = arith.constant 0.000000e+00 : f32
    %6 = vector.broadcast %cst_5 : f32 to vector<16x512xf32>
    %7 = arith.maximumf %5, %6 : vector<16x512xf32>
    %8 = arith.truncf %7 : vector<16x512xf32> to vector<16x512xbf16>
    %c0_6 = arith.constant 0 : index
    %c0_7 = arith.constant 0 : index
    %9 = vector.load %arg4[%c0_6, %c0_7] : memref<512x384xbf16, #tpu.memory_space<vmem>>, vector<512x384xbf16>
    %cst_8 = arith.constant dense<0.000000e+00> : vector<16x384xf32>
    %10 = tpu.matmul %8, %9, %cst_8 {dimension_numbers = #tpu.dot_dimension_numbers<[1], [0], [0], [1], [0, 0, 1, 1], [], []>} : vector<16x512xbf16>, vector<512x384xbf16>, vector<16x384xf32> -> vector<16x384xf32>
    %c0_9 = arith.constant 0 : index
    %c0_10 = arith.constant 0 : index
    %11 = vector.load %arg5[%c0_9, %c0_10] : memref<1x384xf32, #tpu.memory_space<vmem>>, vector<1x384xf32>
    %12 = vector.broadcast %11 : vector<1x384xf32> to vector<16x384xf32>
    %13 = arith.addf %10, %12 : vector<16x384xf32>
    %cst_11 = arith.constant 0.000000e+00 : f32
    %14 = vector.broadcast %cst_11 : f32 to vector<16x384xf32>
    %15 = arith.maximumf %13, %14 : vector<16x384xf32>
    %16 = arith.truncf %15 : vector<16x384xf32> to vector<16x384xbf16>
    %c0_12 = arith.constant 0 : index
    %c0_13 = arith.constant 0 : index
    %17 = vector.load %arg6[%c0_12, %c0_13] : memref<384x1152xbf16, #tpu.memory_space<vmem>>, vector<384x1152xbf16>
    %cst_14 = arith.constant dense<0.000000e+00> : vector<16x1152xf32>
    %18 = tpu.matmul %16, %17, %cst_14 {dimension_numbers = #tpu.dot_dimension_numbers<[1], [0], [0], [1], [0, 0, 1, 1], [], []>} : vector<16x384xbf16>, vector<384x1152xbf16>, vector<16x1152xf32> -> vector<16x1152xf32>
    %c0_15 = arith.constant 0 : index
    %c0_16 = arith.constant 0 : index
    %19 = vector.load %arg7[%c0_15, %c0_16] : memref<1x1152xf32, #tpu.memory_space<vmem>>, vector<1x1152xf32>
    %20 = vector.broadcast %19 : vector<1x1152xf32> to vector<16x1152xf32>
    %21 = arith.addf %18, %20 : vector<16x1152xf32>
    %cst_17 = arith.constant 0.000000e+00 : f32
    %22 = vector.broadcast %cst_17 : f32 to vector<16x1152xf32>
    %23 = arith.maximumf %21, %22 : vector<16x1152xf32>
    %24 = vector.extract_strided_slice %23 {offsets = [0, 0], sizes = [16, 128], strides = [1, 1]} : vector<16x1152xf32> to vector<16x128xf32>
    %25 = vector.extract_strided_slice %23 {offsets = [0, 128], sizes = [16, 128], strides = [1, 1]} : vector<16x1152xf32> to vector<16x128xf32>
    %26 = arith.maximumf %24, %25 : vector<16x128xf32>
    %27 = vector.extract_strided_slice %23 {offsets = [0, 256], sizes = [16, 128], strides = [1, 1]} : vector<16x1152xf32> to vector<16x128xf32>
    %28 = arith.maximumf %26, %27 : vector<16x128xf32>
    %29 = vector.extract_strided_slice %23 {offsets = [0, 384], sizes = [16, 128], strides = [1, 1]} : vector<16x1152xf32> to vector<16x128xf32>
    %30 = arith.maximumf %28, %29 : vector<16x128xf32>
    %31 = vector.extract_strided_slice %23 {offsets = [0, 512], sizes = [16, 128], strides = [1, 1]} : vector<16x1152xf32> to vector<16x128xf32>
    %32 = arith.maximumf %30, %31 : vector<16x128xf32>
    %33 = vector.extract_strided_slice %23 {offsets = [0, 640], sizes = [16, 128], strides = [1, 1]} : vector<16x1152xf32> to vector<16x128xf32>
    %34 = arith.maximumf %32, %33 : vector<16x128xf32>
    %35 = vector.extract_strided_slice %23 {offsets = [0, 768], sizes = [16, 128], strides = [1, 1]} : vector<16x1152xf32> to vector<16x128xf32>
    %36 = arith.maximumf %34, %35 : vector<16x128xf32>
    %37 = vector.extract_strided_slice %23 {offsets = [0, 896], sizes = [16, 128], strides = [1, 1]} : vector<16x1152xf32> to vector<16x128xf32>
    %38 = arith.maximumf %36, %37 : vector<16x128xf32>
    %39 = vector.extract_strided_slice %23 {offsets = [0, 1024], sizes = [16, 128], strides = [1, 1]} : vector<16x1152xf32> to vector<16x128xf32>
    %40 = arith.maximumf %38, %39 : vector<16x128xf32>
    %41 = arith.truncf %40 : vector<16x128xf32> to vector<16x128xbf16>
    %c0_18 = arith.constant 0 : index
    %c0_19 = arith.constant 0 : index
    %42 = vector.load %arg8[%c0_18, %c0_19] : memref<128x128xbf16, #tpu.memory_space<vmem>>, vector<128x128xbf16>
    %cst_20 = arith.constant dense<0.000000e+00> : vector<16x128xf32>
    %43 = tpu.matmul %41, %42, %cst_20 {dimension_numbers = #tpu.dot_dimension_numbers<[1], [0], [0], [1], [0, 0, 1, 1], [], []>} : vector<16x128xbf16>, vector<128x128xbf16>, vector<16x128xf32> -> vector<16x128xf32>
    %c0_21 = arith.constant 0 : index
    %c0_22 = arith.constant 0 : index
    %44 = vector.load %arg9[%c0_21, %c0_22] : memref<1x128xf32, #tpu.memory_space<vmem>>, vector<1x128xf32>
    %45 = vector.broadcast %44 : vector<1x128xf32> to vector<16x128xf32>
    %46 = arith.addf %43, %45 : vector<16x128xf32>
    %cst_23 = arith.constant 0.000000e+00 : f32
    %47 = vector.broadcast %cst_23 : f32 to vector<16x128xf32>
    %48 = arith.maximumf %46, %47 : vector<16x128xf32>
    %49 = arith.truncf %48 : vector<16x128xf32> to vector<16x128xbf16>
    %c0_24 = arith.constant 0 : index
    %c0_25 = arith.constant 0 : index
    %50 = vector.load %arg10[%c0_24, %c0_25] : memref<128x128xbf16, #tpu.memory_space<vmem>>, vector<128x128xbf16>
    %cst_26 = arith.constant dense<0.000000e+00> : vector<16x128xf32>
    %51 = tpu.matmul %49, %50, %cst_26 {dimension_numbers = #tpu.dot_dimension_numbers<[1], [0], [0], [1], [0, 0, 1, 1], [], []>} : vector<16x128xbf16>, vector<128x128xbf16>, vector<16x128xf32> -> vector<16x128xf32>
    %c0_27 = arith.constant 0 : index
    %c0_28 = arith.constant 0 : index
    %52 = vector.load %arg11[%c0_27, %c0_28] : memref<1x128xf32, #tpu.memory_space<vmem>>, vector<1x128xf32>
    %53 = vector.broadcast %52 : vector<1x128xf32> to vector<16x128xf32>
    %54 = arith.addf %51, %53 : vector<16x128xf32>
    %cst_29 = arith.constant 0.000000e+00 : f32
    %55 = vector.broadcast %cst_29 : f32 to vector<16x128xf32>
    %56 = arith.maximumf %54, %55 : vector<16x128xf32>
    %57 = arith.truncf %56 : vector<16x128xf32> to vector<16x128xbf16>
    %c0_30 = arith.constant 0 : index
    %c0_31 = arith.constant 0 : index
    %58 = vector.load %arg12[%c0_30, %c0_31] : memref<128x128xbf16, #tpu.memory_space<vmem>>, vector<128x128xbf16>
    %cst_32 = arith.constant dense<0.000000e+00> : vector<16x128xf32>
    %59 = tpu.matmul %57, %58, %cst_32 {dimension_numbers = #tpu.dot_dimension_numbers<[1], [0], [0], [1], [0, 0, 1, 1], [], []>} : vector<16x128xbf16>, vector<128x128xbf16>, vector<16x128xf32> -> vector<16x128xf32>
    %c0_33 = arith.constant 0 : index
    %c0_34 = arith.constant 0 : index
    %60 = vector.load %arg13[%c0_33, %c0_34] : memref<1x128xf32, #tpu.memory_space<vmem>>, vector<1x128xf32>
    %61 = vector.broadcast %60 : vector<1x128xf32> to vector<16x128xf32>
    %62 = arith.addf %59, %61 : vector<16x128xf32>
    %63 = arith.truncf %62 : vector<16x128xf32> to vector<16x128xbf16>
    %c0_35 = arith.constant 0 : index
    %c0_36 = arith.constant 0 : index
    %64 = vector.load %arg14[%c0_35, %c0_36] : memref<128x128xbf16, #tpu.memory_space<vmem>>, vector<128x128xbf16>
    %cst_37 = arith.constant dense<0.000000e+00> : vector<16x128xf32>
    %65 = tpu.matmul %63, %64, %cst_37 {dimension_numbers = #tpu.dot_dimension_numbers<[1], [0], [0], [1], [0, 0, 1, 1], [], []>} : vector<16x128xbf16>, vector<128x128xbf16>, vector<16x128xf32> -> vector<16x128xf32>
    %c0_38 = arith.constant 0 : index
    %c0_39 = arith.constant 0 : index
    %66 = vector.load %arg15[%c0_38, %c0_39] : memref<1x128xf32, #tpu.memory_space<vmem>>, vector<1x128xf32>
    %67 = vector.broadcast %66 : vector<1x128xf32> to vector<16x128xf32>
    %68 = arith.addf %65, %67 : vector<16x128xf32>
    %c0_40 = arith.constant 0 : index
    %c0_41 = arith.constant 0 : index
    %69 = vector.load %arg16[%c0_40, %c0_41] : memref<16x128xf32, #tpu.memory_space<vmem>>, vector<16x128xf32>
    tpu.vector_store %arg16[%c0_40, %c0_41], %68 {strides = array<i32>} : memref<16x128xf32, #tpu.memory_space<vmem>>, vector<16x128xf32>,
    return
  }
  func.func @transform_0(%arg0: i32) -> (i32, i32) {
    %c0_i32 = arith.constant 0 : i32
    %c0_i32_0 = arith.constant 0 : i32
    %c0_i32_1 = arith.constant 0 : i32
    return %c0_i32, %c0_i32_0 : i32, i32
  }
  func.func @transform_1(%arg0: i32) -> (i32, i32) {
    %c0_i32 = arith.constant 0 : i32
    %c0_i32_0 = arith.constant 0 : i32
    %c0_i32_1 = arith.constant 0 : i32
    return %c0_i32, %c0_i32_0 : i32, i32
  }
  func.func @transform_2(%arg0: i32) -> (i32, i32) {
    %c0_i32 = arith.constant 0 : i32
    %c0_i32_0 = arith.constant 0 : i32
    %c0_i32_1 = arith.constant 0 : i32
    return %c0_i32, %c0_i32_0 : i32, i32
  }
  func.func @transform_3(%arg0: i32) -> (i32, i32) {
    %c0_i32 = arith.constant 0 : i32
    %c0_i32_0 = arith.constant 0 : i32
    %c0_i32_1 = arith.constant 0 : i32
    return %c0_i32, %c0_i32_0 : i32, i32
  }
  func.func @transform_4(%arg0: i32) -> (i32, i32) {
    %c0_i32 = arith.constant 0 : i32
    %c0_i32_0 = arith.constant 0 : i32
    %c0_i32_1 = arith.constant 0 : i32
    return %c0_i32, %c0_i32_0 : i32, i32
  }
  func.func @transform_5(%arg0: i32) -> (i32, i32) {
    %c0_i32 = arith.constant 0 : i32
    %c0_i32_0 = arith.constant 0 : i32
    %c0_i32_1 = arith.constant 0 : i32
    return %c0_i32, %c0_i32_0 : i32, i32
  }
  func.func @transform_6(%arg0: i32) -> (i32, i32) {
    %c0_i32 = arith.constant 0 : i32
    %c0_i32_0 = arith.constant 0 : i32
    %c0_i32_1 = arith.constant 0 : i32
    return %c0_i32, %c0_i32_0 : i32, i32
  }
  func.func @transform_7(%arg0: i32) -> (i32, i32) {
    %c0_i32 = arith.constant 0 : i32
    %c0_i32_0 = arith.constant 0 : i32
    %c0_i32_1 = arith.constant 0 : i32
    return %c0_i32, %c0_i32_0 : i32, i32
  }
  func.func @transform_8(%arg0: i32) -> (i32, i32) {
    %c0_i32 = arith.constant 0 : i32
    %c0_i32_0 = arith.constant 0 : i32
    %c0_i32_1 = arith.constant 0 : i32
    return %c0_i32, %c0_i32_0 : i32, i32
  }
  func.func @transform_9(%arg0: i32) -> (i32, i32) {
    %c0_i32 = arith.constant 0 : i32
    %c0_i32_0 = arith.constant 0 : i32
    %c0_i32_1 = arith.constant 0 : i32
    return %c0_i32, %c0_i32_0 : i32, i32
  }
  func.func @transform_10(%arg0: i32) -> (i32, i32) {
    %c0_i32 = arith.constant 0 : i32
    %c0_i32_0 = arith.constant 0 : i32
    %c0_i32_1 = arith.constant 0 : i32
    return %c0_i32, %c0_i32_0 : i32, i32
  }
  func.func @transform_11(%arg0: i32) -> (i32, i32) {
    %c0_i32 = arith.constant 0 : i32
    %c0_i32_0 = arith.constant 0 : i32
    %c0_i32_1 = arith.constant 0 : i32
    return %c0_i32, %c0_i32_0 : i32, i32
  }
  func.func @transform_12(%arg0: i32) -> (i32, i32) {
    %c0_i32 = arith.constant 0 : i32
    %c0_i32_0 = arith.constant 0 : i32
    %c0_i32_1 = arith.constant 0 : i32
    return %c0_i32, %c0_i32_0 : i32, i32
  }
  func.func @transform_13(%arg0: i32) -> (i32, i32) {
    %c0_i32 = arith.constant 0 : i32
    %c0_i32_0 = arith.constant 0 : i32
    %c0_i32_1 = arith.constant 0 : i32
    return %c0_i32, %c0_i32_0 : i32, i32
  }
  func.func @transform_14(%arg0: i32) -> (i32, i32) {
    %c0_i32 = arith.constant 0 : i32
    %c0_i32_0 = arith.constant 0 : i32
    %c0_i32_1 = arith.constant 0 : i32
    return %c0_i32, %c0_i32_0 : i32, i32
  }
  func.func @transform_15(%arg0: i32) -> (i32, i32) {
    %c0_i32 = arith.constant 0 : i32
    %c0_i32_0 = arith.constant 0 : i32
    %c0_i32_1 = arith.constant 0 : i32
    return %c0_i32, %c0_i32_0 : i32, i32
  }
}

</mosaic_0001>

<bundles_post_ra>
// kernel: fnet_vlcs_forward.3
= control target key start
LH: loop header
LB: loop body
LE: loop exit
PB: predicated region body
PF: predicated region fallthrough
CT: control target
= control target key end

     0   :  { %s1908_s12 = smov 0   ;;  %s1910_s13 = smov 0   ;;  %s2157_s0 = inlined_call_operand.vmem [shape: bf16[480,384], index: 0, kind: input, shape index: {}]   ;;  %s2158_s1 = inlined_call_operand.vmem [shape: bf16[384,128], index: 1, kind: input, shape index: {}]   ;;  %s2159_s2 = inlined_call_operand.vmem [shape: f32[1,128], index: 2, kind: input, shape index: {}]   ;;  %s2160_s3 = inlined_call_operand.vmem [shape: bf16[480,128], index: 3, kind: output, shape index: {}]  }
   0x1   :  { %s1912_s14 = smov 0  }
   0x2 LB: > { %s25_s15 = sadd.s32 1, %s1880_s13  ;;  %p1322_p0 = scmp.ge.s32.totalorder %s1884_s14, 1  ;;  %s1884_s14 = sphi %s1912_s14, %s13_s14   ;;  %s1880_s13 = sphi %s1910_s13, %s2162_s13   ;;  %s1876_s12 = sphi %s1908_s12, %s2161_s12  }
   0x3   : > { %p27_p1 = scmp.ge.s32.totalorder %s25_s15, 2  ;;  %p170_p2 = scmp.lt.s32.totalorder %s1884_s14, 3 }
   0x5   : > { %s2164_s15 = smov (%p27_p1, %s25_s15), 0  ;;  %p171_p3 = pnand %p1322_p0, %p170_p2 }
   0x6   : > { %s205_s30 = smul.u32 (!%p171_p3), 30, %s1876_s12 }
   0x7   : > { %174 = sbr.rel (%p171_p3) target bundleno = 367 (0x16f), region = 32 }
   0x8   : > { %p206_p4 = scmp.lt.s32.totalorder (!%p171_p3), %s205_s30, 59 }
   0xc   : > { %v1778_v0 = vld [vmem:[%s2158_s1 + $0x78] sm:$0xff]   ;;  %v1886_v1 = vmov 0.0   ;;  %v1781_v4 = vld [vmem:[%s2158_s1 + $0x70] sm:$0xff]   ;;  %vm1887_vm0 = vmmov 0   ;;  %v1784_v7 = vld [vmem:[%s2158_s1 + $0x68] sm:$0xff]   ;;  %s2166_s30 = smov (!%p206_p4, %s205_s30), 59 }
   0xd   : > { %1675 = vmatprep.subr.bf16.mxu1 %v1886_v1  ;;  %v1779_v2 = vld [vmem:[%s2158_s1 + $0x38] sm:$0xff]   ;;  %1546 = vmatprep.subr.bf16.mxu0 %v1778_v0  ;;  %v1782_v5 = vld [vmem:[%s2158_s1 + $0x30] sm:$0xff]   ;;  %v1785_v8 = vld [vmem:[%s2158_s1 + $0x28] sm:$0xff]   ;;  %s1751_s27 = smul.u32 12, %s2166_s30  ;;  %s1324_s24 = sshll.u32 %s2166_s30, 2 }
   0xe   : > { %v1780_v3 = vld [vmem:[%s2158_s1 + $0xb8] sm:$0xff]   ;;  %1547 = vmatpush3.bf16.msra.mxu0 %v1779_v2  ;;  %1691 = vmatprep.mubr.msk.bf16.mxu1 %vm1887_vm0, %v1886_v1  ;;  %v1783_v6 = vld [vmem:[%s2158_s1 + $0xb0] sm:$0xff]   ;;  %v1786_v9 = vld [vmem:[%s2158_s1 + $0xa8] sm:$0xff]  }
   0xf   : > { %1676 = vmatpush3.bf16.msra.mxu1 %v1780_v3  ;;  %1548 = vmatprep.subr.bf16.mxu0 %v1781_v4  ;;  %v1787_v10 = vld [vmem:[%s2158_s1 + $0x60] sm:$0xff]   ;;  %v1790_v13 = vld [vmem:[%s2158_s1 + $0x58] sm:$0xff]   ;;  %v1793_v16 = vld [vmem:[%s2158_s1 + $0x50] sm:$0xff]   ;;  %s2003_s10 = scalar_lea.vmem %s2157_s0, %s1751_s27  ;;  %s2104_s27 = scalar_lea.vmem %s2160_s3, %s1324_s24 }
  0x10   : > { %1677 = vmatprep.subr.bf16.mxu1 %v1886_v1  ;;  %v1788_v11 = vld [vmem:[%s2158_s1 + $0x20] sm:$0xff]   ;;  %v1791_v14 = vld [vmem:[%s2158_s1 + $0x18] sm:$0xff]   ;;  %v1794_v17 = vld [vmem:[%s2158_s1 + $0x10] sm:$0xff]  }
  0x11   : > { %v1789_v12 = vld [vmem:[%s2158_s1 + $0xa0] sm:$0xff]   ;;  %v1792_v15 = vld [vmem:[%s2158_s1 + $0x98] sm:$0xff]   ;;  %v1795_v18 = vld [vmem:[%s2158_s1 + $0x90] sm:$0xff]  }
  0x12   : > { %1549 = vmatpush3.bf16.msra.mxu0 %v1782_v5  ;;  %v1796_v19 = vld [vmem:[%s2158_s1 + $0x48] sm:$0xff]   ;;  %v1799_v22 = vld [vmem:[%s2158_s1 + $0x40] sm:$0xff]   ;;  %v1812_v32 = vld [vmem:[%s2003_s10 + $0x30] ss:$12 sps:$4 sm:$0xff]  }
  0x13   : > { %1678 = vmatpush3.bf16.msra.mxu1 %v1783_v6  ;;  %1550 = vmatprep.subr.bf16.mxu0 %v1784_v7  ;;  %v1797_v20 = vld [vmem:[%s2158_s1 + $0x8] sm:$0xff]   ;;  %v1804_v23 = vld [vmem:[%s2003_s10 + $0x4] ss:$12 sps:$4 sm:$0xff]   ;;  %v1810_v31 = vld [vmem:[%s2003_s10 + $0x34] ss:$12 sps:$4 sm:$0xff]  }
  0x14   : > { %1679 = vmatprep.subr.bf16.mxu1 %v1886_v1  ;;  %v1798_v21 = vld [vmem:[%s2158_s1 + $0x88] sm:$0xff]   ;;  %v1800_v24 = vld [vmem:[%s2158_s1] sm:$0xff]   ;;  %760 = vmatprep.mubr.bf16.mxu0 %v1804_v23  ;;  %v1817_v36 = vld [vmem:[%s2003_s10 + $0x50] ss:$12 sps:$4 sm:$0xff]  }
  0x15   : > { %v1801_v25 = vld [vmem:[%s2158_s1 + $0x80] sm:$0xff]   ;;  %v1805_v27 = vld [vmem:[%s2003_s10 + $0x8] ss:$12 sps:$4 sm:$0xff]   ;;  %v1814_v34 = vld [vmem:[%s2003_s10 + $0x4c] ss:$12 sps:$4 sm:$0xff]  }
  0x16   : > { %1551 = vmatpush3.bf16.msra.mxu0 %v1785_v8  ;;  %v1802_v26 = vld [vmem:[%s2003_s10] ss:$12 sps:$4 sm:$0xff]   ;;  %v1806_v28 = vld [vmem:[%s2003_s10 + $0x1c] ss:$12 sps:$4 sm:$0xff]   ;;  %v1808_v29 = vld [vmem:[%s2003_s10 + $0x18] ss:$12 sps:$4 sm:$0xff]  }
  0x17   : > { %1680 = vmatpush3.bf16.msra.mxu1 %v1786_v9  ;;  %1552 = vmatprep.subr.bf16.mxu0 %v1787_v10  ;;  %v1809_v30 = vld [vmem:[%s2003_s10 + $0x20] ss:$12 sps:$4 sm:$0xff]   ;;  %v1813_v33 = vld [vmem:[%s2003_s10 + $0x38] ss:$12 sps:$4 sm:$0xff]   ;;  %v1816_v35 = vld [vmem:[%s2003_s10 + $0x48] ss:$12 sps:$4 sm:$0xff]  }
  0x18   : > { %1681 = vmatprep.subr.bf16.mxu1 %v1886_v1  ;;  %v1818_v37 = vld [vmem:[%s2003_s10 + $0x64] ss:$12 sps:$4 sm:$0xff]   ;;  %v1820_v38 = vld [vmem:[%s2003_s10 + $0x60] ss:$12 sps:$4 sm:$0xff]   ;;  %v1821_v39 = vld [vmem:[%s2003_s10 + $0x68] ss:$12 sps:$4 sm:$0xff]  }
  0x19   : > { %v1822_v40 = vld [vmem:[%s2003_s10 + $0x7c] ss:$12 sps:$4 sm:$0xff]   ;;  %v1824_v41 = vld [vmem:[%s2003_s10 + $0x78] ss:$12 sps:$4 sm:$0xff]   ;;  %v1825_v42 = vld [vmem:[%s2003_s10 + $0x80] ss:$12 sps:$4 sm:$0xff]  }
  0x1a   : > { %1553 = vmatpush3.bf16.msra.mxu0 %v1788_v11  ;;  %v1826_v43 = vld [vmem:[%s2003_s10 + $0x94] ss:$12 sps:$4 sm:$0xff]   ;;  %v1828_v44 = vld [vmem:[%s2003_s10 + $0x90] ss:$12 sps:$4 sm:$0xff]   ;;  %v1829_v45 = vld [vmem:[%s2003_s10 + $0x98] ss:$12 sps:$4 sm:$0xff]  }
  0x1b   : > { %1682 = vmatpush3.bf16.msra.mxu1 %v1789_v12  ;;  %1554 = vmatprep.subr.bf16.mxu0 %v1790_v13  ;;  %v1830_v46 = vld [vmem:[%s2003_s10 + $0xac] ss:$12 sps:$4 sm:$0xff]   ;;  %v1832_v47 = vld [vmem:[%s2003_s10 + $0xa8] ss:$12 sps:$4 sm:$0xff]   ;;  %v1833_v48 = vld [vmem:[%s2003_s10 + $0xb0] ss:$12 sps:$4 sm:$0xff]  }
  0x1c   : > { %1683 = vmatprep.subr.bf16.mxu1 %v1886_v1  ;;  %v1834_v49 = vld [vmem:[%s2003_s10 + $0xc4] ss:$12 sps:$4 sm:$0xff]   ;;  %v1836_v50 = vld [vmem:[%s2003_s10 + $0xc0] ss:$12 sps:$4 sm:$0xff]   ;;  %v1837_v51 = vld [vmem:[%s2003_s10 + $0xc8] ss:$12 sps:$4 sm:$0xff]  }
  0x1d   : > { %v1838_v52 = vld [vmem:[%s2003_s10 + $0xdc] ss:$12 sps:$4 sm:$0xff]   ;;  %v1840_v53 = vld [vmem:[%s2003_s10 + $0xd8] ss:$12 sps:$4 sm:$0xff]   ;;  %v1841_v54 = vld [vmem:[%s2003_s10 + $0xe0] ss:$12 sps:$4 sm:$0xff]  }
  0x1e   : > { %1555 = vmatpush3.bf16.msra.mxu0 %v1791_v14  ;;  %v1842_v55 = vld [vmem:[%s2003_s10 + $0xf4] ss:$12 sps:$4 sm:$0xff]   ;;  %v1844_v56 = vld [vmem:[%s2003_s10 + $0xf0] ss:$12 sps:$4 sm:$0xff]   ;;  %v1845_v57 = vld [vmem:[%s2003_s10 + $0xf8] ss:$12 sps:$4 sm:$0xff]  }
  0x1f   : > { %1684 = vmatpush3.bf16.msra.mxu1 %v1792_v15  ;;  %1556 = vmatprep.subr.bf16.mxu0 %v1793_v16  ;;  %v1846_v58 = vld [vmem:[%s2003_s10 + $0x10c] ss:$12 sps:$4 sm:$0xff]   ;;  %v1848_v59 = vld [vmem:[%s2003_s10 + $0x108] ss:$12 sps:$4 sm:$0xff]   ;;  %v1849_v60 = vld [vmem:[%s2003_s10 + $0x110] ss:$12 sps:$4 sm:$0xff]  }
  0x20   : > { %1685 = vmatprep.subr.bf16.mxu1 %v1886_v1  ;;  %v1850_v61 = vld [vmem:[%s2003_s10 + $0x124] ss:$12 sps:$4 sm:$0xff]   ;;  %v1852_v62 = vld [vmem:[%s2003_s10 + $0x120] ss:$12 sps:$4 sm:$0xff]   ;;  %v1853_v63 = vld [vmem:[%s2003_s10 + $0x128] ss:$12 sps:$4 sm:$0xff]  }
  0x21   : > { %v1854_v0 = vld [vmem:[%s2003_s10 + $0x13c] ss:$12 sps:$4 sm:$0xff]   ;;  %v1856_v2 = vld [vmem:[%s2003_s10 + $0x138] ss:$12 sps:$4 sm:$0xff]   ;;  %v1857_v3 = vld [vmem:[%s2003_s10 + $0x140] ss:$12 sps:$4 sm:$0xff]  }
  0x22   : > { %1557 = vmatpush3.bf16.msra.mxu0 %v1794_v17  ;;  %v1858_v4 = vld [vmem:[%s2003_s10 + $0x154] ss:$12 sps:$4 sm:$0xff]   ;;  %v1860_v5 = vld [vmem:[%s2003_s10 + $0x150] ss:$12 sps:$4 sm:$0xff]   ;;  %v1861_v6 = vld [vmem:[%s2003_s10 + $0x158] ss:$12 sps:$4 sm:$0xff]  }
  0x23   : > { %1686 = vmatpush3.bf16.msra.mxu1 %v1795_v18  ;;  %1558 = vmatprep.subr.bf16.mxu0 %v1796_v19  ;;  %v2095_v9 = vld [vmem:[%s2159_s2] ss:$0 sm:$0xff] }
  0x24   : > { %1687 = vmatprep.subr.bf16.mxu1 %v1886_v1 }
  0x26   : > { %1559 = vmatpush3.bf16.msra.mxu0 %v1797_v20 }
  0x27   : > { %1688 = vmatpush3.bf16.msra.mxu1 %v1798_v21  ;;  %1560 = vmatprep.subr.bf16.mxu0 %v1799_v22 }
  0x28   : > { %1689 = vmatprep.subr.bf16.mxu1 %v1886_v1 }
  0x2a   : > { %1561 = vmatpush3.bf16.msra.mxu0 %v1800_v24 }
  0x2b   : > { %1690 = vmatpush3.bf16.msra.mxu1 %v1801_v25 }
  0x2d   : > { %761 = vmatmul.mubr.bf16.vlgmr.msra.gmra.mxu0 %v1802_v26 }
  0x2e   : > { %1692 = vmatmul.mubr.bf16.vlgmr.msra.gmra.mxu1 %v1805_v27  ;;  %768 = vmatprep.mubr.bf16.mxu0 %v1806_v28 }
  0x2f   : > { %1695 = vmatprep.mubr.msk.bf16.mxu1 %vm1887_vm0, %v1886_v1 }
  0x35   : > { %769 = vmatmul.mubr.bf16.gmra.mxu0 %v1808_v29 }
  0x36   : > { %1696 = vmatmul.mubr.bf16.gmra.mxu1 %v1809_v30  ;;  %776 = vmatprep.mubr.bf16.mxu0 %v1810_v31 }
  0x37   : > { %1699 = vmatprep.mubr.msk.bf16.mxu1 %vm1887_vm0, %v1886_v1 }
  0x3d   : > { %777 = vmatmul.mubr.bf16.gmra.mxu0 %v1812_v32 }
  0x3e   : > { %1700 = vmatmul.mubr.bf16.gmra.mxu1 %v1813_v33  ;;  %784 = vmatprep.mubr.bf16.mxu0 %v1814_v34 }
  0x3f   : > { %1703 = vmatprep.mubr.msk.bf16.mxu1 %vm1887_vm0, %v1886_v1 }
  0x45   : > { %785 = vmatmul.mubr.bf16.gmra.mxu0 %v1816_v35 }
  0x46   : > { %1704 = vmatmul.mubr.bf16.gmra.mxu1 %v1817_v36  ;;  %792 = vmatprep.mubr.bf16.mxu0 %v1818_v37 }
  0x47   : > { %1707 = vmatprep.mubr.msk.bf16.mxu1 %vm1887_vm0, %v1886_v1 }
  0x4d   : > { %793 = vmatmul.mubr.bf16.gmra.mxu0 %v1820_v38 }
  0x4e   : > { %1708 = vmatmul.mubr.bf16.gmra.mxu1 %v1821_v39  ;;  %800 = vmatprep.mubr.bf16.mxu0 %v1822_v40 }
  0x4f   : > { %1711 = vmatprep.mubr.msk.bf16.mxu1 %vm1887_vm0, %v1886_v1 }
  0x55   : > { %801 = vmatmul.mubr.bf16.gmra.mxu0 %v1824_v41 }
  0x56   : > { %1712 = vmatmul.mubr.bf16.gmra.mxu1 %v1825_v42  ;;  %808 = vmatprep.mubr.bf16.mxu0 %v1826_v43 }
  0x57   : > { %1715 = vmatprep.mubr.msk.bf16.mxu1 %vm1887_vm0, %v1886_v1 }
  0x5d   : > { %809 = vmatmul.mubr.bf16.gmra.mxu0 %v1828_v44 }
  0x5e   : > { %1716 = vmatmul.mubr.bf16.gmra.mxu1 %v1829_v45  ;;  %816 = vmatprep.mubr.bf16.mxu0 %v1830_v46 }
  0x5f   : > { %1719 = vmatprep.mubr.msk.bf16.mxu1 %vm1887_vm0, %v1886_v1 }
  0x65   : > { %817 = vmatmul.mubr.bf16.gmra.mxu0 %v1832_v47 }
  0x66   : > { %1720 = vmatmul.mubr.bf16.gmra.mxu1 %v1833_v48  ;;  %824 = vmatprep.mubr.bf16.mxu0 %v1834_v49 }
  0x67   : > { %1723 = vmatprep.mubr.msk.bf16.mxu1 %vm1887_vm0, %v1886_v1 }
  0x6d   : > { %825 = vmatmul.mubr.bf16.gmra.mxu0 %v1836_v50 }
  0x6e   : > { %1724 = vmatmul.mubr.bf16.gmra.mxu1 %v1837_v51  ;;  %832 = vmatprep.mubr.bf16.mxu0 %v1838_v52 }
  0x6f   : > { %1727 = vmatprep.mubr.msk.bf16.mxu1 %vm1887_vm0, %v1886_v1 }
  0x75   : > { %833 = vmatmul.mubr.bf16.gmra.mxu0 %v1840_v53 }
  0x76   : > { %1728 = vmatmul.mubr.bf16.gmra.mxu1 %v1841_v54  ;;  %840 = vmatprep.mubr.bf16.mxu0 %v1842_v55 }
  0x77   : > { %1731 = vmatprep.mubr.msk.bf16.mxu1 %vm1887_vm0, %v1886_v1 }
  0x7d   : > { %841 = vmatmul.mubr.bf16.gmra.mxu0 %v1844_v56 }
  0x7e   : > { %1732 = vmatmul.mubr.bf16.gmra.mxu1 %v1845_v57  ;;  %848 = vmatprep.mubr.bf16.mxu0 %v1846_v58 }
  0x7f   : > { %1735 = vmatprep.mubr.msk.bf16.mxu1 %vm1887_vm0, %v1886_v1 }
  0x85   : > { %849 = vmatmul.mubr.bf16.gmra.mxu0 %v1848_v59 }
  0x86   : > { %1736 = vmatmul.mubr.bf16.gmra.mxu1 %v1849_v60  ;;  %856 = vmatprep.mubr.bf16.mxu0 %v1850_v61 }
  0x87   : > { %1739 = vmatprep.mubr.msk.bf16.mxu1 %vm1887_vm0, %v1886_v1 }
  0x8d   : > { %857 = vmatmul.mubr.bf16.gmra.mxu0 %v1852_v62 }
  0x8e   : > { %1740 = vmatmul.mubr.bf16.gmra.mxu1 %v1853_v63  ;;  %864 = vmatprep.mubr.bf16.mxu0 %v1854_v0 }
  0x8f   : > { %1743 = vmatprep.mubr.msk.bf16.mxu1 %vm1887_vm0, %v1886_v1 }
  0x95   : > { %865 = vmatmul.mubr.bf16.gmra.mxu0 %v1856_v2 }
  0x96   : > { %1744 = vmatmul.mubr.bf16.gmra.mxu1 %v1857_v3  ;;  %872 = vmatprep.mubr.bf16.mxu0 %v1858_v4 }
  0x97   : > { %1747 = vmatprep.mubr.msk.bf16.mxu1 %vm1887_vm0, %v1886_v1 }
  0x9d   : > { %873 = vmatmul.mubr.bf16.gmra.mxu0 %v1860_v5 }
  0x9e   : > { %1748 = vmatmul.mubr.bf16.gmra.mxu1 %v1861_v6 }
  0xed   : > { %v1562_v7 = vpop.f32.mrf.mxu0 }
  0xee   : > { %v915_v8 = vpop.f32.mrf.mxu1 }
  0xef   : > { %v1563_v10 = vpop.f32.mrf.mxu0 }
  0xf0   : > { %v1564_v11 = vadd.f32 %v1563_v10, %v1562_v7  ;;  %v1693_v12 = vpop.f32.mrf.mxu1 }
  0xf1   : > { %v1565_v13 = vpop.f32.mrf.mxu0 }
  0xf2   : > { %v763_v14 = vadd.f32 %v1564_v11, %v2095_v9  ;;  %v918_v15 = vpop.f32.mrf.mxu1 }
  0xf3   : > { %v1566_v1 = vpop.f32.mrf.mxu0 }
  0xf4   : > { %v1567_v16 = vadd.f32 %v1566_v1, %v1565_v13  ;;  %v1694_v17 = vpop.f32.mrf.mxu1  ;;  %v916_v19 = vadd.f32 %v915_v8, %v763_v14 }
  0xf5   : > { %v1568_v18 = vpop.f32.mrf.mxu0 }
  0xf6   : > { %v766_v20 = vadd.f32 %v1567_v16, %v2095_v9  ;;  %v923_v21 = vpop.f32.mrf.mxu1  ;;  %v1034_v27 = vmax.f32 %v916_v19, 0.0 }
  0xf7   : > { %v1569_v22 = vpop.f32.mrf.mxu0 }
  0xf8   : > { %v919_v23 = vadd.f32 %v918_v15, %v766_v20  ;;  %v1570_v24 = vadd.f32 %v1569_v22, %v1568_v18  ;;  %v1697_v25 = vpop.f32.mrf.mxu1 }
  0xf9   : > { %v1571_v26 = vpop.f32.mrf.mxu0 }
  0xfa   : > { %v1035_v28 = vmax.f32 %v919_v23, 0.0  ;;  %v771_v29 = vadd.f32 %v1570_v24, %v2095_v9  ;;  %v926_v30 = vpop.f32.mrf.mxu1 }
  0xfb   : > { %v1572_v31 = vpop.f32.mrf.mxu0 }
  0xfc   : > { %v1460_v32 = vpack.c.bf16 %v1035_v28, %v1034_v27  ;;  %v1573_v33 = vadd.f32 %v1572_v31, %v1571_v26  ;;  %v1698_v34 = vpop.f32.mrf.mxu1  ;;  %v924_v36 = vadd.f32 %v923_v21, %v771_v29 }
  0xfd   : > { %v1574_v35 = vpop.f32.mrf.mxu0 }
  0xfe   : > { %1461 = vst [vmem:[%s2104_s27] sm:$0xff] %v1460_v32   ;;  %v774_v37 = vadd.f32 %v1573_v33, %v2095_v9  ;;  %v931_v38 = vpop.f32.mrf.mxu1  ;;  %v1036_v44 = vmax.f32 %v924_v36, 0.0 }
  0xff   : > { %v1575_v39 = vpop.f32.mrf.mxu0 }
 0x100   : > { %v927_v40 = vadd.f32 %v926_v30, %v774_v37  ;;  %v1576_v41 = vadd.f32 %v1575_v39, %v1574_v35  ;;  %v1701_v42 = vpop.f32.mrf.mxu1 }
 0x101   : > { %v1577_v43 = vpop.f32.mrf.mxu0 }
 0x102   : > { %v1037_v45 = vmax.f32 %v927_v40, 0.0  ;;  %v779_v46 = vadd.f32 %v1576_v41, %v2095_v9  ;;  %v934_v47 = vpop.f32.mrf.mxu1 }
 0x103   : > { %v1578_v48 = vpop.f32.mrf.mxu0 }
 0x104   : > { %v1465_v49 = vpack.c.bf16 %v1037_v45, %v1036_v44  ;;  %v1579_v50 = vadd.f32 %v1578_v48, %v1577_v43  ;;  %v1702_v51 = vpop.f32.mrf.mxu1  ;;  %v932_v53 = vadd.f32 %v931_v38, %v779_v46 }
 0x105   : > { %v1580_v52 = vpop.f32.mrf.mxu0 }
 0x106   : > { %1532 = vst [vmem:[%s2104_s27 + $0x8] sm:$0xff] %v1465_v49   ;;  %v782_v54 = vadd.f32 %v1579_v50, %v2095_v9  ;;  %v939_v55 = vpop.f32.mrf.mxu1  ;;  %v1038_v61 = vmax.f32 %v932_v53, 0.0 }
 0x107   : > { %v1581_v56 = vpop.f32.mrf.mxu0 }
 0x108   : > { %v935_v57 = vadd.f32 %v934_v47, %v782_v54  ;;  %v1582_v58 = vadd.f32 %v1581_v56, %v1580_v52  ;;  %v1705_v59 = vpop.f32.mrf.mxu1 }
 0x109   : > { %v1583_v60 = vpop.f32.mrf.mxu0 }
 0x10a   : > { %v1039_v62 = vmax.f32 %v935_v57, 0.0  ;;  %v787_v63 = vadd.f32 %v1582_v58, %v2095_v9  ;;  %v942_v0 = vpop.f32.mrf.mxu1 }
 0x10b   : > { %v1584_v2 = vpop.f32.mrf.mxu0 }
 0x10c   : > { %v1470_v3 = vpack.c.bf16 %v1039_v62, %v1038_v61  ;;  %v1585_v4 = vadd.f32 %v1584_v2, %v1583_v60  ;;  %v1706_v5 = vpop.f32.mrf.mxu1  ;;  %v940_v7 = vadd.f32 %v939_v55, %v787_v63 }
 0x10d   : > { %v1586_v6 = vpop.f32.mrf.mxu0 }
 0x10e   : > { %1533 = vst [vmem:[%s2104_s27 + $0x10] sm:$0xff] %v1470_v3   ;;  %v790_v8 = vadd.f32 %v1585_v4, %v2095_v9  ;;  %v947_v10 = vpop.f32.mrf.mxu1  ;;  %v1040_v1 = vmax.f32 %v940_v7, 0.0 }
 0x10f   : > { %v1587_v11 = vpop.f32.mrf.mxu0 }
 0x110   : > { %v943_v12 = vadd.f32 %v942_v0, %v790_v8  ;;  %v1588_v13 = vadd.f32 %v1587_v11, %v1586_v6  ;;  %v1709_v14 = vpop.f32.mrf.mxu1 }
 0x111   : > { %v1589_v15 = vpop.f32.mrf.mxu0 }
 0x112   : > { %v1041_v16 = vmax.f32 %v943_v12, 0.0  ;;  %v795_v17 = vadd.f32 %v1588_v13, %v2095_v9  ;;  %v950_v18 = vpop.f32.mrf.mxu1 }
 0x113   : > { %v1590_v19 = vpop.f32.mrf.mxu0 }
 0x114   : > { %v1475_v20 = vpack.c.bf16 %v1041_v16, %v1040_v1  ;;  %v1591_v21 = vadd.f32 %v1590_v19, %v1589_v15  ;;  %v1710_v22 = vpop.f32.mrf.mxu1  ;;  %v948_v24 = vadd.f32 %v947_v10, %v795_v17 }
 0x115   : > { %v1592_v23 = vpop.f32.mrf.mxu0 }
 0x116   : > { %1534 = vst [vmem:[%s2104_s27 + $0x18] sm:$0xff] %v1475_v20   ;;  %v798_v25 = vadd.f32 %v1591_v21, %v2095_v9  ;;  %v955_v26 = vpop.f32.mrf.mxu1  ;;  %v1042_v32 = vmax.f32 %v948_v24, 0.0 }
 0x117   : > { %v1593_v27 = vpop.f32.mrf.mxu0 }
 0x118   : > { %v951_v28 = vadd.f32 %v950_v18, %v798_v25  ;;  %v1594_v29 = vadd.f32 %v1593_v27, %v1592_v23  ;;  %v1713_v30 = vpop.f32.mrf.mxu1 }
 0x119   : > { %v1595_v31 = vpop.f32.mrf.mxu0 }
 0x11a   : > { %v1043_v33 = vmax.f32 %v951_v28, 0.0  ;;  %v803_v34 = vadd.f32 %v1594_v29, %v2095_v9  ;;  %v958_v35 = vpop.f32.mrf.mxu1 }
 0x11b   : > { %v1596_v36 = vpop.f32.mrf.mxu0 }
 0x11c   : > { %v1480_v37 = vpack.c.bf16 %v1043_v33, %v1042_v32  ;;  %v1597_v38 = vadd.f32 %v1596_v36, %v1595_v31  ;;  %v1714_v39 = vpop.f32.mrf.mxu1  ;;  %v956_v41 = vadd.f32 %v955_v26, %v803_v34 }
 0x11d   : > { %v1598_v40 = vpop.f32.mrf.mxu0 }
 0x11e   : > { %1535 = vst [vmem:[%s2104_s27 + $0x20] sm:$0xff] %v1480_v37   ;;  %v806_v42 = vadd.f32 %v1597_v38, %v2095_v9  ;;  %v963_v43 = vpop.f32.mrf.mxu1  ;;  %v1044_v49 = vmax.f32 %v956_v41, 0.0 }
 0x11f   : > { %v1599_v44 = vpop.f32.mrf.mxu0 }
 0x120   : > { %v959_v45 = vadd.f32 %v958_v35, %v806_v42  ;;  %v1600_v46 = vadd.f32 %v1599_v44, %v1598_v40  ;;  %v1717_v47 = vpop.f32.mrf.mxu1 }
 0x121   : > { %v1601_v48 = vpop.f32.mrf.mxu0 }
 0x122   : > { %v1045_v50 = vmax.f32 %v959_v45, 0.0  ;;  %v811_v51 = vadd.f32 %v1600_v46, %v2095_v9  ;;  %v966_v52 = vpop.f32.mrf.mxu1 }
 0x123   : > { %v1602_v53 = vpop.f32.mrf.mxu0 }
 0x124   : > { %v1485_v54 = vpack.c.bf16 %v1045_v50, %v1044_v49  ;;  %v1603_v55 = vadd.f32 %v1602_v53, %v1601_v48  ;;  %v1718_v56 = vpop.f32.mrf.mxu1  ;;  %v964_v58 = vadd.f32 %v963_v43, %v811_v51 }
 0x125   : > { %v1604_v57 = vpop.f32.mrf.mxu0 }
 0x126   : > { %1536 = vst [vmem:[%s2104_s27 + $0x28] sm:$0xff] %v1485_v54   ;;  %v814_v59 = vadd.f32 %v1603_v55, %v2095_v9  ;;  %v971_v60 = vpop.f32.mrf.mxu1  ;;  %v1046_v3 = vmax.f32 %v964_v58, 0.0 }
 0x127   : > { %v1605_v61 = vpop.f32.mrf.mxu0 }
 0x128   : > { %v967_v62 = vadd.f32 %v966_v52, %v814_v59  ;;  %v1606_v63 = vadd.f32 %v1605_v61, %v1604_v57  ;;  %v1721_v0 = vpop.f32.mrf.mxu1 }
 0x129   : > { %v1607_v2 = vpop.f32.mrf.mxu0 }
 0x12a   : > { %v1047_v4 = vmax.f32 %v967_v62, 0.0  ;;  %v819_v5 = vadd.f32 %v1606_v63, %v2095_v9  ;;  %v974_v6 = vpop.f32.mrf.mxu1 }
 0x12b   : > { %v1608_v7 = vpop.f32.mrf.mxu0 }
 0x12c   : > { %v1490_v8 = vpack.c.bf16 %v1047_v4, %v1046_v3  ;;  %v1609_v10 = vadd.f32 %v1608_v7, %v1607_v2  ;;  %v1722_v11 = vpop.f32.mrf.mxu1  ;;  %v972_v13 = vadd.f32 %v971_v60, %v819_v5 }
 0x12d   : > { %v1610_v12 = vpop.f32.mrf.mxu0 }
 0x12e   : > { %1537 = vst [vmem:[%s2104_s27 + $0x30] sm:$0xff] %v1490_v8   ;;  %v822_v14 = vadd.f32 %v1609_v10, %v2095_v9  ;;  %v979_v15 = vpop.f32.mrf.mxu1  ;;  %v1048_v20 = vmax.f32 %v972_v13, 0.0 }
 0x12f   : > { %v1611_v1 = vpop.f32.mrf.mxu0 }
 0x130   : > { %v975_v16 = vadd.f32 %v974_v6, %v822_v14  ;;  %v1612_v17 = vadd.f32 %v1611_v1, %v1610_v12  ;;  %v1725_v18 = vpop.f32.mrf.mxu1 }
 0x131   : > { %v1613_v19 = vpop.f32.mrf.mxu0 }
 0x132   : > { %v1049_v21 = vmax.f32 %v975_v16, 0.0  ;;  %v827_v22 = vadd.f32 %v1612_v17, %v2095_v9  ;;  %v982_v23 = vpop.f32.mrf.mxu1 }
 0x133   : > { %v1614_v24 = vpop.f32.mrf.mxu0 }
 0x134   : > { %v1495_v25 = vpack.c.bf16 %v1049_v21, %v1048_v20  ;;  %v1615_v26 = vadd.f32 %v1614_v24, %v1613_v19  ;;  %v1726_v27 = vpop.f32.mrf.mxu1  ;;  %v980_v29 = vadd.f32 %v979_v15, %v827_v22 }
 0x135   : > { %v1616_v28 = vpop.f32.mrf.mxu0 }
 0x136   : > { %1538 = vst [vmem:[%s2104_s27 + $0x38] sm:$0xff] %v1495_v25   ;;  %v830_v30 = vadd.f32 %v1615_v26, %v2095_v9  ;;  %v987_v31 = vpop.f32.mrf.mxu1  ;;  %v1050_v37 = vmax.f32 %v980_v29, 0.0 }
 0x137   : > { %v1617_v32 = vpop.f32.mrf.mxu0 }
 0x138   : > { %v983_v33 = vadd.f32 %v982_v23, %v830_v30  ;;  %v1618_v34 = vadd.f32 %v1617_v32, %v1616_v28  ;;  %v1729_v35 = vpop.f32.mrf.mxu1 }
 0x139   : > { %v1619_v36 = vpop.f32.mrf.mxu0 }
 0x13a   : > { %v1051_v38 = vmax.f32 %v983_v33, 0.0  ;;  %v835_v39 = vadd.f32 %v1618_v34, %v2095_v9  ;;  %v990_v40 = vpop.f32.mrf.mxu1 }
 0x13b   : > { %v1620_v41 = vpop.f32.mrf.mxu0 }
 0x13c   : > { %v1500_v42 = vpack.c.bf16 %v1051_v38, %v1050_v37  ;;  %v1621_v43 = vadd.f32 %v1620_v41, %v1619_v36  ;;  %v1730_v44 = vpop.f32.mrf.mxu1  ;;  %v988_v46 = vadd.f32 %v987_v31, %v835_v39 }
 0x13d   : > { %v1622_v45 = vpop.f32.mrf.mxu0 }
 0x13e   : > { %1539 = vst [vmem:[%s2104_s27 + $0x40] sm:$0xff] %v1500_v42   ;;  %v838_v47 = vadd.f32 %v1621_v43, %v2095_v9  ;;  %v995_v48 = vpop.f32.mrf.mxu1  ;;  %v1052_v54 = vmax.f32 %v988_v46, 0.0 }
 0x13f   : > { %v1623_v49 = vpop.f32.mrf.mxu0 }
 0x140   : > { %v991_v50 = vadd.f32 %v990_v40, %v838_v47  ;;  %v1624_v51 = vadd.f32 %v1623_v49, %v1622_v45  ;;  %v1733_v52 = vpop.f32.mrf.mxu1 }
 0x141   : > { %v1625_v53 = vpop.f32.mrf.mxu0 }
 0x142   : > { %v1053_v55 = vmax.f32 %v991_v50, 0.0  ;;  %v843_v56 = vadd.f32 %v1624_v51, %v2095_v9  ;;  %v998_v57 = vpop.f32.mrf.mxu1 }
 0x143   : > { %v1626_v58 = vpop.f32.mrf.mxu0 }
 0x144   : > { %v1505_v59 = vpack.c.bf16 %v1053_v55, %v1052_v54  ;;  %v1627_v60 = vadd.f32 %v1626_v58, %v1625_v53  ;;  %v1734_v61 = vpop.f32.mrf.mxu1  ;;  %v996_v63 = vadd.f32 %v995_v48, %v843_v56 }
 0x145   : > { %v1628_v62 = vpop.f32.mrf.mxu0 }
 0x146   : > { %1540 = vst [vmem:[%s2104_s27 + $0x48] sm:$0xff] %v1505_v59   ;;  %v846_v0 = vadd.f32 %v1627_v60, %v2095_v9  ;;  %v1003_v2 = vpop.f32.mrf.mxu1  ;;  %v1054_v8 = vmax.f32 %v996_v63, 0.0 }
 0x147   : > { %v1629_v3 = vpop.f32.mrf.mxu0 }
 0x148   : > { %v999_v4 = vadd.f32 %v998_v57, %v846_v0  ;;  %v1630_v5 = vadd.f32 %v1629_v3, %v1628_v62  ;;  %v1737_v6 = vpop.f32.mrf.mxu1 }
 0x149   : > { %v1631_v7 = vpop.f32.mrf.mxu0 }
 0x14a   : > { %v1055_v10 = vmax.f32 %v999_v4, 0.0  ;;  %v851_v11 = vadd.f32 %v1630_v5, %v2095_v9  ;;  %v1006_v12 = vpop.f32.mrf.mxu1 }
 0x14b   : > { %v1632_v13 = vpop.f32.mrf.mxu0 }
 0x14c   : > { %v1510_v14 = vpack.c.bf16 %v1055_v10, %v1054_v8  ;;  %v1633_v15 = vadd.f32 %v1632_v13, %v1631_v7  ;;  %v1738_v1 = vpop.f32.mrf.mxu1  ;;  %v1004_v17 = vadd.f32 %v1003_v2, %v851_v11 }
 0x14d   : > { %v1634_v16 = vpop.f32.mrf.mxu0 }
 0x14e   : > { %1541 = vst [vmem:[%s2104_s27 + $0x50] sm:$0xff] %v1510_v14   ;;  %v854_v18 = vadd.f32 %v1633_v15, %v2095_v9  ;;  %v1011_v19 = vpop.f32.mrf.mxu1  ;;  %v1056_v25 = vmax.f32 %v1004_v17, 0.0 }
 0x14f   : > { %v1635_v20 = vpop.f32.mrf.mxu0 }
 0x150   : > { %v1007_v21 = vadd.f32 %v1006_v12, %v854_v18  ;;  %v1636_v22 = vadd.f32 %v1635_v20, %v1634_v16  ;;  %v1741_v23 = vpop.f32.mrf.mxu1 }
 0x151   : > { %v1637_v24 = vpop.f32.mrf.mxu0 }
 0x152   : > { %v1057_v26 = vmax.f32 %v1007_v21, 0.0  ;;  %v859_v27 = vadd.f32 %v1636_v22, %v2095_v9  ;;  %v1014_v28 = vpop.f32.mrf.mxu1 }
 0x153   : > { %v1638_v29 = vpop.f32.mrf.mxu0 }
 0x154   : > { %v1515_v30 = vpack.c.bf16 %v1057_v26, %v1056_v25  ;;  %v1639_v31 = vadd.f32 %v1638_v29, %v1637_v24  ;;  %v1742_v32 = vpop.f32.mrf.mxu1  ;;  %v1012_v34 = vadd.f32 %v1011_v19, %v859_v27 }
 0x155   : > { %v1640_v33 = vpop.f32.mrf.mxu0 }
 0x156   : > { %1542 = vst [vmem:[%s2104_s27 + $0x58] sm:$0xff] %v1515_v30   ;;  %v862_v35 = vadd.f32 %v1639_v31, %v2095_v9  ;;  %v1019_v36 = vpop.f32.mrf.mxu1  ;;  %v1058_v42 = vmax.f32 %v1012_v34, 0.0 }
 0x157   : > { %v1641_v37 = vpop.f32.mrf.mxu0 }
 0x158   : > { %v1015_v38 = vadd.f32 %v1014_v28, %v862_v35  ;;  %v1642_v39 = vadd.f32 %v1641_v37, %v1640_v33  ;;  %v1745_v40 = vpop.f32.mrf.mxu1 }
 0x159   : > { %v1643_v41 = vpop.f32.mrf.mxu0 }
 0x15a   : > { %v1059_v43 = vmax.f32 %v1015_v38, 0.0  ;;  %v867_v44 = vadd.f32 %v1642_v39, %v2095_v9  ;;  %v1022_v45 = vpop.f32.mrf.mxu1 }
 0x15b   : > { %v1644_v46 = vpop.f32.mrf.mxu0 }
 0x15c   : > { %v1520_v47 = vpack.c.bf16 %v1059_v43, %v1058_v42  ;;  %v1645_v48 = vadd.f32 %v1644_v46, %v1643_v41  ;;  %v1746_v49 = vpop.f32.mrf.mxu1  ;;  %v1020_v51 = vadd.f32 %v1019_v36, %v867_v44 }
 0x15d   : > { %v1646_v50 = vpop.f32.mrf.mxu0 }
 0x15e   : > { %1543 = vst [vmem:[%s2104_s27 + $0x60] sm:$0xff] %v1520_v47   ;;  %v870_v52 = vadd.f32 %v1645_v48, %v2095_v9  ;;  %v1027_v53 = vpop.f32.mrf.mxu1  ;;  %v1060_v59 = vmax.f32 %v1020_v51, 0.0 }
 0x15f   : > { %v1647_v54 = vpop.f32.mrf.mxu0 }
 0x160   : > { %v1023_v55 = vadd.f32 %v1022_v45, %v870_v52  ;;  %v1648_v56 = vadd.f32 %v1647_v54, %v1646_v50  ;;  %v1749_v57 = vpop.f32.mrf.mxu1 }
 0x161   : > { %v1649_v58 = vpop.f32.mrf.mxu0 }
 0x162   : > { %v1061_v60 = vmax.f32 %v1023_v55, 0.0  ;;  %v875_v61 = vadd.f32 %v1648_v56, %v2095_v9  ;;  %v1030_v62 = vpop.f32.mrf.mxu1 }
 0x163   : > { %v1650_v63 = vpop.f32.mrf.mxu0 }
 0x164   : > { %v1525_v0 = vpack.c.bf16 %v1061_v60, %v1060_v59  ;;  %v1651_v2 = vadd.f32 %v1650_v63, %v1649_v58  ;;  %v1750_v3 = vpop.f32.mrf.mxu1  ;;  %v1028_v4 = vadd.f32 %v1027_v53, %v875_v61 }
 0x166   : > { %1544 = vst [vmem:[%s2104_s27 + $0x68] sm:$0xff] %v1525_v0   ;;  %v878_v5 = vadd.f32 %v1651_v2, %v2095_v9  ;;  %v1062_v7 = vmax.f32 %v1028_v4, 0.0 }
 0x168   : > { %v1031_v6 = vadd.f32 %v1030_v62, %v878_v5 }
 0x16a   : > { %v1063_v8 = vmax.f32 %v1031_v6, 0.0 }
 0x16c   : > { %v1530_v10 = vpack.c.bf16 %v1063_v8, %v1062_v7 }
 0x16e   : > { %1545 = vst [vmem:[%s2104_s27 + $0x70] sm:$0xff] %v1530_v10  }
 0x16f PF: > { %s13_s14 = sadd.s32 1, %s1884_s14   ;;  %s2161_s12 = smov %s1880_s13 }
 0x170   : > { %p10_p5 = scmp.ge.s32.totalorder %s13_s14, 4   ;;  %s2162_s13 = smov %s2164_s15 }
 0x172   :  { %12 = sbr.rel (!%p10_p5) target bundleno = 2 (0x2), region = 68 }

// kernel: fnet_vlcs_forward.4
= control target key start
LH: loop header
LB: loop body
LE: loop exit
PB: predicated region body
PF: predicated region fallthrough
CT: control target
= control target key end

     0   :  { %vm5609_vm0 = vmmov 0   ;;  %s7165_s1 = inlined_call_operand.vmem [shape: bf16[3200,128], index: 1, kind: input, shape index: {}]   ;;  %s7166_s0 = inlined_call_operand.vmem [shape: bf16[112,3200], index: 0, kind: input, shape index: {}]   ;;  %s7167_s2 = inlined_call_operand.vmem [shape: f32[1,128], index: 2, kind: input, shape index: {}]   ;;  %s7168_s3 = inlined_call_operand.vmem [shape: bf16[112,128], index: 3, kind: output, shape index: {}]  }
   0x1   :  { %v5149_v0 = vld [vmem:[%s7165_s1 + $0x78] sm:$0xff]   ;;  %v5151_v2 = vld [vmem:[%s7165_s1 + $0x70] sm:$0xff]   ;;  %v5153_v4 = vld [vmem:[%s7165_s1 + $0x68] sm:$0xff]  }
   0x2   :  { %v5150_v1 = vld [vmem:[%s7165_s1 + $0x38] sm:$0xff]   ;;  %5131 = vmatprep.subr.bf16.mxu1 %v5149_v0  ;;  %4376 = vmatprep.subr.bf16.mxu0 %v5149_v0  ;;  %v5152_v3 = vld [vmem:[%s7165_s1 + $0x30] sm:$0xff]   ;;  %v5154_v5 = vld [vmem:[%s7165_s1 + $0x28] sm:$0xff]  }
   0x3   :  { %5139 = vmatpush3.bf16.msra.mxu1 %v5150_v1  ;;  %4377 = vmatpush3.bf16.msra.mxu0 %v5150_v1  ;;  %v5155_v6 = vld [vmem:[%s7165_s1 + $0x60] sm:$0xff]   ;;  %v5157_v8 = vld [vmem:[%s7165_s1 + $0x58] sm:$0xff]   ;;  %v5159_v10 = vld [vmem:[%s7165_s1 + $0x50] sm:$0xff]  }
   0x4   :  { %5132 = vmatprep.subr.bf16.mxu1 %v5151_v2  ;;  %4378 = vmatprep.subr.bf16.mxu0 %v5151_v2  ;;  %v5156_v7 = vld [vmem:[%s7165_s1 + $0x20] sm:$0xff]   ;;  %v5158_v9 = vld [vmem:[%s7165_s1 + $0x18] sm:$0xff]   ;;  %v5160_v13 = vld [vmem:[%s7165_s1 + $0x10] sm:$0xff]  }
   0x5   :  { %v5167_v11 = vld [vmem:[%s7166_s0 + $0x324] ss:$100 sps:$4 sm:$0xff]   ;;  %v5171_v20 = vld [vmem:[%s7165_s1 + $0xf8] sm:$0xff]   ;;  %v5175_v24 = vld [vmem:[%s7165_s1 + $0xf0] sm:$0xff]  }
   0x6   :  { %v5170_v12 = vld [vmem:[%s7166_s0 + $0x4] ss:$100 sps:$4 sm:$0xff]   ;;  %2750 = vmatprep.mubr.bf16.mxu1 %v5167_v11  ;;  %v5173_v21 = vld [vmem:[%s7165_s1 + $0x178] sm:$0xff]   ;;  %v5177_v25 = vld [vmem:[%s7165_s1 + $0x170] sm:$0xff]  }
   0x7   :  { %5140 = vmatpush3.bf16.msra.mxu1 %v5152_v3  ;;  %4379 = vmatpush3.bf16.msra.mxu0 %v5152_v3  ;;  %v5161_v14 = vld [vmem:[%s7165_s1 + $0x48] sm:$0xff]   ;;  %v5163_v16 = vld [vmem:[%s7165_s1 + $0x40] sm:$0xff]   ;;  %v5172_v22 = vld [vmem:[%s7165_s1 + $0xb8] sm:$0xff]  }
   0x8   :  { %5133 = vmatprep.subr.bf16.mxu1 %v5153_v4  ;;  %4380 = vmatprep.subr.bf16.mxu0 %v5153_v4  ;;  %v5162_v15 = vld [vmem:[%s7165_s1 + $0x8] sm:$0xff]   ;;  %v5164_v17 = vld [vmem:[%s7165_s1] sm:$0xff]   ;;  %v5174_v23 = vld [vmem:[%s7165_s1 + $0x138] sm:$0xff]  }
   0x9   :  { %2718 = vmatprep.mubr.bf16.mxu0 %v5170_v12  ;;  %v5165_v18 = vld [vmem:[%s7166_s0 + $0x320] ss:$100 sps:$4 sm:$0xff]   ;;  %v5179_v26 = vld [vmem:[%s7166_s0 + $0xcc] ss:$100 sps:$4 sm:$0xff]   ;;  %v5193_v39 = vld [vmem:[%s7166_s0 + $0x194] ss:$100 sps:$4 sm:$0xff]  }
   0xa   :  { %v5168_v19 = vld [vmem:[%s7166_s0] ss:$100 sps:$4 sm:$0xff]   ;;  %v5176_v27 = vld [vmem:[%s7165_s1 + $0xb0] sm:$0xff]   ;;  %v5181_v30 = vld [vmem:[%s7165_s1 + $0xe8] sm:$0xff]  }
   0xb   :  { %5141 = vmatpush3.bf16.msra.mxu1 %v5154_v5  ;;  %4381 = vmatpush3.bf16.msra.mxu0 %v5154_v5  ;;  %v5185_v28 = vld [vmem:[%s7166_s0 + $0x3ec] ss:$100 sps:$4 sm:$0xff]   ;;  %v5189_v36 = vld [vmem:[%s7165_s1 + $0xe0] sm:$0xff]   ;;  %v5199_v40 = vld [vmem:[%s7166_s0 + $0x4b4] ss:$100 sps:$4 sm:$0xff]  }
   0xc   :  { %5134 = vmatprep.subr.bf16.mxu1 %v5155_v6  ;;  %4382 = vmatprep.subr.bf16.mxu0 %v5155_v6  ;;  %v5178_v29 = vld [vmem:[%s7165_s1 + $0x130] sm:$0xff]   ;;  %v5182_v31 = vld [vmem:[%s7166_s0 + $0xc8] ss:$100 sps:$4 sm:$0xff]   ;;  %v5191_v37 = vld [vmem:[%s7165_s1 + $0x160] sm:$0xff]  }
   0xd   :  { %v5184_v32 = vld [vmem:[%s7165_s1 + $0x168] sm:$0xff]   ;;  %v5190_v38 = vld [vmem:[%s7165_s1 + $0xa0] sm:$0xff]   ;;  %v5195_v42 = vld [vmem:[%s7165_s1 + $0xd8] sm:$0xff]  }
   0xe   :  { %v5183_v33 = vld [vmem:[%s7165_s1 + $0xa8] sm:$0xff]   ;;  %v5192_v41 = vld [vmem:[%s7165_s1 + $0x120] sm:$0xff]   ;;  %v5196_v43 = vld [vmem:[%s7166_s0 + $0x190] ss:$100 sps:$4 sm:$0xff]  }
   0xf   :  { %5142 = vmatpush3.bf16.msra.mxu1 %v5156_v7  ;;  %4383 = vmatpush3.bf16.msra.mxu0 %v5156_v7  ;;  %v5188_v34 = vld [vmem:[%s7166_s0 + $0x3e8] ss:$100 sps:$4 sm:$0xff]   ;;  %v5198_v44 = vld [vmem:[%s7165_s1 + $0x158] sm:$0xff]   ;;  %v5202_v47 = vld [vmem:[%s7166_s0 + $0x4b0] ss:$100 sps:$4 sm:$0xff]  }
  0x10   :  { %5135 = vmatprep.subr.bf16.mxu1 %v5157_v8  ;;  %4384 = vmatprep.subr.bf16.mxu0 %v5157_v8  ;;  %v5187_v35 = vld [vmem:[%s7165_s1 + $0x128] sm:$0xff]   ;;  %v5197_v45 = vld [vmem:[%s7165_s1 + $0x98] sm:$0xff]   ;;  %v5203_v48 = vld [vmem:[%s7165_s1 + $0xd0] sm:$0xff]  }
  0x11   :  { %v5201_v46 = vld [vmem:[%s7165_s1 + $0x118] sm:$0xff]   ;;  %v5205_v49 = vld [vmem:[%s7165_s1 + $0x150] sm:$0xff]   ;;  %v5209_v53 = vld [vmem:[%s7165_s1 + $0xc8] sm:$0xff]  }
  0x12   :  { %v5204_v50 = vld [vmem:[%s7165_s1 + $0x90] sm:$0xff]   ;;  %v5207_v51 = vld [vmem:[%s7166_s0 + $0x25c] ss:$100 sps:$4 sm:$0xff]   ;;  %v5212_v55 = vld [vmem:[%s7165_s1 + $0x148] sm:$0xff]  }
  0x13   :  { %5143 = vmatpush3.bf16.msra.mxu1 %v5158_v9  ;;  %4385 = vmatpush3.bf16.msra.mxu0 %v5158_v9  ;;  %v5206_v52 = vld [vmem:[%s7165_s1 + $0x110] sm:$0xff]   ;;  %v5210_v54 = vld [vmem:[%s7166_s0 + $0x258] ss:$100 sps:$4 sm:$0xff]   ;;  %v5211_v56 = vld [vmem:[%s7165_s1 + $0x88] sm:$0xff]  }
  0x14   :  { %5136 = vmatprep.subr.bf16.mxu1 %v5159_v10  ;;  %4386 = vmatprep.subr.bf16.mxu0 %v5159_v10  ;;  %v5213_v57 = vld [vmem:[%s7165_s1 + $0x108] sm:$0xff]   ;;  %v5214_v58 = vld [vmem:[%s7165_s1 + $0xc0] sm:$0xff]   ;;  %v5223_v63 = vld [vmem:[%s7166_s0 + $0x14] ss:$100 sps:$4 sm:$0xff]  }
  0x15   :  { %v5216_v59 = vld [vmem:[%s7165_s1 + $0x140] sm:$0xff]   ;;  %v5220_v61 = vld [vmem:[%s7166_s0 + $0xc] ss:$100 sps:$4 sm:$0xff]   ;;  %v5224_v2 = vld [vmem:[%s7165_s1 + $0x1f8] sm:$0xff]  }
  0x16   :  { %v5215_v60 = vld [vmem:[%s7165_s1 + $0x80] sm:$0xff]   ;;  %v5218_v0 = vld [vmem:[%s7166_s0 + $0x8] ss:$100 sps:$4 sm:$0xff]   ;;  %v5221_v1 = vld [vmem:[%s7166_s0 + $0x10] ss:$100 sps:$4 sm:$0xff]  }
  0x17   :  { %5144 = vmatpush3.bf16.msra.mxu1 %v5160_v13  ;;  %4387 = vmatpush3.bf16.msra.mxu0 %v5160_v13  ;;  %v5217_v62 = vld [vmem:[%s7165_s1 + $0x100] sm:$0xff]   ;;  %v5225_v3 = vld [vmem:[%s7165_s1 + $0x1b8] sm:$0xff]   ;;  %v5229_v6 = vld [vmem:[%s7165_s1 + $0x1f0] sm:$0xff]  }
  0x18   :  { %5137 = vmatprep.subr.bf16.mxu1 %v5161_v14  ;;  %4388 = vmatprep.subr.bf16.mxu0 %v5161_v14  ;;  %v5226_v4 = vld [vmem:[%s7165_s1 + $0x278] sm:$0xff]   ;;  %v5231_v9 = vld [vmem:[%s7166_s0 + $0xd0] ss:$100 sps:$4 sm:$0xff]   ;;  %v5237_v13 = vld [vmem:[%s7165_s1 + $0x1e8] sm:$0xff]  }
  0x19   :  { %v5227_v5 = vld [vmem:[%s7166_s0 + $0xd4] ss:$100 sps:$4 sm:$0xff]   ;;  %v5232_v8 = vld [vmem:[%s7166_s0 + $0xdc] ss:$100 sps:$4 sm:$0xff]  }
  0x1a   :  { %v5230_v7 = vld [vmem:[%s7165_s1 + $0x238] sm:$0xff]   ;;  %v5234_v10 = vld [vmem:[%s7165_s1 + $0x1b0] sm:$0xff]  }
  0x1b   :  { %5145 = vmatpush3.bf16.msra.mxu1 %v5162_v15  ;;  %4389 = vmatpush3.bf16.msra.mxu0 %v5162_v15  ;;  %v5235_v11 = vld [vmem:[%s7166_s0 + $0xd8] ss:$100 sps:$4 sm:$0xff]   ;;  %v5236_v12 = vld [vmem:[%s7165_s1 + $0x270] sm:$0xff]  }
  0x1c   :  { %5138 = vmatprep.subr.bf16.mxu1 %v5163_v16  ;;  %4390 = vmatprep.subr.bf16.mxu0 %v5163_v16  ;;  %v5238_v14 = vld [vmem:[%s7165_s1 + $0x230] sm:$0xff]   ;;  %v5239_v15 = vld [vmem:[%s7166_s0 + $0x19c] ss:$100 sps:$4 sm:$0xff]   ;;  %v5241_v16 = vld [vmem:[%s7165_s1 + $0x1a8] sm:$0xff]  }
  0x1f   :  { %5146 = vmatpush3.bf16.msra.mxu1 %v5164_v17  ;;  %4391 = vmatpush3.bf16.msra.mxu0 %v5164_v17  ;;  %v5243_v17 = vld [vmem:[%s7166_s0 + $0x1a4] ss:$100 sps:$4 sm:$0xff]  }
  0x20   :  { %4434 = vmatprep.subr.bf16.mxu1 %v5171_v20  ;;  %4492 = vmatprep.subr.bf16.mxu0 %v5173_v21  ;;  %v5246_v20 = vld [vmem:[%s7165_s1 + $0x268] sm:$0xff]   ;;  %v5247_v21 = vld [vmem:[%s7165_s1 + $0x1e0] sm:$0xff]  }
  0x22   :  { %2751 = vmatmul.mubr.bf16.vlgmr.msra.gmra.mxu1 %v5165_v18  ;;  %2719 = vmatmul.mubr.bf16.vlgmr.msra.gmra.mxu0 %v5168_v19  ;;  %v5242_v18 = vld [vmem:[%s7166_s0 + $0x198] ss:$100 sps:$4 sm:$0xff]   ;;  %v5245_v19 = vld [vmem:[%s7166_s0 + $0x1a0] ss:$100 sps:$4 sm:$0xff]  }
  0x23   :  { %4435 = vmatpush3.bf16.msra.mxu1 %v5172_v22  ;;  %4493 = vmatpush3.bf16.msra.mxu0 %v5174_v23  ;;  %v5248_v22 = vld [vmem:[%s7165_s1 + $0x228] sm:$0xff]   ;;  %v5249_v23 = vld [vmem:[%s7165_s1 + $0x1a0] sm:$0xff]  }
  0x24   :  { %4436 = vmatprep.subr.bf16.mxu1 %v5175_v24  ;;  %4494 = vmatprep.subr.bf16.mxu0 %v5177_v25  ;;  %v5250_v24 = vld [vmem:[%s7166_s0 + $0x264] ss:$100 sps:$4 sm:$0xff]   ;;  %v5253_v25 = vld [vmem:[%s7166_s0 + $0x26c] ss:$100 sps:$4 sm:$0xff]  }
  0x25   :  { %2726 = vmatprep.mubr.bf16.mxu0 %v5179_v26  ;;  %2758 = vmatprep.mubr.bf16.mxu1 %v5185_v28  ;;  %v5256_v26 = vld [vmem:[%s7165_s1 + $0x260] sm:$0xff]  }
  0x26   :  { %v5252_v28 = vld [vmem:[%s7166_s0 + $0x260] ss:$100 sps:$4 sm:$0xff]  }
  0x27   :  { %4437 = vmatpush3.bf16.msra.mxu1 %v5176_v27  ;;  %4495 = vmatpush3.bf16.msra.mxu0 %v5178_v29  ;;  %v5257_v27 = vld [vmem:[%s7165_s1 + $0x1d8] sm:$0xff]   ;;  %v5258_v29 = vld [vmem:[%s7165_s1 + $0x220] sm:$0xff]  }
  0x28   :  { %4438 = vmatprep.subr.bf16.mxu1 %v5181_v30  ;;  %4496 = vmatprep.subr.bf16.mxu0 %v5184_v32  ;;  %v5259_v30 = vld [vmem:[%s7165_s1 + $0x198] sm:$0xff]   ;;  %v5260_v32 = vld [vmem:[%s7166_s0 + $0x32c] ss:$100 sps:$4 sm:$0xff]  }
  0x2a   :  { %2727 = vmatmul.mubr.bf16.gmra.mxu0 %v5182_v31  ;;  %2759 = vmatmul.mubr.bf16.gmra.mxu1 %v5188_v34  ;;  %v5255_v31 = vld [vmem:[%s7166_s0 + $0x268] ss:$100 sps:$4 sm:$0xff]   ;;  %v5266_v34 = vld [vmem:[%s7165_s1 + $0x258] sm:$0xff]  }
  0x2b   :  { %4439 = vmatpush3.bf16.msra.mxu1 %v5183_v33  ;;  %4497 = vmatpush3.bf16.msra.mxu0 %v5187_v35  ;;  %v5263_v33 = vld [vmem:[%s7166_s0 + $0x334] ss:$100 sps:$4 sm:$0xff]  }
  0x2c   :  { %4440 = vmatprep.subr.bf16.mxu1 %v5189_v36  ;;  %4498 = vmatprep.subr.bf16.mxu0 %v5191_v37  ;;  %v5267_v35 = vld [vmem:[%s7165_s1 + $0x1d0] sm:$0xff]   ;;  %v5268_v36 = vld [vmem:[%s7165_s1 + $0x218] sm:$0xff]  }
  0x2d   :  { %2734 = vmatprep.mubr.bf16.mxu0 %v5193_v39  ;;  %2766 = vmatprep.mubr.bf16.mxu1 %v5199_v40  ;;  %v5269_v37 = vld [vmem:[%s7165_s1 + $0x190] sm:$0xff]  }
  0x2e   :  { %v5265_v39 = vld [vmem:[%s7166_s0 + $0x330] ss:$100 sps:$4 sm:$0xff]  }
  0x2f   :  { %4441 = vmatpush3.bf16.msra.mxu1 %v5190_v38  ;;  %4499 = vmatpush3.bf16.msra.mxu0 %v5192_v41  ;;  %v5262_v38 = vld [vmem:[%s7166_s0 + $0x328] ss:$100 sps:$4 sm:$0xff]   ;;  %v5270_v40 = vld [vmem:[%s7166_s0 + $0x3f4] ss:$100 sps:$4 sm:$0xff]   ;;  %v5273_v41 = vld [vmem:[%s7166_s0 + $0x3fc] ss:$100 sps:$4 sm:$0xff]  }
  0x30   :  { %4442 = vmatprep.subr.bf16.mxu1 %v5195_v42  ;;  %4500 = vmatprep.subr.bf16.mxu0 %v5198_v44  ;;  %v5276_v42 = vld [vmem:[%s7165_s1 + $0x250] sm:$0xff]  }
  0x31   :  { %v5278_v44 = vld [vmem:[%s7165_s1 + $0x210] sm:$0xff]  }
  0x32   :  { %2735 = vmatmul.mubr.bf16.gmra.mxu0 %v5196_v43  ;;  %2767 = vmatmul.mubr.bf16.gmra.mxu1 %v5202_v47  ;;  %v5277_v43 = vld [vmem:[%s7165_s1 + $0x1c8] sm:$0xff]   ;;  %v5275_v47 = vld [vmem:[%s7166_s0 + $0x3f8] ss:$100 sps:$4 sm:$0xff]  }
  0x33   :  { %4443 = vmatpush3.bf16.msra.mxu1 %v5197_v45  ;;  %4501 = vmatpush3.bf16.msra.mxu0 %v5201_v46  ;;  %v5279_v45 = vld [vmem:[%s7165_s1 + $0x188] sm:$0xff]   ;;  %v5272_v46 = vld [vmem:[%s7166_s0 + $0x3f0] ss:$100 sps:$4 sm:$0xff]  }
  0x34   :  { %4444 = vmatprep.subr.bf16.mxu1 %v5203_v48  ;;  %4502 = vmatprep.subr.bf16.mxu0 %v5205_v49  ;;  %v5280_v48 = vld [vmem:[%s7166_s0 + $0x4bc] ss:$100 sps:$4 sm:$0xff]   ;;  %v5283_v49 = vld [vmem:[%s7166_s0 + $0x4c4] ss:$100 sps:$4 sm:$0xff]  }
  0x35   :  { %2742 = vmatprep.mubr.bf16.mxu0 %v5207_v51  ;;  %2807 = vmatprep.mubr.bf16.mxu1 %v5220_v61  ;;  %v5287_v51 = vld [vmem:[%s7165_s1 + $0x1c0] sm:$0xff]   ;;  %v5300_v61 = vld [vmem:[%s7165_s1 + $0x378] sm:$0xff]  }
  0x37   :  { %4445 = vmatpush3.bf16.msra.mxu1 %v5204_v50  ;;  %4503 = vmatpush3.bf16.msra.mxu0 %v5206_v52  ;;  %v5285_v50 = vld [vmem:[%s7165_s1 + $0x248] sm:$0xff]  }
  0x38   :  { %4446 = vmatprep.subr.bf16.mxu1 %v5209_v53  ;;  %4504 = vmatprep.subr.bf16.mxu0 %v5212_v55  ;;  %v5288_v52 = vld [vmem:[%s7165_s1 + $0x208] sm:$0xff]   ;;  %v5289_v53 = vld [vmem:[%s7165_s1 + $0x180] sm:$0xff]   ;;  %v5282_v55 = vld [vmem:[%s7166_s0 + $0x4b8] ss:$100 sps:$4 sm:$0xff]  }
  0x3a   :  { %2743 = vmatmul.mubr.bf16.gmra.mxu0 %v5210_v54  ;;  %v5290_v54 = vld [vmem:[%s7165_s1 + $0x240] sm:$0xff]  }
  0x3b   :  { %4447 = vmatpush3.bf16.msra.mxu1 %v5211_v56  ;;  %4505 = vmatpush3.bf16.msra.mxu0 %v5213_v57  ;;  %v5291_v56 = vld [vmem:[%s7165_s1 + $0x200] sm:$0xff]  }
  0x3c   :  { %4448 = vmatprep.subr.bf16.mxu1 %v5214_v58  ;;  %4506 = vmatprep.subr.bf16.mxu0 %v5216_v59  ;;  %v5286_v57 = vld [vmem:[%s7166_s0 + $0x4c0] ss:$100 sps:$4 sm:$0xff]  }
  0x3d   :  { %2896 = vmatprep.mubr.bf16.mxu0 %v5223_v63  ;;  %v5294_v58 = vld [vmem:[%s7166_s0 + $0x1c] ss:$100 sps:$4 sm:$0xff]   ;;  %v5297_v59 = vld [vmem:[%s7166_s0 + $0x24] ss:$100 sps:$4 sm:$0xff]  }
  0x3e   :  { %v5295_v63 = vld [vmem:[%s7166_s0 + $0x20] ss:$100 sps:$4 sm:$0xff]  }
  0x3f   :  { %4449 = vmatpush3.bf16.msra.mxu1 %v5215_v60  ;;  %4507 = vmatpush3.bf16.msra.mxu0 %v5217_v62  ;;  %v5298_v60 = vld [vmem:[%s7165_s1 + $0x2f8] sm:$0xff]  }
  0x40   :  { %4550 = vmatprep.subr.bf16.mxu1 %v5224_v2  ;;  %4608 = vmatprep.subr.bf16.mxu0 %v5226_v4  ;;  %v5292_v62 = vld [vmem:[%s7166_s0 + $0x18] ss:$100 sps:$4 sm:$0xff]   ;;  %v5303_v2 = vld [vmem:[%s7165_s1 + $0x2f0] sm:$0xff]  }
  0x41   :  { %v5306_v4 = vld [vmem:[%s7166_s0 + $0xec] ss:$100 sps:$4 sm:$0xff]  }
  0x42   :  { %2808 = vmatmul.mubr.bf16.vlgmr.msra.gmra.mxu1 %v5218_v0  ;;  %2897 = vmatmul.mubr.bf16.vlgmr.msra.gmra.mxu0 %v5221_v1  ;;  %v5299_v0 = vld [vmem:[%s7165_s1 + $0x2b8] sm:$0xff]   ;;  %v5301_v1 = vld [vmem:[%s7166_s0 + $0xe4] ss:$100 sps:$4 sm:$0xff]  }
  0x43   :  { %4551 = vmatpush3.bf16.msra.mxu1 %v5225_v3  ;;  %2815 = vmatprep.mubr.bf16.mxu1 %v5227_v5  ;;  %v5304_v3 = vld [vmem:[%s7165_s1 + $0x338] sm:$0xff]   ;;  %v5310_v5 = vld [vmem:[%s7165_s1 + $0x370] sm:$0xff]  }
  0x44   :  { %4552 = vmatprep.subr.bf16.mxu1 %v5229_v6  ;;  %4609 = vmatpush3.bf16.msra.mxu0 %v5230_v7  ;;  %v5308_v6 = vld [vmem:[%s7165_s1 + $0x2b0] sm:$0xff]   ;;  %v5305_v7 = vld [vmem:[%s7166_s0 + $0xe0] ss:$100 sps:$4 sm:$0xff]  }
  0x45   :  { %2904 = vmatprep.mubr.bf16.mxu0 %v5232_v8  ;;  %4610 = vmatprep.subr.bf16.mxu0 %v5236_v12  ;;  %v5309_v8 = vld [vmem:[%s7166_s0 + $0xe8] ss:$100 sps:$4 sm:$0xff]  }
  0x46   :  { %v5315_v12 = vld [vmem:[%s7165_s1 + $0x2a8] sm:$0xff]  }
  0x47   :  { %4553 = vmatpush3.bf16.msra.mxu1 %v5234_v10  ;;  %v5312_v10 = vld [vmem:[%s7165_s1 + $0x330] sm:$0xff]  }
  0x48   :  { %4554 = vmatprep.subr.bf16.mxu1 %v5237_v13  ;;  %4611 = vmatpush3.bf16.msra.mxu0 %v5238_v14  ;;  %v5320_v13 = vld [vmem:[%s7165_s1 + $0x368] sm:$0xff]   ;;  %v5317_v14 = vld [vmem:[%s7166_s0 + $0x1b4] ss:$100 sps:$4 sm:$0xff]  }
  0x49   :  { %4612 = vmatprep.subr.bf16.mxu0 %v5246_v20  ;;  %v5324_v20 = vld [vmem:[%s7166_s0 + $0x274] ss:$100 sps:$4 sm:$0xff]  }
  0x4a   :  { %2816 = vmatmul.mubr.bf16.gmra.mxu1 %v5231_v9  ;;  %2905 = vmatmul.mubr.bf16.gmra.mxu0 %v5235_v11  ;;  %v5311_v9 = vld [vmem:[%s7165_s1 + $0x2e8] sm:$0xff]  }
  0x4b   :  { %2823 = vmatprep.mubr.bf16.mxu1 %v5239_v15  ;;  %4555 = vmatpush3.bf16.msra.mxu1 %v5241_v16  ;;  %v5313_v11 = vld [vmem:[%s7166_s0 + $0x1ac] ss:$100 sps:$4 sm:$0xff]   ;;  %v5321_v15 = vld [vmem:[%s7165_s1 + $0x2e0] sm:$0xff]  }
  0x4c   :  { %2912 = vmatprep.mubr.bf16.mxu0 %v5243_v17  ;;  %4556 = vmatprep.subr.bf16.mxu1 %v5247_v21  ;;  %v5322_v16 = vld [vmem:[%s7165_s1 + $0x328] sm:$0xff]   ;;  %v5323_v17 = vld [vmem:[%s7165_s1 + $0x2a0] sm:$0xff]  }
  0x4d   :  { %4613 = vmatpush3.bf16.msra.mxu0 %v5248_v22  ;;  %v5327_v21 = vld [vmem:[%s7166_s0 + $0x27c] ss:$100 sps:$4 sm:$0xff]  }
  0x4e   :  { %4614 = vmatprep.subr.bf16.mxu0 %v5256_v26  ;;  %v5330_v22 = vld [vmem:[%s7165_s1 + $0x360] sm:$0xff]   ;;  %v5326_v26 = vld [vmem:[%s7166_s0 + $0x270] ss:$100 sps:$4 sm:$0xff]  }
  0x4f   :  { %4557 = vmatpush3.bf16.msra.mxu1 %v5249_v23  ;;  %v5331_v23 = vld [vmem:[%s7165_s1 + $0x2d8] sm:$0xff]  }
  0x50   :  { %4558 = vmatprep.subr.bf16.mxu1 %v5257_v27  ;;  %v5329_v27 = vld [vmem:[%s7166_s0 + $0x278] ss:$100 sps:$4 sm:$0xff]  }
  0x51   :  { %4615 = vmatpush3.bf16.msra.mxu0 %v5258_v29  ;;  %v5334_v29 = vld [vmem:[%s7166_s0 + $0x33c] ss:$100 sps:$4 sm:$0xff]  }
  0x52   :  { %2824 = vmatmul.mubr.bf16.gmra.mxu1 %v5242_v18  ;;  %2913 = vmatmul.mubr.bf16.gmra.mxu0 %v5245_v19  ;;  %v5316_v18 = vld [vmem:[%s7166_s0 + $0x1a8] ss:$100 sps:$4 sm:$0xff]   ;;  %v5319_v19 = vld [vmem:[%s7166_s0 + $0x1b0] ss:$100 sps:$4 sm:$0xff]  }
  0x53   :  { %2831 = vmatprep.mubr.bf16.mxu1 %v5250_v24  ;;  %2920 = vmatprep.mubr.bf16.mxu0 %v5253_v25  ;;  %v5332_v24 = vld [vmem:[%s7165_s1 + $0x320] sm:$0xff]   ;;  %v5333_v25 = vld [vmem:[%s7165_s1 + $0x298] sm:$0xff]  }
  0x54   :  { %4559 = vmatpush3.bf16.msra.mxu1 %v5259_v30  ;;  %4616 = vmatprep.subr.bf16.mxu0 %v5266_v34  ;;  %v5337_v30 = vld [vmem:[%s7166_s0 + $0x344] ss:$100 sps:$4 sm:$0xff]   ;;  %v5350_v34 = vld [vmem:[%s7165_s1 + $0x350] sm:$0xff]  }
  0x55   :  { %4560 = vmatprep.subr.bf16.mxu1 %v5267_v35  ;;  %4617 = vmatpush3.bf16.msra.mxu0 %v5268_v36  ;;  %v5351_v35 = vld [vmem:[%s7165_s1 + $0x2c8] sm:$0xff]   ;;  %v5336_v36 = vld [vmem:[%s7166_s0 + $0x338] ss:$100 sps:$4 sm:$0xff]  }
  0x56   :  { %4618 = vmatprep.subr.bf16.mxu0 %v5276_v42  ;;  %v5359_v42 = vld [vmem:[%s7165_s1 + $0x348] sm:$0xff]  }
  0x58   :  { %4561 = vmatpush3.bf16.msra.mxu1 %v5269_v37  ;;  %v5339_v37 = vld [vmem:[%s7166_s0 + $0x340] ss:$100 sps:$4 sm:$0xff]  }
  0x59   :  { %4562 = vmatprep.subr.bf16.mxu1 %v5277_v43  ;;  %4619 = vmatpush3.bf16.msra.mxu0 %v5278_v44  ;;  %v5361_v43 = vld [vmem:[%s7165_s1 + $0x2c0] sm:$0xff]   ;;  %v5362_v44 = vld [vmem:[%s7165_s1 + $0x308] sm:$0xff]  }
  0x5a   :  { %2832 = vmatmul.mubr.bf16.gmra.mxu1 %v5252_v28  ;;  %2921 = vmatmul.mubr.bf16.gmra.mxu0 %v5255_v31  ;;  %v5340_v28 = vld [vmem:[%s7165_s1 + $0x358] sm:$0xff]   ;;  %v5341_v31 = vld [vmem:[%s7165_s1 + $0x2d0] sm:$0xff]  }
  0x5b   :  { %2839 = vmatprep.mubr.bf16.mxu1 %v5260_v32  ;;  %2928 = vmatprep.mubr.bf16.mxu0 %v5263_v33  ;;  %v5342_v32 = vld [vmem:[%s7165_s1 + $0x318] sm:$0xff]   ;;  %v5343_v33 = vld [vmem:[%s7165_s1 + $0x290] sm:$0xff]  }
  0x5c   :  { %4563 = vmatpush3.bf16.msra.mxu1 %v5279_v45  ;;  %4620 = vmatprep.subr.bf16.mxu0 %v5285_v50  ;;  %v5346_v45 = vld [vmem:[%s7166_s0 + $0x400] ss:$100 sps:$4 sm:$0xff]   ;;  %v5354_v50 = vld [vmem:[%s7166_s0 + $0x4cc] ss:$100 sps:$4 sm:$0xff]  }
  0x5d   :  { %4564 = vmatprep.subr.bf16.mxu1 %v5287_v51  ;;  %4621 = vmatpush3.bf16.msra.mxu0 %v5288_v52  ;;  %v5357_v51 = vld [vmem:[%s7166_s0 + $0x4d4] ss:$100 sps:$4 sm:$0xff]  }
  0x5e   :  { %4622 = vmatprep.subr.bf16.mxu0 %v5290_v54  ;;  %v5372_v52 = vld [vmem:[%s7165_s1 + $0x3f8] sm:$0xff]   ;;  %v5356_v54 = vld [vmem:[%s7166_s0 + $0x4c8] ss:$100 sps:$4 sm:$0xff]  }
  0x60   :  { %4565 = vmatpush3.bf16.msra.mxu1 %v5289_v53  ;;  %v5374_v53 = vld [vmem:[%s7165_s1 + $0x478] sm:$0xff]  }
  0x61   :  { %4623 = vmatpush3.bf16.msra.mxu0 %v5291_v56  ;;  %4666 = vmatprep.subr.bf16.mxu1 %v5298_v60  ;;  %v5368_v56 = vld [vmem:[%s7166_s0 + $0x2c] ss:$100 sps:$4 sm:$0xff]   ;;  %v5373_v60 = vld [vmem:[%s7165_s1 + $0x3b8] sm:$0xff]  }
  0x62   :  { %2840 = vmatmul.mubr.bf16.gmra.mxu1 %v5262_v38  ;;  %2929 = vmatmul.mubr.bf16.gmra.mxu0 %v5265_v39  ;;  %v5352_v38 = vld [vmem:[%s7165_s1 + $0x310] sm:$0xff]   ;;  %v5353_v39 = vld [vmem:[%s7165_s1 + $0x288] sm:$0xff]  }
  0x63   :  { %2847 = vmatprep.mubr.bf16.mxu1 %v5270_v40  ;;  %2936 = vmatprep.mubr.bf16.mxu0 %v5273_v41  ;;  %v5344_v40 = vld [vmem:[%s7166_s0 + $0x404] ss:$100 sps:$4 sm:$0xff]   ;;  %v5347_v41 = vld [vmem:[%s7166_s0 + $0x40c] ss:$100 sps:$4 sm:$0xff]  }
  0x64   :  { %4724 = vmatprep.subr.bf16.mxu0 %v5300_v61  ;;  %v5375_v61 = vld [vmem:[%s7166_s0 + $0xf4] ss:$100 sps:$4 sm:$0xff]  }
  0x6a   :  { %2848 = vmatmul.mubr.bf16.gmra.mxu1 %v5272_v46  ;;  %2937 = vmatmul.mubr.bf16.gmra.mxu0 %v5275_v47  ;;  %v5349_v46 = vld [vmem:[%s7166_s0 + $0x408] ss:$100 sps:$4 sm:$0xff]   ;;  %v5363_v47 = vld [vmem:[%s7165_s1 + $0x280] sm:$0xff]  }
  0x6b   :  { %2855 = vmatprep.mubr.bf16.mxu1 %v5280_v48  ;;  %2944 = vmatprep.mubr.bf16.mxu0 %v5283_v49  ;;  %v5364_v48 = vld [vmem:[%s7165_s1 + $0x340] sm:$0xff]  }
  0x6c   :  { %v5365_v49 = vld [vmem:[%s7165_s1 + $0x300] sm:$0xff]  }
  0x72   :  { %2856 = vmatmul.mubr.bf16.gmra.mxu1 %v5282_v55  ;;  %2945 = vmatmul.mubr.bf16.gmra.mxu0 %v5286_v57  ;;  %v5360_v55 = vld [vmem:[%s7166_s0 + $0x4d0] ss:$100 sps:$4 sm:$0xff]  }
  0x73   :  { %2985 = vmatprep.mubr.bf16.mxu1 %v5294_v58  ;;  %3074 = vmatprep.mubr.bf16.mxu0 %v5297_v59  ;;  %v5371_v57 = vld [vmem:[%s7166_s0 + $0x34] ss:$100 sps:$4 sm:$0xff]   ;;  %v5366_v58 = vld [vmem:[%s7166_s0 + $0x28] ss:$100 sps:$4 sm:$0xff]  }
  0x74   :  { %v5369_v59 = vld [vmem:[%s7166_s0 + $0x30] ss:$100 sps:$4 sm:$0xff]  }
  0x7a   :  { %2986 = vmatmul.mubr.bf16.vlgmr.msra.gmra.mxu1 %v5292_v62  ;;  %3075 = vmatmul.mubr.bf16.vlgmr.msra.gmra.mxu0 %v5295_v63  ;;  %v5377_v62 = vld [vmem:[%s7165_s1 + $0x3f0] sm:$0xff]   ;;  %v5378_v63 = vld [vmem:[%s7165_s1 + $0x438] sm:$0xff]  }
  0x7b   :  { %4667 = vmatpush3.bf16.msra.mxu1 %v5299_v0  ;;  %2993 = vmatprep.mubr.bf16.mxu1 %v5301_v1  ;;  %v5380_v0 = vld [vmem:[%s7166_s0 + $0xfc] ss:$100 sps:$4 sm:$0xff]   ;;  %v5384_v1 = vld [vmem:[%s7165_s1 + $0x470] sm:$0xff]  }
  0x7c   :  { %4668 = vmatprep.subr.bf16.mxu1 %v5303_v2  ;;  %4725 = vmatpush3.bf16.msra.mxu0 %v5304_v3  ;;  %v5382_v2 = vld [vmem:[%s7165_s1 + $0x3b0] sm:$0xff]   ;;  %v5385_v3 = vld [vmem:[%s7165_s1 + $0x3e8] sm:$0xff]  }
  0x7d   :  { %3082 = vmatprep.mubr.bf16.mxu0 %v5306_v4  ;;  %4726 = vmatprep.subr.bf16.mxu0 %v5310_v5  ;;  %v5379_v4 = vld [vmem:[%s7166_s0 + $0xf0] ss:$100 sps:$4 sm:$0xff]   ;;  %v5383_v5 = vld [vmem:[%s7166_s0 + $0xf8] ss:$100 sps:$4 sm:$0xff]  }
  0x7f   :  { %4669 = vmatpush3.bf16.msra.mxu1 %v5308_v6  ;;  %v5386_v6 = vld [vmem:[%s7165_s1 + $0x430] sm:$0xff]  }
  0x80   :  { %4670 = vmatprep.subr.bf16.mxu1 %v5311_v9  ;;  %4727 = vmatpush3.bf16.msra.mxu0 %v5312_v10  ;;  %v5389_v9 = vld [vmem:[%s7165_s1 + $0x3a8] sm:$0xff]  }
  0x81   :  { %4728 = vmatprep.subr.bf16.mxu0 %v5320_v13  ;;  %v5391_v10 = vld [vmem:[%s7166_s0 + $0x1c4] ss:$100 sps:$4 sm:$0xff]  }
  0x82   :  { %2994 = vmatmul.mubr.bf16.gmra.mxu1 %v5305_v7  ;;  %3083 = vmatmul.mubr.bf16.gmra.mxu0 %v5309_v8  ;;  %v5387_v7 = vld [vmem:[%s7166_s0 + $0x1bc] ss:$100 sps:$4 sm:$0xff]   ;;  %v5394_v8 = vld [vmem:[%s7165_s1 + $0x468] sm:$0xff]  }
  0x83   :  { %3001 = vmatprep.mubr.bf16.mxu1 %v5313_v11  ;;  %4671 = vmatpush3.bf16.msra.mxu1 %v5315_v12  ;;  %v5395_v11 = vld [vmem:[%s7165_s1 + $0x3e0] sm:$0xff]   ;;  %v5396_v12 = vld [vmem:[%s7165_s1 + $0x428] sm:$0xff]  }
  0x84   :  { %3090 = vmatprep.mubr.bf16.mxu0 %v5317_v14  ;;  %4672 = vmatprep.subr.bf16.mxu1 %v5321_v15  ;;  %v5404_v13 = vld [vmem:[%s7165_s1 + $0x460] sm:$0xff]   ;;  %v5390_v15 = vld [vmem:[%s7166_s0 + $0x1b8] ss:$100 sps:$4 sm:$0xff]  }
  0x85   :  { %4729 = vmatpush3.bf16.msra.mxu0 %v5322_v16  ;;  %v5397_v14 = vld [vmem:[%s7165_s1 + $0x3a0] sm:$0xff]  }
  0x86   :  { %4730 = vmatprep.subr.bf16.mxu0 %v5330_v22  ;;  %v5393_v16 = vld [vmem:[%s7166_s0 + $0x1c0] ss:$100 sps:$4 sm:$0xff]   ;;  %v5414_v22 = vld [vmem:[%s7165_s1 + $0x458] sm:$0xff]  }
  0x87   :  { %4673 = vmatpush3.bf16.msra.mxu1 %v5323_v17  ;;  %v5405_v17 = vld [vmem:[%s7165_s1 + $0x3d8] sm:$0xff]  }
  0x88   :  { %4674 = vmatprep.subr.bf16.mxu1 %v5331_v23  ;;  %v5415_v23 = vld [vmem:[%s7165_s1 + $0x3d0] sm:$0xff]  }
  0x89   :  { %4731 = vmatpush3.bf16.msra.mxu0 %v5332_v24  ;;  %v5416_v24 = vld [vmem:[%s7165_s1 + $0x418] sm:$0xff]  }
  0x8a   :  { %3002 = vmatmul.mubr.bf16.gmra.mxu1 %v5316_v18  ;;  %3091 = vmatmul.mubr.bf16.gmra.mxu0 %v5319_v19  ;;  %v5398_v18 = vld [vmem:[%s7166_s0 + $0x284] ss:$100 sps:$4 sm:$0xff]   ;;  %v5401_v19 = vld [vmem:[%s7166_s0 + $0x28c] ss:$100 sps:$4 sm:$0xff]  }
  0x8b   :  { %3009 = vmatprep.mubr.bf16.mxu1 %v5324_v20  ;;  %3098 = vmatprep.mubr.bf16.mxu0 %v5327_v21  ;;  %v5406_v20 = vld [vmem:[%s7165_s1 + $0x420] sm:$0xff]   ;;  %v5407_v21 = vld [vmem:[%s7165_s1 + $0x398] sm:$0xff]  }
  0x8c   :  { %4675 = vmatpush3.bf16.msra.mxu1 %v5333_v25  ;;  %4732 = vmatprep.subr.bf16.mxu0 %v5340_v28  ;;  %v5400_v25 = vld [vmem:[%s7166_s0 + $0x280] ss:$100 sps:$4 sm:$0xff]   ;;  %v5408_v28 = vld [vmem:[%s7166_s0 + $0x34c] ss:$100 sps:$4 sm:$0xff]  }
  0x8d   :  { %4676 = vmatprep.subr.bf16.mxu1 %v5341_v31  ;;  %4733 = vmatpush3.bf16.msra.mxu0 %v5342_v32  ;;  %v5425_v31 = vld [vmem:[%s7165_s1 + $0x3c8] sm:$0xff]   ;;  %v5426_v32 = vld [vmem:[%s7165_s1 + $0x410] sm:$0xff]  }
  0x8e   :  { %4734 = vmatprep.subr.bf16.mxu0 %v5350_v34  ;;  %v5433_v34 = vld [vmem:[%s7165_s1 + $0x448] sm:$0xff]  }
  0x90   :  { %4677 = vmatpush3.bf16.msra.mxu1 %v5343_v33  ;;  %v5427_v33 = vld [vmem:[%s7165_s1 + $0x388] sm:$0xff]  }
  0x91   :  { %4678 = vmatprep.subr.bf16.mxu1 %v5351_v35  ;;  %4735 = vmatpush3.bf16.msra.mxu0 %v5352_v38  ;;  %v5410_v35 = vld [vmem:[%s7166_s0 + $0x348] ss:$100 sps:$4 sm:$0xff]   ;;  %v5435_v38 = vld [vmem:[%s7165_s1 + $0x3c0] sm:$0xff]  }
  0x92   :  { %3010 = vmatmul.mubr.bf16.gmra.mxu1 %v5326_v26  ;;  %3099 = vmatmul.mubr.bf16.gmra.mxu0 %v5329_v27  ;;  %v5403_v26 = vld [vmem:[%s7166_s0 + $0x288] ss:$100 sps:$4 sm:$0xff]   ;;  %v5417_v27 = vld [vmem:[%s7165_s1 + $0x390] sm:$0xff]  }
  0x93   :  { %3017 = vmatprep.mubr.bf16.mxu1 %v5334_v29  ;;  %3106 = vmatprep.mubr.bf16.mxu0 %v5337_v30  ;;  %v5411_v29 = vld [vmem:[%s7166_s0 + $0x354] ss:$100 sps:$4 sm:$0xff]  }
  0x94   :  { %4679 = vmatpush3.bf16.msra.mxu1 %v5353_v39  ;;  %4736 = vmatprep.subr.bf16.mxu0 %v5359_v42  ;;  %v5424_v30 = vld [vmem:[%s7165_s1 + $0x450] sm:$0xff]   ;;  %v5421_v39 = vld [vmem:[%s7166_s0 + $0x41c] ss:$100 sps:$4 sm:$0xff]  }
  0x95   :  { %4680 = vmatprep.subr.bf16.mxu1 %v5361_v43  ;;  %4737 = vmatpush3.bf16.msra.mxu0 %v5362_v44  ;;  %v5438_v42 = vld [vmem:[%s7165_s1 + $0x440] sm:$0xff]   ;;  %v5420_v44 = vld [vmem:[%s7166_s0 + $0x410] ss:$100 sps:$4 sm:$0xff]  }
  0x96   :  { %4738 = vmatprep.subr.bf16.mxu0 %v5364_v48  ;;  %v5439_v43 = vld [vmem:[%s7165_s1 + $0x400] sm:$0xff]  }
  0x97   :  { %v5431_v48 = vld [vmem:[%s7166_s0 + $0x4e4] ss:$100 sps:$4 sm:$0xff]  }
  0x98   :  { %4681 = vmatpush3.bf16.msra.mxu1 %v5363_v47  ;;  %v5446_v47 = vld [vmem:[%s7165_s1 + $0x4f8] sm:$0xff]  }
  0x99   :  { %4739 = vmatpush3.bf16.msra.mxu0 %v5365_v49  ;;  %4782 = vmatprep.subr.bf16.mxu1 %v5372_v52  ;;  %v5448_v49 = vld [vmem:[%s7165_s1 + $0x578] sm:$0xff]  }
  0x9a   :  { %3018 = vmatmul.mubr.bf16.gmra.mxu1 %v5336_v36  ;;  %3107 = vmatmul.mubr.bf16.gmra.mxu0 %v5339_v37  ;;  %v5413_v36 = vld [vmem:[%s7166_s0 + $0x350] ss:$100 sps:$4 sm:$0xff]   ;;  %v5442_v52 = vld [vmem:[%s7166_s0 + $0x3c] ss:$100 sps:$4 sm:$0xff]  }
  0x9b   :  { %3025 = vmatprep.mubr.bf16.mxu1 %v5344_v40  ;;  %3114 = vmatprep.mubr.bf16.mxu0 %v5347_v41  ;;  %v5418_v37 = vld [vmem:[%s7166_s0 + $0x414] ss:$100 sps:$4 sm:$0xff]   ;;  %v5436_v40 = vld [vmem:[%s7165_s1 + $0x408] sm:$0xff]   ;;  %v5437_v41 = vld [vmem:[%s7165_s1 + $0x380] sm:$0xff]  }
  0x9c   :  { %4840 = vmatprep.subr.bf16.mxu0 %v5374_v53  ;;  %v5445_v53 = vld [vmem:[%s7166_s0 + $0x44] ss:$100 sps:$4 sm:$0xff]  }
  0xa2   :  { %3026 = vmatmul.mubr.bf16.gmra.mxu1 %v5346_v45  ;;  %3115 = vmatmul.mubr.bf16.gmra.mxu0 %v5349_v46  ;;  %v5423_v45 = vld [vmem:[%s7166_s0 + $0x418] ss:$100 sps:$4 sm:$0xff]  }
  0xa3   :  { %3033 = vmatprep.mubr.bf16.mxu1 %v5354_v50  ;;  %3122 = vmatprep.mubr.bf16.mxu0 %v5357_v51  ;;  %v5428_v46 = vld [vmem:[%s7166_s0 + $0x4dc] ss:$100 sps:$4 sm:$0xff]  }
  0xa4   :  { %v5430_v50 = vld [vmem:[%s7166_s0 + $0x4d8] ss:$100 sps:$4 sm:$0xff]   ;;  %v5434_v51 = vld [vmem:[%s7166_s0 + $0x4e0] ss:$100 sps:$4 sm:$0xff]  }
  0xaa   :  { %3034 = vmatmul.mubr.bf16.gmra.mxu1 %v5356_v54  ;;  %3123 = vmatmul.mubr.bf16.gmra.mxu0 %v5360_v55 }
  0xab   :  { %3163 = vmatprep.mubr.bf16.mxu1 %v5368_v56  ;;  %3252 = vmatprep.mubr.bf16.mxu0 %v5371_v57 }
  0xb2   :  { %3164 = vmatmul.mubr.bf16.vlgmr.msra.gmra.mxu1 %v5366_v58  ;;  %3253 = vmatmul.mubr.bf16.vlgmr.msra.gmra.mxu0 %v5369_v59  ;;  %v5440_v58 = vld [vmem:[%s7166_s0 + $0x38] ss:$100 sps:$4 sm:$0xff]   ;;  %v5443_v59 = vld [vmem:[%s7166_s0 + $0x40] ss:$100 sps:$4 sm:$0xff]  }
  0xb3   :  { %4783 = vmatpush3.bf16.msra.mxu1 %v5373_v60  ;;  %3171 = vmatprep.mubr.bf16.mxu1 %v5375_v61 }
  0xb4   :  { %4784 = vmatprep.subr.bf16.mxu1 %v5377_v62  ;;  %4841 = vmatpush3.bf16.msra.mxu0 %v5378_v63  ;;  %v5447_v62 = vld [vmem:[%s7165_s1 + $0x4b8] sm:$0xff]  }
  0xb5   :  { %3260 = vmatprep.mubr.bf16.mxu0 %v5380_v0  ;;  %4842 = vmatprep.subr.bf16.mxu0 %v5384_v1  ;;  %v5449_v1 = vld [vmem:[%s7166_s0 + $0x104] ss:$100 sps:$4 sm:$0xff]  }
  0xb7   :  { %4785 = vmatpush3.bf16.msra.mxu1 %v5382_v2  ;;  %v5451_v2 = vld [vmem:[%s7165_s1 + $0x4f0] sm:$0xff]  }
  0xb8   :  { %4786 = vmatprep.subr.bf16.mxu1 %v5385_v3  ;;  %4843 = vmatpush3.bf16.msra.mxu0 %v5386_v6  ;;  %v5454_v6 = vld [vmem:[%s7166_s0 + $0x10c] ss:$100 sps:$4 sm:$0xff]  }
  0xb9   :  { %4844 = vmatprep.subr.bf16.mxu0 %v5394_v8 }
  0xba   :  { %3172 = vmatmul.mubr.bf16.gmra.mxu1 %v5379_v4  ;;  %3261 = vmatmul.mubr.bf16.gmra.mxu0 %v5383_v5  ;;  %v5452_v5 = vld [vmem:[%s7165_s1 + $0x538] sm:$0xff]  }
  0xbb   :  { %3179 = vmatprep.mubr.bf16.mxu1 %v5387_v7  ;;  %4787 = vmatpush3.bf16.msra.mxu1 %v5389_v9  ;;  %v5458_v9 = vld [vmem:[%s7165_s1 + $0x570] sm:$0xff]  }
  0xbc   :  { %3268 = vmatprep.mubr.bf16.mxu0 %v5391_v10  ;;  %4788 = vmatprep.subr.bf16.mxu1 %v5395_v11 }
  0xbd   :  { %4845 = vmatpush3.bf16.msra.mxu0 %v5396_v12  ;;  %v5456_v12 = vld [vmem:[%s7165_s1 + $0x4b0] sm:$0xff]  }
  0xbe   :  { %4846 = vmatprep.subr.bf16.mxu0 %v5404_v13  ;;  %v5459_v13 = vld [vmem:[%s7165_s1 + $0x4e8] sm:$0xff]  }
  0xbf   :  { %4789 = vmatpush3.bf16.msra.mxu1 %v5397_v14 }
  0xc0   :  { %4790 = vmatprep.subr.bf16.mxu1 %v5405_v17  ;;  %v5460_v17 = vld [vmem:[%s7165_s1 + $0x530] sm:$0xff]  }
  0xc1   :  { %4847 = vmatpush3.bf16.msra.mxu0 %v5406_v20  ;;  %v5468_v20 = vld [vmem:[%s7165_s1 + $0x568] sm:$0xff]  }
  0xc2   :  { %3180 = vmatmul.mubr.bf16.gmra.mxu1 %v5390_v15  ;;  %3269 = vmatmul.mubr.bf16.gmra.mxu0 %v5393_v16  ;;  %v5453_v16 = vld [vmem:[%s7166_s0 + $0x100] ss:$100 sps:$4 sm:$0xff]  }
  0xc3   :  { %3187 = vmatprep.mubr.bf16.mxu1 %v5398_v18  ;;  %3276 = vmatprep.mubr.bf16.mxu0 %v5401_v19 }
  0xc4   :  { %4791 = vmatpush3.bf16.msra.mxu1 %v5407_v21  ;;  %4848 = vmatprep.subr.bf16.mxu0 %v5414_v22 }
  0xc5   :  { %4792 = vmatprep.subr.bf16.mxu1 %v5415_v23  ;;  %4849 = vmatpush3.bf16.msra.mxu0 %v5416_v24  ;;  %v5457_v23 = vld [vmem:[%s7166_s0 + $0x108] ss:$100 sps:$4 sm:$0xff]  }
  0xc6   :  { %4850 = vmatprep.subr.bf16.mxu0 %v5424_v30  ;;  %v5461_v24 = vld [vmem:[%s7166_s0 + $0x1cc] ss:$100 sps:$4 sm:$0xff]  }
  0xc8   :  { %4793 = vmatpush3.bf16.msra.mxu1 %v5417_v27 }
  0xc9   :  { %4794 = vmatprep.subr.bf16.mxu1 %v5425_v31  ;;  %4851 = vmatpush3.bf16.msra.mxu0 %v5426_v32  ;;  %v5470_v32 = vld [vmem:[%s7165_s1 + $0x528] sm:$0xff]  }
  0xca   :  { %3188 = vmatmul.mubr.bf16.gmra.mxu1 %v5400_v25  ;;  %3277 = vmatmul.mubr.bf16.gmra.mxu0 %v5403_v26  ;;  %v5463_v25 = vld [vmem:[%s7165_s1 + $0x4a8] sm:$0xff]  }
  0xcb   :  { %3195 = vmatprep.mubr.bf16.mxu1 %v5408_v28  ;;  %3284 = vmatprep.mubr.bf16.mxu0 %v5411_v29  ;;  %v5465_v28 = vld [vmem:[%s7166_s0 + $0x1d4] ss:$100 sps:$4 sm:$0xff]   ;;  %v5469_v29 = vld [vmem:[%s7165_s1 + $0x4e0] sm:$0xff]  }
  0xcc   :  { %4795 = vmatpush3.bf16.msra.mxu1 %v5427_v33  ;;  %4852 = vmatprep.subr.bf16.mxu0 %v5433_v34 }
  0xcd   :  { %4796 = vmatprep.subr.bf16.mxu1 %v5435_v38  ;;  %4853 = vmatpush3.bf16.msra.mxu0 %v5436_v40  ;;  %v5467_v40 = vld [vmem:[%s7166_s0 + $0x1d0] ss:$100 sps:$4 sm:$0xff]  }
  0xce   :  { %4854 = vmatprep.subr.bf16.mxu0 %v5438_v42 }
  0xd0   :  { %4797 = vmatpush3.bf16.msra.mxu1 %v5437_v41  ;;  %v5479_v41 = vld [vmem:[%s7165_s1 + $0x4d8] sm:$0xff]  }
  0xd1   :  { %4855 = vmatpush3.bf16.msra.mxu0 %v5439_v43  ;;  %4898 = vmatprep.subr.bf16.mxu1 %v5446_v47 }
  0xd2   :  { %3196 = vmatmul.mubr.bf16.gmra.mxu1 %v5410_v35  ;;  %3285 = vmatmul.mubr.bf16.gmra.mxu0 %v5413_v36  ;;  %v5478_v35 = vld [vmem:[%s7165_s1 + $0x560] sm:$0xff]  }
  0xd3   :  { %3203 = vmatprep.mubr.bf16.mxu1 %v5418_v37  ;;  %3292 = vmatprep.mubr.bf16.mxu0 %v5421_v39  ;;  %v5471_v36 = vld [vmem:[%s7165_s1 + $0x4a0] sm:$0xff]   ;;  %v5464_v39 = vld [vmem:[%s7166_s0 + $0x1c8] ss:$100 sps:$4 sm:$0xff]  }
  0xd4   :  { %4956 = vmatprep.subr.bf16.mxu0 %v5448_v49  ;;  %v5481_v49 = vld [vmem:[%s7165_s1 + $0x498] sm:$0xff]  }
  0xda   :  { %3204 = vmatmul.mubr.bf16.gmra.mxu1 %v5420_v44  ;;  %3293 = vmatmul.mubr.bf16.gmra.mxu0 %v5423_v45  ;;  %v5472_v44 = vld [vmem:[%s7166_s0 + $0x294] ss:$100 sps:$4 sm:$0xff]   ;;  %v5480_v45 = vld [vmem:[%s7165_s1 + $0x520] sm:$0xff]  }
  0xdb   :  { %3211 = vmatprep.mubr.bf16.mxu1 %v5428_v46  ;;  %3300 = vmatprep.mubr.bf16.mxu0 %v5431_v48  ;;  %v5477_v48 = vld [vmem:[%s7166_s0 + $0x29c] ss:$100 sps:$4 sm:$0xff]  }
  0xe2   :  { %v4416_v54 = vpop.f32.mrf.mxu1  ;;  %3212 = vmatmul.mubr.bf16.gmra.mxu1 %v5430_v50  ;;  %v4392_v55 = vpop.f32.mrf.mxu0  ;;  %3301 = vmatmul.mubr.bf16.gmra.mxu0 %v5434_v51  ;;  %v5488_v50 = vld [vmem:[%s7165_s1 + $0x558] sm:$0xff]  }
  0xe3   :  { %3341 = vmatprep.mubr.bf16.mxu1 %v5442_v52  ;;  %3430 = vmatprep.mubr.bf16.mxu0 %v5445_v53  ;;  %v5489_v53 = vld [vmem:[%s7165_s1 + $0x4d0] sm:$0xff]  }
  0xe4   :  { %v4417_v56 = vpop.f32.mrf.mxu1  ;;  %v4393_v57 = vpop.f32.mrf.mxu0 }
  0xe5   :  { %v6374_v60 = vadd.f32 %v4417_v56, %v4416_v54  ;;  %v6376_v61 = vadd.f32 %v4393_v57, %v4392_v55  ;;  %v5490_v56 = vld [vmem:[%s7165_s1 + $0x518] sm:$0xff]  }
  0xe6   :  { %v4419_v63 = vpop.f32.mrf.mxu1  ;;  %v4395_v0 = vpop.f32.mrf.mxu0 }
  0xe8   :  { %v4420_v3 = vpop.f32.mrf.mxu1  ;;  %v4396_v4 = vpop.f32.mrf.mxu0 }
  0xe9   :  { %v6393_v7 = vadd.f32 %v4420_v3, %v4419_v63  ;;  %v6395_v8 = vadd.f32 %v4396_v4, %v4395_v0  ;;  %v5475_v63 = vld [vmem:[%s7166_s0 + $0x298] ss:$100 sps:$4 sm:$0xff]   ;;  %v5491_v0 = vld [vmem:[%s7165_s1 + $0x490] sm:$0xff]   ;;  %v5487_v4 = vld [vmem:[%s7166_s0 + $0x364] ss:$100 sps:$4 sm:$0xff]  }
  0xea   :  { %3342 = vmatmul.mubr.bf16.vlgmr.msra.gmra.mxu1 %v5440_v58  ;;  %v4398_v10 = vpop.f32.mrf.mxu0  ;;  %3431 = vmatmul.mubr.bf16.vlgmr.msra.gmra.mxu0 %v5443_v59  ;;  %v4422_v11 = vpop.f32.mrf.mxu1  ;;  %v5498_v58 = vld [vmem:[%s7165_s1 + $0x550] sm:$0xff]   ;;  %v5484_v3 = vld [vmem:[%s7166_s0 + $0x35c] ss:$100 sps:$4 sm:$0xff]  }
  0xeb   :  { %4899 = vmatpush3.bf16.msra.mxu1 %v5447_v62  ;;  %3349 = vmatprep.mubr.bf16.mxu1 %v5449_v1  ;;  %v5474_v62 = vld [vmem:[%s7166_s0 + $0x290] ss:$100 sps:$4 sm:$0xff]   ;;  %v5499_v1 = vld [vmem:[%s7165_s1 + $0x4c8] sm:$0xff]  }
  0xec   :  { %v4399_v14 = vpop.f32.mrf.mxu0  ;;  %v4423_v15 = vpop.f32.mrf.mxu1  ;;  %4900 = vmatprep.subr.bf16.mxu1 %v5451_v2  ;;  %4957 = vmatpush3.bf16.msra.mxu0 %v5452_v5  ;;  %v5500_v5 = vld [vmem:[%s7165_s1 + $0x510] sm:$0xff]  }
  0xed   :  { %v6412_v18 = vadd.f32 %v4399_v14, %v4398_v10  ;;  %v6414_v19 = vadd.f32 %v4423_v15, %v4422_v11  ;;  %3438 = vmatprep.mubr.bf16.mxu0 %v5454_v6  ;;  %4958 = vmatprep.subr.bf16.mxu0 %v5458_v9  ;;  %v5501_v9 = vld [vmem:[%s7165_s1 + $0x488] sm:$0xff]   ;;  %v6528_v15 = vld [vmem:[%s7167_s2] ss:$0 sm:$0xff] }
  0xee   :  { %v4401_v21 = vpop.f32.mrf.mxu0  ;;  %v4425_v22 = vpop.f32.mrf.mxu1  ;;  %v5508_v10 = vld [vmem:[%s7165_s1 + $0x548] sm:$0xff]  }
  0xef   :  { %4901 = vmatpush3.bf16.msra.mxu1 %v5456_v12  ;;  %v5509_v12 = vld [vmem:[%s7165_s1 + $0x4c0] sm:$0xff]   ;;  %v5510_v14 = vld [vmem:[%s7165_s1 + $0x508] sm:$0xff]  }
  0xf0   :  { %v4402_v26 = vpop.f32.mrf.mxu0  ;;  %v4426_v27 = vpop.f32.mrf.mxu1  ;;  %4902 = vmatprep.subr.bf16.mxu1 %v5459_v13  ;;  %4959 = vmatpush3.bf16.msra.mxu0 %v5460_v17 }
  0xf1   :  { %v6434_v30 = vadd.f32 %v4402_v26, %v4401_v21  ;;  %v6436_v31 = vadd.f32 %v4426_v27, %v4425_v22  ;;  %4960 = vmatprep.subr.bf16.mxu0 %v5468_v20  ;;  %v5512_v20 = vld [vmem:[%s7165_s1 + $0x540] sm:$0xff]  }
  0xf2   :  { %3350 = vmatmul.mubr.bf16.gmra.mxu1 %v5453_v16  ;;  %v4404_v33 = vpop.f32.mrf.mxu0  ;;  %3439 = vmatmul.mubr.bf16.gmra.mxu0 %v5457_v23  ;;  %v4428_v34 = vpop.f32.mrf.mxu1  ;;  %v5482_v23 = vld [vmem:[%s7166_s0 + $0x358] ss:$100 sps:$4 sm:$0xff]  }
  0xf3   :  { %3357 = vmatprep.mubr.bf16.mxu1 %v5461_v24  ;;  %4903 = vmatpush3.bf16.msra.mxu1 %v5463_v25  ;;  %v5511_v24 = vld [vmem:[%s7165_s1 + $0x480] sm:$0xff]   ;;  %v2721_v25 = vadd.f32 %v6376_v61, %v6528_v15  ;;  %v5497_v61 = vld [vmem:[%s7166_s0 + $0x42c] ss:$100 sps:$4 sm:$0xff]  }
  0xf4   :  { %v4405_v37 = vpop.f32.mrf.mxu0  ;;  %v4429_v38 = vpop.f32.mrf.mxu1  ;;  %3446 = vmatprep.mubr.bf16.mxu0 %v5465_v28  ;;  %4904 = vmatprep.subr.bf16.mxu1 %v5469_v29  ;;  %v5485_v28 = vld [vmem:[%s7166_s0 + $0x360] ss:$100 sps:$4 sm:$0xff]  }
  0xf5   :  { %v6456_v42 = vadd.f32 %v4405_v37, %v4404_v33  ;;  %v6458_v43 = vadd.f32 %v4429_v38, %v4428_v34  ;;  %4961 = vmatpush3.bf16.msra.mxu0 %v5470_v32  ;;  %v5513_v29 = vld [vmem:[%s7165_s1 + $0x500] sm:$0xff]   ;;  %v2724_v37 = vadd.f32 %v6395_v8, %v6528_v15  ;;  %v2729_v8 = vadd.f32 %v6412_v18, %v6528_v15  ;;  %v5507_v18 = vld [vmem:[%s7166_s0 + $0x4f4] ss:$100 sps:$4 sm:$0xff]  }
  0xf6   :  { %v4407_v46 = vpop.f32.mrf.mxu0  ;;  %v4431_v47 = vpop.f32.mrf.mxu1  ;;  %4962 = vmatprep.subr.bf16.mxu0 %v5478_v35  ;;  %v5494_v34 = vld [vmem:[%s7166_s0 + $0x424] ss:$100 sps:$4 sm:$0xff]  }
  0xf7   :  { %4905 = vmatpush3.bf16.msra.mxu1 %v5471_v36  ;;  %v5520_v36 = vld [vmem:[%s7165_s1 + $0x5f8] sm:$0xff]  }
  0xf8   :  { %v4408_v51 = vpop.f32.mrf.mxu0  ;;  %v4432_v52 = vpop.f32.mrf.mxu1  ;;  %4906 = vmatprep.subr.bf16.mxu1 %v5479_v41 }
  0xf9   :  { %v6478_v54 = vadd.f32 %v4408_v51, %v4407_v46  ;;  %v6480_v55 = vadd.f32 %v4432_v52, %v4431_v47  ;;  %4963 = vmatpush3.bf16.msra.mxu0 %v5480_v45 }
  0xfa   :  { %3358 = vmatmul.mubr.bf16.gmra.mxu1 %v5464_v39  ;;  %v4410_v57 = vpop.f32.mrf.mxu0  ;;  %3447 = vmatmul.mubr.bf16.gmra.mxu0 %v5467_v40 }
  0xfb   :  { %3365 = vmatprep.mubr.bf16.mxu1 %v5472_v44  ;;  %3454 = vmatprep.mubr.bf16.mxu0 %v5477_v48 }
  0xfc   :  { %v4411_v59 = vpop.f32.mrf.mxu0  ;;  %4907 = vmatpush3.bf16.msra.mxu1 %v5481_v49  ;;  %4964 = vmatprep.subr.bf16.mxu0 %v5488_v50  ;;  %v5608_v50 = vmov 0.0  }
  0xfd   :  { %v6500_v2 = vadd.f32 %v4411_v59, %v4410_v57  ;;  %4908 = vmatprep.subr.bf16.mxu1 %v5489_v53  ;;  %4965 = vmatpush3.bf16.msra.mxu0 %v5490_v56  ;;  %v5492_v56 = vld [vmem:[%s7166_s0 + $0x420] ss:$100 sps:$4 sm:$0xff]   ;;  %v5495_v57 = vld [vmem:[%s7166_s0 + $0x428] ss:$100 sps:$4 sm:$0xff]  }
  0xfe   :  { %v4413_v6 = vpop.f32.mrf.mxu0  ;;  %4966 = vmatprep.subr.bf16.mxu0 %v5498_v58 }
 0x100   :  { %v4414_v11 = vpop.f32.mrf.mxu0  ;;  %4909 = vmatpush3.bf16.msra.mxu1 %v5491_v0 }
 0x101   :  { %v6520_v13 = vadd.f32 %v4414_v11, %v4413_v6  ;;  %4910 = vmatprep.subr.bf16.mxu1 %v5499_v1  ;;  %4967 = vmatpush3.bf16.msra.mxu0 %v5500_v5 }
 0x102   :  { %v4450_v16 = vpop.f32.mrf.mxu1  ;;  %3366 = vmatmul.mubr.bf16.gmra.mxu1 %v5474_v62  ;;  %v4508_v17 = vpop.f32.mrf.mxu0  ;;  %3455 = vmatmul.mubr.bf16.gmra.mxu0 %v5475_v63  ;;  %v5504_v62 = vld [vmem:[%s7166_s0 + $0x4ec] ss:$100 sps:$4 sm:$0xff]  }
 0x103   :  { %3373 = vmatprep.mubr.bf16.mxu1 %v5484_v3  ;;  %3462 = vmatprep.mubr.bf16.mxu0 %v5487_v4  ;;  %v2732_v3 = vadd.f32 %v6434_v30, %v6528_v15  ;;  %v2737_v30 = vadd.f32 %v6456_v42, %v6528_v15 }
 0x104   :  { %v4451_v21 = vpop.f32.mrf.mxu1  ;;  %v4509_v22 = vpop.f32.mrf.mxu0  ;;  %4911 = vmatpush3.bf16.msra.mxu1 %v5501_v9  ;;  %4968 = vmatprep.subr.bf16.mxu0 %v5508_v10 }
 0x105   :  { %v4452_v26 = vadd.f32 %v4451_v21, %v4450_v16  ;;  %v4510_v27 = vadd.f32 %v4509_v22, %v4508_v17  ;;  %4912 = vmatprep.subr.bf16.mxu1 %v5509_v12  ;;  %4969 = vmatpush3.bf16.msra.mxu0 %v5510_v14  ;;  %v5502_v16 = vld [vmem:[%s7166_s0 + $0x4e8] ss:$100 sps:$4 sm:$0xff]   ;;  %v5505_v22 = vld [vmem:[%s7166_s0 + $0x4f0] ss:$100 sps:$4 sm:$0xff]  }
 0x106   :  { %v4453_v32 = vpop.f32.mrf.mxu1  ;;  %v4511_v33 = vpop.f32.mrf.mxu0  ;;  %4970 = vmatprep.subr.bf16.mxu0 %v5512_v20 }
 0x107   :  { %v2810_v35 = vadd.f32 %v4452_v26, %v2721_v25  ;;  %v5516_v25 = vld [vmem:[%s7166_s0 + $0x4c] ss:$100 sps:$4 sm:$0xff]  }
 0x108   :  { %v4454_v38 = vpop.f32.mrf.mxu1  ;;  %v4512_v39 = vpop.f32.mrf.mxu0  ;;  %4913 = vmatpush3.bf16.msra.mxu1 %v5511_v24 }
 0x109   :  { %v6558_v40 = vadd.f32 %v4510_v27, %v2810_v35  ;;  %v4455_v41 = vadd.f32 %v4454_v38, %v4453_v32  ;;  %v4513_v44 = vadd.f32 %v4512_v39, %v4511_v33  ;;  %4971 = vmatpush3.bf16.msra.mxu0 %v5513_v29  ;;  %5014 = vmatprep.subr.bf16.mxu1 %v5520_v36  ;;  %v5519_v27 = vld [vmem:[%s7166_s0 + $0x54] ss:$100 sps:$4 sm:$0xff]   ;;  %v5514_v39 = vld [vmem:[%s7166_s0 + $0x48] ss:$100 sps:$4 sm:$0xff]  }
 0x10a   :  { %v4456_v45 = vpop.f32.mrf.mxu1  ;;  %3374 = vmatmul.mubr.bf16.gmra.mxu1 %v5482_v23  ;;  %v4514_v46 = vpop.f32.mrf.mxu0  ;;  %3463 = vmatmul.mubr.bf16.gmra.mxu0 %v5485_v28  ;;  %v2740_v29 = vadd.f32 %v6478_v54, %v6528_v15  ;;  %v2745_v54 = vadd.f32 %v6500_v2, %v6528_v15  ;;  %v5525_v2 = vld [vmem:[%s7165_s1 + $0x5f0] sm:$0xff]  }
 0x10b   :  { %v2813_v47 = vadd.f32 %v4455_v41, %v2724_v37  ;;  %3381 = vmatprep.mubr.bf16.mxu1 %v5494_v34  ;;  %3470 = vmatprep.mubr.bf16.mxu0 %v5497_v61 }
 0x10c   :  { %v4457_v48 = vpop.f32.mrf.mxu1  ;;  %v4515_v49 = vpop.f32.mrf.mxu0  ;;  %5087 = vmatprep.subr.bf16.mxu0 %v5608_v50 }
 0x10d   :  { %v6563_v51 = vadd.f32 %v4513_v44, %v2813_v47  ;;  %v4458_v52 = vadd.f32 %v4457_v48, %v4456_v45  ;;  %v4516_v53 = vadd.f32 %v4515_v49, %v4514_v46  ;;  %v5517_v46 = vld [vmem:[%s7166_s0 + $0x50] ss:$100 sps:$4 sm:$0xff]   ;;  %v5521_v49 = vld [vmem:[%s7165_s1 + $0x5b8] sm:$0xff]  }
 0x10e   :  { %v4459_v58 = vpop.f32.mrf.mxu1  ;;  %v4517_v59 = vpop.f32.mrf.mxu0 }
 0x10f   :  { %v2818_v63 = vadd.f32 %v4458_v52, %v2729_v8  ;;  %v5524_v52 = vld [vmem:[%s7166_s0 + $0x114] ss:$100 sps:$4 sm:$0xff]  }
 0x110   :  { %v4460_v0 = vpop.f32.mrf.mxu1  ;;  %v4518_v1 = vpop.f32.mrf.mxu0 }
 0x111   :  { %v6579_v4 = vadd.f32 %v4516_v53, %v2818_v63  ;;  %v4461_v5 = vadd.f32 %v4460_v0, %v4459_v58  ;;  %v4519_v6 = vadd.f32 %v4518_v1, %v4517_v59  ;;  %v2748_v58 = vadd.f32 %v6520_v13, %v6528_v15  ;;  %v5531_v13 = vld [vmem:[%s7165_s1 + $0x5e8] sm:$0xff]  }
 0x112   :  { %v4462_v9 = vpop.f32.mrf.mxu1  ;;  %3382 = vmatmul.mubr.bf16.gmra.mxu1 %v5492_v56  ;;  %v4520_v10 = vpop.f32.mrf.mxu0  ;;  %3471 = vmatmul.mubr.bf16.gmra.mxu0 %v5495_v57  ;;  %v5526_v57 = vld [vmem:[%s7165_s1 + $0x638] sm:$0xff]  }
 0x113   :  { %v2821_v11 = vadd.f32 %v4461_v5, %v2732_v3  ;;  %3389 = vmatprep.mubr.bf16.mxu1 %v5504_v62  ;;  %3478 = vmatprep.mubr.bf16.mxu0 %v5507_v18  ;;  %v5529_v18 = vld [vmem:[%s7166_s0 + $0x11c] ss:$100 sps:$4 sm:$0xff]   ;;  %v5530_v5 = vld [vmem:[%s7165_s1 + $0x5b0] sm:$0xff]  }
 0x114   :  { %v4463_v12 = vpop.f32.mrf.mxu1  ;;  %v4521_v14 = vpop.f32.mrf.mxu0 }
 0x115   :  { %v6586_v17 = vadd.f32 %v4519_v6, %v2821_v11  ;;  %v4464_v20 = vadd.f32 %v4463_v12, %v4462_v9  ;;  %v4522_v21 = vadd.f32 %v4521_v14, %v4520_v10  ;;  %v2753_v6 = vadd.f32 %v6374_v60, %v6528_v15  ;;  %v5522_v11 = vld [vmem:[%s7166_s0 + $0x110] ss:$100 sps:$4 sm:$0xff]   ;;  %v5527_v12 = vld [vmem:[%s7166_s0 + $0x118] ss:$100 sps:$4 sm:$0xff]  }
 0x116   :  { %v4465_v23 = vpop.f32.mrf.mxu1  ;;  %v4523_v24 = vpop.f32.mrf.mxu0  ;;  %v5532_v14 = vld [vmem:[%s7165_s1 + $0x630] sm:$0xff]  }
 0x117   :  { %v2826_v26 = vadd.f32 %v4464_v20, %v2737_v30  ;;  %v5535_v20 = vld [vmem:[%s7166_s0 + $0x1dc] ss:$100 sps:$4 sm:$0xff]  }
 0x118   :  { %v4466_v42 = vpop.f32.mrf.mxu1  ;;  %v4524_v28 = vpop.f32.mrf.mxu0 }
 0x119   :  { %v6599_v32 = vadd.f32 %v4522_v21, %v2826_v26  ;;  %v4467_v33 = vadd.f32 %v4466_v42, %v4465_v23  ;;  %v4525_v34 = vadd.f32 %v4524_v28, %v4523_v24  ;;  %v5536_v23 = vld [vmem:[%s7165_s1 + $0x5a8] sm:$0xff]   ;;  %v5540_v42 = vld [vmem:[%s7165_s1 + $0x5e0] sm:$0xff]   ;;  %v2756_v28 = vadd.f32 %v6393_v7, %v6528_v15 }
 0x11a   :  { %v4468_v61 = vpop.f32.mrf.mxu1  ;;  %3390 = vmatmul.mubr.bf16.gmra.mxu1 %v5502_v16  ;;  %v4526_v35 = vpop.f32.mrf.mxu0  ;;  %3479 = vmatmul.mubr.bf16.gmra.mxu0 %v5505_v22  ;;  %v5542_v7 = vld [vmem:[%s7165_s1 + $0x5a0] sm:$0xff]  }
 0x11b   :  { %v2829_v36 = vadd.f32 %v4467_v33, %v2740_v29  ;;  %3519 = vmatprep.mubr.bf16.mxu1 %v5516_v25  ;;  %3608 = vmatprep.mubr.bf16.mxu0 %v5519_v27  ;;  %v5539_v25 = vld [vmem:[%s7166_s0 + $0x1e4] ss:$100 sps:$4 sm:$0xff]  }
 0x11c   :  { %v4469_v37 = vpop.f32.mrf.mxu1  ;;  %v4527_v38 = vpop.f32.mrf.mxu0 }
 0x11d   :  { %v6606_v41 = vadd.f32 %v4525_v34, %v2829_v36  ;;  %v4470_v44 = vadd.f32 %v4469_v37, %v4468_v61  ;;  %v4528_v45 = vadd.f32 %v4527_v38, %v4526_v35  ;;  %v5541_v61 = vld [vmem:[%s7165_s1 + $0x628] sm:$0xff]  }
 0x11e   :  { %v4471_v47 = vpop.f32.mrf.mxu1  ;;  %v4529_v48 = vpop.f32.mrf.mxu0 }
 0x11f   :  { %v2834_v8 = vadd.f32 %v4470_v44, %v2745_v54  ;;  %v5533_v54 = vld [vmem:[%s7166_s0 + $0x1d8] ss:$100 sps:$4 sm:$0xff]   ;;  %v5537_v44 = vld [vmem:[%s7166_s0 + $0x1e0] ss:$100 sps:$4 sm:$0xff]  }
 0x120   :  { %v4472_v53 = vpop.f32.mrf.mxu1  ;;  %v4530_v56 = vpop.f32.mrf.mxu0 }
 0x121   :  { %v6625_v59 = vadd.f32 %v4528_v45, %v2834_v8  ;;  %v4473_v62 = vadd.f32 %v4472_v53, %v4471_v47  ;;  %v4531_v63 = vadd.f32 %v4530_v56, %v4529_v48  ;;  %v5549_v45 = vld [vmem:[%s7165_s1 + $0x5d8] sm:$0xff]   ;;  %v5545_v8 = vld [vmem:[%s7166_s0 + $0x2a4] ss:$100 sps:$4 sm:$0xff]   ;;  %v5548_v56 = vld [vmem:[%s7166_s0 + $0x2ac] ss:$100 sps:$4 sm:$0xff]  }
 0x122   :  { %v4474_v0 = vpop.f32.mrf.mxu1  ;;  %3520 = vmatmul.mubr.bf16.vlgmr.msra.gmra.mxu1 %v5514_v39  ;;  %v4532_v1 = vpop.f32.mrf.mxu0  ;;  %3609 = vmatmul.mubr.bf16.vlgmr.msra.gmra.mxu0 %v5517_v46  ;;  %v2761_v46 = vadd.f32 %v6414_v19, %v6528_v15 }
 0x123   :  { %v2837_v3 = vadd.f32 %v4473_v62, %v2748_v58  ;;  %5015 = vmatpush3.bf16.msra.mxu1 %v5521_v49  ;;  %3527 = vmatprep.mubr.bf16.mxu1 %v5524_v52  ;;  %v5550_v52 = vld [vmem:[%s7165_s1 + $0x620] sm:$0xff]  }
 0x124   :  { %v4475_v9 = vpop.f32.mrf.mxu1  ;;  %v4533_v10 = vpop.f32.mrf.mxu0  ;;  %5016 = vmatprep.subr.bf16.mxu1 %v5525_v2  ;;  %5088 = vmatpush3.bf16.msra.mxu0 %v5526_v57  ;;  %v5551_v57 = vld [vmem:[%s7165_s1 + $0x598] sm:$0xff]  }
 0x125   :  { %v6647_v16 = vadd.f32 %v4531_v63, %v2837_v3  ;;  %v4476_v30 = vadd.f32 %v4475_v9, %v4474_v0  ;;  %v4534_v60 = vadd.f32 %v4533_v10, %v4532_v1  ;;  %3616 = vmatprep.mubr.bf16.mxu0 %v5529_v18  ;;  %5089 = vmatprep.subr.bf16.mxu0 %v5608_v50  ;;  %v5558_v63 = vld [vmem:[%s7165_s1 + $0x5d0] sm:$0xff]  }
 0x126   :  { %v4477_v21 = vpop.f32.mrf.mxu1  ;;  %v4535_v22 = vpop.f32.mrf.mxu0  ;;  %v2764_v18 = vadd.f32 %v6436_v31, %v6528_v15  ;;  %v2769_v10 = vadd.f32 %v6458_v43, %v6528_v15  ;;  %v5567_v43 = vld [vmem:[%s7165_s1 + $0x5c8] sm:$0xff]  }
 0x127   :  { %v2842_v24 = vadd.f32 %v4476_v30, %v2753_v6  ;;  %5017 = vmatpush3.bf16.msra.mxu1 %v5530_v5  ;;  %v5559_v5 = vld [vmem:[%s7165_s1 + $0x618] sm:$0xff]   ;;  %v5560_v30 = vld [vmem:[%s7165_s1 + $0x590] sm:$0xff]  }
 0x128   :  { %v4478_v26 = vpop.f32.mrf.mxu1  ;;  %v4536_v27 = vpop.f32.mrf.mxu0  ;;  %5018 = vmatprep.subr.bf16.mxu1 %v5531_v13  ;;  %5090 = vmatpush3.bf16.msra.mxu0 %v5532_v14  ;;  %v5546_v14 = vld [vmem:[%s7166_s0 + $0x2a8] ss:$100 sps:$4 sm:$0xff]  }
 0x129   :  { %v6664_v29 = vadd.f32 %v4534_v60, %v2842_v24  ;;  %v4479_v33 = vadd.f32 %v4478_v26, %v4477_v21  ;;  %v4537_v34 = vadd.f32 %v4536_v27, %v4535_v22  ;;  %5091 = vmatprep.subr.bf16.mxu0 %v5608_v50  ;;  %v5568_v22 = vld [vmem:[%s7165_s1 + $0x610] sm:$0xff]  }
 0x12a   :  { %v4480_v35 = vpop.f32.mrf.mxu1  ;;  %3528 = vmatmul.mubr.bf16.gmra.mxu1 %v5522_v11  ;;  %v4538_v36 = vpop.f32.mrf.mxu0  ;;  %3617 = vmatmul.mubr.bf16.gmra.mxu0 %v5527_v12  ;;  %v5543_v12 = vld [vmem:[%s7166_s0 + $0x2a0] ss:$100 sps:$4 sm:$0xff]   ;;  %v5557_v27 = vld [vmem:[%s7166_s0 + $0x374] ss:$100 sps:$4 sm:$0xff]  }
 0x12b   :  { %v2845_v37 = vadd.f32 %v4479_v33, %v2756_v28  ;;  %3535 = vmatprep.mubr.bf16.mxu1 %v5535_v20  ;;  %5019 = vmatpush3.bf16.msra.mxu1 %v5536_v23 }
 0x12c   :  { %v4481_v38 = vpop.f32.mrf.mxu1  ;;  %v4539_v39 = vpop.f32.mrf.mxu0  ;;  %3624 = vmatprep.mubr.bf16.mxu0 %v5539_v25  ;;  %5020 = vmatprep.subr.bf16.mxu1 %v5540_v42  ;;  %v5554_v25 = vld [vmem:[%s7166_s0 + $0x36c] ss:$100 sps:$4 sm:$0xff]   ;;  %v2772_v42 = vadd.f32 %v6480_v55, %v6528_v15 }
 0x12d   :  { %v6684_v47 = vadd.f32 %v4537_v34, %v2845_v37  ;;  %v4482_v48 = vadd.f32 %v4481_v38, %v4480_v35  ;;  %v4540_v49 = vadd.f32 %v4539_v39, %v4538_v36  ;;  %5092 = vmatpush3.bf16.msra.mxu0 %v5541_v61  ;;  %v5569_v34 = vld [vmem:[%s7165_s1 + $0x588] sm:$0xff]   ;;  %v5576_v37 = vld [vmem:[%s7165_s1 + $0x5c0] sm:$0xff]  }
 0x12e   :  { %v4483_v2 = vpop.f32.mrf.mxu1  ;;  %v4541_v53 = vpop.f32.mrf.mxu0  ;;  %5093 = vmatprep.subr.bf16.mxu0 %v5608_v50  ;;  %v5577_v55 = vld [vmem:[%s7165_s1 + $0x608] sm:$0xff]  }
 0x12f   :  { %v2850_v19 = vadd.f32 %v4482_v48, %v2761_v46  ;;  %5021 = vmatpush3.bf16.msra.mxu1 %v5542_v7 }
 0x130   :  { %v4484_v58 = vpop.f32.mrf.mxu1  ;;  %v4542_v62 = vpop.f32.mrf.mxu0  ;;  %5022 = vmatprep.subr.bf16.mxu1 %v5549_v45  ;;  %v5578_v45 = vld [vmem:[%s7165_s1 + $0x580] sm:$0xff]  }
 0x131   :  { %v6704_v0 = vadd.f32 %v4540_v49, %v2850_v19  ;;  %v4485_v1 = vadd.f32 %v4484_v58, %v4483_v2  ;;  %v4543_v3 = vadd.f32 %v4542_v62, %v4541_v53  ;;  %5094 = vmatpush3.bf16.msra.mxu0 %v5550_v52  ;;  %v5555_v53 = vld [vmem:[%s7166_s0 + $0x370] ss:$100 sps:$4 sm:$0xff]  }
 0x132   :  { %v4486_v13 = vpop.f32.mrf.mxu1  ;;  %3536 = vmatmul.mubr.bf16.gmra.mxu1 %v5533_v54  ;;  %v4544_v6 = vpop.f32.mrf.mxu0  ;;  %3625 = vmatmul.mubr.bf16.gmra.mxu0 %v5537_v44  ;;  %v5552_v44 = vld [vmem:[%s7166_s0 + $0x368] ss:$100 sps:$4 sm:$0xff]   ;;  %v5563_v19 = vld [vmem:[%s7166_s0 + $0x434] ss:$100 sps:$4 sm:$0xff]  }
 0x133   :  { %v2853_v9 = vadd.f32 %v4485_v1, %v2764_v18  ;;  %3543 = vmatprep.mubr.bf16.mxu1 %v5545_v8  ;;  %3632 = vmatprep.mubr.bf16.mxu0 %v5548_v56  ;;  %v5579_v8 = vld [vmem:[%s7165_s1 + $0x600] sm:$0xff]  }
 0x134   :  { %v4487_v31 = vpop.f32.mrf.mxu1  ;;  %v4545_v11 = vpop.f32.mrf.mxu0  ;;  %5023 = vmatpush3.bf16.msra.mxu1 %v5551_v57  ;;  %5095 = vmatprep.subr.bf16.mxu0 %v5608_v50  ;;  %v5566_v57 = vld [vmem:[%s7166_s0 + $0x43c] ss:$100 sps:$4 sm:$0xff]  }
 0x135   :  { %v6724_v60 = vadd.f32 %v4543_v3, %v2853_v9  ;;  %v4488_v20 = vadd.f32 %v4487_v31, %v4486_v13  ;;  %v4546_v21 = vadd.f32 %v4545_v11, %v4544_v6  ;;  %5024 = vmatprep.subr.bf16.mxu1 %v5558_v63  ;;  %5096 = vmatpush3.bf16.msra.mxu0 %v5559_v5 }
 0x136   :  { %v4489_v23 = vpop.f32.mrf.mxu1  ;;  %v4547_v24 = vpop.f32.mrf.mxu0  ;;  %5097 = vmatprep.subr.bf16.mxu0 %v5608_v50 }
 0x137   :  { %v2858_v26 = vadd.f32 %v4488_v20, %v2769_v10  ;;  %v5575_v20 = vld [vmem:[%s7166_s0 + $0x504] ss:$100 sps:$4 sm:$0xff]  }
 0x138   :  { %v4490_v28 = vpop.f32.mrf.mxu1  ;;  %v4548_v33 = vpop.f32.mrf.mxu0  ;;  %5025 = vmatpush3.bf16.msra.mxu1 %v5560_v30  ;;  %v5564_v30 = vld [vmem:[%s7166_s0 + $0x438] ss:$100 sps:$4 sm:$0xff]  }
 0x139   :  { %v6741_v61 = vadd.f32 %v4546_v21, %v2858_v26  ;;  %v4491_v35 = vadd.f32 %v4490_v28, %v4489_v23  ;;  %v4549_v36 = vadd.f32 %v4548_v33, %v4547_v24  ;;  %5026 = vmatprep.subr.bf16.mxu1 %v5567_v43  ;;  %5098 = vmatpush3.bf16.msra.mxu0 %v5568_v22  ;;  %v5572_v43 = vld [vmem:[%s7166_s0 + $0x4fc] ss:$100 sps:$4 sm:$0xff]  }
 0x13a   :  { %v4566_v15 = vpop.f32.mrf.mxu1  ;;  %3544 = vmatmul.mubr.bf16.gmra.mxu1 %v5543_v12  ;;  %v4624_v7 = vpop.f32.mrf.mxu0  ;;  %3633 = vmatmul.mubr.bf16.gmra.mxu0 %v5546_v14  ;;  %v5561_v14 = vld [vmem:[%s7166_s0 + $0x430] ss:$100 sps:$4 sm:$0xff]  }
 0x13b   :  { %v2861_v38 = vadd.f32 %v4491_v35, %v2772_v42  ;;  %3551 = vmatprep.mubr.bf16.mxu1 %v5554_v25  ;;  %3640 = vmatprep.mubr.bf16.mxu0 %v5557_v27 }
 0x13c   :  { %v4567_v39 = vpop.f32.mrf.mxu1  ;;  %v4625_v54 = vpop.f32.mrf.mxu0  ;;  %5027 = vmatpush3.bf16.msra.mxu1 %v5569_v34  ;;  %5099 = vmatprep.subr.bf16.mxu0 %v5608_v50 }
 0x13d   :  { %v6756_v46 = vadd.f32 %v4549_v36, %v2861_v38  ;;  %v4568_v48 = vadd.f32 %v4567_v39, %v4566_v15  ;;  %v4626_v49 = vadd.f32 %v4625_v54, %v4624_v7  ;;  %5028 = vmatprep.subr.bf16.mxu1 %v5576_v37  ;;  %5100 = vmatpush3.bf16.msra.mxu0 %v5577_v55  ;;  %v5570_v55 = vld [vmem:[%s7166_s0 + $0x4f8] ss:$100 sps:$4 sm:$0xff]   ;;  %v5573_v15 = vld [vmem:[%s7166_s0 + $0x500] ss:$100 sps:$4 sm:$0xff]  }
 0x13e   :  { %v4569_v52 = vpop.f32.mrf.mxu1  ;;  %v4627_v2 = vpop.f32.mrf.mxu0  ;;  %5101 = vmatprep.subr.bf16.mxu0 %v5608_v50  ;;  %v5582_v7 = vld [vmem:[%s7166_s0 + $0x5c] ss:$100 sps:$4 sm:$0xff]  }
 0x13f   :  { %v2988_v56 = vadd.f32 %v4568_v48, %v6558_v40 }
 0x140   :  { %v4570_v58 = vpop.f32.mrf.mxu1  ;;  %v4628_v62 = vpop.f32.mrf.mxu0  ;;  %5029 = vmatpush3.bf16.msra.mxu1 %v5578_v45 }
 0x141   :  { %v6772_v63 = vadd.f32 %v4626_v49, %v2988_v56  ;;  %v4571_v18 = vadd.f32 %v4570_v58, %v4569_v52  ;;  %v4629_v1 = vadd.f32 %v4628_v62, %v4627_v2  ;;  %5102 = vmatpush3.bf16.msra.mxu0 %v5579_v8  ;;  %v5580_v58 = vld [vmem:[%s7166_s0 + $0x58] ss:$100 sps:$4 sm:$0xff]  }
 0x142   :  { %v4572_v3 = vpop.f32.mrf.mxu1  ;;  %3552 = vmatmul.mubr.bf16.gmra.mxu1 %v5552_v44  ;;  %v4630_v5 = vpop.f32.mrf.mxu0  ;;  %3641 = vmatmul.mubr.bf16.gmra.mxu0 %v5555_v53 }
 0x143   :  { %v2991_v40 = vadd.f32 %v4571_v18, %v6563_v51  ;;  %3559 = vmatprep.mubr.bf16.mxu1 %v5563_v19  ;;  %3648 = vmatprep.mubr.bf16.mxu0 %v5566_v57  ;;  %v5586_v18 = vld [vmem:[%s7166_s0 + $0x124] ss:$100 sps:$4 sm:$0xff]  }
 0x144   :  { %v4573_v13 = vpop.f32.mrf.mxu1  ;;  %v4631_v6 = vpop.f32.mrf.mxu0 }
 0x145   :  { %v6775_v9 = vadd.f32 %v4629_v1, %v2991_v40  ;;  %v4574_v10 = vadd.f32 %v4573_v13, %v4572_v3  ;;  %v4632_v31 = vadd.f32 %v4631_v6, %v4630_v5 }
 0x146   :  { %v4575_v11 = vpop.f32.mrf.mxu1  ;;  %v4633_v12 = vpop.f32.mrf.mxu0 }
 0x147   :  { %v2996_v51 = vadd.f32 %v4574_v10, %v6579_v4 }
 0x148   :  { %v4576_v21 = vpop.f32.mrf.mxu1  ;;  %v4634_v22 = vpop.f32.mrf.mxu0 }
 0x149   :  { %v6790_v23 = vadd.f32 %v4632_v31, %v2996_v51  ;;  %v4577_v24 = vadd.f32 %v4576_v21, %v4575_v11  ;;  %v4635_v25 = vadd.f32 %v4634_v22, %v4633_v12  ;;  %v5590_v22 = vld [vmem:[%s7166_s0 + $0x1ec] ss:$100 sps:$4 sm:$0xff]  }
 0x14a   :  { %v4578_v26 = vpop.f32.mrf.mxu1  ;;  %3560 = vmatmul.mubr.bf16.gmra.mxu1 %v5561_v14  ;;  %v4636_v27 = vpop.f32.mrf.mxu0  ;;  %3649 = vmatmul.mubr.bf16.gmra.mxu0 %v5564_v30 }
 0x14b   :  { %v2999_v4 = vadd.f32 %v4577_v24, %v6586_v17  ;;  %3567 = vmatprep.mubr.bf16.mxu1 %v5572_v43  ;;  %3656 = vmatprep.mubr.bf16.mxu0 %v5575_v20  ;;  %v5584_v20 = vld [vmem:[%s7166_s0 + $0x120] ss:$100 sps:$4 sm:$0xff]  }
 0x14c   :  { %v4579_v42 = vpop.f32.mrf.mxu1  ;;  %v4637_v28 = vpop.f32.mrf.mxu0 }
 0x14d   :  { %v6793_v33 = vadd.f32 %v4635_v25, %v2999_v4  ;;  %v4580_v34 = vadd.f32 %v4579_v42, %v4578_v26  ;;  %v4638_v35 = vadd.f32 %v4637_v28, %v4636_v27 }
 0x14e   :  { %v4581_v36 = vpop.f32.mrf.mxu1  ;;  %v4639_v37 = vpop.f32.mrf.mxu0 }
 0x14f   :  { %v3004_v17 = vadd.f32 %v4580_v34, %v6599_v32 }
 0x150   :  { %v4582_v38 = vpop.f32.mrf.mxu1  ;;  %v4640_v39 = vpop.f32.mrf.mxu0 }
 0x151   :  { %v6805_v54 = vadd.f32 %v4638_v35, %v3004_v17  ;;  %v4583_v44 = vadd.f32 %v4582_v38, %v4581_v36  ;;  %v4641_v45 = vadd.f32 %v4640_v39, %v4639_v37  ;;  %v5594_v39 = vld [vmem:[%s7166_s0 + $0x2b4] ss:$100 sps:$4 sm:$0xff]  }
 0x152   :  { %v4584_v48 = vpop.f32.mrf.mxu1  ;;  %3568 = vmatmul.mubr.bf16.gmra.mxu1 %v5570_v55  ;;  %v4642_v49 = vpop.f32.mrf.mxu0  ;;  %3657 = vmatmul.mubr.bf16.gmra.mxu0 %v5573_v15 }
 0x153   :  { %v3007_v8 = vadd.f32 %v4583_v44, %v6606_v41  ;;  %3697 = vmatprep.mubr.bf16.mxu1 %v5582_v7  ;;  %5103 = vmatprep.mubr.msk.bf16.mxu0 %vm5609_vm0, %v5608_v50  ;;  %v5583_v41 = vld [vmem:[%s7166_s0 + $0x60] ss:$100 sps:$4 sm:$0xff]   ;;  %v5588_v7 = vld [vmem:[%s7166_s0 + $0x1e8] ss:$100 sps:$4 sm:$0xff]  }
 0x154   :  { %v4585_v32 = vpop.f32.mrf.mxu1  ;;  %v4643_v52 = vpop.f32.mrf.mxu0 }
 0x155   :  { %v6810_v2 = vadd.f32 %v4641_v45, %v3007_v8  ;;  %v4586_v53 = vadd.f32 %v4585_v32, %v4584_v48  ;;  %v4644_v56 = vadd.f32 %v4643_v52, %v4642_v49 }
 0x156   :  { %v4587_v19 = vpop.f32.mrf.mxu1  ;;  %v4645_v57 = vpop.f32.mrf.mxu0 }
 0x157   :  { %v3012_v62 = vadd.f32 %v4586_v53, %v6625_v59 }
 0x158   :  { %v4588_v1 = vpop.f32.mrf.mxu1  ;;  %v4646_v3 = vpop.f32.mrf.mxu0 }
 0x159   :  { %v6822_v5 = vadd.f32 %v4644_v56, %v3012_v62  ;;  %v4589_v40 = vadd.f32 %v4588_v1, %v4587_v19  ;;  %v4647_v13 = vadd.f32 %v4646_v3, %v4645_v57  ;;  %v5598_v3 = vld [vmem:[%s7166_s0 + $0x37c] ss:$100 sps:$4 sm:$0xff]  }
 0x15a   :  { %v4590_v6 = vpop.f32.mrf.mxu1  ;;  %3698 = vmatmul.mubr.bf16.vlgmr.msra.gmra.mxu1 %v5580_v58  ;;  %v4648_v10 = vpop.f32.mrf.mxu0  ;;  %5104 = vmatmul.mubr.bf16.vlgmr.msra.gmra.mxu0 %v5583_v41 }
 0x15b   :  { %v3015_v31 = vadd.f32 %v4589_v40, %v6647_v16  ;;  %3705 = vmatprep.mubr.bf16.mxu1 %v5586_v18  ;;  %5107 = vmatprep.mubr.msk.bf16.mxu0 %vm5609_vm0, %v5608_v50  ;;  %v5587_v16 = vld [vmem:[%s7166_s0 + $0x128] ss:$100 sps:$4 sm:$0xff]   ;;  %v5592_v18 = vld [vmem:[%s7166_s0 + $0x2b0] ss:$100 sps:$4 sm:$0xff]  }
 0x15c   :  { %v4591_v59 = vpop.f32.mrf.mxu1  ;;  %v4649_v11 = vpop.f32.mrf.mxu0 }
 0x15d   :  { %v6827_v12 = vadd.f32 %v4647_v13, %v3015_v31  ;;  %v4592_v14 = vadd.f32 %v4591_v59, %v4590_v6  ;;  %v4650_v30 = vadd.f32 %v4649_v11, %v4648_v10 }
 0x15e   :  { %v4593_v51 = vpop.f32.mrf.mxu1  ;;  %v4651_v43 = vpop.f32.mrf.mxu0 }
 0x15f   :  { %v3020_v21 = vadd.f32 %v4592_v14, %v6664_v29 }
 0x160   :  { %v4594_v24 = vpop.f32.mrf.mxu1  ;;  %v4652_v25 = vpop.f32.mrf.mxu0 }
 0x161   :  { %v6839_v26 = vadd.f32 %v4650_v30, %v3020_v21  ;;  %v4595_v27 = vadd.f32 %v4594_v24, %v4593_v51  ;;  %v4653_v4 = vadd.f32 %v4652_v25, %v4651_v43  ;;  %v5602_v25 = vld [vmem:[%s7166_s0 + $0x444] ss:$100 sps:$4 sm:$0xff]  }
 0x162   :  { %v4596_v42 = vpop.f32.mrf.mxu1  ;;  %3706 = vmatmul.mubr.bf16.gmra.mxu1 %v5584_v20  ;;  %v4654_v28 = vpop.f32.mrf.mxu0  ;;  %5108 = vmatmul.mubr.bf16.gmra.mxu0 %v5587_v16 }
 0x163   :  { %v3023_v34 = vadd.f32 %v4595_v27, %v6684_v47  ;;  %3713 = vmatprep.mubr.bf16.mxu1 %v5590_v22  ;;  %5111 = vmatprep.mubr.msk.bf16.mxu0 %vm5609_vm0, %v5608_v50  ;;  %v5591_v47 = vld [vmem:[%s7166_s0 + $0x1f0] ss:$100 sps:$4 sm:$0xff]   ;;  %v5596_v22 = vld [vmem:[%s7166_s0 + $0x378] ss:$100 sps:$4 sm:$0xff]  }
 0x164   :  { %v4597_v29 = vpop.f32.mrf.mxu1  ;;  %v4655_v35 = vpop.f32.mrf.mxu0 }
 0x165   :  { %v6844_v36 = vadd.f32 %v4653_v4, %v3023_v34  ;;  %v4598_v37 = vadd.f32 %v4597_v29, %v4596_v42  ;;  %v4656_v55 = vadd.f32 %v4655_v35, %v4654_v28 }
 0x166   :  { %v4599_v15 = vpop.f32.mrf.mxu1  ;;  %v4657_v17 = vpop.f32.mrf.mxu0 }
 0x167   :  { %v3028_v38 = vadd.f32 %v4598_v37, %v6704_v0 }
 0x168   :  { %v4600_v44 = vpop.f32.mrf.mxu1  ;;  %v4658_v45 = vpop.f32.mrf.mxu0 }
 0x169   :  { %v6856_v48 = vadd.f32 %v4656_v55, %v3028_v38  ;;  %v4601_v49 = vadd.f32 %v4600_v44, %v4599_v15  ;;  %v4659_v8 = vadd.f32 %v4658_v45, %v4657_v17  ;;  %v5606_v45 = vld [vmem:[%s7166_s0 + $0x50c] ss:$100 sps:$4 sm:$0xff]  }
 0x16a   :  { %v4602_v32 = vpop.f32.mrf.mxu1  ;;  %3714 = vmatmul.mubr.bf16.gmra.mxu1 %v5588_v7  ;;  %v4660_v52 = vpop.f32.mrf.mxu0  ;;  %5112 = vmatmul.mubr.bf16.gmra.mxu0 %v5591_v47 }
 0x16b   :  { %v3031_v53 = vadd.f32 %v4601_v49, %v6724_v60  ;;  %3721 = vmatprep.mubr.bf16.mxu1 %v5594_v39  ;;  %5115 = vmatprep.mubr.msk.bf16.mxu0 %vm5609_vm0, %v5608_v50  ;;  %v5595_v60 = vld [vmem:[%s7166_s0 + $0x2b8] ss:$100 sps:$4 sm:$0xff]   ;;  %v5600_v39 = vld [vmem:[%s7166_s0 + $0x440] ss:$100 sps:$4 sm:$0xff]  }
 0x16c   :  { %v4603_v0 = vpop.f32.mrf.mxu1  ;;  %v4661_v56 = vpop.f32.mrf.mxu0 }
 0x16d   :  { %v6861_v19 = vadd.f32 %v4659_v8, %v3031_v53  ;;  %v4604_v57 = vadd.f32 %v4603_v0, %v4602_v32  ;;  %v4662_v58 = vadd.f32 %v4661_v56, %v4660_v52 }
 0x16e   :  { %v4605_v41 = vpop.f32.mrf.mxu1  ;;  %v4663_v62 = vpop.f32.mrf.mxu0 }
 0x16f   :  { %v3036_v1 = vadd.f32 %v4604_v57, %v6741_v61 }
 0x170   :  { %v4606_v40 = vpop.f32.mrf.mxu1  ;;  %v4664_v13 = vpop.f32.mrf.mxu0 }
 0x171   :  { %v6873_v6 = vadd.f32 %v4662_v58, %v3036_v1  ;;  %v4607_v10 = vadd.f32 %v4606_v40, %v4605_v41  ;;  %v4665_v31 = vadd.f32 %v4664_v13, %v4663_v62 }
 0x172   :  { %v4682_v59 = vpop.f32.mrf.mxu1  ;;  %3722 = vmatmul.mubr.bf16.gmra.mxu1 %v5592_v18  ;;  %v4740_v11 = vpop.f32.mrf.mxu0  ;;  %5116 = vmatmul.mubr.bf16.gmra.mxu0 %v5595_v60 }
 0x173   :  { %v3039_v14 = vadd.f32 %v4607_v10, %v6756_v46  ;;  %3729 = vmatprep.mubr.bf16.mxu1 %v5598_v3  ;;  %5119 = vmatprep.mubr.msk.bf16.mxu0 %vm5609_vm0, %v5608_v50  ;;  %v5599_v46 = vld [vmem:[%s7166_s0 + $0x380] ss:$100 sps:$4 sm:$0xff]   ;;  %v5604_v3 = vld [vmem:[%s7166_s0 + $0x508] ss:$100 sps:$4 sm:$0xff]  }
 0x174   :  { %v4683_v61 = vpop.f32.mrf.mxu1  ;;  %v4741_v30 = vpop.f32.mrf.mxu0 }
 0x175   :  { %v6878_v51 = vadd.f32 %v4665_v31, %v3039_v14  ;;  %v4684_v43 = vadd.f32 %v4683_v61, %v4682_v59  ;;  %v4742_v20 = vadd.f32 %v4741_v30, %v4740_v11 }
 0x176   :  { %v4685_v16 = vpop.f32.mrf.mxu1  ;;  %v4743_v21 = vpop.f32.mrf.mxu0 }
 0x177   :  { %v3166_v24 = vadd.f32 %v4684_v43, %v6772_v63 }
 0x178   :  { %v4686_v27 = vpop.f32.mrf.mxu1  ;;  %v4744_v4 = vpop.f32.mrf.mxu0 }
 0x179   :  { %v6890_v42 = vadd.f32 %v4742_v20, %v3166_v24  ;;  %v4687_v28 = vadd.f32 %v4686_v27, %v4685_v16  ;;  %v4745_v34 = vadd.f32 %v4744_v4, %v4743_v21 }
 0x17a   :  { %v4688_v29 = vpop.f32.mrf.mxu1  ;;  %3730 = vmatmul.mubr.bf16.gmra.mxu1 %v5596_v22  ;;  %v4746_v35 = vpop.f32.mrf.mxu0  ;;  %5120 = vmatmul.mubr.bf16.gmra.mxu0 %v5599_v46 }
 0x17b   :  { %v3169_v37 = vadd.f32 %v4687_v28, %v6775_v9  ;;  %3737 = vmatprep.mubr.bf16.mxu1 %v5602_v25  ;;  %5123 = vmatprep.mubr.msk.bf16.mxu0 %vm5609_vm0, %v5608_v50  ;;  %v5603_v9 = vld [vmem:[%s7166_s0 + $0x448] ss:$100 sps:$4 sm:$0xff]  }
 0x17c   :  { %v4689_v63 = vpop.f32.mrf.mxu1  ;;  %v4747_v55 = vpop.f32.mrf.mxu0 }
 0x17d   :  { %v6895_v15 = vadd.f32 %v4745_v34, %v3169_v37  ;;  %v4690_v17 = vadd.f32 %v4689_v63, %v4688_v29  ;;  %v4748_v7 = vadd.f32 %v4747_v55, %v4746_v35 }
 0x17e   :  { %v4691_v47 = vpop.f32.mrf.mxu1  ;;  %v4749_v38 = vpop.f32.mrf.mxu0 }
 0x17f   :  { %v3174_v44 = vadd.f32 %v4690_v17, %v6790_v23 }
 0x180   :  { %v4692_v49 = vpop.f32.mrf.mxu1  ;;  %v4750_v8 = vpop.f32.mrf.mxu0 }
 0x181   :  { %v6907_v32 = vadd.f32 %v4748_v7, %v3174_v44  ;;  %v4693_v52 = vadd.f32 %v4692_v49, %v4691_v47  ;;  %v4751_v53 = vadd.f32 %v4750_v8, %v4749_v38 }
 0x182   :  { %v4694_v0 = vpop.f32.mrf.mxu1  ;;  %3738 = vmatmul.mubr.bf16.gmra.mxu1 %v5600_v39  ;;  %v4752_v56 = vpop.f32.mrf.mxu0  ;;  %5124 = vmatmul.mubr.bf16.gmra.mxu0 %v5603_v9 }
 0x183   :  { %v3177_v57 = vadd.f32 %v4693_v52, %v6793_v33  ;;  %3745 = vmatprep.mubr.bf16.mxu1 %v5606_v45  ;;  %5127 = vmatprep.mubr.msk.bf16.mxu0 %vm5609_vm0, %v5608_v50  ;;  %v5607_v33 = vld [vmem:[%s7166_s0 + $0x510] ss:$100 sps:$4 sm:$0xff]  }
 0x184   :  { %v4695_v23 = vpop.f32.mrf.mxu1  ;;  %v4753_v58 = vpop.f32.mrf.mxu0 }
 0x185   :  { %v6912_v41 = vadd.f32 %v4751_v53, %v3177_v57  ;;  %v4696_v62 = vadd.f32 %v4695_v23, %v4694_v0  ;;  %v4754_v18 = vadd.f32 %v4753_v58, %v4752_v56 }
 0x186   :  { %v4697_v60 = vpop.f32.mrf.mxu1  ;;  %v4755_v1 = vpop.f32.mrf.mxu0 }
 0x187   :  { %v3182_v40 = vadd.f32 %v4696_v62, %v6805_v54 }
 0x188   :  { %v4698_v13 = vpop.f32.mrf.mxu1  ;;  %v4756_v50 = vpop.f32.mrf.mxu0 }
 0x189   :  { %v6921_v10 = vadd.f32 %v4754_v18, %v3182_v40  ;;  %v4699_v31 = vadd.f32 %v4698_v13, %v4697_v60  ;;  %v4757_v59 = vadd.f32 %v4756_v50, %v4755_v1 }
 0x18a   :  { %v4700_v11 = vpop.f32.mrf.mxu1  ;;  %3746 = vmatmul.mubr.bf16.gmra.mxu1 %v5604_v3  ;;  %v4758_v14 = vpop.f32.mrf.mxu0  ;;  %5128 = vmatmul.mubr.bf16.gmra.mxu0 %v5607_v33 }
 0x18b   :  { %v3185_v61 = vadd.f32 %v4699_v31, %v6810_v2 }
 0x18c   :  { %v4701_v30 = vpop.f32.mrf.mxu1  ;;  %v4759_v43 = vpop.f32.mrf.mxu0 }
 0x18d   :  { %v6924_v20 = vadd.f32 %v4757_v59, %v3185_v61  ;;  %v4702_v16 = vadd.f32 %v4701_v30, %v4700_v11  ;;  %v4760_v21 = vadd.f32 %v4759_v43, %v4758_v14 }
 0x18e   :  { %v4703_v22 = vpop.f32.mrf.mxu1  ;;  %v4761_v54 = vpop.f32.mrf.mxu0 }
 0x18f   :  { %v3190_v46 = vadd.f32 %v4702_v16, %v6822_v5 }
 0x190   :  { %v4704_v24 = vpop.f32.mrf.mxu1  ;;  %v4762_v25 = vpop.f32.mrf.mxu0 }
 0x191   :  { %v6927_v27 = vadd.f32 %v4760_v21, %v3190_v46  ;;  %v4705_v4 = vadd.f32 %v4704_v24, %v4703_v22  ;;  %v4763_v28 = vadd.f32 %v4762_v25, %v4761_v54 }
 0x192   :  { %v4706_v34 = vpop.f32.mrf.mxu1  ;;  %v4764_v29 = vpop.f32.mrf.mxu0 }
 0x193   :  { %v3193_v2 = vadd.f32 %v4705_v4, %v6827_v12 }
 0x194   :  { %v4707_v35 = vpop.f32.mrf.mxu1  ;;  %v4765_v37 = vpop.f32.mrf.mxu0 }
 0x195   :  { %v6930_v63 = vadd.f32 %v4763_v28, %v3193_v2  ;;  %v4708_v55 = vadd.f32 %v4707_v35, %v4706_v34  ;;  %v4766_v17 = vadd.f32 %v4765_v37, %v4764_v29 }
 0x196   :  { %v4709_v7 = vpop.f32.mrf.mxu1  ;;  %v4767_v47 = vpop.f32.mrf.mxu0 }
 0x197   :  { %v3198_v5 = vadd.f32 %v4708_v55, %v6839_v26 }
 0x198   :  { %v4710_v38 = vpop.f32.mrf.mxu1  ;;  %v4768_v39 = vpop.f32.mrf.mxu0 }
 0x199   :  { %v6933_v9 = vadd.f32 %v4766_v17, %v3198_v5  ;;  %v4711_v44 = vadd.f32 %v4710_v38, %v4709_v7  ;;  %v4769_v45 = vadd.f32 %v4768_v39, %v4767_v47 }
 0x19a   :  { %v4712_v49 = vpop.f32.mrf.mxu1  ;;  %v4770_v8 = vpop.f32.mrf.mxu0 }
 0x19b   :  { %v3201_v12 = vadd.f32 %v4711_v44, %v6844_v36 }
 0x19c   :  { %v4713_v52 = vpop.f32.mrf.mxu1  ;;  %v4771_v53 = vpop.f32.mrf.mxu0 }
 0x19d   :  { %v6936_v0 = vadd.f32 %v4769_v45, %v3201_v12  ;;  %v4714_v56 = vadd.f32 %v4713_v52, %v4712_v49  ;;  %v4772_v57 = vadd.f32 %v4771_v53, %v4770_v8 }
 0x19e   :  { %v4715_v23 = vpop.f32.mrf.mxu1  ;;  %v4773_v58 = vpop.f32.mrf.mxu0 }
 0x19f   :  { %v3206_v26 = vadd.f32 %v4714_v56, %v6856_v48 }
 0x1a0   :  { %v4716_v62 = vpop.f32.mrf.mxu1  ;;  %v4774_v18 = vpop.f32.mrf.mxu0 }
 0x1a1   :  { %v6939_v60 = vadd.f32 %v4772_v57, %v3206_v26  ;;  %v4717_v1 = vadd.f32 %v4716_v62, %v4715_v23  ;;  %v4775_v3 = vadd.f32 %v4774_v18, %v4773_v58 }
 0x1a2   :  { %v4718_v33 = vpop.f32.mrf.mxu1  ;;  %v4776_v40 = vpop.f32.mrf.mxu0 }
 0x1a3   :  { %v3209_v36 = vadd.f32 %v4717_v1, %v6861_v19 }
 0x1a4   :  { %v4719_v13 = vpop.f32.mrf.mxu1  ;;  %v4777_v50 = vpop.f32.mrf.mxu0 }
 0x1a5   :  { %v6942_v31 = vadd.f32 %v4775_v3, %v3209_v36  ;;  %v4720_v59 = vadd.f32 %v4719_v13, %v4718_v33  ;;  %v4778_v11 = vadd.f32 %v4777_v50, %v4776_v40 }
 0x1a6   :  { %v4721_v14 = vpop.f32.mrf.mxu1  ;;  %v4779_v61 = vpop.f32.mrf.mxu0 }
 0x1a7   :  { %v3214_v48 = vadd.f32 %v4720_v59, %v6873_v6 }
 0x1a8   :  { %v4722_v30 = vpop.f32.mrf.mxu1  ;;  %v4780_v43 = vpop.f32.mrf.mxu0 }
 0x1a9   :  { %v6945_v16 = vadd.f32 %v4778_v11, %v3214_v48  ;;  %v4723_v21 = vadd.f32 %v4722_v30, %v4721_v14  ;;  %v4781_v22 = vadd.f32 %v4780_v43, %v4779_v61 }
 0x1aa   :  { %v4798_v54 = vpop.f32.mrf.mxu1  ;;  %v4856_v46 = vpop.f32.mrf.mxu0 }
 0x1ab   :  { %v3217_v19 = vadd.f32 %v4723_v21, %v6878_v51 }
 0x1ac   :  { %v4799_v24 = vpop.f32.mrf.mxu1  ;;  %v4857_v25 = vpop.f32.mrf.mxu0 }
 0x1ad   :  { %v6948_v4 = vadd.f32 %v4781_v22, %v3217_v19  ;;  %v4800_v28 = vadd.f32 %v4799_v24, %v4798_v54  ;;  %v4858_v34 = vadd.f32 %v4857_v25, %v4856_v46 }
 0x1ae   :  { %v4801_v29 = vpop.f32.mrf.mxu1  ;;  %v4859_v2 = vpop.f32.mrf.mxu0 }
 0x1af   :  { %v3344_v6 = vadd.f32 %v4800_v28, %v6890_v42 }
 0x1b0   :  { %v4802_v35 = vpop.f32.mrf.mxu1  ;;  %v4860_v37 = vpop.f32.mrf.mxu0 }
 0x1b1   :  { %v6951_v55 = vadd.f32 %v4858_v34, %v3344_v6  ;;  %v4803_v17 = vadd.f32 %v4802_v35, %v4801_v29  ;;  %v4861_v7 = vadd.f32 %v4860_v37, %v4859_v2 }
 0x1b2   :  { %v4804_v47 = vpop.f32.mrf.mxu1  ;;  %v4862_v5 = vpop.f32.mrf.mxu0 }
 0x1b3   :  { %v3347_v51 = vadd.f32 %v4803_v17, %v6895_v15 }
 0x1b4   :  { %v4805_v38 = vpop.f32.mrf.mxu1  ;;  %v4863_v39 = vpop.f32.mrf.mxu0 }
 0x1b5   :  { %v6954_v44 = vadd.f32 %v4861_v7, %v3347_v51  ;;  %v4806_v45 = vadd.f32 %v4805_v38, %v4804_v47  ;;  %v4864_v49 = vadd.f32 %v4863_v39, %v4862_v5 }
 0x1b6   :  { %v4807_v8 = vpop.f32.mrf.mxu1  ;;  %v4865_v12 = vpop.f32.mrf.mxu0 }
 0x1b7   :  { %v3352_v42 = vadd.f32 %v4806_v45, %v6907_v32 }
 0x1b8   :  { %v4808_v52 = vpop.f32.mrf.mxu1  ;;  %v4866_v53 = vpop.f32.mrf.mxu0 }
 0x1b9   :  { %v6957_v56 = vadd.f32 %v4864_v49, %v3352_v42  ;;  %v4809_v57 = vadd.f32 %v4808_v52, %v4807_v8  ;;  %v4867_v23 = vadd.f32 %v4866_v53, %v4865_v12 }
 0x1ba   :  { %v4810_v58 = vpop.f32.mrf.mxu1  ;;  %v4868_v26 = vpop.f32.mrf.mxu0 }
 0x1bb   :  { %v3355_v15 = vadd.f32 %v4809_v57, %v6912_v41 }
 0x1bc   :  { %v4811_v62 = vpop.f32.mrf.mxu1  ;;  %v4869_v18 = vpop.f32.mrf.mxu0 }
 0x1bd   :  { %v6960_v1 = vadd.f32 %v4867_v23, %v3355_v15  ;;  %v4812_v3 = vadd.f32 %v4811_v62, %v4810_v58  ;;  %v4870_v33 = vadd.f32 %v4869_v18, %v4868_v26 }
 0x1be   :  { %v4813_v40 = vpop.f32.mrf.mxu1  ;;  %v4871_v36 = vpop.f32.mrf.mxu0 }
 0x1bf   :  { %v3360_v32 = vadd.f32 %v4812_v3, %v6921_v10 }
 0x1c0   :  { %v4814_v13 = vpop.f32.mrf.mxu1  ;;  %v4872_v50 = vpop.f32.mrf.mxu0 }
 0x1c1   :  { %v6963_v59 = vadd.f32 %v4870_v33, %v3360_v32  ;;  %v4815_v11 = vadd.f32 %v4814_v13, %v4813_v40  ;;  %v4873_v14 = vadd.f32 %v4872_v50, %v4871_v36 }
 0x1c2   :  { %v4816_v61 = vpop.f32.mrf.mxu1  ;;  %v4874_v48 = vpop.f32.mrf.mxu0 }
 0x1c3   :  { %v3363_v41 = vadd.f32 %v4815_v11, %v6924_v20 }
 0x1c4   :  { %v4817_v30 = vpop.f32.mrf.mxu1  ;;  %v4875_v43 = vpop.f32.mrf.mxu0 }
 0x1c5   :  { %v6966_v21 = vadd.f32 %v4873_v14, %v3363_v41  ;;  %v4818_v22 = vadd.f32 %v4817_v30, %v4816_v61  ;;  %v4876_v54 = vadd.f32 %v4875_v43, %v4874_v48 }
 0x1c6   :  { %v4819_v46 = vpop.f32.mrf.mxu1  ;;  %v4877_v19 = vpop.f32.mrf.mxu0 }
 0x1c7   :  { %v3368_v10 = vadd.f32 %v4818_v22, %v6927_v27 }
 0x1c8   :  { %v4820_v24 = vpop.f32.mrf.mxu1  ;;  %v4878_v25 = vpop.f32.mrf.mxu0 }
 0x1c9   :  { %v6969_v28 = vadd.f32 %v4876_v54, %v3368_v10  ;;  %v4821_v34 = vadd.f32 %v4820_v24, %v4819_v46  ;;  %v4879_v29 = vadd.f32 %v4878_v25, %v4877_v19 }
 0x1ca   :  { %v4822_v2 = vpop.f32.mrf.mxu1  ;;  %v4880_v6 = vpop.f32.mrf.mxu0 }
 0x1cb   :  { %v3371_v20 = vadd.f32 %v4821_v34, %v6930_v63 }
 0x1cc   :  { %v4823_v35 = vpop.f32.mrf.mxu1  ;;  %v4881_v37 = vpop.f32.mrf.mxu0 }
 0x1cd   :  { %v6972_v17 = vadd.f32 %v4879_v29, %v3371_v20  ;;  %v4824_v7 = vadd.f32 %v4823_v35, %v4822_v2  ;;  %v4882_v47 = vadd.f32 %v4881_v37, %v4880_v6 }
 0x1ce   :  { %v4825_v5 = vpop.f32.mrf.mxu1  ;;  %v4883_v51 = vpop.f32.mrf.mxu0 }
 0x1cf   :  { %v3376_v27 = vadd.f32 %v4824_v7, %v6933_v9 }
 0x1d0   :  { %v4826_v38 = vpop.f32.mrf.mxu1  ;;  %v4884_v39 = vpop.f32.mrf.mxu0 }
 0x1d1   :  { %v6975_v45 = vadd.f32 %v4882_v47, %v3376_v27  ;;  %v4827_v49 = vadd.f32 %v4826_v38, %v4825_v5  ;;  %v4885_v8 = vadd.f32 %v4884_v39, %v4883_v51 }
 0x1d2   :  { %v4828_v12 = vpop.f32.mrf.mxu1  ;;  %v4886_v42 = vpop.f32.mrf.mxu0 }
 0x1d3   :  { %v3379_v63 = vadd.f32 %v4827_v49, %v6936_v0 }
 0x1d4   :  { %v4829_v52 = vpop.f32.mrf.mxu1  ;;  %v4887_v53 = vpop.f32.mrf.mxu0 }
 0x1d5   :  { %v6978_v57 = vadd.f32 %v4885_v8, %v3379_v63  ;;  %v4830_v23 = vadd.f32 %v4829_v52, %v4828_v12  ;;  %v4888_v58 = vadd.f32 %v4887_v53, %v4886_v42 }
 0x1d6   :  { %v4831_v26 = vpop.f32.mrf.mxu1  ;;  %v4889_v15 = vpop.f32.mrf.mxu0 }
 0x1d7   :  { %v3384_v9 = vadd.f32 %v4830_v23, %v6939_v60 }
 0x1d8   :  { %v4832_v62 = vpop.f32.mrf.mxu1  ;;  %v4890_v18 = vpop.f32.mrf.mxu0 }
 0x1d9   :  { %v6981_v3 = vadd.f32 %v4888_v58, %v3384_v9  ;;  %v4833_v33 = vadd.f32 %v4832_v62, %v4831_v26  ;;  %v4891_v40 = vadd.f32 %v4890_v18, %v4889_v15 }
 0x1da   :  { %v4834_v36 = vpop.f32.mrf.mxu1  ;;  %v4892_v32 = vpop.f32.mrf.mxu0 }
 0x1db   :  { %7169 = vst [vmem:[#allocation2_spill] sm:$0xff] %v6981_v3  ;;  %v3387_v0 = vadd.f32 %v4833_v33, %v6942_v31 }
 0x1dc   :  { %v4835_v13 = vpop.f32.mrf.mxu1  ;;  %v4893_v50 = vpop.f32.mrf.mxu0 }
 0x1dd   :  { %v6984_v11 = vadd.f32 %v4891_v40, %v3387_v0  ;;  %v4836_v14 = vadd.f32 %v4835_v13, %v4834_v36  ;;  %v4894_v61 = vadd.f32 %v4893_v50, %v4892_v32 }
 0x1de   :  { %v4837_v48 = vpop.f32.mrf.mxu1  ;;  %v4895_v41 = vpop.f32.mrf.mxu0 }
 0x1df   :  { %7170 = vst [vmem:[#allocation3_spill] sm:$0xff] %v6984_v11  ;;  %v3392_v60 = vadd.f32 %v4836_v14, %v6945_v16 }
 0x1e0   :  { %v4838_v30 = vpop.f32.mrf.mxu1  ;;  %v4896_v43 = vpop.f32.mrf.mxu0 }
 0x1e1   :  { %v6987_v22 = vadd.f32 %v4894_v61, %v3392_v60  ;;  %v4839_v54 = vadd.f32 %v4838_v30, %v4837_v48  ;;  %v4897_v46 = vadd.f32 %v4896_v43, %v4895_v41 }
 0x1e2   :  { %v4914_v19 = vpop.f32.mrf.mxu1  ;;  %v4972_v10 = vpop.f32.mrf.mxu0 }
 0x1e3   :  { %7171 = vst [vmem:[#allocation4_spill] sm:$0xff] %v6987_v22  ;;  %v3395_v31 = vadd.f32 %v4839_v54, %v6948_v4 }
 0x1e4   :  { %v4915_v24 = vpop.f32.mrf.mxu1  ;;  %v4973_v25 = vpop.f32.mrf.mxu0 }
 0x1e5   :  { %v6990_v34 = vadd.f32 %v4897_v46, %v3395_v31  ;;  %v4916_v11 = vadd.f32 %v4915_v24, %v4914_v19 }
 0x1e6   :  { %v4917_v29 = vpop.f32.mrf.mxu1  ;;  %v6992_v2 = vpop.f32.mrf.mxu0 }
 0x1e7   :  { %7172 = vst [vmem:[#allocation5_spill] sm:$0xff] %v6990_v34 }
 0x1e8   :  { %v4918_v6 = vpop.f32.mrf.mxu1  ;;  %v6994_v20 = vpop.f32.mrf.mxu0 }
 0x1ea   :  { %v4920_v16 = vpop.f32.mrf.mxu1  ;;  %v6996_v35 = vpop.f32.mrf.mxu0 }
 0x1ec   :  { %v4921_v37 = vpop.f32.mrf.mxu1  ;;  %v6998_v7 = vpop.f32.mrf.mxu0 }
 0x1ed   :  { %v4922_v19 = vadd.f32 %v4921_v37, %v4920_v16 }
 0x1ee   :  { %v4923_v47 = vpop.f32.mrf.mxu1  ;;  %v7000_v5 = vpop.f32.mrf.mxu0 }
 0x1f0   :  { %v4924_v4 = vpop.f32.mrf.mxu1  ;;  %v7002_v51 = vpop.f32.mrf.mxu0 }
 0x1f2   :  { %v7004_v27 = vpop.f32.mrf.mxu1  ;;  %v7006_v38 = vpop.f32.mrf.mxu0 }
 0x1f4   :  { %v7008_v39 = vpop.f32.mrf.mxu1  ;;  %v7010_v49 = vpop.f32.mrf.mxu0 }
 0x1f6   :  { %v7012_v8 = vpop.f32.mrf.mxu1  ;;  %v7014_v12 = vpop.f32.mrf.mxu0 }
 0x1f8   :  { %v7016_v42 = vpop.f32.mrf.mxu1  ;;  %v7018_v63 = vpop.f32.mrf.mxu0 }
 0x1fa   :  { %v7020_v52 = vpop.f32.mrf.mxu1  ;;  %v7022_v53 = vpop.f32.mrf.mxu0 }
 0x1fc   :  { %v7024_v23 = vpop.f32.mrf.mxu1  ;;  %v7026_v58 = vpop.f32.mrf.mxu0 }
 0x1fe   :  { %v7028_v26 = vpop.f32.mrf.mxu1  ;;  %v7030_v15 = vpop.f32.mrf.mxu0 }
 0x200   :  { %v7032_v9 = vpop.f32.mrf.mxu1  ;;  %v7034_v62 = vpop.f32.mrf.mxu0 }
 0x202   :  { %v7036_v18 = vpop.f32.mrf.mxu1  ;;  %v7038_v33 = vpop.f32.mrf.mxu0 }
 0x204   :  { %v7040_v40 = vpop.f32.mrf.mxu1  ;;  %v7042_v36 = vpop.f32.mrf.mxu0 }
 0x206   :  { %v7044_v32 = vpop.f32.mrf.mxu1  ;;  %v7046_v0 = vpop.f32.mrf.mxu0 }
 0x207   :  { %7173 = vst [vmem:[#allocation6_spill] sm:$0xff] %v7046_v0 }
 0x208   :  { %v7048_v13 = vpop.f32.mrf.mxu1  ;;  %v7050_v50 = vpop.f32.mrf.mxu0 }
 0x209   :  { %7174 = vst [vmem:[#allocation7_spill] sm:$0xff] %v7050_v50 }
 0x20a   :  { %v7052_v14 = vpop.f32.mrf.mxu1  ;;  %v7054_v61 = vpop.f32.mrf.mxu0 }
 0x20b   :  { %7175 = vst [vmem:[#allocation8_spill] sm:$0xff] %v7052_v14  ;;  %7176 = vst [vmem:[#allocation9_spill] sm:$0xff] %v7054_v61 }
 0x20c   :  { %v7056_v48 = vpop.f32.mrf.mxu1  ;;  %v7058_v41 = vpop.f32.mrf.mxu0 }
 0x20d   :  { %7177 = vst [vmem:[#allocation10_spill] sm:$0xff] %v7056_v48  ;;  %7178 = vst [vmem:[#allocation11_spill] sm:$0xff] %v7058_v41 }
 0x20e   :  { %v7060_v60 = vpop.f32.mrf.mxu1  ;;  %v7062_v30 = vpop.f32.mrf.mxu0 }
 0x20f   :  { %7179 = vst [vmem:[#allocation12_spill] sm:$0xff] %v7060_v60  ;;  %7180 = vst [vmem:[#allocation13_spill] sm:$0xff] %v7062_v30  ;;  %v4919_v60 = vadd.f32 %v4918_v6, %v4917_v29 }
 0x210   :  { %v7064_v43 = vpop.f32.mrf.mxu1  ;;  %v7066_v54 = vpop.f32.mrf.mxu0 }
 0x211   :  { %7181 = vst [vmem:[#allocation14_spill] sm:$0xff] %v7064_v43  ;;  %7182 = vst [vmem:[#allocation15_spill] sm:$0xff] %v7066_v54  ;;  %v3522_v43 = vadd.f32 %v4916_v11, %v6951_v55  ;;  %v4974_v54 = vadd.f32 %v4973_v25, %v4972_v10  ;;  %v3530_v10 = vadd.f32 %v4922_v19, %v6957_v56 }
 0x212   :  { %v7068_v46 = vpop.f32.mrf.mxu1  ;;  %v7070_v31 = vpop.f32.mrf.mxu0  ;;  %v4980_v25 = vadd.f32 %v6998_v7, %v6996_v35  ;;  %v4983_v56 = vadd.f32 %v7002_v51, %v7000_v5 }
 0x213   :  { %7183 = vst [vmem:[#allocation16_spill] sm:$0xff] %v7068_v46  ;;  %7184 = vst [vmem:[#allocation17_spill] sm:$0xff] %v7070_v31 }
 0x214   :  { %v7072_v34 = vpop.f32.mrf.mxu1  ;;  %v7074_v22 = vpop.f32.mrf.mxu0 }
 0x215   :  { %7185 = vst [vmem:[#allocation18_spill] sm:$0xff] %v7072_v34  ;;  %7186 = vst [vmem:[#allocation19_spill] sm:$0xff] %v7074_v22  ;;  %v3611_v34 = vadd.f32 %v4974_v54, %v3522_v43  ;;  %v3525_v22 = vadd.f32 %v4919_v60, %v6954_v44 }
 0x216   :  { %v7076_v61 = vpop.f32.mrf.mxu1  ;;  %v7078_v41 = vpop.f32.mrf.mxu0 }
 0x217   :  { %7187 = vst [vmem:[#allocation20_spill] sm:$0xff] %v7076_v61  ;;  %7188 = vst [vmem:[#allocation21_spill] sm:$0xff] %v7078_v41  ;;  %v4977_v41 = vadd.f32 %v6994_v20, %v6992_v2  ;;  %v3619_v2 = vadd.f32 %v4980_v25, %v3530_v10 }
 0x218   :  { %v7080_v3 = vpop.f32.mrf.mxu1  ;;  %v7082_v30 = vpop.f32.mrf.mxu0 }
 0x219   :  { %7189 = vst [vmem:[#allocation22_spill] sm:$0xff] %v7080_v3  ;;  %7190 = vst [vmem:[#allocation23_spill] sm:$0xff] %v7082_v30  ;;  %v4925_v30 = vadd.f32 %v4924_v4, %v4923_v47  ;;  %v3614_v11 = vadd.f32 %v4977_v41, %v3525_v22 }
 0x21a   :  { %v5030_v46 = vpop.f32.mrf.mxu1  ;;  %v3788_v50 = vpop.f32.mrf.mxu0 }
 0x21c   :  { %v5031_v31 = vpop.f32.mrf.mxu1  ;;  %v5105_v0 = vpop.f32.mrf.mxu0 }
 0x21d   :  { %v5032_v24 = vadd.f32 %v5031_v31, %v5030_v46  ;;  %v3533_v0 = vadd.f32 %v4925_v30, %v6960_v1  ;;  %v4931_v1 = vadd.f32 %v7016_v42, %v7012_v8 }
 0x21e   :  { %v5033_v61 = vpop.f32.mrf.mxu1  ;;  %v3791_v48 = vpop.f32.mrf.mxu0 }
 0x21f   :  { %v3700_v3 = vadd.f32 %v5032_v24, %v3611_v34  ;;  %v4928_v34 = vadd.f32 %v7008_v39, %v7004_v27  ;;  %v4986_v27 = vadd.f32 %v7010_v49, %v7006_v38  ;;  %v3541_v46 = vadd.f32 %v4931_v1, %v6966_v21 }
 0x220   :  { %v5034_v14 = vpop.f32.mrf.mxu1  ;;  %v5106_v55 = vpop.f32.mrf.mxu0  ;;  %v4989_v49 = vadd.f32 %v7018_v63, %v7014_v12  ;;  %v4937_v21 = vadd.f32 %v7032_v9, %v7028_v26 }
 0x221   :  { %v5035_v29 = vadd.f32 %v5034_v14, %v5033_v61  ;;  %v3789_v16 = vadd.f32 %v3788_v50, %v3700_v3  ;;  %v3622_v3 = vadd.f32 %v4983_v56, %v3533_v0  ;;  %v3538_v41 = vadd.f32 %v4928_v34, %v6963_v59 }
 0x222   :  { %v5036_v6 = vpop.f32.mrf.mxu1  ;;  %v3796_v44 = vpop.f32.mrf.mxu0  ;;  %v4934_v59 = vadd.f32 %v7024_v23, %v7020_v52  ;;  %v4992_v52 = vadd.f32 %v7026_v58, %v7022_v53  ;;  %v4995_v58 = vadd.f32 %v7034_v62, %v7030_v15 }
 0x223   :  { %v3703_v37 = vadd.f32 %v5035_v29, %v3614_v11  ;;  %v3843_v7 = vmax.f32 %v3789_v16, 0.0  ;;  %v3627_v31 = vadd.f32 %v4986_v27, %v3538_v41  ;;  %v3630_v29 = vadd.f32 %v4989_v49, %v3541_v46 }
 0x224   :  { %v5037_v60 = vpop.f32.mrf.mxu1  ;;  %v5109_v43 = vpop.f32.mrf.mxu0  ;;  %v3546_v16 = vadd.f32 %v4934_v59, %v6969_v28  ;;  %v4940_v28 = vadd.f32 %v7040_v40, %v7036_v18  ;;  %v4998_v18 = vadd.f32 %v7042_v36, %v7038_v33  ;;  %v7193_v36 = vld [vmem:[#allocation6_spill] sm:$0xff] }
 0x225   :  { %v3792_v20 = vadd.f32 %v3791_v48, %v3703_v37  ;;  %v5038_v22 = vadd.f32 %v5037_v60, %v5036_v6  ;;  %v3549_v43 = vadd.f32 %v4937_v21, %v6972_v17  ;;  %v4943_v17 = vadd.f32 %v7048_v13, %v7044_v32 }
 0x226   :  { %v5039_v47 = vpop.f32.mrf.mxu1  ;;  %v3799_v35 = vpop.f32.mrf.mxu0 }
 0x227   :  { %v3844_v4 = vmax.f32 %v3792_v20, 0.0  ;;  %v3708_v14 = vadd.f32 %v5038_v22, %v3619_v2  ;;  %v3635_v2 = vadd.f32 %v4992_v52, %v3546_v16  ;;  %v3557_v41 = vadd.f32 %v4943_v17, %v6978_v57  ;;  %v7205_v17 = vld [vmem:[#allocation17_spill] sm:$0xff] }
 0x228   :  { %v5040_v50 = vpop.f32.mrf.mxu1  ;;  %v5110_v61 = vpop.f32.mrf.mxu0 }
 0x229   :  { %v4338_v39 = vpack.c.bf16 %v3844_v4, %v3843_v7  ;;  %v5041_v48 = vadd.f32 %v5040_v50, %v5039_v47  ;;  %v3797_v51 = vadd.f32 %v3796_v44, %v3708_v14  ;;  %v3638_v7 = vadd.f32 %v4995_v58, %v3549_v43  ;;  %v7201_v43 = vld [vmem:[#allocation16_spill] sm:$0xff] }
 0x22a   :  { %v5042_v30 = vpop.f32.mrf.mxu1  ;;  %v3804_v5 = vpop.f32.mrf.mxu0 }
 0x22b   :  { %4339 = vst [vmem:[%s7168_s3] sm:$0xff] %v4338_v39   ;;  %v3711_v54 = vadd.f32 %v5041_v48, %v3622_v3  ;;  %v3845_v11 = vmax.f32 %v3797_v51, 0.0  ;;  %v3554_v3 = vadd.f32 %v4940_v28, %v6975_v45  ;;  %v7191_v39 = vld [vmem:[#allocation8_spill] sm:$0xff]  ;;  %v7192_v45 = vld [vmem:[#allocation10_spill] sm:$0xff] }
 0x22c   :  { %v5043_v8 = vpop.f32.mrf.mxu1  ;;  %v5113_v42 = vpop.f32.mrf.mxu0  ;;  %v4946_v48 = vadd.f32 %v7192_v45, %v7191_v39 }
 0x22d   :  { %v3800_v19 = vadd.f32 %v3799_v35, %v3711_v54  ;;  %v5044_v38 = vadd.f32 %v5043_v8, %v5042_v30  ;;  %v3643_v27 = vadd.f32 %v4998_v18, %v3554_v3 }
 0x22e   :  { %v5045_v24 = vpop.f32.mrf.mxu1  ;;  %v3807_v55 = vpop.f32.mrf.mxu0 }
 0x22f   :  { %v3846_v10 = vmax.f32 %v3800_v19, 0.0  ;;  %v3716_v25 = vadd.f32 %v5044_v38, %v3627_v31  ;;  %v7195_v19 = vld [vmem:[#allocation12_spill] sm:$0xff]  ;;  %v7196_v38 = vld [vmem:[#allocation14_spill] sm:$0xff] }
 0x230   :  { %v5046_v6 = vpop.f32.mrf.mxu1  ;;  %v5114_v44 = vpop.f32.mrf.mxu0  ;;  %v4949_v57 = vadd.f32 %v7196_v38, %v7195_v19 }
 0x231   :  { %v4343_v23 = vpack.c.bf16 %v3846_v10, %v3845_v11  ;;  %v5047_v37 = vadd.f32 %v5046_v6, %v5045_v24  ;;  %v3805_v63 = vadd.f32 %v3804_v5, %v3716_v25  ;;  %v7194_v5 = vld [vmem:[#allocation7_spill] sm:$0xff]  ;;  %v7198_v10 = vld [vmem:[#allocation9_spill] sm:$0xff] }
 0x232   :  { %v5048_v0 = vpop.f32.mrf.mxu1  ;;  %v3812_v12 = vpop.f32.mrf.mxu0  ;;  %v5001_v51 = vadd.f32 %v7194_v5, %v7193_v36  ;;  %v7199_v25 = vld [vmem:[#allocation11_spill] sm:$0xff] }
 0x233   :  { %4370 = vst [vmem:[%s7168_s3 + $0x8] sm:$0xff] %v4343_v23   ;;  %v3719_v60 = vadd.f32 %v5047_v37, %v3630_v29  ;;  %v3847_v56 = vmax.f32 %v3805_v63, 0.0  ;;  %v5004_v29 = vadd.f32 %v7199_v25, %v7198_v10  ;;  %v7200_v37 = vld [vmem:[#allocation3_spill] sm:$0xff] }
 0x234   :  { %v5049_v26 = vpop.f32.mrf.mxu1  ;;  %v5117_v9 = vpop.f32.mrf.mxu0  ;;  %v3646_v59 = vadd.f32 %v5001_v51, %v3557_v41 }
 0x235   :  { %v3808_v34 = vadd.f32 %v3807_v55, %v3719_v60  ;;  %v5050_v53 = vadd.f32 %v5049_v26, %v5048_v0  ;;  %v7197_v55 = vld [vmem:[#allocation2_spill] sm:$0xff]  ;;  %v3565_v0 = vadd.f32 %v4949_v57, %v7200_v37 }
 0x236   :  { %v5051_v20 = vpop.f32.mrf.mxu1  ;;  %v3815_v22 = vpop.f32.mrf.mxu0  ;;  %v3562_v11 = vadd.f32 %v4946_v48, %v7197_v55  ;;  %v7202_v26 = vld [vmem:[#allocation18_spill] sm:$0xff] }
 0x237   :  { %v3848_v47 = vmax.f32 %v3808_v34, 0.0  ;;  %v3724_v35 = vadd.f32 %v5050_v53, %v3635_v2  ;;  %v4952_v9 = vadd.f32 %v7202_v26, %v7201_v43  ;;  %v7203_v34 = vld [vmem:[#allocation13_spill] sm:$0xff]  ;;  %v7204_v53 = vld [vmem:[#allocation15_spill] sm:$0xff] }
 0x238   :  { %v5052_v4 = vpop.f32.mrf.mxu1  ;;  %v5118_v14 = vpop.f32.mrf.mxu0  ;;  %v3651_v60 = vadd.f32 %v5004_v29, %v3562_v11  ;;  %v5007_v58 = vadd.f32 %v7204_v53, %v7203_v34 }
 0x239   :  { %v4348_v40 = vpack.c.bf16 %v3848_v47, %v3847_v56  ;;  %v5053_v1 = vadd.f32 %v5052_v4, %v5051_v20  ;;  %v3813_v62 = vadd.f32 %v3812_v12, %v3724_v35  ;;  %v7206_v4 = vld [vmem:[#allocation19_spill] sm:$0xff] }
 0x23a   :  { %v5054_v50 = vpop.f32.mrf.mxu1  ;;  %v3820_v15 = vpop.f32.mrf.mxu0  ;;  %v5010_v14 = vadd.f32 %v7206_v4, %v7205_v17 }
 0x23b   :  { %4371 = vst [vmem:[%s7168_s3 + $0x10] sm:$0xff] %v4348_v40   ;;  %v3727_v61 = vadd.f32 %v5053_v1, %v3638_v7  ;;  %v3849_v8 = vmax.f32 %v3813_v62, 0.0  ;;  %v3654_v7 = vadd.f32 %v5007_v58, %v3565_v0  ;;  %v7207_v40 = vld [vmem:[#allocation4_spill] sm:$0xff] }
 0x23c   :  { %v5055_v32 = vpop.f32.mrf.mxu1  ;;  %v5121_v13 = vpop.f32.mrf.mxu0  ;;  %v3570_v1 = vadd.f32 %v4952_v9, %v7207_v40 }
 0x23d   :  { %v3816_v30 = vadd.f32 %v3815_v22, %v3727_v61  ;;  %v5056_v33 = vadd.f32 %v5055_v32, %v5054_v50  ;;  %v7208_v50 = vld [vmem:[#allocation20_spill] sm:$0xff] }
 0x23e   :  { %v5057_v54 = vpop.f32.mrf.mxu1  ;;  %v3823_v46 = vpop.f32.mrf.mxu0 }
 0x23f   :  { %v3850_v42 = vmax.f32 %v3816_v30, 0.0  ;;  %v3732_v31 = vadd.f32 %v5056_v33, %v3643_v27  ;;  %v3659_v30 = vadd.f32 %v5010_v14, %v3570_v1  ;;  %v7210_v33 = vld [vmem:[#allocation5_spill] sm:$0xff] }
 0x240   :  { %v5058_v49 = vpop.f32.mrf.mxu1  ;;  %v5122_v24 = vpop.f32.mrf.mxu0 }
 0x241   :  { %v4353_v21 = vpack.c.bf16 %v3850_v42, %v3849_v8  ;;  %v5059_v6 = vadd.f32 %v5058_v49, %v5057_v54  ;;  %v3821_v52 = vadd.f32 %v3820_v15, %v3732_v31  ;;  %v7209_v15 = vld [vmem:[#allocation22_spill] sm:$0xff]  ;;  %v7211_v8 = vld [vmem:[#allocation21_spill] sm:$0xff]  ;;  %v7212_v42 = vld [vmem:[#allocation23_spill] sm:$0xff] }
 0x242   :  { %v5060_v44 = vpop.f32.mrf.mxu1  ;;  %v3828_v16 = vpop.f32.mrf.mxu0  ;;  %v4955_v62 = vadd.f32 %v7209_v15, %v7208_v50  ;;  %v5013_v31 = vadd.f32 %v7212_v42, %v7211_v8 }
 0x243   :  { %4372 = vst [vmem:[%s7168_s3 + $0x18] sm:$0xff] %v4353_v21   ;;  %v3735_v23 = vadd.f32 %v5059_v6, %v3646_v59  ;;  %v3851_v56 = vmax.f32 %v3821_v52, 0.0 }
 0x244   :  { %v5061_v12 = vpop.f32.mrf.mxu1  ;;  %v5125_v63 = vpop.f32.mrf.mxu0  ;;  %v3573_v36 = vadd.f32 %v4955_v62, %v7210_v33 }
 0x245   :  { %v3824_v2 = vadd.f32 %v3823_v46, %v3735_v23  ;;  %v5062_v28 = vadd.f32 %v5061_v12, %v5060_v44 }
 0x246   :  { %v5063_v20 = vpop.f32.mrf.mxu1  ;;  %v3831_v22 = vpop.f32.mrf.mxu0  ;;  %v3662_v24 = vadd.f32 %v5013_v31, %v3573_v36 }
 0x247   :  { %v3852_v47 = vmax.f32 %v3824_v2, 0.0  ;;  %v3740_v35 = vadd.f32 %v5062_v28, %v3651_v60 }
 0x248   :  { %v5064_v3 = vpop.f32.mrf.mxu1  ;;  %v5126_v18 = vpop.f32.mrf.mxu0 }
 0x249   :  { %v4358_v61 = vpack.c.bf16 %v3852_v47, %v3851_v56  ;;  %v5065_v41 = vadd.f32 %v5064_v3, %v5063_v20  ;;  %v3829_v27 = vadd.f32 %v3828_v16, %v3740_v35 }
 0x24a   :  { %v5066_v32 = vpop.f32.mrf.mxu1  ;;  %v3836_v13 = vpop.f32.mrf.mxu0 }
 0x24b   :  { %4373 = vst [vmem:[%s7168_s3 + $0x20] sm:$0xff] %v4358_v61   ;;  %v3743_v39 = vadd.f32 %v5065_v41, %v3654_v7  ;;  %v3853_v59 = vmax.f32 %v3829_v27, 0.0 }
 0x24c   :  { %v5067_v45 = vpop.f32.mrf.mxu1  ;;  %v5129_v48 = vpop.f32.mrf.mxu0 }
 0x24d   :  { %v3832_v5 = vadd.f32 %v3831_v22, %v3743_v39  ;;  %v5068_v51 = vadd.f32 %v5067_v45, %v5066_v32 }
 0x24e   :  { %v5069_v54 = vpop.f32.mrf.mxu1  ;;  %v3839_v46 = vpop.f32.mrf.mxu0 }
 0x24f   :  { %v3854_v19 = vmax.f32 %v3832_v5, 0.0  ;;  %v3748_v38 = vadd.f32 %v5068_v51, %v3659_v30 }
 0x250   :  { %v5070_v57 = vpop.f32.mrf.mxu1  ;;  %v5130_v49 = vpop.f32.mrf.mxu0 }
 0x251   :  { %v4363_v55 = vpack.c.bf16 %v3854_v19, %v3853_v59  ;;  %v5071_v11 = vadd.f32 %v5070_v57, %v5069_v54  ;;  %v3837_v10 = vadd.f32 %v3836_v13, %v3748_v38 }
 0x253   :  { %4374 = vst [vmem:[%s7168_s3 + $0x28] sm:$0xff] %v4363_v55   ;;  %v3751_v25 = vadd.f32 %v5071_v11, %v3662_v24  ;;  %v3855_v21 = vmax.f32 %v3837_v10, 0.0 }
 0x255   :  { %v3840_v29 = vadd.f32 %v3839_v46, %v3751_v25 }
 0x257   :  { %v3856_v6 = vmax.f32 %v3840_v29, 0.0 }
 0x259   :  { %v4368_v44 = vpack.c.bf16 %v3856_v6, %v3855_v21 }
 0x25b   :  { %4375 = vst [vmem:[%s7168_s3 + $0x30] sm:$0xff] %v4368_v44  }

// kernel: fnet_vlcs_forward.5
= control target key start
LH: loop header
LB: loop body
LE: loop exit
PB: predicated region body
PF: predicated region fallthrough
CT: control target
= control target key end

     0   :  { %vm7231_vm0 = vmmov 0   ;;  %s9430_s1 = inlined_call_operand.vmem [shape: bf16[1152,512], index: 1, kind: input, shape index: {}]   ;;  %s9431_s0 = inlined_call_operand.vmem [shape: bf16[16,1152], index: 0, kind: input, shape index: {}]   ;;  %s9432_s3 = inlined_call_operand.vmem [shape: bf16[512,384], index: 3, kind: input, shape index: {}]   ;;  %s9433_s2 = inlined_call_operand.vmem [shape: f32[1,512], index: 2, kind: input, shape index: {}]   ;;  %s9434_s5 = inlined_call_operand.vmem [shape: bf16[384,1152], index: 5, kind: input, shape index: {}]   ;;  %s9435_s4 = inlined_call_operand.vmem [shape: f32[1,384], index: 4, kind: input, shape index: {}]   ;;  %s9436_s7 = inlined_call_operand.vmem [shape: bf16[128,128], index: 7, kind: input, shape index: {}]   ;;  %s9437_s9 = inlined_call_operand.vmem [shape: bf16[128,128], index: 9, kind: input, shape index: {}]   ;;  %s9438_s6 = inlined_call_operand.vmem [shape: f32[1,1152], index: 6, kind: input, shape index: {}]   ;;  %s9439_s11 = inlined_call_operand.vmem [shape: bf16[128,128], index: 11, kind: input, shape index: {}]   ;;  %s9440_s8 = inlined_call_operand.vmem [shape: f32[1,128], index: 8, kind: input, shape index: {}]   ;;  %s9441_s13 = inlined_call_operand.vmem [shape: bf16[128,128], index: 13, kind: input, shape index: {}]   ;;  %s9442_s10 = inlined_call_operand.vmem [shape: f32[1,128], index: 10, kind: input, shape index: {}]   ;;  %s9443_s12 = inlined_call_operand.vmem [shape: f32[1,128], index: 12, kind: input, shape index: {}]   ;;  %s9444_s14 = inlined_call_operand.vmem [shape: f32[1,128], index: 14, kind: input, shape index: {}]   ;;  %s9445_s15 = inlined_call_operand.vmem [shape: f32[16,128], index: 15, kind: output, shape index: {}]  }
   0x1   :  { %v6308_v0 = vld [vmem:[%s9430_s1 + $0xe4] ss:$16 sps:$4 sm:$0xff]   ;;  %v6312_v2 = vld [vmem:[%s9430_s1 + $0xe0] ss:$16 sps:$4 sm:$0xff]  }
   0x2   :  { %v6310_v1 = vld [vmem:[%s9430_s1 + $0x2e4] ss:$16 sps:$4 sm:$0xff]   ;;  %1857 = vmatprep.subr.bf16.mxu0 %v6308_v0  ;;  %v6313_v3 = vld [vmem:[%s9430_s1 + $0x2e0] ss:$16 sps:$4 sm:$0xff]  }
   0x3   :  { %1900 = vmatprep.subr.bf16.mxu1 %v6310_v1  ;;  %v6314_v4 = vld [vmem:[%s9430_s1 + $0xc4] ss:$16 sps:$4 sm:$0xff]   ;;  %1858 = vmatpush1.bf16.msra.mxu0 %v6312_v2  ;;  %v6318_v6 = vld [vmem:[%s9430_s1 + $0xc0] ss:$16 sps:$4 sm:$0xff]  }
   0x4   :  { %1901 = vmatpush1.bf16.msra.mxu1 %v6313_v3  ;;  %v6316_v5 = vld [vmem:[%s9430_s1 + $0x2c4] ss:$16 sps:$4 sm:$0xff]   ;;  %1859 = vmatprep.subr.bf16.mxu0 %v6314_v4  ;;  %v6319_v7 = vld [vmem:[%s9430_s1 + $0x2c0] ss:$16 sps:$4 sm:$0xff]  }
   0x5   :  { %1902 = vmatprep.subr.bf16.mxu1 %v6316_v5  ;;  %v6320_v8 = vld [vmem:[%s9430_s1 + $0xa4] ss:$16 sps:$4 sm:$0xff]   ;;  %v6324_v10 = vld [vmem:[%s9430_s1 + $0xa0] ss:$16 sps:$4 sm:$0xff]   ;;  %v6407_v5 = vld [vmem:[%s9431_s0 + $0x8] ss:$36 sps:$4 sm:$0xff]  }
   0x6   :  { %v6322_v9 = vld [vmem:[%s9430_s1 + $0x2a4] ss:$16 sps:$4 sm:$0xff]   ;;  %v6325_v11 = vld [vmem:[%s9430_s1 + $0x2a0] ss:$16 sps:$4 sm:$0xff]  }
   0x7   :  { %1860 = vmatpush1.bf16.msra.mxu0 %v6318_v6  ;;  %v6326_v12 = vld [vmem:[%s9430_s1 + $0x84] ss:$16 sps:$4 sm:$0xff]   ;;  %v6330_v14 = vld [vmem:[%s9430_s1 + $0x80] ss:$16 sps:$4 sm:$0xff]  }
   0x8   :  { %1903 = vmatpush1.bf16.msra.mxu1 %v6319_v7  ;;  %1861 = vmatprep.subr.bf16.mxu0 %v6320_v8  ;;  %v6328_v13 = vld [vmem:[%s9430_s1 + $0x284] ss:$16 sps:$4 sm:$0xff]   ;;  %v6331_v15 = vld [vmem:[%s9430_s1 + $0x280] ss:$16 sps:$4 sm:$0xff]  }
   0x9   :  { %1904 = vmatprep.subr.bf16.mxu1 %v6322_v9  ;;  %v6332_v16 = vld [vmem:[%s9430_s1 + $0x64] ss:$16 sps:$4 sm:$0xff]   ;;  %v6336_v18 = vld [vmem:[%s9430_s1 + $0x60] ss:$16 sps:$4 sm:$0xff]  }
   0xa   :  { %v6334_v17 = vld [vmem:[%s9430_s1 + $0x264] ss:$16 sps:$4 sm:$0xff]   ;;  %v6337_v19 = vld [vmem:[%s9430_s1 + $0x260] ss:$16 sps:$4 sm:$0xff]  }
   0xb   :  { %1862 = vmatpush1.bf16.msra.mxu0 %v6324_v10  ;;  %v6338_v20 = vld [vmem:[%s9430_s1 + $0x44] ss:$16 sps:$4 sm:$0xff]   ;;  %v6342_v22 = vld [vmem:[%s9430_s1 + $0x40] ss:$16 sps:$4 sm:$0xff]  }
   0xc   :  { %1905 = vmatpush1.bf16.msra.mxu1 %v6325_v11  ;;  %1863 = vmatprep.subr.bf16.mxu0 %v6326_v12  ;;  %v6340_v21 = vld [vmem:[%s9430_s1 + $0x244] ss:$16 sps:$4 sm:$0xff]   ;;  %v6343_v23 = vld [vmem:[%s9430_s1 + $0x240] ss:$16 sps:$4 sm:$0xff]  }
   0xd   :  { %1906 = vmatprep.subr.bf16.mxu1 %v6328_v13  ;;  %v6344_v24 = vld [vmem:[%s9430_s1 + $0x24] ss:$16 sps:$4 sm:$0xff]   ;;  %v6348_v26 = vld [vmem:[%s9430_s1 + $0x20] ss:$16 sps:$4 sm:$0xff]  }
   0xe   :  { %v6346_v25 = vld [vmem:[%s9430_s1 + $0x224] ss:$16 sps:$4 sm:$0xff]   ;;  %v6349_v27 = vld [vmem:[%s9430_s1 + $0x220] ss:$16 sps:$4 sm:$0xff]  }
   0xf   :  { %1864 = vmatpush1.bf16.msra.mxu0 %v6330_v14  ;;  %v6350_v28 = vld [vmem:[%s9430_s1 + $0x4] ss:$16 sps:$4 sm:$0xff]   ;;  %v6354_v30 = vld [vmem:[%s9430_s1] ss:$16 sps:$4 sm:$0xff]  }
  0x10   :  { %1907 = vmatpush1.bf16.msra.mxu1 %v6331_v15  ;;  %1865 = vmatprep.subr.bf16.mxu0 %v6332_v16  ;;  %v6352_v29 = vld [vmem:[%s9430_s1 + $0x204] ss:$16 sps:$4 sm:$0xff]   ;;  %v6355_v31 = vld [vmem:[%s9430_s1 + $0x200] ss:$16 sps:$4 sm:$0xff]  }
  0x11   :  { %1908 = vmatprep.subr.bf16.mxu1 %v6334_v17  ;;  %v6356_v32 = vld [vmem:[%s9430_s1 + $0x1e4] ss:$16 sps:$4 sm:$0xff]   ;;  %v6360_v34 = vld [vmem:[%s9430_s1 + $0x1e0] ss:$16 sps:$4 sm:$0xff]  }
  0x12   :  { %v6358_v33 = vld [vmem:[%s9430_s1 + $0x3e4] ss:$16 sps:$4 sm:$0xff]   ;;  %v6361_v35 = vld [vmem:[%s9430_s1 + $0x3e0] ss:$16 sps:$4 sm:$0xff]  }
  0x13   :  { %1866 = vmatpush1.bf16.msra.mxu0 %v6336_v18  ;;  %v6362_v36 = vld [vmem:[%s9430_s1 + $0x1c4] ss:$16 sps:$4 sm:$0xff]   ;;  %v6366_v38 = vld [vmem:[%s9430_s1 + $0x1c0] ss:$16 sps:$4 sm:$0xff]  }
  0x14   :  { %1909 = vmatpush1.bf16.msra.mxu1 %v6337_v19  ;;  %1867 = vmatprep.subr.bf16.mxu0 %v6338_v20  ;;  %v6364_v37 = vld [vmem:[%s9430_s1 + $0x3c4] ss:$16 sps:$4 sm:$0xff]   ;;  %v6367_v39 = vld [vmem:[%s9430_s1 + $0x3c0] ss:$16 sps:$4 sm:$0xff]  }
  0x15   :  { %1910 = vmatprep.subr.bf16.mxu1 %v6340_v21  ;;  %v6368_v40 = vld [vmem:[%s9430_s1 + $0x1a4] ss:$16 sps:$4 sm:$0xff]   ;;  %v6372_v42 = vld [vmem:[%s9430_s1 + $0x1a0] ss:$16 sps:$4 sm:$0xff]  }
  0x16   :  { %v6370_v41 = vld [vmem:[%s9430_s1 + $0x3a4] ss:$16 sps:$4 sm:$0xff]   ;;  %v6373_v43 = vld [vmem:[%s9430_s1 + $0x3a0] ss:$16 sps:$4 sm:$0xff]  }
  0x17   :  { %1868 = vmatpush1.bf16.msra.mxu0 %v6342_v22  ;;  %v6374_v44 = vld [vmem:[%s9430_s1 + $0x184] ss:$16 sps:$4 sm:$0xff]   ;;  %v6378_v46 = vld [vmem:[%s9430_s1 + $0x180] ss:$16 sps:$4 sm:$0xff]  }
  0x18   :  { %1911 = vmatpush1.bf16.msra.mxu1 %v6343_v23  ;;  %1869 = vmatprep.subr.bf16.mxu0 %v6344_v24  ;;  %v6376_v45 = vld [vmem:[%s9430_s1 + $0x384] ss:$16 sps:$4 sm:$0xff]   ;;  %v6379_v47 = vld [vmem:[%s9430_s1 + $0x380] ss:$16 sps:$4 sm:$0xff]  }
  0x19   :  { %1912 = vmatprep.subr.bf16.mxu1 %v6346_v25  ;;  %v6380_v48 = vld [vmem:[%s9430_s1 + $0x164] ss:$16 sps:$4 sm:$0xff]   ;;  %v7470_v51 = vld [vmem:[%s9431_s0 + $0xc] ss:$36 sps:$4 sm:$0xff]  }
  0x1a   :  { %v7462_v49 = vld [vmem:[%s9431_s0 + $0x4] ss:$36 sps:$4 sm:$0xff]   ;;  %v6384_v52 = vld [vmem:[%s9430_s1 + $0x160] ss:$16 sps:$4 sm:$0xff]   ;;  %1932 = vmatprep.mubr.bf16.mxu1 %v7470_v51 }
  0x1b   :  { %1870 = vmatpush1.bf16.msra.mxu0 %v6348_v26  ;;  %v6382_v50 = vld [vmem:[%s9430_s1 + $0x364] ss:$16 sps:$4 sm:$0xff]   ;;  %1889 = vmatprep.mubr.bf16.mxu0 %v7462_v49  ;;  %v6385_v53 = vld [vmem:[%s9430_s1 + $0x360] ss:$16 sps:$4 sm:$0xff]  }
  0x1c   :  { %1913 = vmatpush1.bf16.msra.mxu1 %v6349_v27  ;;  %1871 = vmatprep.subr.bf16.mxu0 %v6350_v28  ;;  %v6386_v54 = vld [vmem:[%s9430_s1 + $0x144] ss:$16 sps:$4 sm:$0xff]   ;;  %v6390_v56 = vld [vmem:[%s9430_s1 + $0x140] ss:$16 sps:$4 sm:$0xff]  }
  0x1d   :  { %1914 = vmatprep.subr.bf16.mxu1 %v6352_v29  ;;  %v6388_v55 = vld [vmem:[%s9430_s1 + $0x344] ss:$16 sps:$4 sm:$0xff]   ;;  %v6391_v57 = vld [vmem:[%s9430_s1 + $0x340] ss:$16 sps:$4 sm:$0xff]  }
  0x1e   :  { %v6392_v58 = vld [vmem:[%s9430_s1 + $0x124] ss:$16 sps:$4 sm:$0xff]   ;;  %v6396_v60 = vld [vmem:[%s9430_s1 + $0x120] ss:$16 sps:$4 sm:$0xff]  }
  0x1f   :  { %1872 = vmatpush1.bf16.msra.mxu0 %v6354_v30  ;;  %v6394_v59 = vld [vmem:[%s9430_s1 + $0x324] ss:$16 sps:$4 sm:$0xff]   ;;  %v6397_v61 = vld [vmem:[%s9430_s1 + $0x320] ss:$16 sps:$4 sm:$0xff]  }
  0x20   :  { %1915 = vmatpush1.bf16.msra.mxu1 %v6355_v31  ;;  %1873 = vmatprep.subr.bf16.mxu0 %v6356_v32  ;;  %v6398_v62 = vld [vmem:[%s9430_s1 + $0x104] ss:$16 sps:$4 sm:$0xff]   ;;  %v6402_v0 = vld [vmem:[%s9430_s1 + $0x100] ss:$16 sps:$4 sm:$0xff]  }
  0x21   :  { %1916 = vmatprep.subr.bf16.mxu1 %v6358_v33  ;;  %v6400_v63 = vld [vmem:[%s9430_s1 + $0x304] ss:$16 sps:$4 sm:$0xff]   ;;  %v6403_v1 = vld [vmem:[%s9430_s1 + $0x300] ss:$16 sps:$4 sm:$0xff]  }
  0x22   :  { %v6412_v2 = vld [vmem:[%s9430_s1 + $0x4e4] ss:$16 sps:$4 sm:$0xff]   ;;  %v6410_v6 = vld [vmem:[%s9430_s1 + $0x4e0] ss:$16 sps:$4 sm:$0xff]  }
  0x23   :  { %1874 = vmatpush2.bf16.msra.mxu0 %v6360_v34  ;;  %v6415_v3 = vld [vmem:[%s9430_s1 + $0x6e4] ss:$16 sps:$4 sm:$0xff]   ;;  %v6413_v7 = vld [vmem:[%s9430_s1 + $0x6e0] ss:$16 sps:$4 sm:$0xff]  }
  0x24   :  { %1917 = vmatpush2.bf16.msra.mxu1 %v6361_v35  ;;  %1875 = vmatprep.subr.bf16.mxu0 %v6362_v36  ;;  %v7525_v4 = vld [vmem:[%s9431_s0] ss:$36 sps:$4 sm:$0xff]   ;;  %v7618_v34 = vld [vmem:[%s9431_s0 + $0x14] ss:$36 sps:$4 sm:$0xff]  }
  0x25   :  { %1918 = vmatprep.subr.bf16.mxu1 %v6364_v37  ;;  %v6418_v8 = vld [vmem:[%s9430_s1 + $0x4c4] ss:$16 sps:$4 sm:$0xff]   ;;  %v6416_v10 = vld [vmem:[%s9430_s1 + $0x4c0] ss:$16 sps:$4 sm:$0xff]  }
  0x26   :  { %v6421_v9 = vld [vmem:[%s9430_s1 + $0x6c4] ss:$16 sps:$4 sm:$0xff]   ;;  %v6419_v11 = vld [vmem:[%s9430_s1 + $0x6c0] ss:$16 sps:$4 sm:$0xff]  }
  0x27   :  { %1876 = vmatpush2.bf16.msra.mxu0 %v6366_v38  ;;  %v6424_v12 = vld [vmem:[%s9430_s1 + $0x4a4] ss:$16 sps:$4 sm:$0xff]   ;;  %v6422_v14 = vld [vmem:[%s9430_s1 + $0x4a0] ss:$16 sps:$4 sm:$0xff]  }
  0x28   :  { %1919 = vmatpush2.bf16.msra.mxu1 %v6367_v39  ;;  %1877 = vmatprep.subr.bf16.mxu0 %v6368_v40  ;;  %v6427_v13 = vld [vmem:[%s9430_s1 + $0x6a4] ss:$16 sps:$4 sm:$0xff]   ;;  %v6425_v15 = vld [vmem:[%s9430_s1 + $0x6a0] ss:$16 sps:$4 sm:$0xff]  }
  0x29   :  { %1920 = vmatprep.subr.bf16.mxu1 %v6370_v41  ;;  %v6430_v16 = vld [vmem:[%s9430_s1 + $0x484] ss:$16 sps:$4 sm:$0xff]   ;;  %v6428_v18 = vld [vmem:[%s9430_s1 + $0x480] ss:$16 sps:$4 sm:$0xff]  }
  0x2a   :  { %v6433_v17 = vld [vmem:[%s9430_s1 + $0x684] ss:$16 sps:$4 sm:$0xff]   ;;  %v6431_v19 = vld [vmem:[%s9430_s1 + $0x680] ss:$16 sps:$4 sm:$0xff]  }
  0x2b   :  { %1878 = vmatpush2.bf16.msra.mxu0 %v6372_v42  ;;  %v6436_v20 = vld [vmem:[%s9430_s1 + $0x464] ss:$16 sps:$4 sm:$0xff]   ;;  %v6434_v22 = vld [vmem:[%s9430_s1 + $0x460] ss:$16 sps:$4 sm:$0xff]  }
  0x2c   :  { %1921 = vmatpush2.bf16.msra.mxu1 %v6373_v43  ;;  %1879 = vmatprep.subr.bf16.mxu0 %v6374_v44  ;;  %v6439_v21 = vld [vmem:[%s9430_s1 + $0x664] ss:$16 sps:$4 sm:$0xff]   ;;  %v6437_v23 = vld [vmem:[%s9430_s1 + $0x660] ss:$16 sps:$4 sm:$0xff]  }
  0x2d   :  { %1922 = vmatprep.subr.bf16.mxu1 %v6376_v45  ;;  %v6442_v24 = vld [vmem:[%s9430_s1 + $0x444] ss:$16 sps:$4 sm:$0xff]   ;;  %v6440_v26 = vld [vmem:[%s9430_s1 + $0x440] ss:$16 sps:$4 sm:$0xff]  }
  0x2e   :  { %v6445_v25 = vld [vmem:[%s9430_s1 + $0x644] ss:$16 sps:$4 sm:$0xff]   ;;  %v6443_v27 = vld [vmem:[%s9430_s1 + $0x640] ss:$16 sps:$4 sm:$0xff]  }
  0x2f   :  { %1880 = vmatpush2.bf16.msra.mxu0 %v6378_v46  ;;  %v6448_v28 = vld [vmem:[%s9430_s1 + $0x424] ss:$16 sps:$4 sm:$0xff]   ;;  %v6446_v30 = vld [vmem:[%s9430_s1 + $0x420] ss:$16 sps:$4 sm:$0xff]  }
  0x30   :  { %1923 = vmatpush2.bf16.msra.mxu1 %v6379_v47  ;;  %1881 = vmatprep.subr.bf16.mxu0 %v6380_v48  ;;  %v6451_v29 = vld [vmem:[%s9430_s1 + $0x624] ss:$16 sps:$4 sm:$0xff]   ;;  %v6449_v31 = vld [vmem:[%s9430_s1 + $0x620] ss:$16 sps:$4 sm:$0xff]  }
  0x31   :  { %1924 = vmatprep.subr.bf16.mxu1 %v6382_v50  ;;  %v6454_v32 = vld [vmem:[%s9430_s1 + $0x404] ss:$16 sps:$4 sm:$0xff]   ;;  %v6511_v35 = vld [vmem:[%s9431_s0 + $0x1c] ss:$36 sps:$4 sm:$0xff]  }
  0x32   :  { %v6457_v33 = vld [vmem:[%s9430_s1 + $0x604] ss:$16 sps:$4 sm:$0xff]   ;;  %v6452_v36 = vld [vmem:[%s9430_s1 + $0x400] ss:$16 sps:$4 sm:$0xff]  }
  0x33   :  { %1882 = vmatpush2.bf16.msra.mxu0 %v6384_v52  ;;  %v6455_v37 = vld [vmem:[%s9430_s1 + $0x600] ss:$16 sps:$4 sm:$0xff]   ;;  %v6460_v38 = vld [vmem:[%s9430_s1 + $0x5e4] ss:$16 sps:$4 sm:$0xff]  }
  0x34   :  { %1925 = vmatpush2.bf16.msra.mxu1 %v6385_v53  ;;  %1883 = vmatprep.subr.bf16.mxu0 %v6386_v54  ;;  %v6463_v39 = vld [vmem:[%s9430_s1 + $0x7e4] ss:$16 sps:$4 sm:$0xff]   ;;  %v6458_v40 = vld [vmem:[%s9430_s1 + $0x5e0] ss:$16 sps:$4 sm:$0xff]  }
  0x35   :  { %1926 = vmatprep.subr.bf16.mxu1 %v6388_v55  ;;  %v6461_v41 = vld [vmem:[%s9430_s1 + $0x7e0] ss:$16 sps:$4 sm:$0xff]   ;;  %v6466_v42 = vld [vmem:[%s9430_s1 + $0x5c4] ss:$16 sps:$4 sm:$0xff]  }
  0x36   :  { %v6469_v43 = vld [vmem:[%s9430_s1 + $0x7c4] ss:$16 sps:$4 sm:$0xff]   ;;  %v6464_v44 = vld [vmem:[%s9430_s1 + $0x5c0] ss:$16 sps:$4 sm:$0xff]  }
  0x37   :  { %1884 = vmatpush2.bf16.msra.mxu0 %v6390_v56  ;;  %v6467_v45 = vld [vmem:[%s9430_s1 + $0x7c0] ss:$16 sps:$4 sm:$0xff]   ;;  %v6472_v46 = vld [vmem:[%s9430_s1 + $0x5a4] ss:$16 sps:$4 sm:$0xff]  }
  0x38   :  { %1927 = vmatpush2.bf16.msra.mxu1 %v6391_v57  ;;  %1885 = vmatprep.subr.bf16.mxu0 %v6392_v58  ;;  %v6475_v47 = vld [vmem:[%s9430_s1 + $0x7a4] ss:$16 sps:$4 sm:$0xff]   ;;  %v6470_v48 = vld [vmem:[%s9430_s1 + $0x5a0] ss:$16 sps:$4 sm:$0xff]  }
  0x39   :  { %1928 = vmatprep.subr.bf16.mxu1 %v6394_v59  ;;  %v6473_v50 = vld [vmem:[%s9430_s1 + $0x7a0] ss:$16 sps:$4 sm:$0xff]   ;;  %v6478_v52 = vld [vmem:[%s9430_s1 + $0x584] ss:$16 sps:$4 sm:$0xff]  }
  0x3a   :  { %v6481_v53 = vld [vmem:[%s9430_s1 + $0x784] ss:$16 sps:$4 sm:$0xff]   ;;  %v6476_v54 = vld [vmem:[%s9430_s1 + $0x580] ss:$16 sps:$4 sm:$0xff]  }
  0x3b   :  { %1886 = vmatpush2.bf16.msra.mxu0 %v6396_v60  ;;  %v6479_v55 = vld [vmem:[%s9430_s1 + $0x780] ss:$16 sps:$4 sm:$0xff]   ;;  %v6484_v56 = vld [vmem:[%s9430_s1 + $0x564] ss:$16 sps:$4 sm:$0xff]  }
  0x3c   :  { %1929 = vmatpush2.bf16.msra.mxu1 %v6397_v61  ;;  %1887 = vmatprep.subr.bf16.mxu0 %v6398_v62  ;;  %v6487_v57 = vld [vmem:[%s9430_s1 + $0x764] ss:$16 sps:$4 sm:$0xff]   ;;  %v6482_v58 = vld [vmem:[%s9430_s1 + $0x560] ss:$16 sps:$4 sm:$0xff]  }
  0x3d   :  { %1930 = vmatprep.subr.bf16.mxu1 %v6400_v63  ;;  %v6485_v59 = vld [vmem:[%s9430_s1 + $0x760] ss:$16 sps:$4 sm:$0xff]   ;;  %v6490_v60 = vld [vmem:[%s9430_s1 + $0x544] ss:$16 sps:$4 sm:$0xff]  }
  0x3e   :  { %v6493_v61 = vld [vmem:[%s9430_s1 + $0x744] ss:$16 sps:$4 sm:$0xff]   ;;  %v6488_v62 = vld [vmem:[%s9430_s1 + $0x540] ss:$16 sps:$4 sm:$0xff]  }
  0x3f   :  { %1888 = vmatpush2.bf16.msra.mxu0 %v6402_v0  ;;  %v6491_v63 = vld [vmem:[%s9430_s1 + $0x740] ss:$16 sps:$4 sm:$0xff]   ;;  %v6496_v0 = vld [vmem:[%s9430_s1 + $0x524] ss:$16 sps:$4 sm:$0xff]  }
  0x40   :  { %1931 = vmatpush2.bf16.msra.mxu1 %v6403_v1  ;;  %1943 = vmatprep.subr.bf16.mxu0 %v6412_v2  ;;  %v6499_v1 = vld [vmem:[%s9430_s1 + $0x724] ss:$16 sps:$4 sm:$0xff]   ;;  %v6494_v2 = vld [vmem:[%s9430_s1 + $0x520] ss:$16 sps:$4 sm:$0xff]  }
  0x41   :  { %1986 = vmatprep.subr.bf16.mxu1 %v6415_v3  ;;  %v6497_v3 = vld [vmem:[%s9430_s1 + $0x720] ss:$16 sps:$4 sm:$0xff]  }
  0x42   :  { %1890 = vmatmul.mubr.bf16.vlgmr.msra.gmra.mxu0 %v7525_v4 }
  0x43   :  { %1933 = vmatmul.mubr.bf16.vlgmr.msra.gmra.mxu1 %v6407_v5  ;;  %1944 = vmatpush1.bf16.msra.mxu0 %v6410_v6  ;;  %v6502_v5 = vld [vmem:[%s9430_s1 + $0x504] ss:$16 sps:$4 sm:$0xff]  }
  0x44   :  { %1987 = vmatpush1.bf16.msra.mxu1 %v6413_v7  ;;  %1945 = vmatprep.subr.bf16.mxu0 %v6418_v8  ;;  %v6505_v6 = vld [vmem:[%s9430_s1 + $0x704] ss:$16 sps:$4 sm:$0xff]   ;;  %v6500_v7 = vld [vmem:[%s9430_s1 + $0x500] ss:$16 sps:$4 sm:$0xff]  }
  0x45   :  { %1988 = vmatprep.subr.bf16.mxu1 %v6421_v9  ;;  %1975 = vmatprep.mubr.bf16.mxu0 %v7618_v34  ;;  %v6503_v8 = vld [vmem:[%s9430_s1 + $0x700] ss:$16 sps:$4 sm:$0xff]   ;;  %v6514_v9 = vld [vmem:[%s9430_s1 + $0x8e4] ss:$16 sps:$4 sm:$0xff]  }
  0x46   :  { %2018 = vmatprep.mubr.bf16.mxu1 %v6511_v35  ;;  %v6545_v35 = vld [vmem:[%s9430_s1 + $0x48] ss:$16 sps:$4 sm:$0xff]  }
  0x47   :  { %1946 = vmatpush1.bf16.msra.mxu0 %v6416_v10  ;;  %v6517_v10 = vld [vmem:[%s9430_s1 + $0xec] ss:$16 sps:$4 sm:$0xff]  }
  0x48   :  { %1989 = vmatpush1.bf16.msra.mxu1 %v6419_v11  ;;  %1947 = vmatprep.subr.bf16.mxu0 %v6424_v12  ;;  %v6506_v11 = vld [vmem:[%s9431_s0 + $0x10] ss:$36 sps:$4 sm:$0xff]   ;;  %v6509_v12 = vld [vmem:[%s9431_s0 + $0x18] ss:$36 sps:$4 sm:$0xff]  }
  0x49   :  { %1990 = vmatprep.subr.bf16.mxu1 %v6427_v13  ;;  %v6512_v13 = vld [vmem:[%s9430_s1 + $0x8e0] ss:$16 sps:$4 sm:$0xff]  }
  0x4b   :  { %1948 = vmatpush1.bf16.msra.mxu0 %v6422_v14  ;;  %v6515_v14 = vld [vmem:[%s9430_s1 + $0xe8] ss:$16 sps:$4 sm:$0xff]  }
  0x4c   :  { %1991 = vmatpush1.bf16.msra.mxu1 %v6425_v15  ;;  %1949 = vmatprep.subr.bf16.mxu0 %v6430_v16  ;;  %v6520_v15 = vld [vmem:[%s9430_s1 + $0x8c4] ss:$16 sps:$4 sm:$0xff]   ;;  %v6523_v16 = vld [vmem:[%s9430_s1 + $0xcc] ss:$16 sps:$4 sm:$0xff]  }
  0x4d   :  { %1992 = vmatprep.subr.bf16.mxu1 %v6433_v17  ;;  %v6518_v17 = vld [vmem:[%s9430_s1 + $0x8c0] ss:$16 sps:$4 sm:$0xff]  }
  0x4f   :  { %1950 = vmatpush1.bf16.msra.mxu0 %v6428_v18  ;;  %v6521_v18 = vld [vmem:[%s9430_s1 + $0xc8] ss:$16 sps:$4 sm:$0xff]  }
  0x50   :  { %1993 = vmatpush1.bf16.msra.mxu1 %v6431_v19  ;;  %1951 = vmatprep.subr.bf16.mxu0 %v6436_v20  ;;  %v6526_v19 = vld [vmem:[%s9430_s1 + $0x8a4] ss:$16 sps:$4 sm:$0xff]   ;;  %v6529_v20 = vld [vmem:[%s9430_s1 + $0xac] ss:$16 sps:$4 sm:$0xff]  }
  0x51   :  { %1994 = vmatprep.subr.bf16.mxu1 %v6439_v21  ;;  %v7229_v21 = vmov 0  }
  0x53   :  { %1952 = vmatpush1.bf16.msra.mxu0 %v6434_v22  ;;  %v6524_v22 = vld [vmem:[%s9430_s1 + $0x8a0] ss:$16 sps:$4 sm:$0xff]  }
  0x54   :  { %1995 = vmatpush1.bf16.msra.mxu1 %v6437_v23  ;;  %1953 = vmatprep.subr.bf16.mxu0 %v6442_v24  ;;  %v6527_v23 = vld [vmem:[%s9430_s1 + $0xa8] ss:$16 sps:$4 sm:$0xff]   ;;  %v6532_v24 = vld [vmem:[%s9430_s1 + $0x884] ss:$16 sps:$4 sm:$0xff]  }
  0x55   :  { %1996 = vmatprep.subr.bf16.mxu1 %v6445_v25  ;;  %v6530_v25 = vld [vmem:[%s9430_s1 + $0x880] ss:$16 sps:$4 sm:$0xff]  }
  0x57   :  { %1954 = vmatpush1.bf16.msra.mxu0 %v6440_v26  ;;  %v6533_v26 = vld [vmem:[%s9430_s1 + $0x88] ss:$16 sps:$4 sm:$0xff]  }
  0x58   :  { %1997 = vmatpush1.bf16.msra.mxu1 %v6443_v27  ;;  %1955 = vmatprep.subr.bf16.mxu0 %v6448_v28  ;;  %v6538_v27 = vld [vmem:[%s9430_s1 + $0x864] ss:$16 sps:$4 sm:$0xff]   ;;  %v6541_v28 = vld [vmem:[%s9430_s1 + $0x6c] ss:$16 sps:$4 sm:$0xff]  }
  0x59   :  { %1998 = vmatprep.subr.bf16.mxu1 %v6451_v29  ;;  %v6536_v29 = vld [vmem:[%s9430_s1 + $0x860] ss:$16 sps:$4 sm:$0xff]  }
  0x5b   :  { %1956 = vmatpush1.bf16.msra.mxu0 %v6446_v30  ;;  %v6539_v30 = vld [vmem:[%s9430_s1 + $0x68] ss:$16 sps:$4 sm:$0xff]  }
  0x5c   :  { %1999 = vmatpush1.bf16.msra.mxu1 %v6449_v31  ;;  %1957 = vmatprep.subr.bf16.mxu0 %v6454_v32  ;;  %v6544_v31 = vld [vmem:[%s9430_s1 + $0x844] ss:$16 sps:$4 sm:$0xff]   ;;  %v6547_v32 = vld [vmem:[%s9430_s1 + $0x4c] ss:$16 sps:$4 sm:$0xff]  }
  0x5d   :  { %2000 = vmatprep.subr.bf16.mxu1 %v6457_v33  ;;  %v6542_v33 = vld [vmem:[%s9430_s1 + $0x840] ss:$16 sps:$4 sm:$0xff]  }
  0x5f   :  { %1958 = vmatpush1.bf16.msra.mxu0 %v6452_v36  ;;  %v6550_v36 = vld [vmem:[%s9430_s1 + $0x824] ss:$16 sps:$4 sm:$0xff]  }
  0x60   :  { %2001 = vmatpush1.bf16.msra.mxu1 %v6455_v37  ;;  %1959 = vmatprep.subr.bf16.mxu0 %v6460_v38  ;;  %v6553_v37 = vld [vmem:[%s9430_s1 + $0x2c] ss:$16 sps:$4 sm:$0xff]   ;;  %v6548_v38 = vld [vmem:[%s9430_s1 + $0x820] ss:$16 sps:$4 sm:$0xff]  }
  0x61   :  { %2002 = vmatprep.subr.bf16.mxu1 %v6463_v39  ;;  %v6551_v39 = vld [vmem:[%s9430_s1 + $0x28] ss:$16 sps:$4 sm:$0xff]  }
  0x63   :  { %1960 = vmatpush2.bf16.msra.mxu0 %v6458_v40  ;;  %v6556_v40 = vld [vmem:[%s9430_s1 + $0x804] ss:$16 sps:$4 sm:$0xff]  }
  0x64   :  { %2003 = vmatpush2.bf16.msra.mxu1 %v6461_v41  ;;  %1961 = vmatprep.subr.bf16.mxu0 %v6466_v42  ;;  %v6559_v41 = vld [vmem:[%s9430_s1 + $0xc] ss:$16 sps:$4 sm:$0xff]   ;;  %v6554_v42 = vld [vmem:[%s9430_s1 + $0x800] ss:$16 sps:$4 sm:$0xff]  }
  0x65   :  { %2004 = vmatprep.subr.bf16.mxu1 %v6469_v43  ;;  %v6557_v43 = vld [vmem:[%s9430_s1 + $0x8] ss:$16 sps:$4 sm:$0xff]  }
  0x67   :  { %1962 = vmatpush2.bf16.msra.mxu0 %v6464_v44  ;;  %v6563_v44 = vld [vmem:[%s9430_s1 + $0x1ec] ss:$16 sps:$4 sm:$0xff]  }
  0x68   :  { %2005 = vmatpush2.bf16.msra.mxu1 %v6467_v45  ;;  %1963 = vmatprep.subr.bf16.mxu0 %v6472_v46  ;;  %v6566_v45 = vld [vmem:[%s9430_s1 + $0x2ec] ss:$16 sps:$4 sm:$0xff]   ;;  %v7839_v46 = vld [vmem:[%s9431_s0 + $0x20] ss:$36 sps:$4 sm:$0xff]  }
  0x69   :  { %2006 = vmatprep.subr.bf16.mxu1 %v6475_v47  ;;  %v6561_v47 = vld [vmem:[%s9430_s1 + $0x1e8] ss:$16 sps:$4 sm:$0xff]  }
  0x6b   :  { %1964 = vmatpush2.bf16.msra.mxu0 %v6470_v48  ;;  %v6564_v48 = vld [vmem:[%s9430_s1 + $0x2e8] ss:$16 sps:$4 sm:$0xff]  }
  0x6c   :  { %2007 = vmatpush2.bf16.msra.mxu1 %v6473_v50  ;;  %1965 = vmatprep.subr.bf16.mxu0 %v6478_v52  ;;  %v6569_v50 = vld [vmem:[%s9430_s1 + $0x1cc] ss:$16 sps:$4 sm:$0xff]  }
  0x6d   :  { %2008 = vmatprep.subr.bf16.mxu1 %v6481_v53  ;;  %v6572_v52 = vld [vmem:[%s9430_s1 + $0x2cc] ss:$16 sps:$4 sm:$0xff]   ;;  %v6567_v53 = vld [vmem:[%s9430_s1 + $0x1c8] ss:$16 sps:$4 sm:$0xff]  }
  0x6f   :  { %1966 = vmatpush2.bf16.msra.mxu0 %v6476_v54  ;;  %v6570_v54 = vld [vmem:[%s9430_s1 + $0x2c8] ss:$16 sps:$4 sm:$0xff]  }
  0x70   :  { %2009 = vmatpush2.bf16.msra.mxu1 %v6479_v55  ;;  %1967 = vmatprep.subr.bf16.mxu0 %v6484_v56  ;;  %v6575_v55 = vld [vmem:[%s9430_s1 + $0x1ac] ss:$16 sps:$4 sm:$0xff]  }
  0x71   :  { %2010 = vmatprep.subr.bf16.mxu1 %v6487_v57  ;;  %v6578_v56 = vld [vmem:[%s9430_s1 + $0x2ac] ss:$16 sps:$4 sm:$0xff]   ;;  %v6573_v57 = vld [vmem:[%s9430_s1 + $0x1a8] ss:$16 sps:$4 sm:$0xff]  }
  0x73   :  { %1968 = vmatpush2.bf16.msra.mxu0 %v6482_v58  ;;  %v6576_v58 = vld [vmem:[%s9430_s1 + $0x2a8] ss:$16 sps:$4 sm:$0xff]  }
  0x74   :  { %2011 = vmatpush2.bf16.msra.mxu1 %v6485_v59  ;;  %1969 = vmatprep.subr.bf16.mxu0 %v6490_v60  ;;  %v6581_v59 = vld [vmem:[%s9430_s1 + $0x18c] ss:$16 sps:$4 sm:$0xff]   ;;  %v6579_v60 = vld [vmem:[%s9430_s1 + $0x188] ss:$16 sps:$4 sm:$0xff]  }
  0x75   :  { %2012 = vmatprep.subr.bf16.mxu1 %v6493_v61  ;;  %v6582_v61 = vld [vmem:[%s9430_s1 + $0x288] ss:$16 sps:$4 sm:$0xff]  }
  0x77   :  { %1970 = vmatpush2.bf16.msra.mxu0 %v6488_v62  ;;  %v6587_v62 = vld [vmem:[%s9430_s1 + $0x16c] ss:$16 sps:$4 sm:$0xff]  }
  0x78   :  { %2013 = vmatpush2.bf16.msra.mxu1 %v6491_v63  ;;  %1971 = vmatprep.subr.bf16.mxu0 %v6496_v0  ;;  %v6590_v63 = vld [vmem:[%s9430_s1 + $0x26c] ss:$16 sps:$4 sm:$0xff]   ;;  %v6585_v0 = vld [vmem:[%s9430_s1 + $0x168] ss:$16 sps:$4 sm:$0xff]  }
  0x79   :  { %2014 = vmatprep.subr.bf16.mxu1 %v6499_v1  ;;  %v6588_v1 = vld [vmem:[%s9430_s1 + $0x268] ss:$16 sps:$4 sm:$0xff]  }
  0x7b   :  { %1972 = vmatpush2.bf16.msra.mxu0 %v6494_v2  ;;  %v6593_v2 = vld [vmem:[%s9430_s1 + $0x14c] ss:$16 sps:$4 sm:$0xff]  }
  0x7c   :  { %2015 = vmatpush2.bf16.msra.mxu1 %v6497_v3  ;;  %1973 = vmatprep.subr.bf16.mxu0 %v6502_v5  ;;  %v6596_v3 = vld [vmem:[%s9430_s1 + $0x24c] ss:$16 sps:$4 sm:$0xff]   ;;  %v6591_v5 = vld [vmem:[%s9430_s1 + $0x148] ss:$16 sps:$4 sm:$0xff]  }
  0x7d   :  { %2016 = vmatprep.subr.bf16.mxu1 %v6505_v6  ;;  %v6594_v6 = vld [vmem:[%s9430_s1 + $0x248] ss:$16 sps:$4 sm:$0xff]  }
  0x7f   :  { %1974 = vmatpush2.bf16.msra.mxu0 %v6500_v7  ;;  %v6599_v7 = vld [vmem:[%s9430_s1 + $0x12c] ss:$16 sps:$4 sm:$0xff]  }
  0x80   :  { %2017 = vmatpush2.bf16.msra.mxu1 %v6503_v8  ;;  %2029 = vmatprep.subr.bf16.mxu0 %v6514_v9  ;;  %v6602_v8 = vld [vmem:[%s9430_s1 + $0x22c] ss:$16 sps:$4 sm:$0xff]   ;;  %v6597_v9 = vld [vmem:[%s9430_s1 + $0x128] ss:$16 sps:$4 sm:$0xff]  }
  0x81   :  { %2072 = vmatprep.subr.bf16.mxu1 %v6517_v10  ;;  %v6600_v10 = vld [vmem:[%s9430_s1 + $0x228] ss:$16 sps:$4 sm:$0xff]  }
  0x82   :  { %1976 = vmatmul.mubr.bf16.vlgmr.msra.gmra.mxu0 %v6506_v11  ;;  %v6605_v11 = vld [vmem:[%s9430_s1 + $0x10c] ss:$16 sps:$4 sm:$0xff]  }
  0x83   :  { %2019 = vmatmul.mubr.bf16.vlgmr.msra.gmra.mxu1 %v6509_v12  ;;  %2030 = vmatpush1.bf16.msra.mxu0 %v6512_v13  ;;  %v6608_v12 = vld [vmem:[%s9430_s1 + $0x20c] ss:$16 sps:$4 sm:$0xff]   ;;  %v6603_v13 = vld [vmem:[%s9430_s1 + $0x108] ss:$16 sps:$4 sm:$0xff]  }
  0x84   :  { %2073 = vmatpush1.bf16.msra.mxu1 %v6515_v14  ;;  %2031 = vmatprep.subr.bf16.mxu0 %v6520_v15  ;;  %v6606_v14 = vld [vmem:[%s9430_s1 + $0x208] ss:$16 sps:$4 sm:$0xff]   ;;  %v6611_v15 = vld [vmem:[%s9430_s1 + $0x3ec] ss:$16 sps:$4 sm:$0xff]  }
  0x85   :  { %2074 = vmatprep.subr.bf16.mxu1 %v6523_v16  ;;  %2061 = vmatprep.mubr.bf16.mxu0 %v7229_v21  ;;  %v6614_v16 = vld [vmem:[%s9430_s1 + $0x4ec] ss:$16 sps:$4 sm:$0xff]  }
  0x86   :  { %2104 = vmatprep.mubr.bf16.mxu1 %v7462_v49  ;;  %v6535_v49 = vld [vmem:[%s9430_s1 + $0x8c] ss:$16 sps:$4 sm:$0xff]  }
  0x87   :  { %2032 = vmatpush1.bf16.msra.mxu0 %v6518_v17  ;;  %v6609_v17 = vld [vmem:[%s9430_s1 + $0x3e8] ss:$16 sps:$4 sm:$0xff]  }
  0x88   :  { %2075 = vmatpush1.bf16.msra.mxu1 %v6521_v18  ;;  %2033 = vmatprep.subr.bf16.mxu0 %v6526_v19  ;;  %v6612_v18 = vld [vmem:[%s9430_s1 + $0x4e8] ss:$16 sps:$4 sm:$0xff]   ;;  %v6617_v19 = vld [vmem:[%s9430_s1 + $0x3cc] ss:$16 sps:$4 sm:$0xff]  }
  0x89   :  { %2076 = vmatprep.subr.bf16.mxu1 %v6529_v20  ;;  %v6620_v20 = vld [vmem:[%s9430_s1 + $0x4cc] ss:$16 sps:$4 sm:$0xff]  }
  0x8b   :  { %2034 = vmatpush1.bf16.msra.mxu0 %v6524_v22  ;;  %v6615_v22 = vld [vmem:[%s9430_s1 + $0x3c8] ss:$16 sps:$4 sm:$0xff]  }
  0x8c   :  { %2077 = vmatpush1.bf16.msra.mxu1 %v6527_v23  ;;  %2035 = vmatprep.subr.bf16.mxu0 %v6532_v24  ;;  %v6618_v23 = vld [vmem:[%s9430_s1 + $0x4c8] ss:$16 sps:$4 sm:$0xff]   ;;  %v6623_v24 = vld [vmem:[%s9430_s1 + $0x3ac] ss:$16 sps:$4 sm:$0xff]  }
  0x8d   :  { %2078 = vmatprep.subr.bf16.mxu1 %v6535_v49  ;;  %v6621_v49 = vld [vmem:[%s9430_s1 + $0x3a8] ss:$16 sps:$4 sm:$0xff]  }
  0x8f   :  { %2036 = vmatpush1.bf16.msra.mxu0 %v6530_v25  ;;  %v6624_v25 = vld [vmem:[%s9430_s1 + $0x4a8] ss:$16 sps:$4 sm:$0xff]  }
  0x90   :  { %2079 = vmatpush1.bf16.msra.mxu1 %v6533_v26  ;;  %2037 = vmatprep.subr.bf16.mxu0 %v6538_v27  ;;  %v6629_v26 = vld [vmem:[%s9430_s1 + $0x38c] ss:$16 sps:$4 sm:$0xff]   ;;  %v6627_v27 = vld [vmem:[%s9430_s1 + $0x388] ss:$16 sps:$4 sm:$0xff]  }
  0x91   :  { %2080 = vmatprep.subr.bf16.mxu1 %v6541_v28  ;;  %v6630_v28 = vld [vmem:[%s9430_s1 + $0x488] ss:$16 sps:$4 sm:$0xff]  }
  0x93   :  { %2038 = vmatpush1.bf16.msra.mxu0 %v6536_v29  ;;  %v6635_v29 = vld [vmem:[%s9430_s1 + $0x36c] ss:$16 sps:$4 sm:$0xff]  }
  0x94   :  { %2081 = vmatpush1.bf16.msra.mxu1 %v6539_v30  ;;  %2039 = vmatprep.subr.bf16.mxu0 %v6544_v31  ;;  %v6638_v30 = vld [vmem:[%s9430_s1 + $0x46c] ss:$16 sps:$4 sm:$0xff]   ;;  %v6633_v31 = vld [vmem:[%s9430_s1 + $0x368] ss:$16 sps:$4 sm:$0xff]  }
  0x95   :  { %2082 = vmatprep.subr.bf16.mxu1 %v6547_v32  ;;  %v6636_v32 = vld [vmem:[%s9430_s1 + $0x468] ss:$16 sps:$4 sm:$0xff]  }
  0x97   :  { %2040 = vmatpush1.bf16.msra.mxu0 %v6542_v33  ;;  %v6641_v33 = vld [vmem:[%s9430_s1 + $0x34c] ss:$16 sps:$4 sm:$0xff]  }
  0x98   :  { %2083 = vmatpush1.bf16.msra.mxu1 %v6545_v35  ;;  %2041 = vmatprep.subr.bf16.mxu0 %v6550_v36  ;;  %v6644_v35 = vld [vmem:[%s9430_s1 + $0x44c] ss:$16 sps:$4 sm:$0xff]   ;;  %v6639_v36 = vld [vmem:[%s9430_s1 + $0x348] ss:$16 sps:$4 sm:$0xff]  }
  0x99   :  { %2084 = vmatprep.subr.bf16.mxu1 %v6553_v37  ;;  %v6642_v37 = vld [vmem:[%s9430_s1 + $0x448] ss:$16 sps:$4 sm:$0xff]  }
  0x9b   :  { %2042 = vmatpush1.bf16.msra.mxu0 %v6548_v38  ;;  %v6647_v38 = vld [vmem:[%s9430_s1 + $0x32c] ss:$16 sps:$4 sm:$0xff]  }
  0x9c   :  { %2085 = vmatpush1.bf16.msra.mxu1 %v6551_v39  ;;  %2043 = vmatprep.subr.bf16.mxu0 %v6556_v40  ;;  %v6650_v39 = vld [vmem:[%s9430_s1 + $0x42c] ss:$16 sps:$4 sm:$0xff]   ;;  %v6645_v40 = vld [vmem:[%s9430_s1 + $0x328] ss:$16 sps:$4 sm:$0xff]  }
  0x9d   :  { %2086 = vmatprep.subr.bf16.mxu1 %v6559_v41  ;;  %v6648_v41 = vld [vmem:[%s9430_s1 + $0x428] ss:$16 sps:$4 sm:$0xff]  }
  0x9f   :  { %2044 = vmatpush1.bf16.msra.mxu0 %v6554_v42  ;;  %v6653_v42 = vld [vmem:[%s9430_s1 + $0x30c] ss:$16 sps:$4 sm:$0xff]  }
  0xa0   :  { %2087 = vmatpush1.bf16.msra.mxu1 %v6557_v43  ;;  %2115 = vmatprep.subr.bf16.mxu0 %v6566_v45  ;;  %v6656_v43 = vld [vmem:[%s9430_s1 + $0x40c] ss:$16 sps:$4 sm:$0xff]   ;;  %v6654_v45 = vld [vmem:[%s9430_s1 + $0x408] ss:$16 sps:$4 sm:$0xff]  }
  0xa1   :  { %2088 = vmatprep.subr.bf16.mxu1 %v6563_v44  ;;  %v6651_v44 = vld [vmem:[%s9430_s1 + $0x308] ss:$16 sps:$4 sm:$0xff]  }
  0xa2   :  { %2062 = vmatmul.mubr.bf16.vlgmr.msra.gmra.mxu0 %v7839_v46 }
  0xa3   :  { %2116 = vmatpush1.bf16.msra.mxu0 %v6564_v48  ;;  %2147 = vmatprep.mubr.bf16.mxu0 %v7470_v51  ;;  %v6584_v51 = vld [vmem:[%s9430_s1 + $0x28c] ss:$16 sps:$4 sm:$0xff]  }
  0xa4   :  { %2089 = vmatpush2.bf16.msra.mxu1 %v6561_v47  ;;  %2117 = vmatprep.subr.bf16.mxu0 %v6572_v52  ;;  %v6659_v47 = vld [vmem:[%s9430_s1 + $0x5ec] ss:$16 sps:$4 sm:$0xff]   ;;  %v6660_v52 = vld [vmem:[%s9430_s1 + $0x6e8] ss:$16 sps:$4 sm:$0xff]  }
  0xa5   :  { %2090 = vmatprep.subr.bf16.mxu1 %v6569_v50  ;;  %v6662_v48 = vld [vmem:[%s9430_s1 + $0x6ec] ss:$16 sps:$4 sm:$0xff]   ;;  %v6657_v50 = vld [vmem:[%s9430_s1 + $0x5e8] ss:$16 sps:$4 sm:$0xff]  }
  0xa7   :  { %2118 = vmatpush1.bf16.msra.mxu0 %v6570_v54  ;;  %v6668_v54 = vld [vmem:[%s9430_s1 + $0x6cc] ss:$16 sps:$4 sm:$0xff]  }
  0xa8   :  { %2091 = vmatpush2.bf16.msra.mxu1 %v6567_v53  ;;  %2119 = vmatprep.subr.bf16.mxu0 %v6578_v56  ;;  %v6665_v53 = vld [vmem:[%s9430_s1 + $0x5cc] ss:$16 sps:$4 sm:$0xff]   ;;  %v6666_v56 = vld [vmem:[%s9430_s1 + $0x6c8] ss:$16 sps:$4 sm:$0xff]  }
  0xa9   :  { %2092 = vmatprep.subr.bf16.mxu1 %v6575_v55  ;;  %v6663_v55 = vld [vmem:[%s9430_s1 + $0x5c8] ss:$16 sps:$4 sm:$0xff]  }
  0xab   :  { %2120 = vmatpush1.bf16.msra.mxu0 %v6576_v58  ;;  %v6671_v58 = vld [vmem:[%s9430_s1 + $0x5ac] ss:$16 sps:$4 sm:$0xff]  }
  0xac   :  { %2093 = vmatpush2.bf16.msra.mxu1 %v6573_v57  ;;  %2121 = vmatprep.subr.bf16.mxu0 %v6584_v51  ;;  %v7225_v57 = vld [vmem:[%s9431_s0 + $0x8] ss:$36 sps:$4 sm:$0xff]  }
  0xad   :  { %2094 = vmatprep.subr.bf16.mxu1 %v6581_v59  ;;  %v6674_v59 = vld [vmem:[%s9430_s1 + $0x6ac] ss:$16 sps:$4 sm:$0xff]   ;;  %v6669_v51 = vld [vmem:[%s9430_s1 + $0x5a8] ss:$16 sps:$4 sm:$0xff]  }
  0xaf   :  { %2122 = vmatpush1.bf16.msra.mxu0 %v6582_v61  ;;  %v7226_v61 = vld [vmem:[%s9431_s0 + $0x1c] ss:$36 sps:$4 sm:$0xff]  }
  0xb0   :  { %2095 = vmatpush2.bf16.msra.mxu1 %v6579_v60  ;;  %2123 = vmatprep.subr.bf16.mxu0 %v6590_v63  ;;  %v6672_v60 = vld [vmem:[%s9430_s1 + $0x6a8] ss:$16 sps:$4 sm:$0xff]   ;;  %v6680_v63 = vld [vmem:[%s9430_s1 + $0x68c] ss:$16 sps:$4 sm:$0xff]  }
  0xb1   :  { %2096 = vmatprep.subr.bf16.mxu1 %v6587_v62  ;;  %v6677_v62 = vld [vmem:[%s9430_s1 + $0x58c] ss:$16 sps:$4 sm:$0xff]  }
  0xb3   :  { %2124 = vmatpush1.bf16.msra.mxu0 %v6588_v1  ;;  %v6678_v1 = vld [vmem:[%s9430_s1 + $0x688] ss:$16 sps:$4 sm:$0xff]  }
  0xb4   :  { %2097 = vmatpush2.bf16.msra.mxu1 %v6585_v0  ;;  %2125 = vmatprep.subr.bf16.mxu0 %v6596_v3  ;;  %v6675_v0 = vld [vmem:[%s9430_s1 + $0x588] ss:$16 sps:$4 sm:$0xff]   ;;  %v6686_v3 = vld [vmem:[%s9430_s1 + $0x66c] ss:$16 sps:$4 sm:$0xff]  }
  0xb5   :  { %2098 = vmatprep.subr.bf16.mxu1 %v6593_v2  ;;  %v6683_v2 = vld [vmem:[%s9430_s1 + $0x56c] ss:$16 sps:$4 sm:$0xff]  }
  0xb7   :  { %2126 = vmatpush1.bf16.msra.mxu0 %v6594_v6  ;;  %v6684_v6 = vld [vmem:[%s9430_s1 + $0x668] ss:$16 sps:$4 sm:$0xff]  }
  0xb8   :  { %2099 = vmatpush2.bf16.msra.mxu1 %v6591_v5  ;;  %2127 = vmatprep.subr.bf16.mxu0 %v6602_v8  ;;  %v6681_v5 = vld [vmem:[%s9430_s1 + $0x568] ss:$16 sps:$4 sm:$0xff]   ;;  %v6692_v8 = vld [vmem:[%s9430_s1 + $0x64c] ss:$16 sps:$4 sm:$0xff]  }
  0xb9   :  { %2100 = vmatprep.subr.bf16.mxu1 %v6599_v7  ;;  %v6689_v7 = vld [vmem:[%s9430_s1 + $0x54c] ss:$16 sps:$4 sm:$0xff]  }
  0xbb   :  { %2128 = vmatpush1.bf16.msra.mxu0 %v6600_v10  ;;  %v6690_v10 = vld [vmem:[%s9430_s1 + $0x648] ss:$16 sps:$4 sm:$0xff]  }
  0xbc   :  { %2101 = vmatpush2.bf16.msra.mxu1 %v6597_v9  ;;  %2129 = vmatprep.subr.bf16.mxu0 %v6608_v12  ;;  %v6687_v9 = vld [vmem:[%s9430_s1 + $0x548] ss:$16 sps:$4 sm:$0xff]   ;;  %v6698_v12 = vld [vmem:[%s9430_s1 + $0x62c] ss:$16 sps:$4 sm:$0xff]  }
  0xbd   :  { %2102 = vmatprep.subr.bf16.mxu1 %v6605_v11  ;;  %v6695_v11 = vld [vmem:[%s9430_s1 + $0x52c] ss:$16 sps:$4 sm:$0xff]  }
  0xbf   :  { %2130 = vmatpush1.bf16.msra.mxu0 %v6606_v14  ;;  %v6696_v14 = vld [vmem:[%s9430_s1 + $0x628] ss:$16 sps:$4 sm:$0xff]  }
  0xc0   :  { %2103 = vmatpush2.bf16.msra.mxu1 %v6603_v13  ;;  %2131 = vmatprep.subr.bf16.mxu0 %v6611_v15  ;;  %v6693_v13 = vld [vmem:[%s9430_s1 + $0x528] ss:$16 sps:$4 sm:$0xff]   ;;  %v6701_v15 = vld [vmem:[%s9430_s1 + $0x50c] ss:$16 sps:$4 sm:$0xff]  }
  0xc1   :  { %2158 = vmatprep.subr.bf16.mxu1 %v6614_v16  ;;  %v6704_v16 = vld [vmem:[%s9430_s1 + $0x60c] ss:$16 sps:$4 sm:$0xff]  }
  0xc3   :  { %2105 = vmatmul.mubr.bf16.vlgmr.msra.gmra.mxu1 %v7525_v4  ;;  %2132 = vmatpush2.bf16.msra.mxu0 %v6609_v17  ;;  %v6626_v4 = vld [vmem:[%s9430_s1 + $0x4ac] ss:$16 sps:$4 sm:$0xff]   ;;  %v6699_v17 = vld [vmem:[%s9430_s1 + $0x508] ss:$16 sps:$4 sm:$0xff]  }
  0xc4   :  { %2159 = vmatpush1.bf16.msra.mxu1 %v6612_v18  ;;  %2133 = vmatprep.subr.bf16.mxu0 %v6617_v19  ;;  %v6702_v18 = vld [vmem:[%s9430_s1 + $0x608] ss:$16 sps:$4 sm:$0xff]   ;;  %v6707_v19 = vld [vmem:[%s9430_s1 + $0x7ec] ss:$16 sps:$4 sm:$0xff]  }
  0xc5   :  { %2160 = vmatprep.subr.bf16.mxu1 %v6620_v20  ;;  %2190 = vmatprep.mubr.bf16.mxu1 %v7618_v34  ;;  %v6632_v34 = vld [vmem:[%s9430_s1 + $0x48c] ss:$16 sps:$4 sm:$0xff]  }
  0xc6   :  { %v6710_v20 = vld [vmem:[%s9430_s1 + $0x8ec] ss:$16 sps:$4 sm:$0xff]  }
  0xc7   :  { %2134 = vmatpush2.bf16.msra.mxu0 %v6615_v22  ;;  %v6705_v22 = vld [vmem:[%s9430_s1 + $0x7e8] ss:$16 sps:$4 sm:$0xff]  }
  0xc8   :  { %2161 = vmatpush1.bf16.msra.mxu1 %v6618_v23  ;;  %2135 = vmatprep.subr.bf16.mxu0 %v6623_v24  ;;  %v6708_v23 = vld [vmem:[%s9430_s1 + $0x8e8] ss:$16 sps:$4 sm:$0xff]   ;;  %v6713_v24 = vld [vmem:[%s9430_s1 + $0x7cc] ss:$16 sps:$4 sm:$0xff]  }
  0xc9   :  { %2162 = vmatprep.subr.bf16.mxu1 %v6626_v4  ;;  %v6716_v4 = vld [vmem:[%s9430_s1 + $0x8cc] ss:$16 sps:$4 sm:$0xff]  }
  0xcb   :  { %2136 = vmatpush2.bf16.msra.mxu0 %v6621_v49  ;;  %v7227_v49 = vld [vmem:[%s9431_s0 + $0x10] ss:$36 sps:$4 sm:$0xff]  }
  0xcc   :  { %2163 = vmatpush1.bf16.msra.mxu1 %v6624_v25  ;;  %2137 = vmatprep.subr.bf16.mxu0 %v6629_v26  ;;  %v6711_v25 = vld [vmem:[%s9430_s1 + $0x7c8] ss:$16 sps:$4 sm:$0xff]  }
  0xcd   :  { %2164 = vmatprep.subr.bf16.mxu1 %v6632_v34  ;;  %v6714_v26 = vld [vmem:[%s9430_s1 + $0x8c8] ss:$16 sps:$4 sm:$0xff]   ;;  %v6719_v34 = vld [vmem:[%s9430_s1 + $0x7ac] ss:$16 sps:$4 sm:$0xff]  }
  0xcf   :  { %2138 = vmatpush2.bf16.msra.mxu0 %v6627_v27  ;;  %v6722_v27 = vld [vmem:[%s9430_s1 + $0x8ac] ss:$16 sps:$4 sm:$0xff]  }
  0xd0   :  { %2165 = vmatpush1.bf16.msra.mxu1 %v6630_v28  ;;  %2139 = vmatprep.subr.bf16.mxu0 %v6635_v29  ;;  %v6717_v28 = vld [vmem:[%s9430_s1 + $0x7a8] ss:$16 sps:$4 sm:$0xff]  }
  0xd1   :  { %2166 = vmatprep.subr.bf16.mxu1 %v6638_v30  ;;  %v6720_v29 = vld [vmem:[%s9430_s1 + $0x8a8] ss:$16 sps:$4 sm:$0xff]   ;;  %v6725_v30 = vld [vmem:[%s9430_s1 + $0x78c] ss:$16 sps:$4 sm:$0xff]  }
  0xd3   :  { %2140 = vmatpush2.bf16.msra.mxu0 %v6633_v31  ;;  %v6728_v31 = vld [vmem:[%s9430_s1 + $0x88c] ss:$16 sps:$4 sm:$0xff]  }
  0xd4   :  { %2167 = vmatpush1.bf16.msra.mxu1 %v6636_v32  ;;  %2141 = vmatprep.subr.bf16.mxu0 %v6641_v33  ;;  %v6723_v32 = vld [vmem:[%s9430_s1 + $0x788] ss:$16 sps:$4 sm:$0xff]  }
  0xd5   :  { %2168 = vmatprep.subr.bf16.mxu1 %v6644_v35  ;;  %v6726_v33 = vld [vmem:[%s9430_s1 + $0x888] ss:$16 sps:$4 sm:$0xff]   ;;  %v6731_v35 = vld [vmem:[%s9430_s1 + $0x76c] ss:$16 sps:$4 sm:$0xff]  }
  0xd7   :  { %2142 = vmatpush2.bf16.msra.mxu0 %v6639_v36  ;;  %v6734_v36 = vld [vmem:[%s9430_s1 + $0x86c] ss:$16 sps:$4 sm:$0xff]  }
  0xd8   :  { %2169 = vmatpush1.bf16.msra.mxu1 %v6642_v37  ;;  %2143 = vmatprep.subr.bf16.mxu0 %v6647_v38  ;;  %v6729_v37 = vld [vmem:[%s9430_s1 + $0x768] ss:$16 sps:$4 sm:$0xff]  }
  0xd9   :  { %2170 = vmatprep.subr.bf16.mxu1 %v6650_v39  ;;  %v6732_v38 = vld [vmem:[%s9430_s1 + $0x868] ss:$16 sps:$4 sm:$0xff]   ;;  %v6737_v39 = vld [vmem:[%s9430_s1 + $0x74c] ss:$16 sps:$4 sm:$0xff]  }
  0xdb   :  { %2144 = vmatpush2.bf16.msra.mxu0 %v6645_v40  ;;  %v6740_v40 = vld [vmem:[%s9430_s1 + $0x84c] ss:$16 sps:$4 sm:$0xff]  }
  0xdc   :  { %2171 = vmatpush1.bf16.msra.mxu1 %v6648_v41  ;;  %2145 = vmatprep.subr.bf16.mxu0 %v6653_v42  ;;  %v6735_v41 = vld [vmem:[%s9430_s1 + $0x748] ss:$16 sps:$4 sm:$0xff]  }
  0xdd   :  { %2172 = vmatprep.subr.bf16.mxu1 %v6656_v43  ;;  %v6738_v42 = vld [vmem:[%s9430_s1 + $0x848] ss:$16 sps:$4 sm:$0xff]   ;;  %v6743_v43 = vld [vmem:[%s9430_s1 + $0x72c] ss:$16 sps:$4 sm:$0xff]  }
  0xdf   :  { %2146 = vmatpush2.bf16.msra.mxu0 %v6651_v44  ;;  %v6746_v44 = vld [vmem:[%s9430_s1 + $0x82c] ss:$16 sps:$4 sm:$0xff]  }
  0xe0   :  { %2173 = vmatpush1.bf16.msra.mxu1 %v6654_v45  ;;  %2201 = vmatprep.subr.bf16.mxu0 %v6662_v48  ;;  %v6741_v45 = vld [vmem:[%s9430_s1 + $0x728] ss:$16 sps:$4 sm:$0xff]   ;;  %v6749_v48 = vld [vmem:[%s9430_s1 + $0x70c] ss:$16 sps:$4 sm:$0xff]  }
  0xe1   :  { %2174 = vmatprep.subr.bf16.mxu1 %v6659_v47  ;;  %v6744_v47 = vld [vmem:[%s9430_s1 + $0x828] ss:$16 sps:$4 sm:$0xff]  }
  0xe2   :  { %2148 = vmatmul.mubr.bf16.vlgmr.msra.gmra.mxu0 %v7225_v57  ;;  %v7228_v57 = vld [vmem:[%s9431_s0 + $0x18] ss:$36 sps:$4 sm:$0xff]  }
  0xe3   :  { %2202 = vmatpush1.bf16.msra.mxu0 %v6660_v52  ;;  %2233 = vmatprep.mubr.bf16.mxu0 %v7226_v61  ;;  %v6747_v52 = vld [vmem:[%s9430_s1 + $0x708] ss:$16 sps:$4 sm:$0xff]  }
  0xe4   :  { %2175 = vmatpush2.bf16.msra.mxu1 %v6657_v50  ;;  %2203 = vmatprep.subr.bf16.mxu0 %v6668_v54  ;;  %v6752_v50 = vld [vmem:[%s9430_s1 + $0x80c] ss:$16 sps:$4 sm:$0xff]  }
  0xe5   :  { %2176 = vmatprep.subr.bf16.mxu1 %v6665_v53  ;;  %v6750_v53 = vld [vmem:[%s9430_s1 + $0x808] ss:$16 sps:$4 sm:$0xff]  }
  0xe6   :  { %v6755_v54 = vld [vmem:[%s9432_s3 + $0xac] ss:$12 sps:$4 sm:$0xff]  }
  0xe7   :  { %2204 = vmatpush1.bf16.msra.mxu0 %v6666_v56  ;;  %v6758_v56 = vld [vmem:[%s9432_s3 + $0x94] ss:$12 sps:$4 sm:$0xff]   ;;  %v6819_v61 = vld [vmem:[%s9432_s3 + $0x22c] ss:$12 sps:$4 sm:$0xff]  }
  0xe8   :  { %2177 = vmatpush2.bf16.msra.mxu1 %v6663_v55  ;;  %2205 = vmatprep.subr.bf16.mxu0 %v6674_v59  ;;  %v6753_v55 = vld [vmem:[%s9432_s3 + $0xa8] ss:$12 sps:$4 sm:$0xff]  }
  0xe9   :  { %2178 = vmatprep.subr.bf16.mxu1 %v6671_v58  ;;  %v6756_v58 = vld [vmem:[%s9432_s3 + $0x90] ss:$12 sps:$4 sm:$0xff]  }
  0xea   :  { %v6761_v59 = vld [vmem:[%s9432_s3 + $0x7c] ss:$12 sps:$4 sm:$0xff]  }
  0xeb   :  { %2206 = vmatpush1.bf16.msra.mxu0 %v6672_v60  ;;  %v6817_v60 = vld [vmem:[%s9432_s3 + $0x228] ss:$12 sps:$4 sm:$0xff]  }
  0xec   :  { %2179 = vmatpush2.bf16.msra.mxu1 %v6669_v51  ;;  %2207 = vmatprep.subr.bf16.mxu0 %v6680_v63  ;;  %v6759_v51 = vld [vmem:[%s9432_s3 + $0x78] ss:$12 sps:$4 sm:$0xff]   ;;  %v6762_v63 = vld [vmem:[%s9432_s3 + $0x60] ss:$12 sps:$4 sm:$0xff]  }
  0xed   :  { %2180 = vmatprep.subr.bf16.mxu1 %v6677_v62  ;;  %v6822_v62 = vld [vmem:[%s9432_s3 + $0x214] ss:$12 sps:$4 sm:$0xff]  }
  0xef   :  { %2208 = vmatpush1.bf16.msra.mxu0 %v6678_v1  ;;  %v6820_v1 = vld [vmem:[%s9432_s3 + $0x210] ss:$12 sps:$4 sm:$0xff]  }
  0xf0   :  { %2181 = vmatpush2.bf16.msra.mxu1 %v6675_v0  ;;  %2209 = vmatprep.subr.bf16.mxu0 %v6686_v3  ;;  %v6767_v0 = vld [vmem:[%s9432_s3 + $0x4c] ss:$12 sps:$4 sm:$0xff]   ;;  %v6765_v3 = vld [vmem:[%s9432_s3 + $0x48] ss:$12 sps:$4 sm:$0xff]  }
  0xf1   :  { %2182 = vmatprep.subr.bf16.mxu1 %v6683_v2  ;;  %v6825_v2 = vld [vmem:[%s9432_s3 + $0x1fc] ss:$12 sps:$4 sm:$0xff]  }
  0xf3   :  { %2210 = vmatpush1.bf16.msra.mxu0 %v6684_v6  ;;  %v6823_v6 = vld [vmem:[%s9432_s3 + $0x1f8] ss:$12 sps:$4 sm:$0xff]  }
  0xf4   :  { %2183 = vmatpush2.bf16.msra.mxu1 %v6681_v5  ;;  %2211 = vmatprep.subr.bf16.mxu0 %v6692_v8  ;;  %v6770_v5 = vld [vmem:[%s9432_s3 + $0x34] ss:$12 sps:$4 sm:$0xff]   ;;  %v6768_v8 = vld [vmem:[%s9432_s3 + $0x30] ss:$12 sps:$4 sm:$0xff]  }
  0xf5   :  { %2184 = vmatprep.subr.bf16.mxu1 %v6689_v7  ;;  %v6828_v7 = vld [vmem:[%s9432_s3 + $0x1e4] ss:$12 sps:$4 sm:$0xff]  }
  0xf7   :  { %2212 = vmatpush1.bf16.msra.mxu0 %v6690_v10  ;;  %v6826_v10 = vld [vmem:[%s9432_s3 + $0x1e0] ss:$12 sps:$4 sm:$0xff]  }
  0xf8   :  { %2185 = vmatpush2.bf16.msra.mxu1 %v6687_v9  ;;  %2213 = vmatprep.subr.bf16.mxu0 %v6698_v12  ;;  %v6773_v9 = vld [vmem:[%s9432_s3 + $0x1c] ss:$12 sps:$4 sm:$0xff]   ;;  %v6771_v12 = vld [vmem:[%s9432_s3 + $0x18] ss:$12 sps:$4 sm:$0xff]  }
  0xf9   :  { %2186 = vmatprep.subr.bf16.mxu1 %v6695_v11  ;;  %v6831_v11 = vld [vmem:[%s9432_s3 + $0x1cc] ss:$12 sps:$4 sm:$0xff]  }
  0xfb   :  { %2214 = vmatpush1.bf16.msra.mxu0 %v6696_v14  ;;  %v6829_v14 = vld [vmem:[%s9432_s3 + $0x1c8] ss:$12 sps:$4 sm:$0xff]  }
  0xfc   :  { %2187 = vmatpush2.bf16.msra.mxu1 %v6693_v13  ;;  %2215 = vmatprep.subr.bf16.mxu0 %v6704_v16  ;;  %v6776_v13 = vld [vmem:[%s9432_s3 + $0x4] ss:$12 sps:$4 sm:$0xff]   ;;  %v6779_v16 = vld [vmem:[%s9432_s3 + $0x16c] ss:$12 sps:$4 sm:$0xff]  }
  0xfd   :  { %2188 = vmatprep.subr.bf16.mxu1 %v6701_v15  ;;  %v6774_v15 = vld [vmem:[%s9432_s3] ss:$12 sps:$4 sm:$0xff]  }
  0xff   :  { %2216 = vmatpush1.bf16.msra.mxu0 %v6702_v18  ;;  %v6782_v18 = vld [vmem:[%s9432_s3 + $0x154] ss:$12 sps:$4 sm:$0xff]  }
 0x100   :  { %2189 = vmatpush2.bf16.msra.mxu1 %v6699_v17  ;;  %2217 = vmatprep.subr.bf16.mxu0 %v6707_v19  ;;  %v6777_v17 = vld [vmem:[%s9432_s3 + $0x168] ss:$12 sps:$4 sm:$0xff]   ;;  %v6780_v19 = vld [vmem:[%s9432_s3 + $0x150] ss:$12 sps:$4 sm:$0xff]  }
 0x101   :  { %2244 = vmatprep.subr.bf16.mxu1 %v6710_v20  ;;  %v6785_v20 = vld [vmem:[%s9432_s3 + $0x13c] ss:$12 sps:$4 sm:$0xff]  }
 0x103   :  { %2191 = vmatmul.mubr.bf16.vlgmr.msra.gmra.mxu1 %v7227_v49  ;;  %2218 = vmatpush2.bf16.msra.mxu0 %v6705_v22  ;;  %v6834_v22 = vld [vmem:[%s9432_s3 + $0x1b4] ss:$12 sps:$4 sm:$0xff]   ;;  %v6788_v49 = vld [vmem:[%s9432_s3 + $0x124] ss:$12 sps:$4 sm:$0xff]  }
 0x104   :  { %2245 = vmatpush1.bf16.msra.mxu1 %v6708_v23  ;;  %2219 = vmatprep.subr.bf16.mxu0 %v6713_v24  ;;  %v6832_v23 = vld [vmem:[%s9432_s3 + $0x1b0] ss:$12 sps:$4 sm:$0xff]   ;;  %v8336_v24 = vpop.f32.mrf.mxu0 }
 0x105   :  { %2246 = vmatprep.subr.bf16.mxu1 %v6716_v4  ;;  %2276 = vmatprep.mubr.bf16.mxu1 %v7229_v21  ;;  %v6783_v4 = vld [vmem:[%s9432_s3 + $0x138] ss:$12 sps:$4 sm:$0xff]  }
 0x107   :  { %2220 = vmatpush2.bf16.msra.mxu0 %v6711_v25  ;;  %v6837_v25 = vld [vmem:[%s9432_s3 + $0x19c] ss:$12 sps:$4 sm:$0xff]  }
 0x108   :  { %2247 = vmatpush1.bf16.msra.mxu1 %v6714_v26  ;;  %2221 = vmatprep.subr.bf16.mxu0 %v6719_v34  ;;  %v6835_v26 = vld [vmem:[%s9432_s3 + $0x198] ss:$12 sps:$4 sm:$0xff]  }
 0x109   :  { %2248 = vmatprep.subr.bf16.mxu1 %v6722_v27  ;;  %v6840_v34 = vld [vmem:[%s9432_s3 + $0x184] ss:$12 sps:$4 sm:$0xff]   ;;  %v1893_v27 = vpop.f32.mrf.mxu0 }
 0x10b   :  { %2222 = vmatpush2.bf16.msra.mxu0 %v6717_v28  ;;  %v351_v28 = vlaneseq }
 0x10c   :  { %2249 = vmatpush1.bf16.msra.mxu1 %v6720_v29  ;;  %2223 = vmatprep.subr.bf16.mxu0 %v6725_v30  ;;  %v6786_v29 = vld [vmem:[%s9432_s3 + $0x120] ss:$12 sps:$4 sm:$0xff]  }
 0x10d   :  { %2250 = vmatprep.subr.bf16.mxu1 %v6728_v31  ;;  %v6838_v30 = vld [vmem:[%s9432_s3 + $0x180] ss:$12 sps:$4 sm:$0xff]   ;;  %v8359_v31 = vpop.f32.mrf.mxu1 }
 0x10f   :  { %2224 = vmatpush2.bf16.msra.mxu0 %v6723_v32  ;;  %v6791_v32 = vld [vmem:[%s9432_s3 + $0x10c] ss:$12 sps:$4 sm:$0xff]  }
 0x110   :  { %2251 = vmatpush1.bf16.msra.mxu1 %v6726_v33  ;;  %2225 = vmatprep.subr.bf16.mxu0 %v6731_v35  ;;  %v6843_v33 = vld [vmem:[%s9432_s3 + $0x2ec] ss:$12 sps:$4 sm:$0xff]   ;;  %v1895_v35 = vpop.f32.mrf.mxu0 }
 0x111   :  { %2252 = vmatprep.subr.bf16.mxu1 %v6734_v36  ;;  %v8367_v36 = vshrl.u32 %v351_v28, 7 }
 0x113   :  { %2226 = vmatpush2.bf16.msra.mxu0 %v6729_v37  ;;  %v6789_v37 = vld [vmem:[%s9432_s3 + $0x108] ss:$12 sps:$4 sm:$0xff]  }
 0x114   :  { %2253 = vmatpush1.bf16.msra.mxu1 %v6732_v38  ;;  %2227 = vmatprep.subr.bf16.mxu0 %v6737_v39  ;;  %v6841_v38 = vld [vmem:[%s9432_s3 + $0x2e8] ss:$12 sps:$4 sm:$0xff]   ;;  %v1936_v39 = vpop.f32.mrf.mxu1 }
 0x115   :  { %2254 = vmatprep.subr.bf16.mxu1 %v6740_v40  ;;  %v6794_v40 = vld [vmem:[%s9432_s3 + $0xf4] ss:$12 sps:$4 sm:$0xff]  }
 0x117   :  { %2228 = vmatpush2.bf16.msra.mxu0 %v6735_v41  ;;  %v6846_v41 = vld [vmem:[%s9432_s3 + $0x2d4] ss:$12 sps:$4 sm:$0xff]  }
 0x118   :  { %2255 = vmatpush1.bf16.msra.mxu1 %v6738_v42  ;;  %2229 = vmatprep.subr.bf16.mxu0 %v6743_v43  ;;  %v1897_v42 = vpop.f32.mrf.mxu0  ;;  %v8382_v43 = vsub.s32 0, %v8367_v36 }
 0x119   :  { %2256 = vmatprep.subr.bf16.mxu1 %v6746_v44  ;;  %v8385_v44 = vsub.s32 1, %v8367_v36 }
 0x11b   :  { %2230 = vmatpush2.bf16.msra.mxu0 %v6741_v45  ;;  %v6792_v45 = vld [vmem:[%s9432_s3 + $0xf0] ss:$12 sps:$4 sm:$0xff]  }
 0x11c   :  { %2257 = vmatpush1.bf16.msra.mxu1 %v6744_v47  ;;  %2231 = vmatprep.subr.bf16.mxu0 %v6749_v48  ;;  %v6844_v47 = vld [vmem:[%s9432_s3 + $0x2d0] ss:$12 sps:$4 sm:$0xff]   ;;  %v8396_v48 = vld [vmem:[%s9433_s2] sm:$0xf] }
 0x11d   :  { %2258 = vmatprep.subr.bf16.mxu1 %v6752_v50  ;;  %v1938_v50 = vpop.f32.mrf.mxu1 }
 0x11f   :  { %2232 = vmatpush2.bf16.msra.mxu0 %v6747_v52 }
 0x120   :  { %2259 = vmatpush1.bf16.msra.mxu1 %v6750_v53  ;;  %2956 = vmatprep.subr.bf16.mxu0 %v6755_v54  ;;  %v6797_v53 = vld [vmem:[%s9432_s3 + $0xdc] ss:$12 sps:$4 sm:$0xff]  }
 0x121   :  { %2999 = vmatprep.subr.bf16.mxu1 %v6819_v61  ;;  %v6849_v54 = vld [vmem:[%s9432_s3 + $0x2bc] ss:$12 sps:$4 sm:$0xff]  }
 0x122   :  { %2234 = vmatmul.mubr.bf16.vlgmr.msra.gmra.mxu0 %v7228_v57  ;;  %v6847_v57 = vld [vmem:[%s9432_s3 + $0x2b8] ss:$12 sps:$4 sm:$0xff]  }
 0x123   :  { %2277 = vmatmul.mubr.bf16.vlgmr.msra.gmra.mxu1 %v7839_v46  ;;  %2957 = vmatpush1.bf16.msra.mxu0 %v6753_v55  ;;  %v6764_v46 = vld [vmem:[%s9432_s3 + $0x64] ss:$12 sps:$4 sm:$0xff]   ;;  %v358_v55 = vrot.slane %v8396_v48, %v8385_v44 }
 0x124   :  { %2958 = vmatprep.subr.bf16.mxu0 %v6758_v56  ;;  %3000 = vmatpush1.bf16.msra.mxu1 %v6817_v60  ;;  %v6795_v56 = vld [vmem:[%s9432_s3 + $0xd8] ss:$12 sps:$4 sm:$0xff]  }
 0x125   :  { %3001 = vmatprep.subr.bf16.mxu1 %v6822_v62  ;;  %v6852_v60 = vld [vmem:[%s9432_s3 + $0x2a4] ss:$12 sps:$4 sm:$0xff]   ;;  %v1894_v62 = vadd.f32 %v1893_v27, %v358_v55 }
 0x127   :  { %2959 = vmatpush1.bf16.msra.mxu0 %v6756_v58  ;;  %v354_v58 = vrot.slane %v8396_v48, %v8382_v43 }
 0x128   :  { %2960 = vmatprep.subr.bf16.mxu0 %v6761_v59  ;;  %3002 = vmatpush1.bf16.msra.mxu1 %v6820_v1  ;;  %v1940_v59 = vpop.f32.mrf.mxu1  ;;  %v6850_v1 = vld [vmem:[%s9432_s3 + $0x2a0] ss:$12 sps:$4 sm:$0xff]  }
 0x129   :  { %3003 = vmatprep.subr.bf16.mxu1 %v6825_v2  ;;  %v1892_v2 = vadd.f32 %v8336_v24, %v354_v58 }
 0x12b   :  { %2961 = vmatpush1.bf16.msra.mxu0 %v6759_v51 }
 0x12c   :  { %2962 = vmatprep.subr.bf16.mxu0 %v6764_v46  ;;  %3004 = vmatpush1.bf16.msra.mxu1 %v6823_v6  ;;  %v6800_v46 = vld [vmem:[%s9432_s3 + $0xc4] ss:$12 sps:$4 sm:$0xff]   ;;  %v6855_v6 = vld [vmem:[%s9432_s3 + $0x28c] ss:$12 sps:$4 sm:$0xff]  }
 0x12d   :  { %3005 = vmatprep.subr.bf16.mxu1 %v6828_v7  ;;  %v1898_v7 = vadd.f32 %v1897_v42, %v358_v55  ;;  %v6805_v55 = vld [vmem:[%s9432_s3 + $0x140] ss:$12 sps:$4 sm:$0xff]  }
 0x12f   :  { %2963 = vmatpush1.bf16.msra.mxu0 %v6762_v63  ;;  %v1896_v63 = vadd.f32 %v1895_v35, %v354_v58  ;;  %v6859_v35 = vld [vmem:[%s9432_s3 + $0x258] ss:$12 sps:$4 sm:$0xff]   ;;  %v6808_v58 = vld [vmem:[%s9432_s3 + $0x68] ss:$12 sps:$4 sm:$0xff]  }
 0x130   :  { %2964 = vmatprep.subr.bf16.mxu0 %v6767_v0  ;;  %3006 = vmatpush1.bf16.msra.mxu1 %v6826_v10  ;;  %v6798_v0 = vld [vmem:[%s9432_s3 + $0xc0] ss:$12 sps:$4 sm:$0xff]  }
 0x131   :  { %3007 = vmatprep.subr.bf16.mxu1 %v6831_v11  ;;  %v1939_v10 = vadd.f32 %v1938_v50, %v1896_v63  ;;  %v6853_v11 = vld [vmem:[%s9432_s3 + $0x288] ss:$12 sps:$4 sm:$0xff]  }
 0x132   :  { %v6815_v63 = vld [vmem:[%s9432_s3 + $0xc8] ss:$12 sps:$4 sm:$0xff]  }
 0x133   :  { %2965 = vmatpush1.bf16.msra.mxu0 %v6765_v3 }
 0x134   :  { %2966 = vmatprep.subr.bf16.mxu0 %v6770_v5  ;;  %3008 = vmatpush1.bf16.msra.mxu1 %v6829_v14  ;;  %v6801_v5 = vld [vmem:[%s9432_s3 + $0x170] ss:$12 sps:$4 sm:$0xff]   ;;  %v1941_v14 = vadd.f32 %v1940_v59, %v1898_v7 }
 0x135   :  { %3009 = vmatprep.subr.bf16.mxu1 %v6834_v22  ;;  %v6809_v59 = vld [vmem:[%s9432_s3 + $0x110] ss:$12 sps:$4 sm:$0xff]  }
 0x137   :  { %2967 = vmatpush1.bf16.msra.mxu0 %v6768_v8 }
 0x138   :  { %2968 = vmatprep.subr.bf16.mxu0 %v6773_v9  ;;  %3010 = vmatpush1.bf16.msra.mxu1 %v6832_v23  ;;  %v1937_v9 = vadd.f32 %v1936_v39, %v1894_v62  ;;  %v6858_v23 = vld [vmem:[%s9432_s3 + $0x274] ss:$12 sps:$4 sm:$0xff]  }
 0x139   :  { %3011 = vmatprep.subr.bf16.mxu1 %v6837_v25  ;;  %v6814_v62 = vld [vmem:[%s9432_s3 + $0x20] ss:$12 sps:$4 sm:$0xff]  }
 0x13b   :  { %2969 = vmatpush1.bf16.msra.mxu0 %v6771_v12  ;;  %v1935_v12 = vadd.f32 %v8359_v31, %v1892_v2 }
 0x13c   :  { %2970 = vmatprep.subr.bf16.mxu0 %v6776_v13  ;;  %3012 = vmatpush1.bf16.msra.mxu1 %v6835_v26 }
 0x13d   :  { %3013 = vmatprep.subr.bf16.mxu1 %v6840_v34 }
 0x13f   :  { %2971 = vmatpush1.bf16.msra.mxu0 %v6774_v15 }
 0x140   :  { %2972 = vmatprep.subr.bf16.mxu0 %v6779_v16  ;;  %3014 = vmatpush1.bf16.msra.mxu1 %v6838_v30 }
 0x141   :  { %3015 = vmatprep.subr.bf16.mxu1 %v6843_v33 }
 0x142   :  { %v1977_v52 = vpop.f32.mrf.mxu0 }
 0x143   :  { %2973 = vmatpush2.bf16.msra.mxu0 %v6777_v17  ;;  %v2020_v61 = vpop.f32.mrf.mxu1  ;;  %v1978_v17 = vadd.f32 %v1977_v52, %v1935_v12  ;;  %v6803_v52 = vld [vmem:[%s9432_s3 + $0x158] ss:$12 sps:$4 sm:$0xff]  }
 0x144   :  { %2974 = vmatprep.subr.bf16.mxu0 %v6782_v18  ;;  %3016 = vmatpush2.bf16.msra.mxu1 %v6841_v38  ;;  %v1979_v51 = vpop.f32.mrf.mxu0  ;;  %v6881_v12 = vld [vmem:[%s9434_s5 + $0x1f8] ss:$36 sps:$4 sm:$0xff]  }
 0x145   :  { %3017 = vmatprep.subr.bf16.mxu1 %v6846_v41  ;;  %v2022_v8 = vpop.f32.mrf.mxu1  ;;  %v1980_v15 = vadd.f32 %v1979_v51, %v1937_v9  ;;  %v2021_v25 = vadd.f32 %v2020_v61, %v1978_v17  ;;  %v6864_v41 = vld [vmem:[%s9432_s3 + $0x244] ss:$12 sps:$4 sm:$0xff]   ;;  %v6813_v61 = vld [vmem:[%s9432_s3 + $0xe0] ss:$12 sps:$4 sm:$0xff]   ;;  %v8505_v9 = vsub.s32 2, %v8367_v36 }
 0x146   :  { %v1981_v3 = vpop.f32.mrf.mxu0  ;;  %v6810_v51 = vld [vmem:[%s9432_s3 + $0x50] ss:$12 sps:$4 sm:$0xff]  }
 0x147   :  { %2975 = vmatpush2.bf16.msra.mxu0 %v6780_v19  ;;  %v1982_v16 = vadd.f32 %v1981_v3, %v1939_v10  ;;  %v2024_v18 = vpop.f32.mrf.mxu1  ;;  %v2023_v24 = vadd.f32 %v2022_v8, %v1980_v15  ;;  %v365_v8 = vsub.s32 3, %v8367_v36  ;;  %v362_v15 = vrot.slane %v8396_v48, %v8505_v9 }
 0x148   :  { %2976 = vmatprep.subr.bf16.mxu0 %v6785_v20  ;;  %3018 = vmatpush2.bf16.msra.mxu1 %v6844_v47  ;;  %v1983_v13 = vpop.f32.mrf.mxu0  ;;  %v6862_v47 = vld [vmem:[%s9432_s3 + $0x240] ss:$12 sps:$4 sm:$0xff]  }
 0x149   :  { %3019 = vmatprep.subr.bf16.mxu1 %v6849_v54  ;;  %v1984_v20 = vadd.f32 %v1983_v13, %v1941_v14  ;;  %v2026_v26 = vpop.f32.mrf.mxu1  ;;  %v6804_v54 = vld [vmem:[%s9432_s3 + $0x98] ss:$12 sps:$4 sm:$0xff]   ;;  %v366_v13 = vrot.slane %v8396_v48, %v365_v8  ;;  %v6883_v14 = vld [vmem:[%s9434_s5 + $0x1fc] ss:$36 sps:$4 sm:$0xff]  }
 0x14b   :  { %2977 = vmatpush2.bf16.msra.mxu0 %v6783_v4  ;;  %v2025_v4 = vadd.f32 %v2024_v18, %v1982_v16  ;;  %v2027_v27 = vadd.f32 %v2026_v26, %v1984_v20  ;;  %v6886_v18 = vld [vmem:[%s9434_s5 + $0x1b4] ss:$36 sps:$4 sm:$0xff]  }
 0x14c   :  { %2978 = vmatprep.subr.bf16.mxu0 %v6788_v49  ;;  %3020 = vmatpush2.bf16.msra.mxu1 %v6847_v57  ;;  %v6856_v49 = vld [vmem:[%s9432_s3 + $0x270] ss:$12 sps:$4 sm:$0xff]   ;;  %v6807_v57 = vld [vmem:[%s9432_s3 + $0x128] ss:$12 sps:$4 sm:$0xff]  }
 0x14d   :  { %3021 = vmatprep.subr.bf16.mxu1 %v6852_v60  ;;  %v6812_v60 = vld [vmem:[%s9432_s3 + $0x38] ss:$12 sps:$4 sm:$0xff]  }
 0x14f   :  { %2979 = vmatpush2.bf16.msra.mxu0 %v6786_v29 }
 0x150   :  { %2980 = vmatprep.subr.bf16.mxu0 %v6791_v32  ;;  %3022 = vmatpush2.bf16.msra.mxu1 %v6850_v1  ;;  %v6861_v32 = vld [vmem:[%s9432_s3 + $0x25c] ss:$12 sps:$4 sm:$0xff]  }
 0x151   :  { %3023 = vmatprep.subr.bf16.mxu1 %v6855_v6 }
 0x153   :  { %2981 = vmatpush2.bf16.msra.mxu0 %v6789_v37 }
 0x154   :  { %2982 = vmatprep.subr.bf16.mxu0 %v6794_v40  ;;  %3024 = vmatpush2.bf16.msra.mxu1 %v6853_v11 }
 0x155   :  { %3025 = vmatprep.subr.bf16.mxu1 %v6858_v23 }
 0x157   :  { %2983 = vmatpush2.bf16.msra.mxu0 %v6792_v45  ;;  %v6802_v45 = vld [vmem:[%s9432_s3 + $0xb0] ss:$12 sps:$4 sm:$0xff]  }
 0x158   :  { %2984 = vmatprep.subr.bf16.mxu0 %v6797_v53  ;;  %3026 = vmatpush2.bf16.msra.mxu1 %v6856_v49  ;;  %v6865_v53 = vld [vmem:[%s9432_s3 + $0x2f0] ss:$12 sps:$4 sm:$0xff]  }
 0x159   :  { %3027 = vmatprep.subr.bf16.mxu1 %v6861_v32 }
 0x15b   :  { %2985 = vmatpush2.bf16.msra.mxu0 %v6795_v56  ;;  %v6806_v56 = vld [vmem:[%s9432_s3 + $0x80] ss:$12 sps:$4 sm:$0xff]  }
 0x15c   :  { %2986 = vmatprep.subr.bf16.mxu0 %v6800_v46  ;;  %3028 = vmatpush2.bf16.msra.mxu1 %v6859_v35  ;;  %v6811_v46 = vld [vmem:[%s9432_s3 + $0xf8] ss:$12 sps:$4 sm:$0xff]  }
 0x15d   :  { %3029 = vmatprep.subr.bf16.mxu1 %v6864_v41 }
 0x15f   :  { %2987 = vmatpush2.bf16.msra.mxu0 %v6798_v0  ;;  %v6816_v0 = vld [vmem:[%s9432_s3 + $0x8] ss:$12 sps:$4 sm:$0xff]  }
 0x160   :  { %6094 = vmatprep.subr.bf16.mxu0 %v6801_v5  ;;  %3030 = vmatpush2.bf16.msra.mxu1 %v6862_v47 }
 0x161   :  { %6116 = vmatprep.subr.bf16.mxu1 %v6865_v53 }
 0x162   :  { %v2063_v19 = vpop.f32.mrf.mxu0 }
 0x163   :  { %v2064_v30 = vadd.f32 %v2063_v19, %v2021_v25  ;;  %v6884_v19 = vld [vmem:[%s9434_s5 + $0x1b0] ss:$36 sps:$4 sm:$0xff]  }
 0x164   :  { %v2065_v22 = vpop.f32.mrf.mxu0 }
 0x165   :  { %v2066_v28 = vadd.f32 %v2065_v22, %v2023_v24  ;;  %v2287_v40 = vmax.f32 %v2064_v30, 0.0  ;;  %v6889_v22 = vld [vmem:[%s9434_s5 + $0x16c] ss:$36 sps:$4 sm:$0xff]  }
 0x166   :  { %v2067_v34 = vpop.f32.mrf.mxu0 }
 0x167   :  { %v2068_v29 = vadd.f32 %v2067_v34, %v2025_v4  ;;  %v2288_v38 = vmax.f32 %v2066_v28, 0.0 }
 0x168   :  { %v2069_v31 = vpop.f32.mrf.mxu0 }
 0x169   :  { %v2070_v33 = vadd.f32 %v2069_v31, %v2027_v27  ;;  %v2291_v37 = vmax.f32 %v2068_v29, 0.0  ;;  %v6887_v27 = vld [vmem:[%s9434_s5 + $0x168] ss:$36 sps:$4 sm:$0xff]  }
 0x16a   :  { %v6892_v31 = vld [vmem:[%s9434_s5 + $0x124] ss:$36 sps:$4 sm:$0xff]  }
 0x16b   :  { %v2292_v39 = vmax.f32 %v2070_v33, 0.0  ;;  %v2295_v50 = vpack.c.bf16 %v2291_v37, %v2287_v40 }
 0x16d   :  { %v2296_v42 = vpack.c.bf16 %v2292_v39, %v2288_v38 }
 0x16f   :  { %2988 = vmatprep.mubr.bf16.mxu0 %v2296_v42 }
 0x170   :  { %2989 = vmatmul.mubr.bf16.vlgmr.msra.gmra.mxu0 %v2295_v50 }
 0x171   :  { %6095 = vmatpush3.bf16.msra.mxu0 %v6802_v45  ;;  %3074 = vmatprep.mubr.bf16.mxu0 %v2296_v42  ;;  %v6890_v45 = vld [vmem:[%s9434_s5 + $0x120] ss:$36 sps:$4 sm:$0xff]  }
 0x172   :  { %6096 = vmatprep.subr.bf16.mxu0 %v6803_v52  ;;  %v6895_v52 = vld [vmem:[%s9434_s5 + $0xdc] ss:$36 sps:$4 sm:$0xff]  }
 0x175   :  { %6097 = vmatpush3.bf16.msra.mxu0 %v6804_v54 }
 0x176   :  { %6098 = vmatprep.subr.bf16.mxu0 %v6805_v55 }
 0x179   :  { %6099 = vmatpush3.bf16.msra.mxu0 %v6806_v56 }
 0x17a   :  { %6100 = vmatprep.subr.bf16.mxu0 %v6807_v57 }
 0x17d   :  { %6101 = vmatpush3.bf16.msra.mxu0 %v6808_v58 }
 0x17e   :  { %6102 = vmatprep.subr.bf16.mxu0 %v6809_v59  ;;  %v6893_v59 = vld [vmem:[%s9434_s5 + $0xd8] ss:$36 sps:$4 sm:$0xff]  }
 0x181   :  { %6103 = vmatpush3.bf16.msra.mxu0 %v6810_v51 }
 0x182   :  { %6104 = vmatprep.subr.bf16.mxu0 %v6811_v46  ;;  %v6898_v46 = vld [vmem:[%s9434_s5 + $0x94] ss:$36 sps:$4 sm:$0xff]  }
 0x183   :  { %v2106_v1 = vpop.f32.mrf.mxu1 }
 0x184   :  { %v2107_v23 = vadd.f32 %v2106_v1, %v362_v15 }
 0x185   :  { %6105 = vmatpush3.bf16.msra.mxu0 %v6812_v60  ;;  %v2108_v2 = vpop.f32.mrf.mxu1 }
 0x186   :  { %6106 = vmatprep.subr.bf16.mxu0 %v6813_v61  ;;  %v2109_v20 = vadd.f32 %v2108_v2, %v366_v13  ;;  %v6896_v61 = vld [vmem:[%s9434_s5 + $0x90] ss:$36 sps:$4 sm:$0xff]   ;;  %v6867_v2 = vld [vmem:[%s9432_s3 + $0x2d8] ss:$12 sps:$4 sm:$0xff]  }
 0x187   :  { %v2110_v3 = vpop.f32.mrf.mxu1 }
 0x188   :  { %v2111_v4 = vadd.f32 %v2110_v3, %v362_v15  ;;  %v6901_v3 = vld [vmem:[%s9434_s5 + $0x4c] ss:$36 sps:$4 sm:$0xff]   ;;  %v6907_v15 = vld [vmem:[%s9434_s5 + $0x43c] ss:$36 sps:$4 sm:$0xff]  }
 0x189   :  { %6107 = vmatpush3.bf16.msra.mxu0 %v6814_v62  ;;  %v2112_v5 = vpop.f32.mrf.mxu1 }
 0x18a   :  { %6108 = vmatprep.subr.bf16.mxu0 %v6815_v63  ;;  %v2113_v28 = vadd.f32 %v2112_v5, %v366_v13  ;;  %v6902_v13 = vld [vmem:[%s9434_s5] ss:$36 sps:$4 sm:$0xff]  }
 0x18d   :  { %6109 = vmatpush3.bf16.msra.mxu0 %v6816_v0  ;;  %v6866_v0 = vld [vmem:[%s9432_s3 + $0x230] ss:$12 sps:$4 sm:$0xff]  }
 0x18e   :  { %4526 = vmatprep.subr.bf16.mxu0 %v6883_v14  ;;  %v6870_v14 = vld [vmem:[%s9432_s3 + $0x200] ss:$12 sps:$4 sm:$0xff]  }
 0x190   :  { %3075 = vmatmul.mubr.bf16.vlgmr.msra.gmra.mxu0 %v2295_v50 }
 0x191   :  { %4527 = vmatpush1.bf16.msra.mxu0 %v6881_v12  ;;  %v6869_v12 = vld [vmem:[%s9432_s3 + $0x2c0] ss:$12 sps:$4 sm:$0xff]  }
 0x192   :  { %4528 = vmatprep.subr.bf16.mxu0 %v6886_v18  ;;  %v6872_v18 = vld [vmem:[%s9432_s3 + $0x1e8] ss:$12 sps:$4 sm:$0xff]  }
 0x195   :  { %4529 = vmatpush1.bf16.msra.mxu0 %v6884_v19  ;;  %v6910_v19 = vld [vmem:[%s9434_s5 + $0x3f4] ss:$36 sps:$4 sm:$0xff]  }
 0x196   :  { %4530 = vmatprep.subr.bf16.mxu0 %v6889_v22  ;;  %v6908_v22 = vld [vmem:[%s9434_s5 + $0x3f0] ss:$36 sps:$4 sm:$0xff]  }
 0x199   :  { %4531 = vmatpush1.bf16.msra.mxu0 %v6887_v27  ;;  %v6878_v27 = vld [vmem:[%s9432_s3 + $0x1a0] ss:$12 sps:$4 sm:$0xff]  }
 0x19a   :  { %4532 = vmatprep.subr.bf16.mxu0 %v6892_v31  ;;  %v6880_v31 = vld [vmem:[%s9432_s3 + $0x188] ss:$12 sps:$4 sm:$0xff]  }
 0x19d   :  { %4533 = vmatpush1.bf16.msra.mxu0 %v6890_v45  ;;  %v6935_v45 = vld [vmem:[%s9434_s5 + $0x630] ss:$36 sps:$4 sm:$0xff]  }
 0x19e   :  { %4534 = vmatprep.subr.bf16.mxu0 %v6895_v52  ;;  %v6943_v52 = vld [vmem:[%s9434_s5 + $0x5ec] ss:$36 sps:$4 sm:$0xff]  }
 0x1a1   :  { %4535 = vmatpush1.bf16.msra.mxu0 %v6893_v59  ;;  %v6967_v59 = vld [vmem:[%s9434_s5 + $0x4cc] ss:$36 sps:$4 sm:$0xff]  }
 0x1a2   :  { %v2149_v6 = vpop.f32.mrf.mxu0  ;;  %4536 = vmatprep.subr.bf16.mxu0 %v6898_v46  ;;  %v6973_v46 = vld [vmem:[%s9434_s5 + $0x484] ss:$36 sps:$4 sm:$0xff]  }
 0x1a3   :  { %v2150_v25 = vadd.f32 %v2149_v6, %v2107_v23  ;;  %v6874_v23 = vld [vmem:[%s9432_s3 + $0x1d0] ss:$12 sps:$4 sm:$0xff]  }
 0x1a4   :  { %v2151_v10 = vpop.f32.mrf.mxu0 }
 0x1a5   :  { %v2152_v49 = vadd.f32 %v2151_v10, %v2109_v20  ;;  %v6868_v10 = vld [vmem:[%s9432_s3 + $0x218] ss:$12 sps:$4 sm:$0xff]   ;;  %4537 = vmatpush1.bf16.msra.mxu0 %v6896_v61  ;;  %v6873_v20 = vld [vmem:[%s9432_s3 + $0x290] ss:$12 sps:$4 sm:$0xff]  }
 0x1a6   :  { %v2153_v16 = vpop.f32.mrf.mxu0  ;;  %4538 = vmatprep.subr.bf16.mxu0 %v6901_v3  ;;  %v6979_v61 = vld [vmem:[%s9434_s5 + $0x204] ss:$36 sps:$4 sm:$0xff]  }
 0x1a7   :  { %v2154_v29 = vadd.f32 %v2153_v16, %v2111_v4  ;;  %v6871_v16 = vld [vmem:[%s9432_s3 + $0x2a8] ss:$12 sps:$4 sm:$0xff]  }
 0x1a8   :  { %v2155_v48 = vpop.f32.mrf.mxu0  ;;  %v6911_v4 = vld [vmem:[%s9434_s5 + $0x3a8] ss:$36 sps:$4 sm:$0xff]  }
 0x1a9   :  { %v2156_v37 = vadd.f32 %v2155_v48, %v2113_v28  ;;  %v6913_v48 = vld [vmem:[%s9434_s5 + $0x3ac] ss:$36 sps:$4 sm:$0xff]   ;;  %v6919_v28 = vld [vmem:[%s9434_s5 + $0x31c] ss:$36 sps:$4 sm:$0xff]  }
 0x1c3   :  { %v2192_v7 = vpop.f32.mrf.mxu1 }
 0x1c4   :  { %v2193_v32 = vadd.f32 %v2192_v7, %v2150_v25  ;;  %v6899_v7 = vld [vmem:[%s9434_s5 + $0x48] ss:$36 sps:$4 sm:$0xff]  }
 0x1c5   :  { %v2194_v11 = vpop.f32.mrf.mxu1  ;;  %4539 = vmatpush1.bf16.msra.mxu0 %v6899_v7  ;;  %v6916_v25 = vld [vmem:[%s9434_s5 + $0x364] ss:$36 sps:$4 sm:$0xff]  }
 0x1c6   :  { %v2195_v30 = vadd.f32 %v2194_v11, %v2152_v49  ;;  %v6904_v11 = vld [vmem:[%s9434_s5 + $0x4] ss:$36 sps:$4 sm:$0xff]  }
 0x1c7   :  { %v2196_v17 = vpop.f32.mrf.mxu1  ;;  %4540 = vmatprep.subr.bf16.mxu0 %v6904_v11  ;;  %v6876_v49 = vld [vmem:[%s9432_s3 + $0x1b8] ss:$12 sps:$4 sm:$0xff]  }
 0x1c8   :  { %v2197_v38 = vadd.f32 %v2196_v17, %v2154_v29  ;;  %v6905_v17 = vld [vmem:[%s9434_s5 + $0x438] ss:$36 sps:$4 sm:$0xff]   ;;  %v6879_v29 = vld [vmem:[%s9432_s3 + $0x248] ss:$12 sps:$4 sm:$0xff]  }
 0x1c9   :  { %v2198_v24 = vpop.f32.mrf.mxu1  ;;  %4541 = vmatpush1.bf16.msra.mxu0 %v6902_v13 }
 0x1ca   :  { %v2199_v47 = vadd.f32 %v2198_v24, %v2156_v37  ;;  %4542 = vmatprep.subr.bf16.mxu0 %v6907_v15  ;;  %v6875_v24 = vld [vmem:[%s9432_s3 + $0x278] ss:$12 sps:$4 sm:$0xff]   ;;  %v6923_v37 = vld [vmem:[%s9434_s5 + $0x288] ss:$36 sps:$4 sm:$0xff]  }
 0x1cd   :  { %4543 = vmatpush2.bf16.msra.mxu0 %v6905_v17 }
 0x1ce   :  { %4544 = vmatprep.subr.bf16.mxu0 %v6910_v19 }
 0x1d1   :  { %4545 = vmatpush2.bf16.msra.mxu0 %v6908_v22 }
 0x1d2   :  { %4546 = vmatprep.subr.bf16.mxu0 %v6913_v48 }
 0x1d5   :  { %4547 = vmatpush2.bf16.msra.mxu0 %v6911_v4  ;;  %v6932_v4 = vld [vmem:[%s9434_s5 + $0x680] ss:$36 sps:$4 sm:$0xff]  }
 0x1d6   :  { %4548 = vmatprep.subr.bf16.mxu0 %v6916_v25  ;;  %v6940_v25 = vld [vmem:[%s9434_s5 + $0x63c] ss:$36 sps:$4 sm:$0xff]  }
 0x1e2   :  { %v2235_v26 = vpop.f32.mrf.mxu0 }
 0x1e3   :  { %v2278_v34 = vpop.f32.mrf.mxu1  ;;  %v2236_v40 = vadd.f32 %v2235_v26, %v2193_v32  ;;  %v6877_v26 = vld [vmem:[%s9432_s3 + $0x260] ss:$12 sps:$4 sm:$0xff]   ;;  %v6922_v32 = vld [vmem:[%s9434_s5 + $0x2d4] ss:$36 sps:$4 sm:$0xff]  }
 0x1e4   :  { %v2237_v33 = vpop.f32.mrf.mxu0 }
 0x1e5   :  { %v2280_v35 = vpop.f32.mrf.mxu1  ;;  %v2238_v39 = vadd.f32 %v2237_v33, %v2195_v30  ;;  %v2279_v57 = vadd.f32 %v2278_v34, %v2236_v40  ;;  %v6914_v34 = vld [vmem:[%s9434_s5 + $0x360] ss:$36 sps:$4 sm:$0xff]   ;;  %v6917_v30 = vld [vmem:[%s9434_s5 + $0x318] ss:$36 sps:$4 sm:$0xff]   ;;  %v6920_v33 = vld [vmem:[%s9434_s5 + $0x2d0] ss:$36 sps:$4 sm:$0xff]  }
 0x1e6   :  { %v2239_v41 = vpop.f32.mrf.mxu0  ;;  %4549 = vmatpush2.bf16.msra.mxu0 %v6914_v34  ;;  %v6931_v40 = vld [vmem:[%s9434_s5 + $0x67c] ss:$36 sps:$4 sm:$0xff]   ;;  %v6946_v34 = vld [vmem:[%s9434_s5 + $0x5f4] ss:$36 sps:$4 sm:$0xff]  }
 0x1e7   :  { %v2282_v42 = vpop.f32.mrf.mxu1  ;;  %v2240_v50 = vadd.f32 %v2239_v41, %v2197_v38  ;;  %v2281_v54 = vadd.f32 %v2280_v35, %v2238_v39  ;;  %v2289_v1 = vmax.f32 %v2279_v57, 0.0  ;;  %4550 = vmatprep.subr.bf16.mxu0 %v6919_v28  ;;  %v6925_v35 = vld [vmem:[%s9434_s5 + $0x28c] ss:$36 sps:$4 sm:$0xff]   ;;  %v6928_v38 = vld [vmem:[%s9434_s5 + $0x244] ss:$36 sps:$4 sm:$0xff]  }
 0x1e8   :  { %v2241_v53 = vpop.f32.mrf.mxu0  ;;  %v6926_v39 = vld [vmem:[%s9434_s5 + $0x240] ss:$36 sps:$4 sm:$0xff]   ;;  %v6961_v57 = vld [vmem:[%s9434_s5 + $0x514] ss:$36 sps:$4 sm:$0xff]  }
 0x1e9   :  { %v2283_v55 = vadd.f32 %v2282_v42, %v2240_v50  ;;  %v2242_v56 = vadd.f32 %v2241_v53, %v2199_v47  ;;  %v2284_v58 = vpop.f32.mrf.mxu1  ;;  %v2290_v62 = vmax.f32 %v2281_v54, 0.0  ;;  %v6934_v41 = vld [vmem:[%s9434_s5 + $0x684] ss:$36 sps:$4 sm:$0xff]   ;;  %v6929_v42 = vld [vmem:[%s9434_s5 + $0x678] ss:$36 sps:$4 sm:$0xff]  }
 0x1ea   :  { %4551 = vmatpush2.bf16.msra.mxu0 %v6917_v30  ;;  %v6937_v47 = vld [vmem:[%s9434_s5 + $0x634] ss:$36 sps:$4 sm:$0xff]   ;;  %v6941_v50 = vld [vmem:[%s9434_s5 + $0x5e8] ss:$36 sps:$4 sm:$0xff]   ;;  %v6947_v53 = vld [vmem:[%s9434_s5 + $0x5a0] ss:$36 sps:$4 sm:$0xff]  }
 0x1eb   :  { %v2285_v51 = vadd.f32 %v2284_v58, %v2242_v56  ;;  %v2293_v60 = vmax.f32 %v2283_v55, 0.0  ;;  %4552 = vmatprep.subr.bf16.mxu0 %v6922_v32  ;;  %v6949_v54 = vld [vmem:[%s9434_s5 + $0x5a4] ss:$36 sps:$4 sm:$0xff]   ;;  %v6953_v55 = vld [vmem:[%s9434_s5 + $0x558] ss:$36 sps:$4 sm:$0xff]  }
 0x1ec   :  { %v6955_v56 = vld [vmem:[%s9434_s5 + $0x55c] ss:$36 sps:$4 sm:$0xff]   ;;  %v6959_v58 = vld [vmem:[%s9434_s5 + $0x510] ss:$36 sps:$4 sm:$0xff]   ;;  %v6950_v30 = vld [vmem:[%s9434_s5 + $0x5a8] ss:$36 sps:$4 sm:$0xff]  }
 0x1ed   :  { %v2294_v63 = vmax.f32 %v2285_v51, 0.0  ;;  %v2297_v6 = vpack.c.bf16 %v2293_v60, %v2289_v1  ;;  %v6965_v51 = vld [vmem:[%s9434_s5 + $0x4c8] ss:$36 sps:$4 sm:$0xff]   ;;  %v6971_v60 = vld [vmem:[%s9434_s5 + $0x480] ss:$36 sps:$4 sm:$0xff]  }
 0x1ee   :  { %4553 = vmatpush2.bf16.msra.mxu0 %v6920_v33  ;;  %v6958_v32 = vld [vmem:[%s9434_s5 + $0x564] ss:$36 sps:$4 sm:$0xff]  }
 0x1ef   :  { %v2298_v5 = vpack.c.bf16 %v2294_v63, %v2290_v62  ;;  %4554 = vmatprep.subr.bf16.mxu0 %v6925_v35  ;;  %v6956_v33 = vld [vmem:[%s9434_s5 + $0x560] ss:$36 sps:$4 sm:$0xff]  }
 0x1f1   :  { %3031 = vmatprep.mubr.bf16.mxu1 %v2298_v5 }
 0x1f2   :  { %3032 = vmatmul.mubr.bf16.vlgmr.msra.gmra.mxu1 %v2297_v6  ;;  %4555 = vmatpush2.bf16.msra.mxu0 %v6923_v37  ;;  %v6964_v37 = vld [vmem:[%s9434_s5 + $0x51c] ss:$36 sps:$4 sm:$0xff]  }
 0x1f3   :  { %6117 = vmatpush3.bf16.msra.mxu1 %v6866_v0  ;;  %3115 = vmatprep.mubr.bf16.mxu1 %v2298_v5  ;;  %v2427_v0 = vld [vmem:[%s9435_s4] sm:$0x7] }
 0x1f4   :  { %6118 = vmatprep.subr.bf16.mxu1 %v6867_v2  ;;  %4556 = vmatprep.subr.bf16.mxu0 %v6928_v38  ;;  %v2436_v2 = vrot.slane %v2427_v0, %v8385_v44  ;;  %v2432_v3 = vrot.slane %v2427_v0, %v8382_v43  ;;  %v6962_v38 = vld [vmem:[%s9434_s5 + $0x518] ss:$36 sps:$4 sm:$0xff]  }
 0x1f6   :  { %4557 = vmatpush2.bf16.msra.mxu0 %v6926_v39 }
 0x1f7   :  { %6119 = vmatpush3.bf16.msra.mxu1 %v6868_v10  ;;  %4655 = vmatprep.subr.bf16.mxu0 %v6934_v41  ;;  %v6970_v41 = vld [vmem:[%s9434_s5 + $0x4d4] ss:$36 sps:$4 sm:$0xff]  }
 0x1f8   :  { %6120 = vmatprep.subr.bf16.mxu1 %v6869_v12 }
 0x1fb   :  { %6121 = vmatpush3.bf16.msra.mxu1 %v6870_v14 }
 0x1fc   :  { %6122 = vmatprep.subr.bf16.mxu1 %v6871_v16 }
 0x1ff   :  { %6123 = vmatpush3.bf16.msra.mxu1 %v6872_v18 }
 0x200   :  { %6124 = vmatprep.subr.bf16.mxu1 %v6873_v20 }
 0x203   :  { %6125 = vmatpush3.bf16.msra.mxu1 %v6874_v23 }
 0x204   :  { %6126 = vmatprep.subr.bf16.mxu1 %v6875_v24 }
 0x207   :  { %6127 = vmatpush3.bf16.msra.mxu1 %v6876_v49 }
 0x208   :  { %6128 = vmatprep.subr.bf16.mxu1 %v6877_v26  ;;  %v6938_v26 = vld [vmem:[%s9434_s5 + $0x638] ss:$36 sps:$4 sm:$0xff]  }
 0x20b   :  { %6129 = vmatpush3.bf16.msra.mxu1 %v6878_v27  ;;  %v6944_v27 = vld [vmem:[%s9434_s5 + $0x5f0] ss:$36 sps:$4 sm:$0xff]  }
 0x20c   :  { %6130 = vmatprep.subr.bf16.mxu1 %v6879_v29  ;;  %v6952_v29 = vld [vmem:[%s9434_s5 + $0x5ac] ss:$36 sps:$4 sm:$0xff]  }
 0x20f   :  { %6131 = vmatpush3.bf16.msra.mxu1 %v6880_v31 }
 0x210   :  { %4569 = vmatprep.subr.bf16.mxu1 %v6931_v40 }
 0x212   :  { %3116 = vmatmul.mubr.bf16.vlgmr.msra.gmra.mxu1 %v2297_v6 }
 0x213   :  { %4601 = vmatprep.mubr.bf16.mxu1 %v7229_v21  ;;  %4570 = vmatpush1.bf16.msra.mxu1 %v6929_v42  ;;  %v2440_v42 = vrot.slane %v2427_v0, %v8505_v9  ;;  %v6977_v0 = vld [vmem:[%s9434_s5 + $0x200] ss:$36 sps:$4 sm:$0xff]  }
 0x214   :  { %4571 = vmatprep.subr.bf16.mxu1 %v6937_v47 }
 0x217   :  { %4572 = vmatpush1.bf16.msra.mxu1 %v6935_v45 }
 0x218   :  { %4573 = vmatprep.subr.bf16.mxu1 %v6943_v52 }
 0x21b   :  { %4574 = vmatpush1.bf16.msra.mxu1 %v6941_v50 }
 0x21c   :  { %4575 = vmatprep.subr.bf16.mxu1 %v6949_v54 }
 0x21f   :  { %4576 = vmatpush1.bf16.msra.mxu1 %v6947_v53  ;;  %v6968_v53 = vld [vmem:[%s9434_s5 + $0x4d0] ss:$36 sps:$4 sm:$0xff]  }
 0x220   :  { %4577 = vmatprep.subr.bf16.mxu1 %v6955_v56 }
 0x223   :  { %4578 = vmatpush1.bf16.msra.mxu1 %v6953_v55  ;;  %v6976_v55 = vld [vmem:[%s9434_s5 + $0x48c] ss:$36 sps:$4 sm:$0xff]  }
 0x224   :  { %4579 = vmatprep.subr.bf16.mxu1 %v6961_v57 }
 0x227   :  { %4580 = vmatpush1.bf16.msra.mxu1 %v6959_v58 }
 0x228   :  { %4581 = vmatprep.subr.bf16.mxu1 %v6967_v59 }
 0x22b   :  { %4582 = vmatpush1.bf16.msra.mxu1 %v6965_v51 }
 0x22c   :  { %4583 = vmatprep.subr.bf16.mxu1 %v6973_v46  ;;  %v6974_v46 = vld [vmem:[%s9434_s5 + $0x488] ss:$36 sps:$4 sm:$0xff]  }
 0x22f   :  { %4584 = vmatpush1.bf16.msra.mxu1 %v6971_v60  ;;  %v6982_v60 = vld [vmem:[%s9434_s5 + $0x20c] ss:$36 sps:$4 sm:$0xff]  }
 0x230   :  { %4612 = vmatprep.subr.bf16.mxu1 %v6979_v61  ;;  %v2990_v62 = vpop.f32.mrf.mxu0 }
 0x231   :  { %v2991_v12 = vadd.f32 %v2990_v62, %v2432_v3 }
 0x232   :  { %v2992_v63 = vpop.f32.mrf.mxu0 }
 0x233   :  { %v2993_v10 = vadd.f32 %v2992_v63, %v2436_v2 }
 0x234   :  { %v2994_v1 = vpop.f32.mrf.mxu0 }
 0x235   :  { %v2995_v11 = vadd.f32 %v2994_v1, %v2432_v3  ;;  %v6980_v1 = vld [vmem:[%s9434_s5 + $0x208] ss:$36 sps:$4 sm:$0xff]   ;;  %v6985_v3 = vld [vmem:[%s9434_s5 + $0x1bc] ss:$36 sps:$4 sm:$0xff]  }
 0x236   :  { %v2996_v6 = vpop.f32.mrf.mxu0 }
 0x237   :  { %v2997_v14 = vadd.f32 %v2996_v6, %v2436_v2  ;;  %v6983_v6 = vld [vmem:[%s9434_s5 + $0x1b8] ss:$36 sps:$4 sm:$0xff]  }
 0x250   :  { %v6110_v28 = vpop.f32.mrf.mxu0 }
 0x252   :  { %v6111_v31 = vpop.f32.mrf.mxu0 }
 0x253   :  { %v6112_v45 = vadd.f32 %v6111_v31, %v6110_v28  ;;  %v7016_v28 = vld [vmem:[%s9434_s5 + $0x58] ss:$36 sps:$4 sm:$0xff]   ;;  %v7019_v31 = vld [vmem:[%s9434_s5 + $0x8] ss:$36 sps:$4 sm:$0xff]  }
 0x254   :  { %v6113_v35 = vpop.f32.mrf.mxu0 }
 0x255   :  { %v3077_v56 = vadd.f32 %v6112_v45, %v2440_v42  ;;  %v7039_v45 = vld [vmem:[%s9434_s5 + $0x3b4] ss:$36 sps:$4 sm:$0xff]  }
 0x256   :  { %v6114_v39 = vpop.f32.mrf.mxu0 }
 0x257   :  { %v6115_v50 = vadd.f32 %v6114_v39, %v6113_v35  ;;  %v7030_v35 = vld [vmem:[%s9434_s5 + $0x44c] ss:$36 sps:$4 sm:$0xff]   ;;  %v7033_v39 = vld [vmem:[%s9434_s5 + $0x3fc] ss:$36 sps:$4 sm:$0xff]  }
 0x259   :  { %v3080_v58 = vadd.f32 %v6115_v50, %v2440_v42  ;;  %v7034_v42 = vld [vmem:[%s9434_s5 + $0x400] ss:$36 sps:$4 sm:$0xff]   ;;  %v7037_v50 = vld [vmem:[%s9434_s5 + $0x3b0] ss:$36 sps:$4 sm:$0xff]  }
 0x2b2   :  { %v3033_v5 = vpop.f32.mrf.mxu1 }
 0x2b3   :  { %v3034_v17 = vadd.f32 %v3033_v5, %v2991_v12  ;;  %v6988_v5 = vld [vmem:[%s9434_s5 + $0x1c4] ss:$36 sps:$4 sm:$0xff]   ;;  %v6989_v12 = vld [vmem:[%s9434_s5 + $0x170] ss:$36 sps:$4 sm:$0xff]  }
 0x2b4   :  { %v3035_v7 = vpop.f32.mrf.mxu1 }
 0x2b5   :  { %v3036_v15 = vadd.f32 %v3035_v7, %v2993_v10  ;;  %v3124_v48 = vmax.f32 %v3034_v17, 0.0  ;;  %v6986_v7 = vld [vmem:[%s9434_s5 + $0x1c0] ss:$36 sps:$4 sm:$0xff]   ;;  %v6991_v10 = vld [vmem:[%s9434_s5 + $0x174] ss:$36 sps:$4 sm:$0xff]  }
 0x2b6   :  { %v3037_v13 = vpop.f32.mrf.mxu1  ;;  %v6998_v17 = vld [vmem:[%s9434_s5 + $0x130] ss:$36 sps:$4 sm:$0xff]  }
 0x2b7   :  { %v3038_v16 = vadd.f32 %v3037_v13, %v2995_v11  ;;  %v3125_v22 = vmax.f32 %v3036_v15, 0.0  ;;  %v6994_v11 = vld [vmem:[%s9434_s5 + $0x17c] ss:$36 sps:$4 sm:$0xff]   ;;  %v7000_v15 = vld [vmem:[%s9434_s5 + $0x134] ss:$36 sps:$4 sm:$0xff]  }
 0x2b8   :  { %v3039_v18 = vpop.f32.mrf.mxu1  ;;  %v6992_v13 = vld [vmem:[%s9434_s5 + $0x178] ss:$36 sps:$4 sm:$0xff]  }
 0x2b9   :  { %v3040_v19 = vadd.f32 %v3039_v18, %v2997_v14  ;;  %v3127_v20 = vmax.f32 %v3038_v16, 0.0  ;;  %v6997_v14 = vld [vmem:[%s9434_s5 + $0x12c] ss:$36 sps:$4 sm:$0xff]   ;;  %v7003_v18 = vld [vmem:[%s9434_s5 + $0xe4] ss:$36 sps:$4 sm:$0xff]  }
 0x2ba   :  { %v6995_v16 = vld [vmem:[%s9434_s5 + $0x128] ss:$36 sps:$4 sm:$0xff]  }
 0x2bb   :  { %v3128_v23 = vmax.f32 %v3040_v19, 0.0  ;;  %v8718_v49 = vpack.c.bf16 %v3127_v20, %v3124_v48  ;;  %v7006_v19 = vld [vmem:[%s9434_s5 + $0xec] ss:$36 sps:$4 sm:$0xff]   ;;  %v7001_v20 = vld [vmem:[%s9434_s5 + $0xe0] ss:$36 sps:$4 sm:$0xff]  }
 0x2bc   :  { %v7012_v48 = vld [vmem:[%s9434_s5 + $0xa4] ss:$36 sps:$4 sm:$0xff]  }
 0x2bd   :  { %v8713_v24 = vpack.c.bf16 %v3128_v23, %v3125_v22  ;;  %v7004_v22 = vld [vmem:[%s9434_s5 + $0xe8] ss:$36 sps:$4 sm:$0xff]   ;;  %v7009_v23 = vld [vmem:[%s9434_s5 + $0x9c] ss:$36 sps:$4 sm:$0xff]  }
 0x2bf   :  { %4558 = vmatprep.mubr.bf16.mxu0 %v8713_v24 }
 0x2c0   :  { %4559 = vmatmul.mubr.bf16.vlgmr.msra.gmra.mxu0 %v8718_v49 }
 0x2c1   :  { %4656 = vmatpush1.bf16.msra.mxu0 %v6932_v4  ;;  %4687 = vmatprep.mubr.bf16.mxu0 %v7229_v21  ;;  %v7007_v4 = vld [vmem:[%s9434_s5 + $0x98] ss:$36 sps:$4 sm:$0xff]  }
 0x2c2   :  { %4657 = vmatprep.subr.bf16.mxu0 %v6940_v25  ;;  %v7010_v25 = vld [vmem:[%s9434_s5 + $0xa0] ss:$36 sps:$4 sm:$0xff]  }
 0x2c5   :  { %4658 = vmatpush1.bf16.msra.mxu0 %v6938_v26  ;;  %v7015_v26 = vld [vmem:[%s9434_s5 + $0x54] ss:$36 sps:$4 sm:$0xff]  }
 0x2c6   :  { %4659 = vmatprep.subr.bf16.mxu0 %v6946_v34  ;;  %v7018_v34 = vld [vmem:[%s9434_s5 + $0x5c] ss:$36 sps:$4 sm:$0xff]  }
 0x2c9   :  { %4660 = vmatpush1.bf16.msra.mxu0 %v6944_v27  ;;  %v7013_v27 = vld [vmem:[%s9434_s5 + $0x50] ss:$36 sps:$4 sm:$0xff]  }
 0x2ca   :  { %4661 = vmatprep.subr.bf16.mxu0 %v6952_v29  ;;  %v7021_v29 = vld [vmem:[%s9434_s5 + $0xc] ss:$36 sps:$4 sm:$0xff]  }
 0x2cd   :  { %4662 = vmatpush1.bf16.msra.mxu0 %v6950_v30  ;;  %v7024_v30 = vld [vmem:[%s9434_s5 + $0x14] ss:$36 sps:$4 sm:$0xff]  }
 0x2ce   :  { %4663 = vmatprep.subr.bf16.mxu0 %v6958_v32  ;;  %v7022_v32 = vld [vmem:[%s9434_s5 + $0x10] ss:$36 sps:$4 sm:$0xff]  }
 0x2d1   :  { %4664 = vmatpush1.bf16.msra.mxu0 %v6956_v33  ;;  %v7027_v33 = vld [vmem:[%s9434_s5 + $0x444] ss:$36 sps:$4 sm:$0xff]  }
 0x2d2   :  { %v6132_v40 = vpop.f32.mrf.mxu1  ;;  %4665 = vmatprep.subr.bf16.mxu0 %v6964_v37  ;;  %v7025_v37 = vld [vmem:[%s9434_s5 + $0x440] ss:$36 sps:$4 sm:$0xff]  }
 0x2d4   :  { %v6133_v47 = vpop.f32.mrf.mxu1 }
 0x2d5   :  { %v6134_v52 = vadd.f32 %v6133_v47, %v6132_v40  ;;  %4666 = vmatpush1.bf16.msra.mxu0 %v6962_v38  ;;  %v7028_v38 = vld [vmem:[%s9434_s5 + $0x448] ss:$36 sps:$4 sm:$0xff]   ;;  %v7042_v47 = vld [vmem:[%s9434_s5 + $0x3bc] ss:$36 sps:$4 sm:$0xff]  }
 0x2d6   :  { %v6135_v54 = vpop.f32.mrf.mxu1  ;;  %4667 = vmatprep.subr.bf16.mxu0 %v6970_v41  ;;  %v7036_v40 = vld [vmem:[%s9434_s5 + $0x404] ss:$36 sps:$4 sm:$0xff]   ;;  %v7031_v41 = vld [vmem:[%s9434_s5 + $0x3f8] ss:$36 sps:$4 sm:$0xff]  }
 0x2d7   :  { %v3118_v59 = vadd.f32 %v6134_v52, %v3077_v56  ;;  %v7040_v52 = vld [vmem:[%s9434_s5 + $0x3b8] ss:$36 sps:$4 sm:$0xff]   ;;  %v7046_v56 = vld [vmem:[%s9434_s5 + $0x370] ss:$36 sps:$4 sm:$0xff]  }
 0x2d8   :  { %v6136_v57 = vpop.f32.mrf.mxu1 }
 0x2d9   :  { %v6137_v51 = vadd.f32 %v6136_v57, %v6135_v54  ;;  %4668 = vmatpush1.bf16.msra.mxu0 %v6968_v53  ;;  %v3126_v62 = vmax.f32 %v3118_v59, 0.0  ;;  %v7045_v53 = vld [vmem:[%s9434_s5 + $0x36c] ss:$36 sps:$4 sm:$0xff]   ;;  %v7048_v54 = vld [vmem:[%s9434_s5 + $0x374] ss:$36 sps:$4 sm:$0xff]  }
 0x2da   :  { %4669 = vmatprep.subr.bf16.mxu0 %v6976_v55  ;;  %v7043_v55 = vld [vmem:[%s9434_s5 + $0x368] ss:$36 sps:$4 sm:$0xff]   ;;  %v7049_v59 = vld [vmem:[%s9434_s5 + $0x320] ss:$36 sps:$4 sm:$0xff]  }
 0x2db   :  { %v3121_v61 = vadd.f32 %v6137_v51, %v3080_v58  ;;  %v7051_v57 = vld [vmem:[%s9434_s5 + $0x324] ss:$36 sps:$4 sm:$0xff]   ;;  %v7054_v58 = vld [vmem:[%s9434_s5 + $0x32c] ss:$36 sps:$4 sm:$0xff]  }
 0x2dc   :  { %v7052_v51 = vld [vmem:[%s9434_s5 + $0x328] ss:$36 sps:$4 sm:$0xff]  }
 0x2dd   :  { %v3129_v63 = vmax.f32 %v3121_v61, 0.0  ;;  %4670 = vmatpush1.bf16.msra.mxu0 %v6974_v46  ;;  %v7057_v46 = vld [vmem:[%s9434_s5 + $0x2dc] ss:$36 sps:$4 sm:$0xff]  }
 0x2de   :  { %4698 = vmatprep.subr.bf16.mxu0 %v6982_v60  ;;  %v7060_v60 = vld [vmem:[%s9434_s5 + $0x2e4] ss:$36 sps:$4 sm:$0xff]   ;;  %v7055_v61 = vld [vmem:[%s9434_s5 + $0x2d8] ss:$36 sps:$4 sm:$0xff]  }
 0x2df   :  { %v8775_v2 = vpack.c.bf16 %v3129_v63, %v3126_v62  ;;  %v7058_v62 = vld [vmem:[%s9434_s5 + $0x2e0] ss:$36 sps:$4 sm:$0xff]   ;;  %v7063_v63 = vld [vmem:[%s9434_s5 + $0x294] ss:$36 sps:$4 sm:$0xff]  }
 0x2e1   :  { %4602 = vmatmul.mubr.bf16.vlgmr.msra.gmra.mxu1 %v8775_v2  ;;  %4688 = vmatmul.mubr.bf16.vlgmr.msra.gmra.mxu0 %v8775_v2 }
 0x2e2   :  { %4613 = vmatpush1.bf16.msra.mxu1 %v6977_v0  ;;  %4699 = vmatpush1.bf16.msra.mxu0 %v6980_v1  ;;  %v7066_v0 = vld [vmem:[%s9434_s5 + $0x29c] ss:$36 sps:$4 sm:$0xff]   ;;  %v7061_v1 = vld [vmem:[%s9434_s5 + $0x290] ss:$36 sps:$4 sm:$0xff]  }
 0x2e3   :  { %4644 = vmatprep.mubr.bf16.mxu1 %v8713_v24  ;;  %4730 = vmatprep.mubr.bf16.mxu0 %v8713_v24 }
 0x2e4   :  { %4614 = vmatprep.subr.bf16.mxu1 %v6985_v3  ;;  %4700 = vmatprep.subr.bf16.mxu0 %v6988_v5  ;;  %v7064_v3 = vld [vmem:[%s9434_s5 + $0x298] ss:$36 sps:$4 sm:$0xff]   ;;  %v7069_v5 = vld [vmem:[%s9434_s5 + $0x24c] ss:$36 sps:$4 sm:$0xff]  }
 0x2e6   :  { %4615 = vmatpush1.bf16.msra.mxu1 %v6983_v6  ;;  %4701 = vmatpush1.bf16.msra.mxu0 %v6986_v7  ;;  %v7072_v6 = vld [vmem:[%s9434_s5 + $0x254] ss:$36 sps:$4 sm:$0xff]   ;;  %v7067_v7 = vld [vmem:[%s9434_s5 + $0x248] ss:$36 sps:$4 sm:$0xff]  }
 0x2e7   :  { %4616 = vmatprep.subr.bf16.mxu1 %v6991_v10  ;;  %4702 = vmatprep.subr.bf16.mxu0 %v6994_v11  ;;  %v7070_v10 = vld [vmem:[%s9434_s5 + $0x250] ss:$36 sps:$4 sm:$0xff]  }
 0x2e8   :  { %v7075_v11 = vld [vmem:[%s9434_s5 + $0x68c] ss:$36 sps:$4 sm:$0xff]  }
 0x2ea   :  { %4617 = vmatpush1.bf16.msra.mxu1 %v6989_v12  ;;  %4703 = vmatpush1.bf16.msra.mxu0 %v6992_v13  ;;  %v7078_v12 = vld [vmem:[%s9434_s5 + $0x694] ss:$36 sps:$4 sm:$0xff]   ;;  %v7073_v13 = vld [vmem:[%s9434_s5 + $0x688] ss:$36 sps:$4 sm:$0xff]  }
 0x2eb   :  { %4618 = vmatprep.subr.bf16.mxu1 %v6997_v14  ;;  %4704 = vmatprep.subr.bf16.mxu0 %v7000_v15  ;;  %v7076_v14 = vld [vmem:[%s9434_s5 + $0x690] ss:$36 sps:$4 sm:$0xff]   ;;  %v7081_v15 = vld [vmem:[%s9434_s5 + $0x644] ss:$36 sps:$4 sm:$0xff]  }
 0x2ee   :  { %4619 = vmatpush1.bf16.msra.mxu1 %v6995_v16  ;;  %4705 = vmatpush1.bf16.msra.mxu0 %v6998_v17  ;;  %v7084_v16 = vld [vmem:[%s9434_s5 + $0x64c] ss:$36 sps:$4 sm:$0xff]   ;;  %v7079_v17 = vld [vmem:[%s9434_s5 + $0x640] ss:$36 sps:$4 sm:$0xff]  }
 0x2ef   :  { %4620 = vmatprep.subr.bf16.mxu1 %v7003_v18  ;;  %4706 = vmatprep.subr.bf16.mxu0 %v7006_v19  ;;  %v7082_v18 = vld [vmem:[%s9434_s5 + $0x648] ss:$36 sps:$4 sm:$0xff]   ;;  %v7087_v19 = vld [vmem:[%s9434_s5 + $0x5fc] ss:$36 sps:$4 sm:$0xff]  }
 0x2f2   :  { %4621 = vmatpush1.bf16.msra.mxu1 %v7001_v20  ;;  %4707 = vmatpush1.bf16.msra.mxu0 %v7004_v22  ;;  %v7090_v20 = vld [vmem:[%s9434_s5 + $0x604] ss:$36 sps:$4 sm:$0xff]   ;;  %v7085_v22 = vld [vmem:[%s9434_s5 + $0x5f8] ss:$36 sps:$4 sm:$0xff]  }
 0x2f3   :  { %4622 = vmatprep.subr.bf16.mxu1 %v7009_v23  ;;  %4708 = vmatprep.subr.bf16.mxu0 %v7012_v48  ;;  %v7088_v23 = vld [vmem:[%s9434_s5 + $0x600] ss:$36 sps:$4 sm:$0xff]   ;;  %v7093_v48 = vld [vmem:[%s9434_s5 + $0x5b4] ss:$36 sps:$4 sm:$0xff]  }
 0x2f6   :  { %4623 = vmatpush1.bf16.msra.mxu1 %v7007_v4  ;;  %4709 = vmatpush1.bf16.msra.mxu0 %v7010_v25  ;;  %v7091_v4 = vld [vmem:[%s9434_s5 + $0x5b0] ss:$36 sps:$4 sm:$0xff]   ;;  %v7094_v25 = vld [vmem:[%s9434_s5 + $0x5b8] ss:$36 sps:$4 sm:$0xff]  }
 0x2f7   :  { %4624 = vmatprep.subr.bf16.mxu1 %v7015_v26  ;;  %4710 = vmatprep.subr.bf16.mxu0 %v7018_v34  ;;  %v7099_v26 = vld [vmem:[%s9434_s5 + $0x56c] ss:$36 sps:$4 sm:$0xff]   ;;  %v7102_v34 = vld [vmem:[%s9434_s5 + $0x574] ss:$36 sps:$4 sm:$0xff]  }
 0x2fa   :  { %4625 = vmatpush1.bf16.msra.mxu1 %v7013_v27  ;;  %4711 = vmatpush1.bf16.msra.mxu0 %v7016_v28  ;;  %v7097_v27 = vld [vmem:[%s9434_s5 + $0x568] ss:$36 sps:$4 sm:$0xff]   ;;  %v7100_v28 = vld [vmem:[%s9434_s5 + $0x570] ss:$36 sps:$4 sm:$0xff]  }
 0x2fb   :  { %4626 = vmatprep.subr.bf16.mxu1 %v7021_v29  ;;  %4712 = vmatprep.subr.bf16.mxu0 %v7024_v30  ;;  %v7105_v29 = vld [vmem:[%s9434_s5 + $0x524] ss:$36 sps:$4 sm:$0xff]   ;;  %v7108_v30 = vld [vmem:[%s9434_s5 + $0x52c] ss:$36 sps:$4 sm:$0xff]  }
 0x2fe   :  { %4627 = vmatpush1.bf16.msra.mxu1 %v7019_v31  ;;  %4713 = vmatpush1.bf16.msra.mxu0 %v7022_v32  ;;  %v7103_v31 = vld [vmem:[%s9434_s5 + $0x520] ss:$36 sps:$4 sm:$0xff]   ;;  %v7106_v32 = vld [vmem:[%s9434_s5 + $0x528] ss:$36 sps:$4 sm:$0xff]  }
 0x2ff   :  { %4628 = vmatprep.subr.bf16.mxu1 %v7027_v33  ;;  %4714 = vmatprep.subr.bf16.mxu0 %v7030_v35  ;;  %v7111_v33 = vld [vmem:[%s9434_s5 + $0x4dc] ss:$36 sps:$4 sm:$0xff]   ;;  %v7114_v35 = vld [vmem:[%s9434_s5 + $0x4e4] ss:$36 sps:$4 sm:$0xff]  }
 0x302   :  { %4629 = vmatpush2.bf16.msra.mxu1 %v7025_v37  ;;  %4715 = vmatpush2.bf16.msra.mxu0 %v7028_v38  ;;  %v7109_v37 = vld [vmem:[%s9434_s5 + $0x4d8] ss:$36 sps:$4 sm:$0xff]   ;;  %v7112_v38 = vld [vmem:[%s9434_s5 + $0x4e0] ss:$36 sps:$4 sm:$0xff]  }
 0x303   :  { %4630 = vmatprep.subr.bf16.mxu1 %v7033_v39  ;;  %4716 = vmatprep.subr.bf16.mxu0 %v7036_v40  ;;  %v7117_v39 = vld [vmem:[%s9434_s5 + $0x494] ss:$36 sps:$4 sm:$0xff]   ;;  %v7120_v40 = vld [vmem:[%s9434_s5 + $0x49c] ss:$36 sps:$4 sm:$0xff]  }
 0x306   :  { %4631 = vmatpush2.bf16.msra.mxu1 %v7031_v41  ;;  %4717 = vmatpush2.bf16.msra.mxu0 %v7034_v42  ;;  %v7115_v41 = vld [vmem:[%s9434_s5 + $0x490] ss:$36 sps:$4 sm:$0xff]   ;;  %v7118_v42 = vld [vmem:[%s9434_s5 + $0x498] ss:$36 sps:$4 sm:$0xff]  }
 0x307   :  { %4632 = vmatprep.subr.bf16.mxu1 %v7039_v45  ;;  %4718 = vmatprep.subr.bf16.mxu0 %v7042_v47  ;;  %v7123_v45 = vld [vmem:[%s9434_s5 + $0x214] ss:$36 sps:$4 sm:$0xff]  }
 0x308   :  { %v7124_v47 = vld [vmem:[%s9434_s5 + $0x458] ss:$36 sps:$4 sm:$0xff]  }
 0x30a   :  { %4633 = vmatpush2.bf16.msra.mxu1 %v7037_v50  ;;  %4719 = vmatpush2.bf16.msra.mxu0 %v7040_v52  ;;  %v7121_v50 = vld [vmem:[%s9434_s5 + $0x210] ss:$36 sps:$4 sm:$0xff]   ;;  %v7125_v52 = vld [vmem:[%s9434_s5 + $0x218] ss:$36 sps:$4 sm:$0xff]  }
 0x30b   :  { %4634 = vmatprep.subr.bf16.mxu1 %v7045_v53  ;;  %4720 = vmatprep.subr.bf16.mxu0 %v7048_v54  ;;  %v7128_v53 = vld [vmem:[%s9434_s5 + $0x1cc] ss:$36 sps:$4 sm:$0xff]  }
 0x30c   :  { %v7129_v54 = vld [vmem:[%s9434_s5 + $0x410] ss:$36 sps:$4 sm:$0xff]  }
 0x30e   :  { %4635 = vmatpush2.bf16.msra.mxu1 %v7043_v55  ;;  %4721 = vmatpush2.bf16.msra.mxu0 %v7046_v56  ;;  %v7126_v55 = vld [vmem:[%s9434_s5 + $0x1c8] ss:$36 sps:$4 sm:$0xff]   ;;  %v7130_v56 = vld [vmem:[%s9434_s5 + $0x1d0] ss:$36 sps:$4 sm:$0xff]  }
 0x30f   :  { %4636 = vmatprep.subr.bf16.mxu1 %v7051_v57  ;;  %4722 = vmatprep.subr.bf16.mxu0 %v7054_v58  ;;  %v7133_v57 = vld [vmem:[%s9434_s5 + $0x184] ss:$36 sps:$4 sm:$0xff]  }
 0x310   :  { %v7134_v58 = vld [vmem:[%s9434_s5 + $0x3c8] ss:$36 sps:$4 sm:$0xff]  }
 0x312   :  { %4637 = vmatpush2.bf16.msra.mxu1 %v7049_v59  ;;  %4723 = vmatpush2.bf16.msra.mxu0 %v7052_v51  ;;  %v7131_v59 = vld [vmem:[%s9434_s5 + $0x180] ss:$36 sps:$4 sm:$0xff]  }
 0x313   :  { %4638 = vmatprep.subr.bf16.mxu1 %v7057_v46  ;;  %4724 = vmatprep.subr.bf16.mxu0 %v7060_v60  ;;  %v7138_v51 = vld [vmem:[%s9434_s5 + $0x13c] ss:$36 sps:$4 sm:$0xff]  }
 0x314   :  { %v7139_v46 = vld [vmem:[%s9434_s5 + $0x380] ss:$36 sps:$4 sm:$0xff]   ;;  %v7136_v60 = vld [vmem:[%s9434_s5 + $0x138] ss:$36 sps:$4 sm:$0xff]  }
 0x316   :  { %4639 = vmatpush2.bf16.msra.mxu1 %v7055_v61  ;;  %4725 = vmatpush2.bf16.msra.mxu0 %v7058_v62  ;;  %v7140_v61 = vld [vmem:[%s9434_s5 + $0x140] ss:$36 sps:$4 sm:$0xff]   ;;  %v7143_v62 = vld [vmem:[%s9434_s5 + $0xf4] ss:$36 sps:$4 sm:$0xff]  }
 0x317   :  { %4640 = vmatprep.subr.bf16.mxu1 %v7063_v63  ;;  %4726 = vmatprep.subr.bf16.mxu0 %v7066_v0  ;;  %v7144_v63 = vld [vmem:[%s9434_s5 + $0x338] ss:$36 sps:$4 sm:$0xff]   ;;  %v7141_v0 = vld [vmem:[%s9434_s5 + $0xf0] ss:$36 sps:$4 sm:$0xff]  }
 0x31a   :  { %4641 = vmatpush2.bf16.msra.mxu1 %v7061_v1  ;;  %4727 = vmatpush2.bf16.msra.mxu0 %v7064_v3  ;;  %v7145_v1 = vld [vmem:[%s9434_s5 + $0xf8] ss:$36 sps:$4 sm:$0xff]   ;;  %v7148_v3 = vld [vmem:[%s9434_s5 + $0xac] ss:$36 sps:$4 sm:$0xff]  }
 0x31b   :  { %4642 = vmatprep.subr.bf16.mxu1 %v7069_v5  ;;  %4728 = vmatprep.subr.bf16.mxu0 %v7072_v6  ;;  %v7149_v5 = vld [vmem:[%s9434_s5 + $0x2f0] ss:$36 sps:$4 sm:$0xff]   ;;  %v7146_v6 = vld [vmem:[%s9434_s5 + $0xa8] ss:$36 sps:$4 sm:$0xff]  }
 0x31e   :  { %4643 = vmatpush2.bf16.msra.mxu1 %v7067_v7  ;;  %4729 = vmatpush2.bf16.msra.mxu0 %v7070_v10  ;;  %v7150_v7 = vld [vmem:[%s9434_s5 + $0xb0] ss:$36 sps:$4 sm:$0xff]   ;;  %v7153_v10 = vld [vmem:[%s9434_s5 + $0x64] ss:$36 sps:$4 sm:$0xff]  }
 0x31f   :  { %4741 = vmatprep.subr.bf16.mxu1 %v7075_v11  ;;  %4827 = vmatprep.subr.bf16.mxu0 %v7078_v12  ;;  %v7154_v11 = vld [vmem:[%s9434_s5 + $0x2a8] ss:$36 sps:$4 sm:$0xff]   ;;  %v7151_v12 = vld [vmem:[%s9434_s5 + $0x60] ss:$36 sps:$4 sm:$0xff]  }
 0x321   :  { %4645 = vmatmul.mubr.bf16.vlgmr.msra.gmra.mxu1 %v8718_v49  ;;  %4731 = vmatmul.mubr.bf16.vlgmr.msra.gmra.mxu0 %v8718_v49 }
 0x322   :  { %4742 = vmatpush1.bf16.msra.mxu1 %v7073_v13  ;;  %4828 = vmatpush1.bf16.msra.mxu0 %v7076_v14  ;;  %v7155_v13 = vld [vmem:[%s9434_s5 + $0x68] ss:$36 sps:$4 sm:$0xff]   ;;  %v7158_v14 = vld [vmem:[%s9434_s5 + $0x1c] ss:$36 sps:$4 sm:$0xff]  }
 0x323   :  { %4743 = vmatprep.subr.bf16.mxu1 %v7081_v15  ;;  %4829 = vmatprep.subr.bf16.mxu0 %v7084_v16  ;;  %v7159_v15 = vld [vmem:[%s9434_s5 + $0x260] ss:$36 sps:$4 sm:$0xff]   ;;  %v7156_v16 = vld [vmem:[%s9434_s5 + $0x18] ss:$36 sps:$4 sm:$0xff]  }
 0x324   :  { %4773 = vmatprep.mubr.bf16.mxu1 %v7229_v21  ;;  %4859 = vmatprep.mubr.bf16.mxu0 %v7229_v21  ;;  %v7096_v21 = vld [vmem:[%s9434_s5 + $0x5bc] ss:$36 sps:$4 sm:$0xff]  }
 0x326   :  { %4744 = vmatpush1.bf16.msra.mxu1 %v7079_v17  ;;  %4830 = vmatpush1.bf16.msra.mxu0 %v7082_v18  ;;  %v7160_v17 = vld [vmem:[%s9434_s5 + $0x20] ss:$36 sps:$4 sm:$0xff]   ;;  %v7163_v18 = vld [vmem:[%s9434_s5 + $0x454] ss:$36 sps:$4 sm:$0xff]  }
 0x327   :  { %4745 = vmatprep.subr.bf16.mxu1 %v7087_v19  ;;  %4831 = vmatprep.subr.bf16.mxu0 %v7090_v20  ;;  %v7161_v19 = vld [vmem:[%s9434_s5 + $0x450] ss:$36 sps:$4 sm:$0xff]  }
 0x328   :  { %v7166_v20 = vld [vmem:[%s9434_s5 + $0x40c] ss:$36 sps:$4 sm:$0xff]  }
 0x32a   :  { %4746 = vmatpush1.bf16.msra.mxu1 %v7085_v22  ;;  %4832 = vmatpush1.bf16.msra.mxu0 %v7088_v23  ;;  %v7230_v22 = vmov 0.0   ;;  %v7164_v23 = vld [vmem:[%s9434_s5 + $0x408] ss:$36 sps:$4 sm:$0xff]  }
 0x32b   :  { %4747 = vmatprep.subr.bf16.mxu1 %v7093_v48  ;;  %4833 = vmatprep.subr.bf16.mxu0 %v7096_v21  ;;  %v7169_v48 = vld [vmem:[%s9434_s5 + $0x3c4] ss:$36 sps:$4 sm:$0xff]  }
 0x32c   :  { %v7167_v21 = vld [vmem:[%s9434_s5 + $0x3c0] ss:$36 sps:$4 sm:$0xff]  }
 0x32e   :  { %4748 = vmatpush1.bf16.msra.mxu1 %v7091_v4  ;;  %4834 = vmatpush1.bf16.msra.mxu0 %v7094_v25  ;;  %v7172_v4 = vld [vmem:[%s9434_s5 + $0x37c] ss:$36 sps:$4 sm:$0xff]  }
 0x32f   :  { %4749 = vmatprep.subr.bf16.mxu1 %v7099_v26  ;;  %4835 = vmatprep.subr.bf16.mxu0 %v7102_v34  ;;  %v7170_v25 = vld [vmem:[%s9434_s5 + $0x378] ss:$36 sps:$4 sm:$0xff]   ;;  %v7173_v34 = vld [vmem:[%s9434_s5 + $0x330] ss:$36 sps:$4 sm:$0xff]  }
 0x330   :  { %v7175_v26 = vld [vmem:[%s9434_s5 + $0x334] ss:$36 sps:$4 sm:$0xff]  }
 0x332   :  { %4750 = vmatpush1.bf16.msra.mxu1 %v7097_v27  ;;  %4836 = vmatpush1.bf16.msra.mxu0 %v7100_v28  ;;  %v7178_v27 = vld [vmem:[%s9434_s5 + $0x2ec] ss:$36 sps:$4 sm:$0xff]  }
 0x333   :  { %4751 = vmatprep.subr.bf16.mxu1 %v7105_v29  ;;  %4837 = vmatprep.subr.bf16.mxu0 %v7108_v30  ;;  %v7176_v28 = vld [vmem:[%s9434_s5 + $0x2e8] ss:$36 sps:$4 sm:$0xff]   ;;  %v7179_v30 = vld [vmem:[%s9434_s5 + $0x2a0] ss:$36 sps:$4 sm:$0xff]  }
 0x334   :  { %v7181_v29 = vld [vmem:[%s9434_s5 + $0x2a4] ss:$36 sps:$4 sm:$0xff]  }
 0x336   :  { %4752 = vmatpush1.bf16.msra.mxu1 %v7103_v31  ;;  %4838 = vmatpush1.bf16.msra.mxu0 %v7106_v32  ;;  %v7184_v31 = vld [vmem:[%s9434_s5 + $0x25c] ss:$36 sps:$4 sm:$0xff]  }
 0x337   :  { %4753 = vmatprep.subr.bf16.mxu1 %v7111_v33  ;;  %4839 = vmatprep.subr.bf16.mxu0 %v7114_v35  ;;  %v7182_v32 = vld [vmem:[%s9434_s5 + $0x258] ss:$36 sps:$4 sm:$0xff]   ;;  %v7186_v35 = vld [vmem:[%s9434_s5 + $0x650] ss:$36 sps:$4 sm:$0xff]  }
 0x338   :  { %v7185_v33 = vld [vmem:[%s9434_s5 + $0x698] ss:$36 sps:$4 sm:$0xff]  }
 0x33a   :  { %4754 = vmatpush1.bf16.msra.mxu1 %v7109_v37  ;;  %4840 = vmatpush1.bf16.msra.mxu0 %v7112_v38  ;;  %v7187_v37 = vld [vmem:[%s9434_s5 + $0x608] ss:$36 sps:$4 sm:$0xff]   ;;  %v7189_v38 = vld [vmem:[%s9434_s5 + $0x578] ss:$36 sps:$4 sm:$0xff]  }
 0x33b   :  { %4755 = vmatprep.subr.bf16.mxu1 %v7117_v39  ;;  %4841 = vmatprep.subr.bf16.mxu0 %v7120_v40  ;;  %v7190_v39 = vld [vmem:[%s9434_s5 + $0x530] ss:$36 sps:$4 sm:$0xff]   ;;  %v7191_v40 = vld [vmem:[%s9434_s5 + $0x4e8] ss:$36 sps:$4 sm:$0xff]  }
 0x33e   :  { %4756 = vmatpush1.bf16.msra.mxu1 %v7115_v41  ;;  %4842 = vmatpush1.bf16.msra.mxu0 %v7118_v42  ;;  %v7192_v41 = vld [vmem:[%s9434_s5 + $0x4a0] ss:$36 sps:$4 sm:$0xff]   ;;  %v7193_v42 = vld [vmem:[%s9436_s7 + $0x38] sm:$0xff]  }
 0x33f   :  { %4784 = vmatprep.subr.bf16.mxu1 %v7123_v45  ;;  %6138 = vmatprep.subr.bf16.mxu0 %v7124_v47  ;;  %v7194_v45 = vld [vmem:[%s9436_s7 + $0x30] sm:$0xff]   ;;  %v7195_v47 = vld [vmem:[%s9436_s7 + $0x28] sm:$0xff]  }
 0x341   :  { %4774 = vmatmul.mubr.bf16.vlgmr.msra.gmra.mxu1 %v8775_v2  ;;  %4860 = vmatmul.mubr.bf16.vlgmr.msra.gmra.mxu0 %v8775_v2 }
 0x342   :  { %4785 = vmatpush1.bf16.msra.mxu1 %v7121_v50  ;;  %4816 = vmatprep.mubr.bf16.mxu1 %v8713_v24  ;;  %v7197_v50 = vld [vmem:[%s9436_s7 + $0x18] sm:$0xff]  }
 0x343   :  { %6139 = vmatpush3.bf16.msra.mxu0 %v7125_v52  ;;  %4902 = vmatprep.mubr.bf16.mxu0 %v8713_v24  ;;  %v7135_v24 = vld [vmem:[%s9434_s5 + $0x188] ss:$36 sps:$4 sm:$0xff]   ;;  %v7198_v52 = vld [vmem:[%s9436_s7 + $0x10] sm:$0xff]  }
 0x344   :  { %4786 = vmatprep.subr.bf16.mxu1 %v7128_v53  ;;  %6140 = vmatprep.subr.bf16.mxu0 %v7129_v54  ;;  %v7199_v53 = vld [vmem:[%s9436_s7 + $0x8] sm:$0xff]   ;;  %v7200_v54 = vld [vmem:[%s9436_s7] sm:$0xff]  }
 0x346   :  { %4787 = vmatpush1.bf16.msra.mxu1 %v7126_v55  ;;  %v7201_v55 = vld [vmem:[%s9437_s9 + $0x38] sm:$0xff]  }
 0x347   :  { %6141 = vmatpush3.bf16.msra.mxu0 %v7130_v56  ;;  %4788 = vmatprep.subr.bf16.mxu1 %v7133_v57  ;;  %v7202_v56 = vld [vmem:[%s9437_s9 + $0x30] sm:$0xff]   ;;  %v7203_v57 = vld [vmem:[%s9437_s9 + $0x28] sm:$0xff]  }
 0x348   :  { %6142 = vmatprep.subr.bf16.mxu0 %v7134_v58  ;;  %v7204_v58 = vld [vmem:[%s9437_s9 + $0x20] sm:$0xff]  }
 0x34a   :  { %4789 = vmatpush1.bf16.msra.mxu1 %v7131_v59  ;;  %v7205_v59 = vld [vmem:[%s9437_s9 + $0x18] sm:$0xff]  }
 0x34b   :  { %6143 = vmatpush3.bf16.msra.mxu0 %v7135_v24  ;;  %4790 = vmatprep.subr.bf16.mxu1 %v7138_v51 }
 0x34c   :  { %6144 = vmatprep.subr.bf16.mxu0 %v7139_v46 }
 0x34e   :  { %4791 = vmatpush1.bf16.msra.mxu1 %v7136_v60 }
 0x34f   :  { %6145 = vmatpush3.bf16.msra.mxu0 %v7140_v61  ;;  %4792 = vmatprep.subr.bf16.mxu1 %v7143_v62 }
 0x350   :  { %6146 = vmatprep.subr.bf16.mxu0 %v7144_v63 }
 0x352   :  { %4793 = vmatpush1.bf16.msra.mxu1 %v7141_v0 }
 0x353   :  { %6147 = vmatpush3.bf16.msra.mxu0 %v7145_v1  ;;  %4794 = vmatprep.subr.bf16.mxu1 %v7148_v3 }
 0x354   :  { %6148 = vmatprep.subr.bf16.mxu0 %v7149_v5 }
 0x356   :  { %4795 = vmatpush1.bf16.msra.mxu1 %v7146_v6 }
 0x357   :  { %6149 = vmatpush3.bf16.msra.mxu0 %v7150_v7  ;;  %4796 = vmatprep.subr.bf16.mxu1 %v7153_v10 }
 0x358   :  { %6150 = vmatprep.subr.bf16.mxu0 %v7154_v11 }
 0x35a   :  { %4797 = vmatpush1.bf16.msra.mxu1 %v7151_v12 }
 0x35b   :  { %6151 = vmatpush3.bf16.msra.mxu0 %v7155_v13  ;;  %4798 = vmatprep.subr.bf16.mxu1 %v7158_v14 }
 0x35c   :  { %6152 = vmatprep.subr.bf16.mxu0 %v7159_v15 }
 0x35e   :  { %4799 = vmatpush1.bf16.msra.mxu1 %v7156_v16 }
 0x35f   :  { %6153 = vmatpush3.bf16.msra.mxu0 %v7160_v17  ;;  %4800 = vmatprep.subr.bf16.mxu1 %v7163_v18 }
 0x360   :  { %6225 = vmatprep.subr.bf16.mxu0 %v7230_v22 }
 0x362   :  { %4903 = vmatmul.mubr.bf16.vlgmr.msra.gmra.mxu0 %v8718_v49  ;;  %4801 = vmatpush2.bf16.msra.mxu1 %v7161_v19 }
 0x363   :  { %4802 = vmatprep.subr.bf16.mxu1 %v7166_v20  ;;  %6241 = vmatprep.mubr.msk.bf16.mxu0 %vm7231_vm0, %v7230_v22  ;;  %v3373_v20 = vld [vmem:[%s9438_s6] sm:$0xff] }
 0x364   :  { %6226 = vmatpush3.bf16.msra.mxu0 %v7193_v42 }
 0x365   :  { %6227 = vmatprep.subr.bf16.mxu0 %v7230_v22 }
 0x366   :  { %4803 = vmatpush2.bf16.msra.mxu1 %v7164_v23 }
 0x367   :  { %4804 = vmatprep.subr.bf16.mxu1 %v7169_v48  ;;  %v3384_v48 = vrot.slane %v3373_v20, %v8385_v44 }
 0x368   :  { %6228 = vmatpush3.bf16.msra.mxu0 %v7194_v45  ;;  %v3399_v45 = vsub.s32 5, %v8367_v36 }
 0x369   :  { %6229 = vmatprep.subr.bf16.mxu0 %v7230_v22 }
 0x36a   :  { %4805 = vmatpush2.bf16.msra.mxu1 %v7167_v21  ;;  %v3388_v21 = vrot.slane %v3373_v20, %v8505_v9 }
 0x36b   :  { %4806 = vmatprep.subr.bf16.mxu1 %v7172_v4 }
 0x36c   :  { %6230 = vmatpush3.bf16.msra.mxu0 %v7195_v47 }
 0x36d   :  { %6231 = vmatprep.subr.bf16.mxu0 %v7230_v22 }
 0x36e   :  { %4807 = vmatpush2.bf16.msra.mxu1 %v7170_v25  ;;  %v3380_v25 = vrot.slane %v3373_v20, %v8382_v43 }
 0x36f   :  { %4808 = vmatprep.subr.bf16.mxu1 %v7175_v26  ;;  %v3392_v26 = vrot.slane %v3373_v20, %v365_v8 }
 0x372   :  { %4809 = vmatpush2.bf16.msra.mxu1 %v7173_v34 }
 0x373   :  { %4810 = vmatprep.subr.bf16.mxu1 %v7178_v27 }
 0x376   :  { %4811 = vmatpush2.bf16.msra.mxu1 %v7176_v28 }
 0x377   :  { %4812 = vmatprep.subr.bf16.mxu1 %v7181_v29 }
 0x37a   :  { %4813 = vmatpush2.bf16.msra.mxu1 %v7179_v30 }
 0x37b   :  { %4814 = vmatprep.subr.bf16.mxu1 %v7184_v31 }
 0x37e   :  { %4815 = vmatpush2.bf16.msra.mxu1 %v7182_v32 }
 0x37f   :  { %6205 = vmatprep.subr.bf16.mxu1 %v7230_v22 }
 0x380   :  { %v4560_v24 = vpop.f32.mrf.mxu0 }
 0x381   :  { %4817 = vmatmul.mubr.bf16.vlgmr.msra.gmra.mxu1 %v8718_v49  ;;  %v7188_v49 = vld [vmem:[%s9434_s5 + $0x5c0] ss:$36 sps:$4 sm:$0xff]   ;;  %v4561_v32 = vadd.f32 %v4560_v24, %v3380_v25 }
 0x382   :  { %6206 = vmatpush3.bf16.msra.mxu1 %v7185_v33  ;;  %6221 = vmatprep.mubr.msk.bf16.mxu1 %vm7231_vm0, %v7230_v22  ;;  %v4562_v51 = vpop.f32.mrf.mxu0 }
 0x383   :  { %6207 = vmatprep.subr.bf16.mxu1 %v7230_v22  ;;  %v4563_v27 = vadd.f32 %v4562_v51, %v3384_v48 }
 0x384   :  { %v4564_v46 = vpop.f32.mrf.mxu0 }
 0x385   :  { %v4565_v33 = vadd.f32 %v4564_v46, %v3380_v25  ;;  %v3400_v46 = vrot.slane %v3373_v20, %v3399_v45 }
 0x386   :  { %6208 = vmatpush3.bf16.msra.mxu1 %v7186_v35  ;;  %v4566_v61 = vpop.f32.mrf.mxu0  ;;  %v3395_v35 = vsub.s32 4, %v8367_v36 }
 0x387   :  { %6209 = vmatprep.subr.bf16.mxu1 %v7230_v22  ;;  %v4567_v28 = vadd.f32 %v4566_v61, %v3384_v48 }
 0x388   :  { %v3396_v42 = vrot.slane %v3373_v20, %v3395_v35 }
 0x38a   :  { %6210 = vmatpush3.bf16.msra.mxu1 %v7187_v37 }
 0x38b   :  { %6211 = vmatprep.subr.bf16.mxu1 %v7230_v22 }
 0x38e   :  { %6212 = vmatpush3.bf16.msra.mxu1 %v7188_v49 }
 0x38f   :  { %6213 = vmatprep.subr.bf16.mxu1 %v7230_v22 }
 0x392   :  { %6214 = vmatpush3.bf16.msra.mxu1 %v7189_v38 }
 0x393   :  { %6215 = vmatprep.subr.bf16.mxu1 %v7230_v22 }
 0x396   :  { %6216 = vmatpush3.bf16.msra.mxu1 %v7190_v39 }
 0x397   :  { %6217 = vmatprep.subr.bf16.mxu1 %v7230_v22 }
 0x39a   :  { %6218 = vmatpush3.bf16.msra.mxu1 %v7191_v40 }
 0x39b   :  { %6219 = vmatprep.subr.bf16.mxu1 %v7230_v22 }
 0x39e   :  { %6220 = vmatpush3.bf16.msra.mxu1 %v7192_v41 }
 0x39f   :  { %6245 = vmatprep.subr.bf16.mxu1 %v7230_v22 }
 0x3a1   :  { %6222 = vmatmul.mubr.bf16.vlgmr.msra.gmra.mxu1 %v8775_v2  ;;  %v7196_v2 = vld [vmem:[%s9436_s7 + $0x20] sm:$0xff]   ;;  %v4603_v60 = vpop.f32.mrf.mxu1  ;;  %v4689_v62 = vpop.f32.mrf.mxu0 }
 0x3a2   :  { %6261 = vmatprep.mubr.msk.bf16.mxu1 %vm7231_vm0, %v7230_v22  ;;  %6232 = vmatpush3.bf16.msra.mxu0 %v7196_v2  ;;  %v4604_v49 = vadd.f32 %v4603_v60, %v4561_v32  ;;  %v3403_v2 = vsub.s32 6, %v8367_v36 }
 0x3a3   :  { %6233 = vmatprep.subr.bf16.mxu0 %v7230_v22  ;;  %6246 = vmatpush3.bf16.msra.mxu1 %v7201_v55  ;;  %v4605_v63 = vpop.f32.mrf.mxu1  ;;  %v4691_v0 = vpop.f32.mrf.mxu0 }
 0x3a4   :  { %6247 = vmatprep.subr.bf16.mxu1 %v7230_v22  ;;  %v4606_v44 = vadd.f32 %v4605_v63, %v4563_v27 }
 0x3a5   :  { %v4607_v1 = vpop.f32.mrf.mxu1  ;;  %v4693_v3 = vpop.f32.mrf.mxu0 }
 0x3a6   :  { %6234 = vmatpush3.bf16.msra.mxu0 %v7197_v50  ;;  %v4608_v38 = vadd.f32 %v4607_v1, %v4565_v33  ;;  %v4953_v50 = vmax.f32 %v4606_v44, 0.0 }
 0x3a7   :  { %6235 = vmatprep.subr.bf16.mxu0 %v7230_v22  ;;  %6248 = vmatpush3.bf16.msra.mxu1 %v7202_v56  ;;  %v4609_v5 = vpop.f32.mrf.mxu1  ;;  %v4695_v7 = vpop.f32.mrf.mxu0  ;;  %v3407_v56 = vsub.s32 7, %v8367_v36 }
 0x3a8   :  { %6249 = vmatprep.subr.bf16.mxu1 %v7230_v22  ;;  %v4610_v37 = vadd.f32 %v4609_v5, %v4567_v28  ;;  %v4961_v55 = vmax.f32 %v4608_v38, 0.0 }
 0x3aa   :  { %6236 = vmatpush3.bf16.msra.mxu0 %v7198_v52  ;;  %v4962_v52 = vmax.f32 %v4610_v37, 0.0 }
 0x3ab   :  { %6237 = vmatprep.subr.bf16.mxu0 %v7230_v22  ;;  %6250 = vmatpush3.bf16.msra.mxu1 %v7203_v57 }
 0x3ac   :  { %6251 = vmatprep.subr.bf16.mxu1 %v7230_v22  ;;  %v4971_v1 = vmax.f32 %v4961_v55, %v4962_v52 }
 0x3ae   :  { %6238 = vmatpush3.bf16.msra.mxu0 %v7199_v53 }
 0x3af   :  { %6239 = vmatprep.subr.bf16.mxu0 %v7230_v22  ;;  %6252 = vmatpush3.bf16.msra.mxu1 %v7204_v58 }
 0x3b0   :  { %6253 = vmatprep.subr.bf16.mxu1 %v7230_v22 }
 0x3b2   :  { %6240 = vmatpush3.bf16.msra.mxu0 %v7200_v54  ;;  %v4952_v54 = vmax.f32 %v4604_v49, 0.0 }
 0x3b3   :  { %6265 = vmatprep.subr.bf16.mxu0 %v7230_v22  ;;  %6254 = vmatpush3.bf16.msra.mxu1 %v7205_v59 }
 0x3b4   :  { %6255 = vmatprep.subr.bf16.mxu1 %v7230_v22  ;;  %v4970_v63 = vmax.f32 %v4952_v54, %v4953_v50 }
 0x3e1   :  { %v4646_v6 = vpop.f32.mrf.mxu1  ;;  %v4732_v10 = vpop.f32.mrf.mxu0 }
 0x3e2   :  { %v4647_v29 = vadd.f32 %v4646_v6, %v3388_v21  ;;  %v4733_v51 = vadd.f32 %v4732_v10, %v3396_v42 }
 0x3e3   :  { %v4648_v11 = vpop.f32.mrf.mxu1  ;;  %v9304_v12 = vpop.f32.mrf.mxu0 }
 0x3e4   :  { %v4690_v39 = vadd.f32 %v4689_v62, %v4647_v29  ;;  %v4649_v40 = vadd.f32 %v4648_v11, %v3392_v26  ;;  %v3404_v62 = vrot.slane %v3373_v20, %v3403_v2  ;;  %v3408_v11 = vrot.slane %v3373_v20, %v3407_v56 }
 0x3e5   :  { %v4650_v13 = vpop.f32.mrf.mxu1  ;;  %v4736_v14 = vpop.f32.mrf.mxu0  ;;  %v4735_v36 = vadd.f32 %v9304_v12, %v3400_v46 }
 0x3e6   :  { %v4651_v30 = vadd.f32 %v4650_v13, %v3388_v21  ;;  %v4954_v57 = vmax.f32 %v4690_v39, 0.0  ;;  %v4692_v58 = vadd.f32 %v4691_v0, %v4649_v40  ;;  %v4737_v60 = vadd.f32 %v4736_v14, %v3396_v42 }
 0x3e7   :  { %v4652_v15 = vpop.f32.mrf.mxu1  ;;  %v4738_v17 = vpop.f32.mrf.mxu0 }
 0x3e8   :  { %v4694_v8 = vadd.f32 %v4693_v3, %v4651_v30  ;;  %v4653_v41 = vadd.f32 %v4652_v15, %v3392_v26  ;;  %v4972_v13 = vmax.f32 %v4970_v63, %v4954_v57  ;;  %v4955_v15 = vmax.f32 %v4692_v58, 0.0  ;;  %v7210_v63 = vld [vmem:[%s9439_s11 + $0x30] sm:$0xff]  }
 0x3e9   :  { %v4739_v0 = vadd.f32 %v4738_v17, %v3400_v46  ;;  %v5841_v17 = vld [vmem:[%s9438_s6 + $0x8] ss:$0 sm:$0xff]  ;;  %v7206_v46 = vld [vmem:[%s9437_s9 + $0x10] sm:$0xff]  }
 0x3ea   :  { %v4963_v59 = vmax.f32 %v4694_v8, 0.0  ;;  %v4696_v24 = vadd.f32 %v4695_v7, %v4653_v41  ;;  %v4974_v30 = vmax.f32 %v4972_v13, %v4955_v15  ;;  %6256 = vmatpush3.bf16.msra.mxu1 %v7206_v46 }
 0x3eb   :  { %6257 = vmatprep.subr.bf16.mxu1 %v7230_v22 }
 0x3ec   :  { %v4973_v48 = vmax.f32 %v4971_v1, %v4963_v59  ;;  %v4964_v21 = vmax.f32 %v4696_v24, 0.0  ;;  %v7211_v1 = vld [vmem:[%s9439_s11 + $0x28] sm:$0xff]  }
 0x401   :  { %v4775_v16 = vpop.f32.mrf.mxu1  ;;  %v9306_v18 = vpop.f32.mrf.mxu0 }
 0x402   :  { %v4776_v5 = vadd.f32 %v4775_v16, %v4733_v51  ;;  %v4975_v16 = vmax.f32 %v4973_v48, %v4964_v21 }
 0x403   :  { %v9308_v19 = vpop.f32.mrf.mxu1  ;;  %v9313_v23 = vpop.f32.mrf.mxu0 }
 0x404   :  { %v4956_v14 = vmax.f32 %v4776_v5, 0.0  ;;  %v4778_v27 = vadd.f32 %v9308_v19, %v4735_v36  ;;  %v7213_v5 = vld [vmem:[%s9439_s11 + $0x18] sm:$0xff]  }
 0x405   :  { %v4779_v4 = vpop.f32.mrf.mxu1  ;;  %v9320_v34 = vpop.f32.mrf.mxu0 }
 0x406   :  { %v4780_v6 = vadd.f32 %v4779_v4, %v4737_v60  ;;  %v4976_v44 = vmax.f32 %v4974_v30, %v4956_v14  ;;  %v4957_v37 = vmax.f32 %v4778_v27, 0.0  ;;  %v7207_v60 = vld [vmem:[%s9437_s9 + $0x8] sm:$0xff]   ;;  %v7216_v14 = vld [vmem:[%s9439_s11] sm:$0xff]   ;;  %v7217_v27 = vld [vmem:[%s9441_s13 + $0x38] sm:$0xff]  }
 0x407   :  { %v4781_v31 = vpop.f32.mrf.mxu1  ;;  %v4867_v43 = vpop.f32.mrf.mxu0  ;;  %6258 = vmatpush3.bf16.msra.mxu1 %v7207_v60  ;;  %v7220_v30 = vld [vmem:[%s9441_s13 + $0x20] sm:$0xff]  }
 0x408   :  { %v4965_v28 = vmax.f32 %v4780_v6, 0.0  ;;  %v4782_v29 = vadd.f32 %v4781_v31, %v4739_v0  ;;  %v4978_v41 = vmax.f32 %v4976_v44, %v4957_v37  ;;  %6259 = vmatprep.subr.bf16.mxu1 %v7230_v22  ;;  %v6058_v6 = vld [vmem:[%s9440_s8] ss:$0 sm:$0xff] }
 0x40a   :  { %v4966_v19 = vmax.f32 %v4782_v29, 0.0  ;;  %v7219_v29 = vld [vmem:[%s9441_s13 + $0x28] sm:$0xff]  }
 0x422   :  { %v6154_v47 = vpop.f32.mrf.mxu0 }
 0x424   :  { %v6155_v61 = vpop.f32.mrf.mxu0 }
 0x425   :  { %v6156_v4 = vadd.f32 %v6155_v61, %v6154_v47  ;;  %v7208_v61 = vld [vmem:[%s9437_s9] sm:$0xff]  }
 0x426   :  { %v6157_v25 = vpop.f32.mrf.mxu0  ;;  %6260 = vmatpush3.bf16.msra.mxu1 %v7208_v61 }
 0x427   :  { %v4905_v31 = vadd.f32 %v6156_v4, %v5841_v17  ;;  %6285 = vmatprep.subr.bf16.mxu1 %v7230_v22  ;;  %v7222_v4 = vld [vmem:[%s9441_s13 + $0x10] sm:$0xff]  }
 0x428   :  { %v6158_v20 = vpop.f32.mrf.mxu0 }
 0x429   :  { %v6159_v49 = vadd.f32 %v6158_v20, %v6157_v25  ;;  %v6067_v20 = vld [vmem:[%s9442_s10] ss:$0 sm:$0xff] }
 0x42b   :  { %v4908_v47 = vadd.f32 %v6159_v49, %v5841_v17  ;;  %v7223_v49 = vld [vmem:[%s9441_s13 + $0x8] sm:$0xff]  }
 0x441   :  { %v4818_v9 = vpop.f32.mrf.mxu1 }
 0x442   :  { %v4819_v7 = vadd.f32 %v4818_v9, %v3404_v62  ;;  %v4977_v9 = vmax.f32 %v4975_v16, %v4965_v28  ;;  %v7218_v28 = vld [vmem:[%s9441_s13 + $0x30] sm:$0xff]   ;;  %v7221_v16 = vld [vmem:[%s9441_s13 + $0x18] sm:$0xff]  }
 0x443   :  { %v4820_v53 = vpop.f32.mrf.mxu1 }
 0x444   :  { %v4862_v32 = vadd.f32 %v9306_v18, %v4819_v7  ;;  %v4821_v33 = vadd.f32 %v4820_v53, %v3408_v11  ;;  %v4979_v42 = vmax.f32 %v4977_v9, %v4966_v19 }
 0x445   :  { %v4822_v3 = vpop.f32.mrf.mxu1 }
 0x446   :  { %v4823_v10 = vadd.f32 %v4822_v3, %v3404_v62  ;;  %v4958_v38 = vmax.f32 %v4862_v32, 0.0  ;;  %v4864_v39 = vadd.f32 %v9313_v23, %v4821_v33  ;;  %v7209_v62 = vld [vmem:[%s9439_s11 + $0x38] sm:$0xff]   ;;  %v7212_v3 = vld [vmem:[%s9439_s11 + $0x20] sm:$0xff]  }
 0x447   :  { %v4824_v26 = vpop.f32.mrf.mxu1 }
 0x448   :  { %v4866_v35 = vadd.f32 %v9320_v34, %v4823_v10  ;;  %v4825_v12 = vadd.f32 %v4824_v26, %v3408_v11  ;;  %v4980_v2 = vmax.f32 %v4978_v41, %v4958_v38  ;;  %v4959_v50 = vmax.f32 %v4864_v39, 0.0  ;;  %v7214_v10 = vld [vmem:[%s9439_s11 + $0x10] sm:$0xff]   ;;  %v7215_v26 = vld [vmem:[%s9439_s11 + $0x8] sm:$0xff]   ;;  %v6076_v39 = vld [vmem:[%s9443_s12] ss:$0 sm:$0xff] }
 0x44a   :  { %v4967_v40 = vmax.f32 %v4866_v35, 0.0  ;;  %v4868_v8 = vadd.f32 %v4867_v43, %v4825_v12  ;;  %v4982_v58 = vmax.f32 %v4980_v2, %v4959_v50 }
 0x44c   :  { %v4981_v52 = vmax.f32 %v4979_v42, %v4967_v40  ;;  %v4968_v53 = vmax.f32 %v4868_v8, 0.0 }
 0x44e   :  { %v4983_v24 = vmax.f32 %v4981_v52, %v4968_v53 }
 0x461   :  { %v4945_v18 = vpop.f32.mrf.mxu1 }
 0x462   :  { %v4946_v34 = vadd.f32 %v4945_v18, %v4905_v31  ;;  %v7224_v31 = vld [vmem:[%s9441_s13] sm:$0xff]  }
 0x463   :  { %v6223_v45 = vpop.f32.mrf.mxu1 }
 0x464   :  { %v4960_v55 = vmax.f32 %v4946_v34, 0.0 }
 0x465   :  { %v4948_v54 = vpop.f32.mrf.mxu1 }
 0x466   :  { %v4949_v56 = vadd.f32 %v4948_v54, %v4908_v47  ;;  %v4984_v23 = vmax.f32 %v4982_v58, %v4960_v55 }
 0x467   :  { %v6224_v57 = vpop.f32.mrf.mxu1 }
 0x468   :  { %v4969_v59 = vmax.f32 %v4949_v56, 0.0 }
 0x46a   :  { %v4985_v51 = vmax.f32 %v4983_v24, %v4969_v59 }
 0x46c   :  { %v4986_v43 = vpack.c.bf16 %v4985_v51, %v4984_v23 }
 0x46e   :  { %6242 = vmatmul.mubr.bf16.vlgmr.msra.gmra.mxu0 %v4986_v43 }
 0x46f   :  { %6281 = vmatprep.mubr.msk.bf16.mxu0 %vm7231_vm0, %v7230_v22  ;;  %6266 = vmatpush3.bf16.msra.mxu0 %v7209_v62 }
 0x470   :  { %6267 = vmatprep.subr.bf16.mxu0 %v7230_v22 }
 0x473   :  { %6268 = vmatpush3.bf16.msra.mxu0 %v7210_v63 }
 0x474   :  { %6269 = vmatprep.subr.bf16.mxu0 %v7230_v22 }
 0x477   :  { %6270 = vmatpush3.bf16.msra.mxu0 %v7211_v1 }
 0x478   :  { %6271 = vmatprep.subr.bf16.mxu0 %v7230_v22 }
 0x47b   :  { %6272 = vmatpush3.bf16.msra.mxu0 %v7212_v3 }
 0x47c   :  { %6273 = vmatprep.subr.bf16.mxu0 %v7230_v22 }
 0x47f   :  { %6274 = vmatpush3.bf16.msra.mxu0 %v7213_v5 }
 0x480   :  { %6275 = vmatprep.subr.bf16.mxu0 %v7230_v22 }
 0x483   :  { %6276 = vmatpush3.bf16.msra.mxu0 %v7214_v10 }
 0x484   :  { %6277 = vmatprep.subr.bf16.mxu0 %v7230_v22 }
 0x487   :  { %6278 = vmatpush3.bf16.msra.mxu0 %v7215_v26 }
 0x488   :  { %6279 = vmatprep.subr.bf16.mxu0 %v7230_v22 }
 0x48b   :  { %6280 = vmatpush3.bf16.msra.mxu0 %v7216_v14 }
 0x52e   :  { %v5092_v11 = vpop.f32.mrf.mxu0 }
 0x52f   :  { %v5093_v15 = vadd.f32 %v6058_v6, %v5092_v11 }
 0x530   :  { %v6243_v13 = vpop.f32.mrf.mxu0 }
 0x531   :  { %v5099_v0 = vmax.f32 %v5093_v15, 0.0 }
 0x532   :  { %v5095_v48 = vpop.f32.mrf.mxu0 }
 0x533   :  { %v5096_v21 = vadd.f32 %v6058_v6, %v5095_v48 }
 0x534   :  { %v6244_v36 = vpop.f32.mrf.mxu0 }
 0x535   :  { %v5100_v25 = vmax.f32 %v5096_v21, 0.0 }
 0x537   :  { %v5101_v7 = vpack.c.bf16 %v5100_v25, %v5099_v0 }
 0x539   :  { %6262 = vmatmul.mubr.bf16.vlgmr.msra.gmra.mxu1 %v5101_v7 }
 0x53a   :  { %6301 = vmatprep.mubr.msk.bf16.mxu1 %vm7231_vm0, %v7230_v22  ;;  %6286 = vmatpush3.bf16.msra.mxu1 %v7217_v27 }
 0x53b   :  { %6287 = vmatprep.subr.bf16.mxu1 %v7230_v22 }
 0x53e   :  { %6288 = vmatpush3.bf16.msra.mxu1 %v7218_v28 }
 0x53f   :  { %6289 = vmatprep.subr.bf16.mxu1 %v7230_v22 }
 0x542   :  { %6290 = vmatpush3.bf16.msra.mxu1 %v7219_v29 }
 0x543   :  { %6291 = vmatprep.subr.bf16.mxu1 %v7230_v22 }
 0x546   :  { %6292 = vmatpush3.bf16.msra.mxu1 %v7220_v30 }
 0x547   :  { %6293 = vmatprep.subr.bf16.mxu1 %v7230_v22 }
 0x54a   :  { %6294 = vmatpush3.bf16.msra.mxu1 %v7221_v16 }
 0x54b   :  { %6295 = vmatprep.subr.bf16.mxu1 %v7230_v22 }
 0x54e   :  { %6296 = vmatpush3.bf16.msra.mxu1 %v7222_v4 }
 0x54f   :  { %6297 = vmatprep.subr.bf16.mxu1 %v7230_v22 }
 0x552   :  { %6298 = vmatpush3.bf16.msra.mxu1 %v7223_v49 }
 0x553   :  { %6299 = vmatprep.subr.bf16.mxu1 %v7230_v22  ;;  %v6085_v22 = vld [vmem:[%s9444_s14] ss:$0 sm:$0xff] }
 0x556   :  { %6300 = vmatpush3.bf16.msra.mxu1 %v7224_v31 }
 0x5f9   :  { %v5207_v32 = vpop.f32.mrf.mxu1 }
 0x5fa   :  { %v5208_v35 = vadd.f32 %v6067_v20, %v5207_v32 }
 0x5fb   :  { %v6263_v33 = vpop.f32.mrf.mxu1 }
 0x5fc   :  { %v5214_v37 = vmax.f32 %v5208_v35, 0.0 }
 0x5fd   :  { %v5210_v12 = vpop.f32.mrf.mxu1 }
 0x5fe   :  { %v5211_v17 = vadd.f32 %v6067_v20, %v5210_v12 }
 0x5ff   :  { %v6264_v44 = vpop.f32.mrf.mxu1 }
 0x600   :  { %v5215_v9 = vmax.f32 %v5211_v17, 0.0 }
 0x602   :  { %v5216_v19 = vpack.c.bf16 %v5215_v9, %v5214_v37 }
 0x604   :  { %6282 = vmatmul.mubr.bf16.vlgmr.msra.gmra.mxu0 %v5216_v19 }
 0x6c4   :  { %v5322_v38 = vpop.f32.mrf.mxu0 }
 0x6c5   :  { %v5323_v18 = vadd.f32 %v6076_v39, %v5322_v38 }
 0x6c6   :  { %v6283_v40 = vpop.f32.mrf.mxu0 }
 0x6c8   :  { %v5325_v8 = vpop.f32.mrf.mxu0 }
 0x6c9   :  { %v5326_v41 = vadd.f32 %v6076_v39, %v5325_v8 }
 0x6ca   :  { %v6284_v42 = vpop.f32.mrf.mxu0 }
 0x6cb   :  { %v5329_v34 = vpack.c.bf16 %v5326_v41, %v5323_v18 }
 0x6cd   :  { %6302 = vmatmul.mubr.bf16.vlgmr.msra.gmra.mxu1 %v5329_v34 }
 0x78d   :  { %v5435_v45 = vpop.f32.mrf.mxu1 }
 0x78e   :  { %v5436_v47 = vadd.f32 %v6085_v22, %v5435_v45 }
 0x78f   :  { %v6303_v2 = vpop.f32.mrf.mxu1 }
 0x790   :  { %5442 = vst [vmem:[%s9445_s15] sm:$0xff] %v5436_v47 }
 0x791   :  { %v5438_v50 = vpop.f32.mrf.mxu1 }
 0x792   :  { %v5439_v52 = vadd.f32 %v6085_v22, %v5438_v50 }
 0x793   :  { %v6304_v53 = vpop.f32.mrf.mxu1 }
 0x794   :  { %5443 = vst [vmem:[%s9445_s15 + $0x8] sm:$0xff] %v5439_v52 }

</bundles_post_ra>
